<compile_context>
chip_gen: v7x
topology: tpu7x:2x2x1
jax: 0.10.0
libtpu: 0.0.40
codegen_flags: <defaults>
</compile_context>

<pallas_src>
import jax
import jax.numpy as jnp
from jax.experimental import pallas as pl
from jax.experimental.pallas import tpu as pltpu

B_TILE = 16          # images per grid step; must be a multiple of 8.


# ------------------------------ Pallas kernel -------------------------------

def _lenet_kernel(x_ref, wb1_ref, b1f_ref, wb2_ref, b2f_ref,
                  pl1_ref, pr1_ref, pl2_ref, pr2_ref,
                  wfc1_ref, bfc1_ref, wfc2_ref, bfc2_ref, wfc3_ref, bfc3_ref,
                  o_ref,
                  a1_ref, y1_ref, p1_ref, a2_ref, y2_ref):
    """LeNet forward for B_TILE images per grid step (grid axis 0 = batch tile)."""
    f32, bf16 = jnp.float32, jnp.bfloat16
    bt = x_ref.shape[0]

    # ---- conv1 im2col (kh-major cols): 5 lane-dense (28, 96) copies / image ---
    for b in range(bt):
        for i in range(5):
            a1_ref[b * 28:(b + 1) * 28, i * 96:(i + 1) * 96] = (
                x_ref[b, i:i + 28, :].astype(bf16))

    # ---- conv1 + bias + ReLU: one (bt*28, 480) @ (480, 168) bf16 MXU matmul --
    y1 = jnp.dot(a1_ref[...], wb1_ref[...], preferred_element_type=f32)
    y1_ref[...] = jnp.maximum(y1 + b1f_ref[...], 0.0).astype(bf16)

    # ---- pool1 (2x2/2 max): stacked even|odd row selector (1 matmul) + max of
    #      sublane halves, lane-padded even|odd column selector + max of halves
    h1 = bt * 14
    zr = jnp.dot(pl1_ref[...], y1_ref[...], preferred_element_type=f32)
    vmax1 = jnp.maximum(zr[:h1, :], zr[h1:, :]).astype(bf16)        # (bt*14, 168)
    zc = jnp.dot(vmax1, pr1_ref[...], preferred_element_type=f32)
    p1_ref[...] = jnp.maximum(zc[:, :84], zc[:, 128:212])           # (bt*14, 84)

    # ---- conv2 im2col: 5 (10, 84) copies / image from the VMEM pool1 maps ----
    for b in range(bt):
        for i in range(5):
            a2_ref[b * 10:(b + 1) * 10, i * 84:(i + 1) * 84] = (
                p1_ref[b * 14 + i:b * 14 + i + 10, :].astype(bf16))

    # ---- conv2 + bias + ReLU: one (bt*10, 420) @ (420, 160) matmul -----------
    y2 = jnp.dot(a2_ref[...], wb2_ref[...], preferred_element_type=f32)
    y2_ref[...] = jnp.maximum(y2 + b2f_ref[...], 0.0).astype(bf16)

    # ---- pool2; its row selector also permutes rows to (r*bt + b), so the fc1
    #      per-r operands below are contiguous, sublane-aligned (bt, 80) slices
    h2 = bt * 5
    zr2 = jnp.dot(pl2_ref[...], y2_ref[...], preferred_element_type=f32)
    vmax2 = jnp.maximum(zr2[:h2, :], zr2[h2:, :]).astype(bf16)      # (bt*5, 160)
    zc2 = jnp.dot(vmax2, pr2_ref[...], preferred_element_type=f32)
    p2 = jnp.maximum(zc2[:, :80], zc2[:, 128:208])                  # (bt*5, 80)

    # ---- fc1: five INDEPENDENT (bt, 80) @ (80, 120) partials, tree-summed ----
    parts = [jnp.dot(p2[r * bt:(r + 1) * bt, :].astype(bf16), wfc1_ref[r],
                     preferred_element_type=f32) for r in range(5)]
    h = (parts[0] + parts[1]) + (parts[2] + parts[3]) + parts[4] + bfc1_ref[...]
    h = jnp.maximum(h, 0.0)                                         # (bt, 120)

    # ---- fc2 / fc3 (fc3 pre-padded to 128 output lanes => unmasked store) ----
    h = jnp.maximum(
        jnp.dot(h.astype(bf16), wfc2_ref[...], preferred_element_type=f32)
        + bfc2_ref[...], 0.0)                                       # (bt, 84)
    o_ref[...] = (jnp.dot(h.astype(bf16), wfc3_ref[...],
                          preferred_element_type=f32) + bfc3_ref[...])


# ------------------------------ host wrapper --------------------------------

def lenet_forward(prep, x):
    """x: (B, 3, 32, 32) float32 -> logits (B, 10)."""
    f32 = jnp.float32
    B = x.shape[0]
    bt = prep["pl1"].shape[0] // 28            # B_TILE baked into the selectors

    Bp = ((B + bt - 1) // bt) * bt
    if Bp != B:                                # pad batch to a tile multiple
        x = jnp.concatenate(
            [x, jnp.zeros((Bp - B,) + x.shape[1:], x.dtype)], axis=0)

    # Layout plumbing: channel-in-lane (B, 32, 3*32) so im2col copies are
    # lane-dense (28, 96) slabs inside the kernel.
    x_t = jnp.transpose(x, (0, 2, 1, 3)).reshape(Bp, 32, 96).astype(f32)

    weights = (prep["wb1"], prep["b1f"], prep["wb2"], prep["b2f"],
               prep["pl1"], prep["pr1"], prep["pl2"], prep["pr2"],
               prep["w_fc1"], prep["b_fc1"], prep["w_fc2"], prep["b_fc2"],
               prep["w_fc3"], prep["b_fc3"])

    def const_spec(a):
        nd = a.ndim
        return pl.BlockSpec(a.shape, lambda g, nd=nd: (0,) * nd)

    out = pl.pallas_call(
        _lenet_kernel,
        out_shape=jax.ShapeDtypeStruct((Bp, 128), f32),
        grid=(Bp // bt,),
        in_specs=[pl.BlockSpec((bt, 32, 96), lambda g: (g, 0, 0))]
                 + [const_spec(w) for w in weights],
        out_specs=pl.BlockSpec((bt, 128), lambda g: (g, 0)),
        scratch_shapes=[
            pltpu.VMEM((bt * 28, 480), jnp.bfloat16),   # conv1 im2col
            pltpu.VMEM((bt * 28, 168), jnp.bfloat16),   # conv1 ReLU output
            pltpu.VMEM((bt * 14, 84), jnp.float32),     # pool1 output maps
            pltpu.VMEM((bt * 10, 420), jnp.bfloat16),   # conv2 im2col
            pltpu.VMEM((bt * 10, 160), jnp.bfloat16),   # conv2 ReLU output
        ],
        compiler_params=pltpu.CompilerParams(
            dimension_semantics=("parallel",)),
    )(x_t, *weights)
    return out[:B, :10]


# -------------------------- parameter preparation ---------------------------

def prepare_params(p, b_tile=B_TILE):
    """One-time pre-packing of PyTorch-layout parameters (outside jit)."""
    assert b_tile % 8 == 0
    f32, bf16 = jnp.float32, jnp.bfloat16

    def conv_pack(w, b, w_in):
        # (C_out, C_in, KH, KW) -> banded matrix, rows ordered (kh, c_in, w_in)
        # so im2col(rows, KH*C_in*W_in) @ Wb gives output cols [c_out*OW + ow].
        c_out, c_in, kh, kw = w.shape
        ow = w_in - kw + 1
        v = jnp.arange(w_in)[None, :, None]
        u = jnp.arange(ow)[None, None, :]
        j = jnp.arange(kw)[:, None, None]
        sel = (v == u + j).astype(f32)                           # (kw, W_in, OW)
        wb = jnp.einsum("ocij,jvu->icvou", w.astype(f32), sel)
        wb = wb.reshape(kh * c_in * w_in, c_out * ow)
        bf_ = jnp.repeat(b.astype(f32), ow)[None, :]             # (1, c_out*OW)
        return wb.astype(bf16), bf_

    def row_sel(oh, n_img, permute=False):
        # Stacked [even; odd] row-decimation selector, (n_img*oh, n_img*oh).
        n = n_img * oh
        half = n // 2
        k = jnp.arange(half)
        if permute:   # output row q = r*n_img + b  (for fc1 slice layout)
            r, b = k // n_img, k % n_img
            src_even = b * oh + 2 * r
        else:         # 2x2 parity aligns globally because oh is even
            src_even = 2 * k
        cols = jnp.arange(n)[None, :]
        ple = (cols == src_even[:, None]).astype(f32)
        plo = (cols == (src_even + 1)[:, None]).astype(f32)
        return jnp.concatenate([ple, plo], axis=0).astype(bf16)   # (n, n)

    def col_sel(ow, c):
        # Column-decimation selector, odd half placed at lane 128 (vreg-aligned).
        n = c * ow
        half = n // 2
        u = jnp.arange(half)[None, :]
        rows = jnp.arange(n)[:, None]
        pre = (rows == 2 * u).astype(f32)
        pro = (rows == 2 * u + 1).astype(f32)
        out = jnp.zeros((n, 256), f32)
        out = out.at[:, :half].set(pre).at[:, 128:128 + half].set(pro)
        return out.astype(bf16)

    wb1, b1f = conv_pack(p["conv1_w"], p["conv1_b"], 32)          # (480, 168)
    wb2, b2f = conv_pack(p["conv2_w"], p["conv2_b"], 14)          # (420, 160)
    pl1 = row_sel(28, b_tile, permute=False)                      # (bt*28, bt*28)
    pr1 = col_sel(28, 6)                                          # (168, 256)
    pl2 = row_sel(10, b_tile, permute=True)                       # (bt*10, bt*10)
    pr2 = col_sel(10, 16)                                         # (160, 256)

    # fc1: PyTorch flatten index is c*25 + r*5 + s; pooled layout is
    # rows (r*bt + b), cols (c*5 + s) -> pre-permute fc1_w.T per pooled row r.
    fc1_t = p["fc1_w"].astype(f32).T                              # (400, 120)
    cc = jnp.arange(16)[:, None]
    ss = jnp.arange(5)[None, :]
    w_fc1 = jnp.stack(
        [fc1_t[(cc * 25 + r * 5 + ss).reshape(-1)] for r in range(5)],
        axis=0).astype(bf16)                                      # (5, 80, 120)

    # fc3 padded to 128 output lanes for an unmasked, lane-dense output store.
    w_fc3 = jnp.zeros((84, 128), f32).at[:, :10].set(
        p["fc3_w"].astype(f32).T).astype(bf16)
    b_fc3 = jnp.zeros((1, 128), f32).at[:, :10].set(
        p["fc3_b"].astype(f32)[None, :])

    return dict(
        wb1=wb1, b1f=b1f, wb2=wb2, b2f=b2f,
        pl1=pl1, pr1=pr1, pl2=pl2, pr2=pr2,
        w_fc1=w_fc1, b_fc1=p["fc1_b"].astype(f32)[None, :],
        w_fc2=p["fc2_w"].astype(f32).T.astype(bf16),
        b_fc2=p["fc2_b"].astype(f32)[None, :],
        w_fc3=w_fc3, b_fc3=b_fc3,
    )


def init_params(key):
    """Deterministic synthetic parameters matching TheModelClass shapes."""
    ks = jax.random.split(key, 10)

    def w(k, shape, fan_in):
        return jax.random.normal(k, shape, jnp.float32) / jnp.sqrt(fan_in)

    return {
        "conv1_w": w(ks[0], (6, 3, 5, 5), 3 * 5 * 5),
        "conv1_b": w(ks[1], (6,), 3 * 5 * 5),
        "conv2_w": w(ks[2], (16, 6, 5, 5), 6 * 5 * 5),
        "conv2_b": w(ks[3], (16,), 6 * 5 * 5),
        "fc1_w": w(ks[4], (120, 400), 400),   # PyTorch Linear layout (out, in)
        "fc1_b": w(ks[5], (120,), 400),
        "fc2_w": w(ks[6], (84, 120), 120),
        "fc2_b": w(ks[7], (84,), 120),
        "fc3_w": w(ks[8], (10, 84), 84),
        "fc3_b": w(ks[9], (10,), 84),
    }


# ----------------------------- pure-JAX reference ----------------------------

def lenet_ref(p, x):
    f32 = jnp.float32
    dn = ("NCHW", "OIHW", "NCHW")
    y = jax.lax.conv_general_dilated(x.astype(f32), p["conv1_w"].astype(f32),
                                     (1, 1), "VALID", dimension_numbers=dn)
    y = jax.nn.relu(y + p["conv1_b"][None, :, None, None])
    y = jax.lax.reduce_window(y, -jnp.inf, jax.lax.max,
                              (1, 1, 2, 2), (1, 1, 2, 2), "VALID")
    y = jax.lax.conv_general_dilated(y, p["conv2_w"].astype(f32),
                                     (1, 1), "VALID", dimension_numbers=dn)
    y = jax.nn.relu(y + p["conv2_b"][None, :, None, None])
    y = jax.lax.reduce_window(y, -jnp.inf, jax.lax.max,
                              (1, 1, 2, 2), (1, 1, 2, 2), "VALID")
    y = y.reshape(y.shape[0], -1)                       # == torch .view(-1, 400)
    y = jax.nn.relu(y @ p["fc1_w"].T + p["fc1_b"])
    y = jax.nn.relu(y @ p["fc2_w"].T + p["fc2_b"])
    return y @ p["fc3_w"].T + p["fc3_b"]


# ---------------------------------- main -------------------------------------

if __name__ == "__main__":
    key = jax.random.PRNGKey(0)
    k_params, k_x = jax.random.split(key)

    raw_params = init_params(k_params)
    prep = prepare_params(raw_params, B_TILE)         # one-time packing
    x = jax.random.normal(k_x, (32, 3, 32, 32), jnp.float32)   # 2 grid steps

    fwd = jax.jit(lenet_forward)
    out = jax.block_until_ready(fwd(prep, x))

    assert out.shape == (32, 10), out.shape
    assert out.dtype == jnp.float32
    assert bool(jnp.all(jnp.isfinite(out)))

    ref = lenet_ref(raw_params, x)
    max_err = float(jnp.max(jnp.abs(out - ref)))
    assert max_err < 0.25, max_err                    # bf16 matmul tolerance

    print("KERNEL_OK")
</pallas_src>

<mosaic_0001>
module attributes {stable_mosaic.version = 11 : i64} {
  func.func @_lenet_kernel(%arg0: i32, %arg1: memref<16x32x96xf32, #tpu.memory_space<vmem>>, %arg2: memref<480x168xbf16, #tpu.memory_space<vmem>>, %arg3: memref<1x168xf32, #tpu.memory_space<vmem>>, %arg4: memref<420x160xbf16, #tpu.memory_space<vmem>>, %arg5: memref<1x160xf32, #tpu.memory_space<vmem>>, %arg6: memref<448x448xbf16, #tpu.memory_space<vmem>>, %arg7: memref<168x256xbf16, #tpu.memory_space<vmem>>, %arg8: memref<160x160xbf16, #tpu.memory_space<vmem>>, %arg9: memref<160x256xbf16, #tpu.memory_space<vmem>>, %arg10: memref<5x80x120xbf16, #tpu.memory_space<vmem>>, %arg11: memref<1x120xf32, #tpu.memory_space<vmem>>, %arg12: memref<120x84xbf16, #tpu.memory_space<vmem>>, %arg13: memref<1x84xf32, #tpu.memory_space<vmem>>, %arg14: memref<84x128xbf16, #tpu.memory_space<vmem>>, %arg15: memref<1x128xf32, #tpu.memory_space<vmem>>, %arg16: memref<16x128xf32, #tpu.memory_space<vmem>>, %arg17: memref<448x480xbf16, #tpu.memory_space<vmem>>, %arg18: memref<448x168xbf16, #tpu.memory_space<vmem>>, %arg19: memref<224x84xf32, #tpu.memory_space<vmem>>, %arg20: memref<160x420xbf16, #tpu.memory_space<vmem>>, %arg21: memref<160x160xbf16, #tpu.memory_space<vmem>>) attributes {dimension_semantics = [#tpu.dimension_semantics<parallel>], iteration_bounds = array<i64: 2>, scalar_prefetch = 0 : i64, scratch_operands = 5 : i64, tpu.core_type = #tpu.core_type<tc>, window_params = [{transform_indices = @transform_0, window_bounds = array<i64: 16, 32, 96>}, {pipeline_mode = #tpu.pipeline_mode<synchronous>, transform_indices = @transform_1, window_bounds = array<i64: 480, 168>}, {pipeline_mode = #tpu.pipeline_mode<synchronous>, transform_indices = @transform_2, window_bounds = array<i64: 1, 168>}, {pipeline_mode = #tpu.pipeline_mode<synchronous>, transform_indices = @transform_3, window_bounds = array<i64: 420, 160>}, {pipeline_mode = #tpu.pipeline_mode<synchronous>, transform_indices = @transform_4, window_bounds = array<i64: 1, 160>}, {pipeline_mode = #tpu.pipeline_mode<synchronous>, transform_indices = @transform_5, window_bounds = array<i64: 448, 448>}, {pipeline_mode = #tpu.pipeline_mode<synchronous>, transform_indices = @transform_6, window_bounds = array<i64: 168, 256>}, {pipeline_mode = #tpu.pipeline_mode<synchronous>, transform_indices = @transform_7, window_bounds = array<i64: 160, 160>}, {pipeline_mode = #tpu.pipeline_mode<synchronous>, transform_indices = @transform_8, window_bounds = array<i64: 160, 256>}, {pipeline_mode = #tpu.pipeline_mode<synchronous>, transform_indices = @transform_9, window_bounds = array<i64: 5, 80, 120>}, {pipeline_mode = #tpu.pipeline_mode<synchronous>, transform_indices = @transform_10, window_bounds = array<i64: 1, 120>}, {pipeline_mode = #tpu.pipeline_mode<synchronous>, transform_indices = @transform_11, window_bounds = array<i64: 120, 84>}, {pipeline_mode = #tpu.pipeline_mode<synchronous>, transform_indices = @transform_12, window_bounds = array<i64: 1, 84>}, {pipeline_mode = #tpu.pipeline_mode<synchronous>, transform_indices = @transform_13, window_bounds = array<i64: 84, 128>}, {pipeline_mode = #tpu.pipeline_mode<synchronous>, transform_indices = @transform_14, window_bounds = array<i64: 1, 128>}, {transform_indices = @transform_15, window_bounds = array<i64: 16, 128>}]} {
    %c0 = arith.constant 0 : index
    %c0_0 = arith.constant 0 : index
    %c0_1 = arith.constant 0 : index
    %0 = vector.load %arg1[%c0, %c0_0, %c0_1] : memref<16x32x96xf32, #tpu.memory_space<vmem>>, vector<1x28x96xf32>
    %1 = vector.shape_cast %0 : vector<1x28x96xf32> to vector<28x96xf32>
    %2 = arith.truncf %1 : vector<28x96xf32> to vector<28x96xbf16>
    %c0_2 = arith.constant 0 : index
    %c0_3 = arith.constant 0 : index
    %3 = vector.load %arg17[%c0_2, %c0_3] : memref<448x480xbf16, #tpu.memory_space<vmem>>, vector<28x96xbf16>
    tpu.vector_store %arg17[%c0_2, %c0_3], %2 {strides = array<i32>} : memref<448x480xbf16, #tpu.memory_space<vmem>>, vector<28x96xbf16>,
    %c0_4 = arith.constant 0 : index
    %c1 = arith.constant 1 : index
    %c0_5 = arith.constant 0 : index
    %4 = vector.load %arg1[%c0_4, %c1, %c0_5] : memref<16x32x96xf32, #tpu.memory_space<vmem>>, vector<1x28x96xf32>
    %5 = vector.shape_cast %4 : vector<1x28x96xf32> to vector<28x96xf32>
    %6 = arith.truncf %5 : vector<28x96xf32> to vector<28x96xbf16>
    %c0_6 = arith.constant 0 : index
    %c96 = arith.constant 96 : index
    %7 = vector.load %arg17[%c0_6, %c96] : memref<448x480xbf16, #tpu.memory_space<vmem>>, vector<28x96xbf16>
    tpu.vector_store %arg17[%c0_6, %c96], %6 {strides = array<i32>} : memref<448x480xbf16, #tpu.memory_space<vmem>>, vector<28x96xbf16>,
    %c0_7 = arith.constant 0 : index
    %c2 = arith.constant 2 : index
    %c0_8 = arith.constant 0 : index
    %8 = vector.load %arg1[%c0_7, %c2, %c0_8] : memref<16x32x96xf32, #tpu.memory_space<vmem>>, vector<1x28x96xf32>
    %9 = vector.shape_cast %8 : vector<1x28x96xf32> to vector<28x96xf32>
    %10 = arith.truncf %9 : vector<28x96xf32> to vector<28x96xbf16>
    %c0_9 = arith.constant 0 : index
    %c192 = arith.constant 192 : index
    %11 = vector.load %arg17[%c0_9, %c192] : memref<448x480xbf16, #tpu.memory_space<vmem>>, vector<28x96xbf16>
    tpu.vector_store %arg17[%c0_9, %c192], %10 {strides = array<i32>} : memref<448x480xbf16, #tpu.memory_space<vmem>>, vector<28x96xbf16>,
    %c0_10 = arith.constant 0 : index
    %c3 = arith.constant 3 : index
    %c0_11 = arith.constant 0 : index
    %12 = vector.load %arg1[%c0_10, %c3, %c0_11] : memref<16x32x96xf32, #tpu.memory_space<vmem>>, vector<1x28x96xf32>
    %13 = vector.shape_cast %12 : vector<1x28x96xf32> to vector<28x96xf32>
    %14 = arith.truncf %13 : vector<28x96xf32> to vector<28x96xbf16>
    %c0_12 = arith.constant 0 : index
    %c288 = arith.constant 288 : index
    %15 = vector.load %arg17[%c0_12, %c288] : memref<448x480xbf16, #tpu.memory_space<vmem>>, vector<28x96xbf16>
    tpu.vector_store %arg17[%c0_12, %c288], %14 {strides = array<i32>} : memref<448x480xbf16, #tpu.memory_space<vmem>>, vector<28x96xbf16>,
    %c0_13 = arith.constant 0 : index
    %c4 = arith.constant 4 : index
    %c0_14 = arith.constant 0 : index
    %16 = vector.load %arg1[%c0_13, %c4, %c0_14] : memref<16x32x96xf32, #tpu.memory_space<vmem>>, vector<1x28x96xf32>
    %17 = vector.shape_cast %16 : vector<1x28x96xf32> to vector<28x96xf32>
    %18 = arith.truncf %17 : vector<28x96xf32> to vector<28x96xbf16>
    %c0_15 = arith.constant 0 : index
    %c384 = arith.constant 384 : index
    %19 = vector.load %arg17[%c0_15, %c384] : memref<448x480xbf16, #tpu.memory_space<vmem>>, vector<28x96xbf16>
    tpu.vector_store %arg17[%c0_15, %c384], %18 {strides = array<i32>} : memref<448x480xbf16, #tpu.memory_space<vmem>>, vector<28x96xbf16>,
    %c1_16 = arith.constant 1 : index
    %c0_17 = arith.constant 0 : index
    %c0_18 = arith.constant 0 : index
    %20 = vector.load %arg1[%c1_16, %c0_17, %c0_18] : memref<16x32x96xf32, #tpu.memory_space<vmem>>, vector<1x28x96xf32>
    %21 = vector.shape_cast %20 : vector<1x28x96xf32> to vector<28x96xf32>
    %22 = arith.truncf %21 : vector<28x96xf32> to vector<28x96xbf16>
    %c28 = arith.constant 28 : index
    %c0_19 = arith.constant 0 : index
    %23 = vector.load %arg17[%c28, %c0_19] : memref<448x480xbf16, #tpu.memory_space<vmem>>, vector<28x96xbf16>
    tpu.vector_store %arg17[%c28, %c0_19], %22 {strides = array<i32>} : memref<448x480xbf16, #tpu.memory_space<vmem>>, vector<28x96xbf16>,
    %c1_20 = arith.constant 1 : index
    %c1_21 = arith.constant 1 : index
    %c0_22 = arith.constant 0 : index
    %24 = vector.load %arg1[%c1_20, %c1_21, %c0_22] : memref<16x32x96xf32, #tpu.memory_space<vmem>>, vector<1x28x96xf32>
    %25 = vector.shape_cast %24 : vector<1x28x96xf32> to vector<28x96xf32>
    %26 = arith.truncf %25 : vector<28x96xf32> to vector<28x96xbf16>
    %c28_23 = arith.constant 28 : index
    %c96_24 = arith.constant 96 : index
    %27 = vector.load %arg17[%c28_23, %c96_24] : memref<448x480xbf16, #tpu.memory_space<vmem>>, vector<28x96xbf16>
    tpu.vector_store %arg17[%c28_23, %c96_24], %26 {strides = array<i32>} : memref<448x480xbf16, #tpu.memory_space<vmem>>, vector<28x96xbf16>,
    %c1_25 = arith.constant 1 : index
    %c2_26 = arith.constant 2 : index
    %c0_27 = arith.constant 0 : index
    %28 = vector.load %arg1[%c1_25, %c2_26, %c0_27] : memref<16x32x96xf32, #tpu.memory_space<vmem>>, vector<1x28x96xf32>
    %29 = vector.shape_cast %28 : vector<1x28x96xf32> to vector<28x96xf32>
    %30 = arith.truncf %29 : vector<28x96xf32> to vector<28x96xbf16>
    %c28_28 = arith.constant 28 : index
    %c192_29 = arith.constant 192 : index
    %31 = vector.load %arg17[%c28_28, %c192_29] : memref<448x480xbf16, #tpu.memory_space<vmem>>, vector<28x96xbf16>
    tpu.vector_store %arg17[%c28_28, %c192_29], %30 {strides = array<i32>} : memref<448x480xbf16, #tpu.memory_space<vmem>>, vector<28x96xbf16>,
    %c1_30 = arith.constant 1 : index
    %c3_31 = arith.constant 3 : index
    %c0_32 = arith.constant 0 : index
    %32 = vector.load %arg1[%c1_30, %c3_31, %c0_32] : memref<16x32x96xf32, #tpu.memory_space<vmem>>, vector<1x28x96xf32>
    %33 = vector.shape_cast %32 : vector<1x28x96xf32> to vector<28x96xf32>
    %34 = arith.truncf %33 : vector<28x96xf32> to vector<28x96xbf16>
    %c28_33 = arith.constant 28 : index
    %c288_34 = arith.constant 288 : index
    %35 = vector.load %arg17[%c28_33, %c288_34] : memref<448x480xbf16, #tpu.memory_space<vmem>>, vector<28x96xbf16>
    tpu.vector_store %arg17[%c28_33, %c288_34], %34 {strides = array<i32>} : memref<448x480xbf16, #tpu.memory_space<vmem>>, vector<28x96xbf16>,
    %c1_35 = arith.constant 1 : index
    %c4_36 = arith.constant 4 : index
    %c0_37 = arith.constant 0 : index
    %36 = vector.load %arg1[%c1_35, %c4_36, %c0_37] : memref<16x32x96xf32, #tpu.memory_space<vmem>>, vector<1x28x96xf32>
    %37 = vector.shape_cast %36 : vector<1x28x96xf32> to vector<28x96xf32>
    %38 = arith.truncf %37 : vector<28x96xf32> to vector<28x96xbf16>
    %c28_38 = arith.constant 28 : index
    %c384_39 = arith.constant 384 : index
    %39 = vector.load %arg17[%c28_38, %c384_39] : memref<448x480xbf16, #tpu.memory_space<vmem>>, vector<28x96xbf16>
    tpu.vector_store %arg17[%c28_38, %c384_39], %38 {strides = array<i32>} : memref<448x480xbf16, #tpu.memory_space<vmem>>, vector<28x96xbf16>,
    %c2_40 = arith.constant 2 : index
    %c0_41 = arith.constant 0 : index
    %c0_42 = arith.constant 0 : index
    %40 = vector.load %arg1[%c2_40, %c0_41, %c0_42] : memref<16x32x96xf32, #tpu.memory_space<vmem>>, vector<1x28x96xf32>
    %41 = vector.shape_cast %40 : vector<1x28x96xf32> to vector<28x96xf32>
    %42 = arith.truncf %41 : vector<28x96xf32> to vector<28x96xbf16>
    %c56 = arith.constant 56 : index
    %c0_43 = arith.constant 0 : index
    %43 = vector.load %arg17[%c56, %c0_43] : memref<448x480xbf16, #tpu.memory_space<vmem>>, vector<28x96xbf16>
    tpu.vector_store %arg17[%c56, %c0_43], %42 {strides = array<i32>} : memref<448x480xbf16, #tpu.memory_space<vmem>>, vector<28x96xbf16>,
    %c2_44 = arith.constant 2 : index
    %c1_45 = arith.constant 1 : index
    %c0_46 = arith.constant 0 : index
    %44 = vector.load %arg1[%c2_44, %c1_45, %c0_46] : memref<16x32x96xf32, #tpu.memory_space<vmem>>, vector<1x28x96xf32>
    %45 = vector.shape_cast %44 : vector<1x28x96xf32> to vector<28x96xf32>
    %46 = arith.truncf %45 : vector<28x96xf32> to vector<28x96xbf16>
    %c56_47 = arith.constant 56 : index
    %c96_48 = arith.constant 96 : index
    %47 = vector.load %arg17[%c56_47, %c96_48] : memref<448x480xbf16, #tpu.memory_space<vmem>>, vector<28x96xbf16>
    tpu.vector_store %arg17[%c56_47, %c96_48], %46 {strides = array<i32>} : memref<448x480xbf16, #tpu.memory_space<vmem>>, vector<28x96xbf16>,
    %c2_49 = arith.constant 2 : index
    %c2_50 = arith.constant 2 : index
    %c0_51 = arith.constant 0 : index
    %48 = vector.load %arg1[%c2_49, %c2_50, %c0_51] : memref<16x32x96xf32, #tpu.memory_space<vmem>>, vector<1x28x96xf32>
    %49 = vector.shape_cast %48 : vector<1x28x96xf32> to vector<28x96xf32>
    %50 = arith.truncf %49 : vector<28x96xf32> to vector<28x96xbf16>
    %c56_52 = arith.constant 56 : index
    %c192_53 = arith.constant 192 : index
    %51 = vector.load %arg17[%c56_52, %c192_53] : memref<448x480xbf16, #tpu.memory_space<vmem>>, vector<28x96xbf16>
    tpu.vector_store %arg17[%c56_52, %c192_53], %50 {strides = array<i32>} : memref<448x480xbf16, #tpu.memory_space<vmem>>, vector<28x96xbf16>,
    %c2_54 = arith.constant 2 : index
    %c3_55 = arith.constant 3 : index
    %c0_56 = arith.constant 0 : index
    %52 = vector.load %arg1[%c2_54, %c3_55, %c0_56] : memref<16x32x96xf32, #tpu.memory_space<vmem>>, vector<1x28x96xf32>
    %53 = vector.shape_cast %52 : vector<1x28x96xf32> to vector<28x96xf32>
    %54 = arith.truncf %53 : vector<28x96xf32> to vector<28x96xbf16>
    %c56_57 = arith.constant 56 : index
    %c288_58 = arith.constant 288 : index
    %55 = vector.load %arg17[%c56_57, %c288_58] : memref<448x480xbf16, #tpu.memory_space<vmem>>, vector<28x96xbf16>
    tpu.vector_store %arg17[%c56_57, %c288_58], %54 {strides = array<i32>} : memref<448x480xbf16, #tpu.memory_space<vmem>>, vector<28x96xbf16>,
    %c2_59 = arith.constant 2 : index
    %c4_60 = arith.constant 4 : index
    %c0_61 = arith.constant 0 : index
    %56 = vector.load %arg1[%c2_59, %c4_60, %c0_61] : memref<16x32x96xf32, #tpu.memory_space<vmem>>, vector<1x28x96xf32>
    %57 = vector.shape_cast %56 : vector<1x28x96xf32> to vector<28x96xf32>
    %58 = arith.truncf %57 : vector<28x96xf32> to vector<28x96xbf16>
    %c56_62 = arith.constant 56 : index
    %c384_63 = arith.constant 384 : index
    %59 = vector.load %arg17[%c56_62, %c384_63] : memref<448x480xbf16, #tpu.memory_space<vmem>>, vector<28x96xbf16>
    tpu.vector_store %arg17[%c56_62, %c384_63], %58 {strides = array<i32>} : memref<448x480xbf16, #tpu.memory_space<vmem>>, vector<28x96xbf16>,
    %c3_64 = arith.constant 3 : index
    %c0_65 = arith.constant 0 : index
    %c0_66 = arith.constant 0 : index
    %60 = vector.load %arg1[%c3_64, %c0_65, %c0_66] : memref<16x32x96xf32, #tpu.memory_space<vmem>>, vector<1x28x96xf32>
    %61 = vector.shape_cast %60 : vector<1x28x96xf32> to vector<28x96xf32>
    %62 = arith.truncf %61 : vector<28x96xf32> to vector<28x96xbf16>
    %c84 = arith.constant 84 : index
    %c0_67 = arith.constant 0 : index
    %63 = vector.load %arg17[%c84, %c0_67] : memref<448x480xbf16, #tpu.memory_space<vmem>>, vector<28x96xbf16>
    tpu.vector_store %arg17[%c84, %c0_67], %62 {strides = array<i32>} : memref<448x480xbf16, #tpu.memory_space<vmem>>, vector<28x96xbf16>,
    %c3_68 = arith.constant 3 : index
    %c1_69 = arith.constant 1 : index
    %c0_70 = arith.constant 0 : index
    %64 = vector.load %arg1[%c3_68, %c1_69, %c0_70] : memref<16x32x96xf32, #tpu.memory_space<vmem>>, vector<1x28x96xf32>
    %65 = vector.shape_cast %64 : vector<1x28x96xf32> to vector<28x96xf32>
    %66 = arith.truncf %65 : vector<28x96xf32> to vector<28x96xbf16>
    %c84_71 = arith.constant 84 : index
    %c96_72 = arith.constant 96 : index
    %67 = vector.load %arg17[%c84_71, %c96_72] : memref<448x480xbf16, #tpu.memory_space<vmem>>, vector<28x96xbf16>
    tpu.vector_store %arg17[%c84_71, %c96_72], %66 {strides = array<i32>} : memref<448x480xbf16, #tpu.memory_space<vmem>>, vector<28x96xbf16>,
    %c3_73 = arith.constant 3 : index
    %c2_74 = arith.constant 2 : index
    %c0_75 = arith.constant 0 : index
    %68 = vector.load %arg1[%c3_73, %c2_74, %c0_75] : memref<16x32x96xf32, #tpu.memory_space<vmem>>, vector<1x28x96xf32>
    %69 = vector.shape_cast %68 : vector<1x28x96xf32> to vector<28x96xf32>
    %70 = arith.truncf %69 : vector<28x96xf32> to vector<28x96xbf16>
    %c84_76 = arith.constant 84 : index
    %c192_77 = arith.constant 192 : index
    %71 = vector.load %arg17[%c84_76, %c192_77] : memref<448x480xbf16, #tpu.memory_space<vmem>>, vector<28x96xbf16>
    tpu.vector_store %arg17[%c84_76, %c192_77], %70 {strides = array<i32>} : memref<448x480xbf16, #tpu.memory_space<vmem>>, vector<28x96xbf16>,
    %c3_78 = arith.constant 3 : index
    %c3_79 = arith.constant 3 : index
    %c0_80 = arith.constant 0 : index
    %72 = vector.load %arg1[%c3_78, %c3_79, %c0_80] : memref<16x32x96xf32, #tpu.memory_space<vmem>>, vector<1x28x96xf32>
    %73 = vector.shape_cast %72 : vector<1x28x96xf32> to vector<28x96xf32>
    %74 = arith.truncf %73 : vector<28x96xf32> to vector<28x96xbf16>
    %c84_81 = arith.constant 84 : index
    %c288_82 = arith.constant 288 : index
    %75 = vector.load %arg17[%c84_81, %c288_82] : memref<448x480xbf16, #tpu.memory_space<vmem>>, vector<28x96xbf16>
    tpu.vector_store %arg17[%c84_81, %c288_82], %74 {strides = array<i32>} : memref<448x480xbf16, #tpu.memory_space<vmem>>, vector<28x96xbf16>,
    %c3_83 = arith.constant 3 : index
    %c4_84 = arith.constant 4 : index
    %c0_85 = arith.constant 0 : index
    %76 = vector.load %arg1[%c3_83, %c4_84, %c0_85] : memref<16x32x96xf32, #tpu.memory_space<vmem>>, vector<1x28x96xf32>
    %77 = vector.shape_cast %76 : vector<1x28x96xf32> to vector<28x96xf32>
    %78 = arith.truncf %77 : vector<28x96xf32> to vector<28x96xbf16>
    %c84_86 = arith.constant 84 : index
    %c384_87 = arith.constant 384 : index
    %79 = vector.load %arg17[%c84_86, %c384_87] : memref<448x480xbf16, #tpu.memory_space<vmem>>, vector<28x96xbf16>
    tpu.vector_store %arg17[%c84_86, %c384_87], %78 {strides = array<i32>} : memref<448x480xbf16, #tpu.memory_space<vmem>>, vector<28x96xbf16>,
    %c4_88 = arith.constant 4 : index
    %c0_89 = arith.constant 0 : index
    %c0_90 = arith.constant 0 : index
    %80 = vector.load %arg1[%c4_88, %c0_89, %c0_90] : memref<16x32x96xf32, #tpu.memory_space<vmem>>, vector<1x28x96xf32>
    %81 = vector.shape_cast %80 : vector<1x28x96xf32> to vector<28x96xf32>
    %82 = arith.truncf %81 : vector<28x96xf32> to vector<28x96xbf16>
    %c112 = arith.constant 112 : index
    %c0_91 = arith.constant 0 : index
    %83 = vector.load %arg17[%c112, %c0_91] : memref<448x480xbf16, #tpu.memory_space<vmem>>, vector<28x96xbf16>
    tpu.vector_store %arg17[%c112, %c0_91], %82 {strides = array<i32>} : memref<448x480xbf16, #tpu.memory_space<vmem>>, vector<28x96xbf16>,
    %c4_92 = arith.constant 4 : index
    %c1_93 = arith.constant 1 : index
    %c0_94 = arith.constant 0 : index
    %84 = vector.load %arg1[%c4_92, %c1_93, %c0_94] : memref<16x32x96xf32, #tpu.memory_space<vmem>>, vector<1x28x96xf32>
    %85 = vector.shape_cast %84 : vector<1x28x96xf32> to vector<28x96xf32>
    %86 = arith.truncf %85 : vector<28x96xf32> to vector<28x96xbf16>
    %c112_95 = arith.constant 112 : index
    %c96_96 = arith.constant 96 : index
    %87 = vector.load %arg17[%c112_95, %c96_96] : memref<448x480xbf16, #tpu.memory_space<vmem>>, vector<28x96xbf16>
    tpu.vector_store %arg17[%c112_95, %c96_96], %86 {strides = array<i32>} : memref<448x480xbf16, #tpu.memory_space<vmem>>, vector<28x96xbf16>,
    %c4_97 = arith.constant 4 : index
    %c2_98 = arith.constant 2 : index
    %c0_99 = arith.constant 0 : index
    %88 = vector.load %arg1[%c4_97, %c2_98, %c0_99] : memref<16x32x96xf32, #tpu.memory_space<vmem>>, vector<1x28x96xf32>
    %89 = vector.shape_cast %88 : vector<1x28x96xf32> to vector<28x96xf32>
    %90 = arith.truncf %89 : vector<28x96xf32> to vector<28x96xbf16>
    %c112_100 = arith.constant 112 : index
    %c192_101 = arith.constant 192 : index
    %91 = vector.load %arg17[%c112_100, %c192_101] : memref<448x480xbf16, #tpu.memory_space<vmem>>, vector<28x96xbf16>
    tpu.vector_store %arg17[%c112_100, %c192_101], %90 {strides = array<i32>} : memref<448x480xbf16, #tpu.memory_space<vmem>>, vector<28x96xbf16>,
    %c4_102 = arith.constant 4 : index
    %c3_103 = arith.constant 3 : index
    %c0_104 = arith.constant 0 : index
    %92 = vector.load %arg1[%c4_102, %c3_103, %c0_104] : memref<16x32x96xf32, #tpu.memory_space<vmem>>, vector<1x28x96xf32>
    %93 = vector.shape_cast %92 : vector<1x28x96xf32> to vector<28x96xf32>
    %94 = arith.truncf %93 : vector<28x96xf32> to vector<28x96xbf16>
    %c112_105 = arith.constant 112 : index
    %c288_106 = arith.constant 288 : index
    %95 = vector.load %arg17[%c112_105, %c288_106] : memref<448x480xbf16, #tpu.memory_space<vmem>>, vector<28x96xbf16>
    tpu.vector_store %arg17[%c112_105, %c288_106], %94 {strides = array<i32>} : memref<448x480xbf16, #tpu.memory_space<vmem>>, vector<28x96xbf16>,
    %c4_107 = arith.constant 4 : index
    %c4_108 = arith.constant 4 : index
    %c0_109 = arith.constant 0 : index
    %96 = vector.load %arg1[%c4_107, %c4_108, %c0_109] : memref<16x32x96xf32, #tpu.memory_space<vmem>>, vector<1x28x96xf32>
    %97 = vector.shape_cast %96 : vector<1x28x96xf32> to vector<28x96xf32>
    %98 = arith.truncf %97 : vector<28x96xf32> to vector<28x96xbf16>
    %c112_110 = arith.constant 112 : index
    %c384_111 = arith.constant 384 : index
    %99 = vector.load %arg17[%c112_110, %c384_111] : memref<448x480xbf16, #tpu.memory_space<vmem>>, vector<28x96xbf16>
    tpu.vector_store %arg17[%c112_110, %c384_111], %98 {strides = array<i32>} : memref<448x480xbf16, #tpu.memory_space<vmem>>, vector<28x96xbf16>,
    %c5 = arith.constant 5 : index
    %c0_112 = arith.constant 0 : index
    %c0_113 = arith.constant 0 : index
    %100 = vector.load %arg1[%c5, %c0_112, %c0_113] : memref<16x32x96xf32, #tpu.memory_space<vmem>>, vector<1x28x96xf32>
    %101 = vector.shape_cast %100 : vector<1x28x96xf32> to vector<28x96xf32>
    %102 = arith.truncf %101 : vector<28x96xf32> to vector<28x96xbf16>
    %c140 = arith.constant 140 : index
    %c0_114 = arith.constant 0 : index
    %103 = vector.load %arg17[%c140, %c0_114] : memref<448x480xbf16, #tpu.memory_space<vmem>>, vector<28x96xbf16>
    tpu.vector_store %arg17[%c140, %c0_114], %102 {strides = array<i32>} : memref<448x480xbf16, #tpu.memory_space<vmem>>, vector<28x96xbf16>,
    %c5_115 = arith.constant 5 : index
    %c1_116 = arith.constant 1 : index
    %c0_117 = arith.constant 0 : index
    %104 = vector.load %arg1[%c5_115, %c1_116, %c0_117] : memref<16x32x96xf32, #tpu.memory_space<vmem>>, vector<1x28x96xf32>
    %105 = vector.shape_cast %104 : vector<1x28x96xf32> to vector<28x96xf32>
    %106 = arith.truncf %105 : vector<28x96xf32> to vector<28x96xbf16>
    %c140_118 = arith.constant 140 : index
    %c96_119 = arith.constant 96 : index
    %107 = vector.load %arg17[%c140_118, %c96_119] : memref<448x480xbf16, #tpu.memory_space<vmem>>, vector<28x96xbf16>
    tpu.vector_store %arg17[%c140_118, %c96_119], %106 {strides = array<i32>} : memref<448x480xbf16, #tpu.memory_space<vmem>>, vector<28x96xbf16>,
    %c5_120 = arith.constant 5 : index
    %c2_121 = arith.constant 2 : index
    %c0_122 = arith.constant 0 : index
    %108 = vector.load %arg1[%c5_120, %c2_121, %c0_122] : memref<16x32x96xf32, #tpu.memory_space<vmem>>, vector<1x28x96xf32>
    %109 = vector.shape_cast %108 : vector<1x28x96xf32> to vector<28x96xf32>
    %110 = arith.truncf %109 : vector<28x96xf32> to vector<28x96xbf16>
    %c140_123 = arith.constant 140 : index
    %c192_124 = arith.constant 192 : index
    %111 = vector.load %arg17[%c140_123, %c192_124] : memref<448x480xbf16, #tpu.memory_space<vmem>>, vector<28x96xbf16>
    tpu.vector_store %arg17[%c140_123, %c192_124], %110 {strides = array<i32>} : memref<448x480xbf16, #tpu.memory_space<vmem>>, vector<28x96xbf16>,
    %c5_125 = arith.constant 5 : index
    %c3_126 = arith.constant 3 : index
    %c0_127 = arith.constant 0 : index
    %112 = vector.load %arg1[%c5_125, %c3_126, %c0_127] : memref<16x32x96xf32, #tpu.memory_space<vmem>>, vector<1x28x96xf32>
    %113 = vector.shape_cast %112 : vector<1x28x96xf32> to vector<28x96xf32>
    %114 = arith.truncf %113 : vector<28x96xf32> to vector<28x96xbf16>
    %c140_128 = arith.constant 140 : index
    %c288_129 = arith.constant 288 : index
    %115 = vector.load %arg17[%c140_128, %c288_129] : memref<448x480xbf16, #tpu.memory_space<vmem>>, vector<28x96xbf16>
    tpu.vector_store %arg17[%c140_128, %c288_129], %114 {strides = array<i32>} : memref<448x480xbf16, #tpu.memory_space<vmem>>, vector<28x96xbf16>,
    %c5_130 = arith.constant 5 : index
    %c4_131 = arith.constant 4 : index
    %c0_132 = arith.constant 0 : index
    %116 = vector.load %arg1[%c5_130, %c4_131, %c0_132] : memref<16x32x96xf32, #tpu.memory_space<vmem>>, vector<1x28x96xf32>
    %117 = vector.shape_cast %116 : vector<1x28x96xf32> to vector<28x96xf32>
    %118 = arith.truncf %117 : vector<28x96xf32> to vector<28x96xbf16>
    %c140_133 = arith.constant 140 : index
    %c384_134 = arith.constant 384 : index
    %119 = vector.load %arg17[%c140_133, %c384_134] : memref<448x480xbf16, #tpu.memory_space<vmem>>, vector<28x96xbf16>
    tpu.vector_store %arg17[%c140_133, %c384_134], %118 {strides = array<i32>} : memref<448x480xbf16, #tpu.memory_space<vmem>>, vector<28x96xbf16>,
    %c6 = arith.constant 6 : index
    %c0_135 = arith.constant 0 : index
    %c0_136 = arith.constant 0 : index
    %120 = vector.load %arg1[%c6, %c0_135, %c0_136] : memref<16x32x96xf32, #tpu.memory_space<vmem>>, vector<1x28x96xf32>
    %121 = vector.shape_cast %120 : vector<1x28x96xf32> to vector<28x96xf32>
    %122 = arith.truncf %121 : vector<28x96xf32> to vector<28x96xbf16>
    %c168 = arith.constant 168 : index
    %c0_137 = arith.constant 0 : index
    %123 = vector.load %arg17[%c168, %c0_137] : memref<448x480xbf16, #tpu.memory_space<vmem>>, vector<28x96xbf16>
    tpu.vector_store %arg17[%c168, %c0_137], %122 {strides = array<i32>} : memref<448x480xbf16, #tpu.memory_space<vmem>>, vector<28x96xbf16>,
    %c6_138 = arith.constant 6 : index
    %c1_139 = arith.constant 1 : index
    %c0_140 = arith.constant 0 : index
    %124 = vector.load %arg1[%c6_138, %c1_139, %c0_140] : memref<16x32x96xf32, #tpu.memory_space<vmem>>, vector<1x28x96xf32>
    %125 = vector.shape_cast %124 : vector<1x28x96xf32> to vector<28x96xf32>
    %126 = arith.truncf %125 : vector<28x96xf32> to vector<28x96xbf16>
    %c168_141 = arith.constant 168 : index
    %c96_142 = arith.constant 96 : index
    %127 = vector.load %arg17[%c168_141, %c96_142] : memref<448x480xbf16, #tpu.memory_space<vmem>>, vector<28x96xbf16>
    tpu.vector_store %arg17[%c168_141, %c96_142], %126 {strides = array<i32>} : memref<448x480xbf16, #tpu.memory_space<vmem>>, vector<28x96xbf16>,
    %c6_143 = arith.constant 6 : index
    %c2_144 = arith.constant 2 : index
    %c0_145 = arith.constant 0 : index
    %128 = vector.load %arg1[%c6_143, %c2_144, %c0_145] : memref<16x32x96xf32, #tpu.memory_space<vmem>>, vector<1x28x96xf32>
    %129 = vector.shape_cast %128 : vector<1x28x96xf32> to vector<28x96xf32>
    %130 = arith.truncf %129 : vector<28x96xf32> to vector<28x96xbf16>
    %c168_146 = arith.constant 168 : index
    %c192_147 = arith.constant 192 : index
    %131 = vector.load %arg17[%c168_146, %c192_147] : memref<448x480xbf16, #tpu.memory_space<vmem>>, vector<28x96xbf16>
    tpu.vector_store %arg17[%c168_146, %c192_147], %130 {strides = array<i32>} : memref<448x480xbf16, #tpu.memory_space<vmem>>, vector<28x96xbf16>,
    %c6_148 = arith.constant 6 : index
    %c3_149 = arith.constant 3 : index
    %c0_150 = arith.constant 0 : index
    %132 = vector.load %arg1[%c6_148, %c3_149, %c0_150] : memref<16x32x96xf32, #tpu.memory_space<vmem>>, vector<1x28x96xf32>
    %133 = vector.shape_cast %132 : vector<1x28x96xf32> to vector<28x96xf32>
    %134 = arith.truncf %133 : vector<28x96xf32> to vector<28x96xbf16>
    %c168_151 = arith.constant 168 : index
    %c288_152 = arith.constant 288 : index
    %135 = vector.load %arg17[%c168_151, %c288_152] : memref<448x480xbf16, #tpu.memory_space<vmem>>, vector<28x96xbf16>
    tpu.vector_store %arg17[%c168_151, %c288_152], %134 {strides = array<i32>} : memref<448x480xbf16, #tpu.memory_space<vmem>>, vector<28x96xbf16>,
    %c6_153 = arith.constant 6 : index
    %c4_154 = arith.constant 4 : index
    %c0_155 = arith.constant 0 : index
    %136 = vector.load %arg1[%c6_153, %c4_154, %c0_155] : memref<16x32x96xf32, #tpu.memory_space<vmem>>, vector<1x28x96xf32>
    %137 = vector.shape_cast %136 : vector<1x28x96xf32> to vector<28x96xf32>
    %138 = arith.truncf %137 : vector<28x96xf32> to vector<28x96xbf16>
    %c168_156 = arith.constant 168 : index
    %c384_157 = arith.constant 384 : index
    %139 = vector.load %arg17[%c168_156, %c384_157] : memref<448x480xbf16, #tpu.memory_space<vmem>>, vector<28x96xbf16>
    tpu.vector_store %arg17[%c168_156, %c384_157], %138 {strides = array<i32>} : memref<448x480xbf16, #tpu.memory_space<vmem>>, vector<28x96xbf16>,
    %c7 = arith.constant 7 : index
    %c0_158 = arith.constant 0 : index
    %c0_159 = arith.constant 0 : index
    %140 = vector.load %arg1[%c7, %c0_158, %c0_159] : memref<16x32x96xf32, #tpu.memory_space<vmem>>, vector<1x28x96xf32>
    %141 = vector.shape_cast %140 : vector<1x28x96xf32> to vector<28x96xf32>
    %142 = arith.truncf %141 : vector<28x96xf32> to vector<28x96xbf16>
    %c196 = arith.constant 196 : index
    %c0_160 = arith.constant 0 : index
    %143 = vector.load %arg17[%c196, %c0_160] : memref<448x480xbf16, #tpu.memory_space<vmem>>, vector<28x96xbf16>
    tpu.vector_store %arg17[%c196, %c0_160], %142 {strides = array<i32>} : memref<448x480xbf16, #tpu.memory_space<vmem>>, vector<28x96xbf16>,
    %c7_161 = arith.constant 7 : index
    %c1_162 = arith.constant 1 : index
    %c0_163 = arith.constant 0 : index
    %144 = vector.load %arg1[%c7_161, %c1_162, %c0_163] : memref<16x32x96xf32, #tpu.memory_space<vmem>>, vector<1x28x96xf32>
    %145 = vector.shape_cast %144 : vector<1x28x96xf32> to vector<28x96xf32>
    %146 = arith.truncf %145 : vector<28x96xf32> to vector<28x96xbf16>
    %c196_164 = arith.constant 196 : index
    %c96_165 = arith.constant 96 : index
    %147 = vector.load %arg17[%c196_164, %c96_165] : memref<448x480xbf16, #tpu.memory_space<vmem>>, vector<28x96xbf16>
    tpu.vector_store %arg17[%c196_164, %c96_165], %146 {strides = array<i32>} : memref<448x480xbf16, #tpu.memory_space<vmem>>, vector<28x96xbf16>,
    %c7_166 = arith.constant 7 : index
    %c2_167 = arith.constant 2 : index
    %c0_168 = arith.constant 0 : index
    %148 = vector.load %arg1[%c7_166, %c2_167, %c0_168] : memref<16x32x96xf32, #tpu.memory_space<vmem>>, vector<1x28x96xf32>
    %149 = vector.shape_cast %148 : vector<1x28x96xf32> to vector<28x96xf32>
    %150 = arith.truncf %149 : vector<28x96xf32> to vector<28x96xbf16>
    %c196_169 = arith.constant 196 : index
    %c192_170 = arith.constant 192 : index
    %151 = vector.load %arg17[%c196_169, %c192_170] : memref<448x480xbf16, #tpu.memory_space<vmem>>, vector<28x96xbf16>
    tpu.vector_store %arg17[%c196_169, %c192_170], %150 {strides = array<i32>} : memref<448x480xbf16, #tpu.memory_space<vmem>>, vector<28x96xbf16>,
    %c7_171 = arith.constant 7 : index
    %c3_172 = arith.constant 3 : index
    %c0_173 = arith.constant 0 : index
    %152 = vector.load %arg1[%c7_171, %c3_172, %c0_173] : memref<16x32x96xf32, #tpu.memory_space<vmem>>, vector<1x28x96xf32>
    %153 = vector.shape_cast %152 : vector<1x28x96xf32> to vector<28x96xf32>
    %154 = arith.truncf %153 : vector<28x96xf32> to vector<28x96xbf16>
    %c196_174 = arith.constant 196 : index
    %c288_175 = arith.constant 288 : index
    %155 = vector.load %arg17[%c196_174, %c288_175] : memref<448x480xbf16, #tpu.memory_space<vmem>>, vector<28x96xbf16>
    tpu.vector_store %arg17[%c196_174, %c288_175], %154 {strides = array<i32>} : memref<448x480xbf16, #tpu.memory_space<vmem>>, vector<28x96xbf16>,
    %c7_176 = arith.constant 7 : index
    %c4_177 = arith.constant 4 : index
    %c0_178 = arith.constant 0 : index
    %156 = vector.load %arg1[%c7_176, %c4_177, %c0_178] : memref<16x32x96xf32, #tpu.memory_space<vmem>>, vector<1x28x96xf32>
    %157 = vector.shape_cast %156 : vector<1x28x96xf32> to vector<28x96xf32>
    %158 = arith.truncf %157 : vector<28x96xf32> to vector<28x96xbf16>
    %c196_179 = arith.constant 196 : index
    %c384_180 = arith.constant 384 : index
    %159 = vector.load %arg17[%c196_179, %c384_180] : memref<448x480xbf16, #tpu.memory_space<vmem>>, vector<28x96xbf16>
    tpu.vector_store %arg17[%c196_179, %c384_180], %158 {strides = array<i32>} : memref<448x480xbf16, #tpu.memory_space<vmem>>, vector<28x96xbf16>,
    %c8 = arith.constant 8 : index
    %c0_181 = arith.constant 0 : index
    %c0_182 = arith.constant 0 : index
    %160 = vector.load %arg1[%c8, %c0_181, %c0_182] : memref<16x32x96xf32, #tpu.memory_space<vmem>>, vector<1x28x96xf32>
    %161 = vector.shape_cast %160 : vector<1x28x96xf32> to vector<28x96xf32>
    %162 = arith.truncf %161 : vector<28x96xf32> to vector<28x96xbf16>
    %c224 = arith.constant 224 : index
    %c0_183 = arith.constant 0 : index
    %163 = vector.load %arg17[%c224, %c0_183] : memref<448x480xbf16, #tpu.memory_space<vmem>>, vector<28x96xbf16>
    tpu.vector_store %arg17[%c224, %c0_183], %162 {strides = array<i32>} : memref<448x480xbf16, #tpu.memory_space<vmem>>, vector<28x96xbf16>,
    %c8_184 = arith.constant 8 : index
    %c1_185 = arith.constant 1 : index
    %c0_186 = arith.constant 0 : index
    %164 = vector.load %arg1[%c8_184, %c1_185, %c0_186] : memref<16x32x96xf32, #tpu.memory_space<vmem>>, vector<1x28x96xf32>
    %165 = vector.shape_cast %164 : vector<1x28x96xf32> to vector<28x96xf32>
    %166 = arith.truncf %165 : vector<28x96xf32> to vector<28x96xbf16>
    %c224_187 = arith.constant 224 : index
    %c96_188 = arith.constant 96 : index
    %167 = vector.load %arg17[%c224_187, %c96_188] : memref<448x480xbf16, #tpu.memory_space<vmem>>, vector<28x96xbf16>
    tpu.vector_store %arg17[%c224_187, %c96_188], %166 {strides = array<i32>} : memref<448x480xbf16, #tpu.memory_space<vmem>>, vector<28x96xbf16>,
    %c8_189 = arith.constant 8 : index
    %c2_190 = arith.constant 2 : index
    %c0_191 = arith.constant 0 : index
    %168 = vector.load %arg1[%c8_189, %c2_190, %c0_191] : memref<16x32x96xf32, #tpu.memory_space<vmem>>, vector<1x28x96xf32>
    %169 = vector.shape_cast %168 : vector<1x28x96xf32> to vector<28x96xf32>
    %170 = arith.truncf %169 : vector<28x96xf32> to vector<28x96xbf16>
    %c224_192 = arith.constant 224 : index
    %c192_193 = arith.constant 192 : index
    %171 = vector.load %arg17[%c224_192, %c192_193] : memref<448x480xbf16, #tpu.memory_space<vmem>>, vector<28x96xbf16>
    tpu.vector_store %arg17[%c224_192, %c192_193], %170 {strides = array<i32>} : memref<448x480xbf16, #tpu.memory_space<vmem>>, vector<28x96xbf16>,
    %c8_194 = arith.constant 8 : index
    %c3_195 = arith.constant 3 : index
    %c0_196 = arith.constant 0 : index
    %172 = vector.load %arg1[%c8_194, %c3_195, %c0_196] : memref<16x32x96xf32, #tpu.memory_space<vmem>>, vector<1x28x96xf32>
    %173 = vector.shape_cast %172 : vector<1x28x96xf32> to vector<28x96xf32>
    %174 = arith.truncf %173 : vector<28x96xf32> to vector<28x96xbf16>
    %c224_197 = arith.constant 224 : index
    %c288_198 = arith.constant 288 : index
    %175 = vector.load %arg17[%c224_197, %c288_198] : memref<448x480xbf16, #tpu.memory_space<vmem>>, vector<28x96xbf16>
    tpu.vector_store %arg17[%c224_197, %c288_198], %174 {strides = array<i32>} : memref<448x480xbf16, #tpu.memory_space<vmem>>, vector<28x96xbf16>,
    %c8_199 = arith.constant 8 : index
    %c4_200 = arith.constant 4 : index
    %c0_201 = arith.constant 0 : index
    %176 = vector.load %arg1[%c8_199, %c4_200, %c0_201] : memref<16x32x96xf32, #tpu.memory_space<vmem>>, vector<1x28x96xf32>
    %177 = vector.shape_cast %176 : vector<1x28x96xf32> to vector<28x96xf32>
    %178 = arith.truncf %177 : vector<28x96xf32> to vector<28x96xbf16>
    %c224_202 = arith.constant 224 : index
    %c384_203 = arith.constant 384 : index
    %179 = vector.load %arg17[%c224_202, %c384_203] : memref<448x480xbf16, #tpu.memory_space<vmem>>, vector<28x96xbf16>
    tpu.vector_store %arg17[%c224_202, %c384_203], %178 {strides = array<i32>} : memref<448x480xbf16, #tpu.memory_space<vmem>>, vector<28x96xbf16>,
    %c9 = arith.constant 9 : index
    %c0_204 = arith.constant 0 : index
    %c0_205 = arith.constant 0 : index
    %180 = vector.load %arg1[%c9, %c0_204, %c0_205] : memref<16x32x96xf32, #tpu.memory_space<vmem>>, vector<1x28x96xf32>
    %181 = vector.shape_cast %180 : vector<1x28x96xf32> to vector<28x96xf32>
    %182 = arith.truncf %181 : vector<28x96xf32> to vector<28x96xbf16>
    %c252 = arith.constant 252 : index
    %c0_206 = arith.constant 0 : index
    %183 = vector.load %arg17[%c252, %c0_206] : memref<448x480xbf16, #tpu.memory_space<vmem>>, vector<28x96xbf16>
    tpu.vector_store %arg17[%c252, %c0_206], %182 {strides = array<i32>} : memref<448x480xbf16, #tpu.memory_space<vmem>>, vector<28x96xbf16>,
    %c9_207 = arith.constant 9 : index
    %c1_208 = arith.constant 1 : index
    %c0_209 = arith.constant 0 : index
    %184 = vector.load %arg1[%c9_207, %c1_208, %c0_209] : memref<16x32x96xf32, #tpu.memory_space<vmem>>, vector<1x28x96xf32>
    %185 = vector.shape_cast %184 : vector<1x28x96xf32> to vector<28x96xf32>
    %186 = arith.truncf %185 : vector<28x96xf32> to vector<28x96xbf16>
    %c252_210 = arith.constant 252 : index
    %c96_211 = arith.constant 96 : index
    %187 = vector.load %arg17[%c252_210, %c96_211] : memref<448x480xbf16, #tpu.memory_space<vmem>>, vector<28x96xbf16>
    tpu.vector_store %arg17[%c252_210, %c96_211], %186 {strides = array<i32>} : memref<448x480xbf16, #tpu.memory_space<vmem>>, vector<28x96xbf16>,
    %c9_212 = arith.constant 9 : index
    %c2_213 = arith.constant 2 : index
    %c0_214 = arith.constant 0 : index
    %188 = vector.load %arg1[%c9_212, %c2_213, %c0_214] : memref<16x32x96xf32, #tpu.memory_space<vmem>>, vector<1x28x96xf32>
    %189 = vector.shape_cast %188 : vector<1x28x96xf32> to vector<28x96xf32>
    %190 = arith.truncf %189 : vector<28x96xf32> to vector<28x96xbf16>
    %c252_215 = arith.constant 252 : index
    %c192_216 = arith.constant 192 : index
    %191 = vector.load %arg17[%c252_215, %c192_216] : memref<448x480xbf16, #tpu.memory_space<vmem>>, vector<28x96xbf16>
    tpu.vector_store %arg17[%c252_215, %c192_216], %190 {strides = array<i32>} : memref<448x480xbf16, #tpu.memory_space<vmem>>, vector<28x96xbf16>,
    %c9_217 = arith.constant 9 : index
    %c3_218 = arith.constant 3 : index
    %c0_219 = arith.constant 0 : index
    %192 = vector.load %arg1[%c9_217, %c3_218, %c0_219] : memref<16x32x96xf32, #tpu.memory_space<vmem>>, vector<1x28x96xf32>
    %193 = vector.shape_cast %192 : vector<1x28x96xf32> to vector<28x96xf32>
    %194 = arith.truncf %193 : vector<28x96xf32> to vector<28x96xbf16>
    %c252_220 = arith.constant 252 : index
    %c288_221 = arith.constant 288 : index
    %195 = vector.load %arg17[%c252_220, %c288_221] : memref<448x480xbf16, #tpu.memory_space<vmem>>, vector<28x96xbf16>
    tpu.vector_store %arg17[%c252_220, %c288_221], %194 {strides = array<i32>} : memref<448x480xbf16, #tpu.memory_space<vmem>>, vector<28x96xbf16>,
    %c9_222 = arith.constant 9 : index
    %c4_223 = arith.constant 4 : index
    %c0_224 = arith.constant 0 : index
    %196 = vector.load %arg1[%c9_222, %c4_223, %c0_224] : memref<16x32x96xf32, #tpu.memory_space<vmem>>, vector<1x28x96xf32>
    %197 = vector.shape_cast %196 : vector<1x28x96xf32> to vector<28x96xf32>
    %198 = arith.truncf %197 : vector<28x96xf32> to vector<28x96xbf16>
    %c252_225 = arith.constant 252 : index
    %c384_226 = arith.constant 384 : index
    %199 = vector.load %arg17[%c252_225, %c384_226] : memref<448x480xbf16, #tpu.memory_space<vmem>>, vector<28x96xbf16>
    tpu.vector_store %arg17[%c252_225, %c384_226], %198 {strides = array<i32>} : memref<448x480xbf16, #tpu.memory_space<vmem>>, vector<28x96xbf16>,
    %c10 = arith.constant 10 : index
    %c0_227 = arith.constant 0 : index
    %c0_228 = arith.constant 0 : index
    %200 = vector.load %arg1[%c10, %c0_227, %c0_228] : memref<16x32x96xf32, #tpu.memory_space<vmem>>, vector<1x28x96xf32>
    %201 = vector.shape_cast %200 : vector<1x28x96xf32> to vector<28x96xf32>
    %202 = arith.truncf %201 : vector<28x96xf32> to vector<28x96xbf16>
    %c280 = arith.constant 280 : index
    %c0_229 = arith.constant 0 : index
    %203 = vector.load %arg17[%c280, %c0_229] : memref<448x480xbf16, #tpu.memory_space<vmem>>, vector<28x96xbf16>
    tpu.vector_store %arg17[%c280, %c0_229], %202 {strides = array<i32>} : memref<448x480xbf16, #tpu.memory_space<vmem>>, vector<28x96xbf16>,
    %c10_230 = arith.constant 10 : index
    %c1_231 = arith.constant 1 : index
    %c0_232 = arith.constant 0 : index
    %204 = vector.load %arg1[%c10_230, %c1_231, %c0_232] : memref<16x32x96xf32, #tpu.memory_space<vmem>>, vector<1x28x96xf32>
    %205 = vector.shape_cast %204 : vector<1x28x96xf32> to vector<28x96xf32>
    %206 = arith.truncf %205 : vector<28x96xf32> to vector<28x96xbf16>
    %c280_233 = arith.constant 280 : index
    %c96_234 = arith.constant 96 : index
    %207 = vector.load %arg17[%c280_233, %c96_234] : memref<448x480xbf16, #tpu.memory_space<vmem>>, vector<28x96xbf16>
    tpu.vector_store %arg17[%c280_233, %c96_234], %206 {strides = array<i32>} : memref<448x480xbf16, #tpu.memory_space<vmem>>, vector<28x96xbf16>,
    %c10_235 = arith.constant 10 : index
    %c2_236 = arith.constant 2 : index
    %c0_237 = arith.constant 0 : index
    %208 = vector.load %arg1[%c10_235, %c2_236, %c0_237] : memref<16x32x96xf32, #tpu.memory_space<vmem>>, vector<1x28x96xf32>
    %209 = vector.shape_cast %208 : vector<1x28x96xf32> to vector<28x96xf32>
    %210 = arith.truncf %209 : vector<28x96xf32> to vector<28x96xbf16>
    %c280_238 = arith.constant 280 : index
    %c192_239 = arith.constant 192 : index
    %211 = vector.load %arg17[%c280_238, %c192_239] : memref<448x480xbf16, #tpu.memory_space<vmem>>, vector<28x96xbf16>
    tpu.vector_store %arg17[%c280_238, %c192_239], %210 {strides = array<i32>} : memref<448x480xbf16, #tpu.memory_space<vmem>>, vector<28x96xbf16>,
    %c10_240 = arith.constant 10 : index
    %c3_241 = arith.constant 3 : index
    %c0_242 = arith.constant 0 : index
    %212 = vector.load %arg1[%c10_240, %c3_241, %c0_242] : memref<16x32x96xf32, #tpu.memory_space<vmem>>, vector<1x28x96xf32>
    %213 = vector.shape_cast %212 : vector<1x28x96xf32> to vector<28x96xf32>
    %214 = arith.truncf %213 : vector<28x96xf32> to vector<28x96xbf16>
    %c280_243 = arith.constant 280 : index
    %c288_244 = arith.constant 288 : index
    %215 = vector.load %arg17[%c280_243, %c288_244] : memref<448x480xbf16, #tpu.memory_space<vmem>>, vector<28x96xbf16>
    tpu.vector_store %arg17[%c280_243, %c288_244], %214 {strides = array<i32>} : memref<448x480xbf16, #tpu.memory_space<vmem>>, vector<28x96xbf16>,
    %c10_245 = arith.constant 10 : index
    %c4_246 = arith.constant 4 : index
    %c0_247 = arith.constant 0 : index
    %216 = vector.load %arg1[%c10_245, %c4_246, %c0_247] : memref<16x32x96xf32, #tpu.memory_space<vmem>>, vector<1x28x96xf32>
    %217 = vector.shape_cast %216 : vector<1x28x96xf32> to vector<28x96xf32>
    %218 = arith.truncf %217 : vector<28x96xf32> to vector<28x96xbf16>
    %c280_248 = arith.constant 280 : index
    %c384_249 = arith.constant 384 : index
    %219 = vector.load %arg17[%c280_248, %c384_249] : memref<448x480xbf16, #tpu.memory_space<vmem>>, vector<28x96xbf16>
    tpu.vector_store %arg17[%c280_248, %c384_249], %218 {strides = array<i32>} : memref<448x480xbf16, #tpu.memory_space<vmem>>, vector<28x96xbf16>,
    %c11 = arith.constant 11 : index
    %c0_250 = arith.constant 0 : index
    %c0_251 = arith.constant 0 : index
    %220 = vector.load %arg1[%c11, %c0_250, %c0_251] : memref<16x32x96xf32, #tpu.memory_space<vmem>>, vector<1x28x96xf32>
    %221 = vector.shape_cast %220 : vector<1x28x96xf32> to vector<28x96xf32>
    %222 = arith.truncf %221 : vector<28x96xf32> to vector<28x96xbf16>
    %c308 = arith.constant 308 : index
    %c0_252 = arith.constant 0 : index
    %223 = vector.load %arg17[%c308, %c0_252] : memref<448x480xbf16, #tpu.memory_space<vmem>>, vector<28x96xbf16>
    tpu.vector_store %arg17[%c308, %c0_252], %222 {strides = array<i32>} : memref<448x480xbf16, #tpu.memory_space<vmem>>, vector<28x96xbf16>,
    %c11_253 = arith.constant 11 : index
    %c1_254 = arith.constant 1 : index
    %c0_255 = arith.constant 0 : index
    %224 = vector.load %arg1[%c11_253, %c1_254, %c0_255] : memref<16x32x96xf32, #tpu.memory_space<vmem>>, vector<1x28x96xf32>
    %225 = vector.shape_cast %224 : vector<1x28x96xf32> to vector<28x96xf32>
    %226 = arith.truncf %225 : vector<28x96xf32> to vector<28x96xbf16>
    %c308_256 = arith.constant 308 : index
    %c96_257 = arith.constant 96 : index
    %227 = vector.load %arg17[%c308_256, %c96_257] : memref<448x480xbf16, #tpu.memory_space<vmem>>, vector<28x96xbf16>
    tpu.vector_store %arg17[%c308_256, %c96_257], %226 {strides = array<i32>} : memref<448x480xbf16, #tpu.memory_space<vmem>>, vector<28x96xbf16>,
    %c11_258 = arith.constant 11 : index
    %c2_259 = arith.constant 2 : index
    %c0_260 = arith.constant 0 : index
    %228 = vector.load %arg1[%c11_258, %c2_259, %c0_260] : memref<16x32x96xf32, #tpu.memory_space<vmem>>, vector<1x28x96xf32>
    %229 = vector.shape_cast %228 : vector<1x28x96xf32> to vector<28x96xf32>
    %230 = arith.truncf %229 : vector<28x96xf32> to vector<28x96xbf16>
    %c308_261 = arith.constant 308 : index
    %c192_262 = arith.constant 192 : index
    %231 = vector.load %arg17[%c308_261, %c192_262] : memref<448x480xbf16, #tpu.memory_space<vmem>>, vector<28x96xbf16>
    tpu.vector_store %arg17[%c308_261, %c192_262], %230 {strides = array<i32>} : memref<448x480xbf16, #tpu.memory_space<vmem>>, vector<28x96xbf16>,
    %c11_263 = arith.constant 11 : index
    %c3_264 = arith.constant 3 : index
    %c0_265 = arith.constant 0 : index
    %232 = vector.load %arg1[%c11_263, %c3_264, %c0_265] : memref<16x32x96xf32, #tpu.memory_space<vmem>>, vector<1x28x96xf32>
    %233 = vector.shape_cast %232 : vector<1x28x96xf32> to vector<28x96xf32>
    %234 = arith.truncf %233 : vector<28x96xf32> to vector<28x96xbf16>
    %c308_266 = arith.constant 308 : index
    %c288_267 = arith.constant 288 : index
    %235 = vector.load %arg17[%c308_266, %c288_267] : memref<448x480xbf16, #tpu.memory_space<vmem>>, vector<28x96xbf16>
    tpu.vector_store %arg17[%c308_266, %c288_267], %234 {strides = array<i32>} : memref<448x480xbf16, #tpu.memory_space<vmem>>, vector<28x96xbf16>,
    %c11_268 = arith.constant 11 : index
    %c4_269 = arith.constant 4 : index
    %c0_270 = arith.constant 0 : index
    %236 = vector.load %arg1[%c11_268, %c4_269, %c0_270] : memref<16x32x96xf32, #tpu.memory_space<vmem>>, vector<1x28x96xf32>
    %237 = vector.shape_cast %236 : vector<1x28x96xf32> to vector<28x96xf32>
    %238 = arith.truncf %237 : vector<28x96xf32> to vector<28x96xbf16>
    %c308_271 = arith.constant 308 : index
    %c384_272 = arith.constant 384 : index
    %239 = vector.load %arg17[%c308_271, %c384_272] : memref<448x480xbf16, #tpu.memory_space<vmem>>, vector<28x96xbf16>
    tpu.vector_store %arg17[%c308_271, %c384_272], %238 {strides = array<i32>} : memref<448x480xbf16, #tpu.memory_space<vmem>>, vector<28x96xbf16>,
    %c12 = arith.constant 12 : index
    %c0_273 = arith.constant 0 : index
    %c0_274 = arith.constant 0 : index
    %240 = vector.load %arg1[%c12, %c0_273, %c0_274] : memref<16x32x96xf32, #tpu.memory_space<vmem>>, vector<1x28x96xf32>
    %241 = vector.shape_cast %240 : vector<1x28x96xf32> to vector<28x96xf32>
    %242 = arith.truncf %241 : vector<28x96xf32> to vector<28x96xbf16>
    %c336 = arith.constant 336 : index
    %c0_275 = arith.constant 0 : index
    %243 = vector.load %arg17[%c336, %c0_275] : memref<448x480xbf16, #tpu.memory_space<vmem>>, vector<28x96xbf16>
    tpu.vector_store %arg17[%c336, %c0_275], %242 {strides = array<i32>} : memref<448x480xbf16, #tpu.memory_space<vmem>>, vector<28x96xbf16>,
    %c12_276 = arith.constant 12 : index
    %c1_277 = arith.constant 1 : index
    %c0_278 = arith.constant 0 : index
    %244 = vector.load %arg1[%c12_276, %c1_277, %c0_278] : memref<16x32x96xf32, #tpu.memory_space<vmem>>, vector<1x28x96xf32>
    %245 = vector.shape_cast %244 : vector<1x28x96xf32> to vector<28x96xf32>
    %246 = arith.truncf %245 : vector<28x96xf32> to vector<28x96xbf16>
    %c336_279 = arith.constant 336 : index
    %c96_280 = arith.constant 96 : index
    %247 = vector.load %arg17[%c336_279, %c96_280] : memref<448x480xbf16, #tpu.memory_space<vmem>>, vector<28x96xbf16>
    tpu.vector_store %arg17[%c336_279, %c96_280], %246 {strides = array<i32>} : memref<448x480xbf16, #tpu.memory_space<vmem>>, vector<28x96xbf16>,
    %c12_281 = arith.constant 12 : index
    %c2_282 = arith.constant 2 : index
    %c0_283 = arith.constant 0 : index
    %248 = vector.load %arg1[%c12_281, %c2_282, %c0_283] : memref<16x32x96xf32, #tpu.memory_space<vmem>>, vector<1x28x96xf32>
    %249 = vector.shape_cast %248 : vector<1x28x96xf32> to vector<28x96xf32>
    %250 = arith.truncf %249 : vector<28x96xf32> to vector<28x96xbf16>
    %c336_284 = arith.constant 336 : index
    %c192_285 = arith.constant 192 : index
    %251 = vector.load %arg17[%c336_284, %c192_285] : memref<448x480xbf16, #tpu.memory_space<vmem>>, vector<28x96xbf16>
    tpu.vector_store %arg17[%c336_284, %c192_285], %250 {strides = array<i32>} : memref<448x480xbf16, #tpu.memory_space<vmem>>, vector<28x96xbf16>,
    %c12_286 = arith.constant 12 : index
    %c3_287 = arith.constant 3 : index
    %c0_288 = arith.constant 0 : index
    %252 = vector.load %arg1[%c12_286, %c3_287, %c0_288] : memref<16x32x96xf32, #tpu.memory_space<vmem>>, vector<1x28x96xf32>
    %253 = vector.shape_cast %252 : vector<1x28x96xf32> to vector<28x96xf32>
    %254 = arith.truncf %253 : vector<28x96xf32> to vector<28x96xbf16>
    %c336_289 = arith.constant 336 : index
    %c288_290 = arith.constant 288 : index
    %255 = vector.load %arg17[%c336_289, %c288_290] : memref<448x480xbf16, #tpu.memory_space<vmem>>, vector<28x96xbf16>
    tpu.vector_store %arg17[%c336_289, %c288_290], %254 {strides = array<i32>} : memref<448x480xbf16, #tpu.memory_space<vmem>>, vector<28x96xbf16>,
    %c12_291 = arith.constant 12 : index
    %c4_292 = arith.constant 4 : index
    %c0_293 = arith.constant 0 : index
    %256 = vector.load %arg1[%c12_291, %c4_292, %c0_293] : memref<16x32x96xf32, #tpu.memory_space<vmem>>, vector<1x28x96xf32>
    %257 = vector.shape_cast %256 : vector<1x28x96xf32> to vector<28x96xf32>
    %258 = arith.truncf %257 : vector<28x96xf32> to vector<28x96xbf16>
    %c336_294 = arith.constant 336 : index
    %c384_295 = arith.constant 384 : index
    %259 = vector.load %arg17[%c336_294, %c384_295] : memref<448x480xbf16, #tpu.memory_space<vmem>>, vector<28x96xbf16>
    tpu.vector_store %arg17[%c336_294, %c384_295], %258 {strides = array<i32>} : memref<448x480xbf16, #tpu.memory_space<vmem>>, vector<28x96xbf16>,
    %c13 = arith.constant 13 : index
    %c0_296 = arith.constant 0 : index
    %c0_297 = arith.constant 0 : index
    %260 = vector.load %arg1[%c13, %c0_296, %c0_297] : memref<16x32x96xf32, #tpu.memory_space<vmem>>, vector<1x28x96xf32>
    %261 = vector.shape_cast %260 : vector<1x28x96xf32> to vector<28x96xf32>
    %262 = arith.truncf %261 : vector<28x96xf32> to vector<28x96xbf16>
    %c364 = arith.constant 364 : index
    %c0_298 = arith.constant 0 : index
    %263 = vector.load %arg17[%c364, %c0_298] : memref<448x480xbf16, #tpu.memory_space<vmem>>, vector<28x96xbf16>
    tpu.vector_store %arg17[%c364, %c0_298], %262 {strides = array<i32>} : memref<448x480xbf16, #tpu.memory_space<vmem>>, vector<28x96xbf16>,
    %c13_299 = arith.constant 13 : index
    %c1_300 = arith.constant 1 : index
    %c0_301 = arith.constant 0 : index
    %264 = vector.load %arg1[%c13_299, %c1_300, %c0_301] : memref<16x32x96xf32, #tpu.memory_space<vmem>>, vector<1x28x96xf32>
    %265 = vector.shape_cast %264 : vector<1x28x96xf32> to vector<28x96xf32>
    %266 = arith.truncf %265 : vector<28x96xf32> to vector<28x96xbf16>
    %c364_302 = arith.constant 364 : index
    %c96_303 = arith.constant 96 : index
    %267 = vector.load %arg17[%c364_302, %c96_303] : memref<448x480xbf16, #tpu.memory_space<vmem>>, vector<28x96xbf16>
    tpu.vector_store %arg17[%c364_302, %c96_303], %266 {strides = array<i32>} : memref<448x480xbf16, #tpu.memory_space<vmem>>, vector<28x96xbf16>,
    %c13_304 = arith.constant 13 : index
    %c2_305 = arith.constant 2 : index
    %c0_306 = arith.constant 0 : index
    %268 = vector.load %arg1[%c13_304, %c2_305, %c0_306] : memref<16x32x96xf32, #tpu.memory_space<vmem>>, vector<1x28x96xf32>
    %269 = vector.shape_cast %268 : vector<1x28x96xf32> to vector<28x96xf32>
    %270 = arith.truncf %269 : vector<28x96xf32> to vector<28x96xbf16>
    %c364_307 = arith.constant 364 : index
    %c192_308 = arith.constant 192 : index
    %271 = vector.load %arg17[%c364_307, %c192_308] : memref<448x480xbf16, #tpu.memory_space<vmem>>, vector<28x96xbf16>
    tpu.vector_store %arg17[%c364_307, %c192_308], %270 {strides = array<i32>} : memref<448x480xbf16, #tpu.memory_space<vmem>>, vector<28x96xbf16>,
    %c13_309 = arith.constant 13 : index
    %c3_310 = arith.constant 3 : index
    %c0_311 = arith.constant 0 : index
    %272 = vector.load %arg1[%c13_309, %c3_310, %c0_311] : memref<16x32x96xf32, #tpu.memory_space<vmem>>, vector<1x28x96xf32>
    %273 = vector.shape_cast %272 : vector<1x28x96xf32> to vector<28x96xf32>
    %274 = arith.truncf %273 : vector<28x96xf32> to vector<28x96xbf16>
    %c364_312 = arith.constant 364 : index
    %c288_313 = arith.constant 288 : index
    %275 = vector.load %arg17[%c364_312, %c288_313] : memref<448x480xbf16, #tpu.memory_space<vmem>>, vector<28x96xbf16>
    tpu.vector_store %arg17[%c364_312, %c288_313], %274 {strides = array<i32>} : memref<448x480xbf16, #tpu.memory_space<vmem>>, vector<28x96xbf16>,
    %c13_314 = arith.constant 13 : index
    %c4_315 = arith.constant 4 : index
    %c0_316 = arith.constant 0 : index
    %276 = vector.load %arg1[%c13_314, %c4_315, %c0_316] : memref<16x32x96xf32, #tpu.memory_space<vmem>>, vector<1x28x96xf32>
    %277 = vector.shape_cast %276 : vector<1x28x96xf32> to vector<28x96xf32>
    %278 = arith.truncf %277 : vector<28x96xf32> to vector<28x96xbf16>
    %c364_317 = arith.constant 364 : index
    %c384_318 = arith.constant 384 : index
    %279 = vector.load %arg17[%c364_317, %c384_318] : memref<448x480xbf16, #tpu.memory_space<vmem>>, vector<28x96xbf16>
    tpu.vector_store %arg17[%c364_317, %c384_318], %278 {strides = array<i32>} : memref<448x480xbf16, #tpu.memory_space<vmem>>, vector<28x96xbf16>,
    %c14 = arith.constant 14 : index
    %c0_319 = arith.constant 0 : index
    %c0_320 = arith.constant 0 : index
    %280 = vector.load %arg1[%c14, %c0_319, %c0_320] : memref<16x32x96xf32, #tpu.memory_space<vmem>>, vector<1x28x96xf32>
    %281 = vector.shape_cast %280 : vector<1x28x96xf32> to vector<28x96xf32>
    %282 = arith.truncf %281 : vector<28x96xf32> to vector<28x96xbf16>
    %c392 = arith.constant 392 : index
    %c0_321 = arith.constant 0 : index
    %283 = vector.load %arg17[%c392, %c0_321] : memref<448x480xbf16, #tpu.memory_space<vmem>>, vector<28x96xbf16>
    tpu.vector_store %arg17[%c392, %c0_321], %282 {strides = array<i32>} : memref<448x480xbf16, #tpu.memory_space<vmem>>, vector<28x96xbf16>,
    %c14_322 = arith.constant 14 : index
    %c1_323 = arith.constant 1 : index
    %c0_324 = arith.constant 0 : index
    %284 = vector.load %arg1[%c14_322, %c1_323, %c0_324] : memref<16x32x96xf32, #tpu.memory_space<vmem>>, vector<1x28x96xf32>
    %285 = vector.shape_cast %284 : vector<1x28x96xf32> to vector<28x96xf32>
    %286 = arith.truncf %285 : vector<28x96xf32> to vector<28x96xbf16>
    %c392_325 = arith.constant 392 : index
    %c96_326 = arith.constant 96 : index
    %287 = vector.load %arg17[%c392_325, %c96_326] : memref<448x480xbf16, #tpu.memory_space<vmem>>, vector<28x96xbf16>
    tpu.vector_store %arg17[%c392_325, %c96_326], %286 {strides = array<i32>} : memref<448x480xbf16, #tpu.memory_space<vmem>>, vector<28x96xbf16>,
    %c14_327 = arith.constant 14 : index
    %c2_328 = arith.constant 2 : index
    %c0_329 = arith.constant 0 : index
    %288 = vector.load %arg1[%c14_327, %c2_328, %c0_329] : memref<16x32x96xf32, #tpu.memory_space<vmem>>, vector<1x28x96xf32>
    %289 = vector.shape_cast %288 : vector<1x28x96xf32> to vector<28x96xf32>
    %290 = arith.truncf %289 : vector<28x96xf32> to vector<28x96xbf16>
    %c392_330 = arith.constant 392 : index
    %c192_331 = arith.constant 192 : index
    %291 = vector.load %arg17[%c392_330, %c192_331] : memref<448x480xbf16, #tpu.memory_space<vmem>>, vector<28x96xbf16>
    tpu.vector_store %arg17[%c392_330, %c192_331], %290 {strides = array<i32>} : memref<448x480xbf16, #tpu.memory_space<vmem>>, vector<28x96xbf16>,
    %c14_332 = arith.constant 14 : index
    %c3_333 = arith.constant 3 : index
    %c0_334 = arith.constant 0 : index
    %292 = vector.load %arg1[%c14_332, %c3_333, %c0_334] : memref<16x32x96xf32, #tpu.memory_space<vmem>>, vector<1x28x96xf32>
    %293 = vector.shape_cast %292 : vector<1x28x96xf32> to vector<28x96xf32>
    %294 = arith.truncf %293 : vector<28x96xf32> to vector<28x96xbf16>
    %c392_335 = arith.constant 392 : index
    %c288_336 = arith.constant 288 : index
    %295 = vector.load %arg17[%c392_335, %c288_336] : memref<448x480xbf16, #tpu.memory_space<vmem>>, vector<28x96xbf16>
    tpu.vector_store %arg17[%c392_335, %c288_336], %294 {strides = array<i32>} : memref<448x480xbf16, #tpu.memory_space<vmem>>, vector<28x96xbf16>,
    %c14_337 = arith.constant 14 : index
    %c4_338 = arith.constant 4 : index
    %c0_339 = arith.constant 0 : index
    %296 = vector.load %arg1[%c14_337, %c4_338, %c0_339] : memref<16x32x96xf32, #tpu.memory_space<vmem>>, vector<1x28x96xf32>
    %297 = vector.shape_cast %296 : vector<1x28x96xf32> to vector<28x96xf32>
    %298 = arith.truncf %297 : vector<28x96xf32> to vector<28x96xbf16>
    %c392_340 = arith.constant 392 : index
    %c384_341 = arith.constant 384 : index
    %299 = vector.load %arg17[%c392_340, %c384_341] : memref<448x480xbf16, #tpu.memory_space<vmem>>, vector<28x96xbf16>
    tpu.vector_store %arg17[%c392_340, %c384_341], %298 {strides = array<i32>} : memref<448x480xbf16, #tpu.memory_space<vmem>>, vector<28x96xbf16>,
    %c15 = arith.constant 15 : index
    %c0_342 = arith.constant 0 : index
    %c0_343 = arith.constant 0 : index
    %300 = vector.load %arg1[%c15, %c0_342, %c0_343] : memref<16x32x96xf32, #tpu.memory_space<vmem>>, vector<1x28x96xf32>
    %301 = vector.shape_cast %300 : vector<1x28x96xf32> to vector<28x96xf32>
    %302 = arith.truncf %301 : vector<28x96xf32> to vector<28x96xbf16>
    %c420 = arith.constant 420 : index
    %c0_344 = arith.constant 0 : index
    %303 = vector.load %arg17[%c420, %c0_344] : memref<448x480xbf16, #tpu.memory_space<vmem>>, vector<28x96xbf16>
    tpu.vector_store %arg17[%c420, %c0_344], %302 {strides = array<i32>} : memref<448x480xbf16, #tpu.memory_space<vmem>>, vector<28x96xbf16>,
    %c15_345 = arith.constant 15 : index
    %c1_346 = arith.constant 1 : index
    %c0_347 = arith.constant 0 : index
    %304 = vector.load %arg1[%c15_345, %c1_346, %c0_347] : memref<16x32x96xf32, #tpu.memory_space<vmem>>, vector<1x28x96xf32>
    %305 = vector.shape_cast %304 : vector<1x28x96xf32> to vector<28x96xf32>
    %306 = arith.truncf %305 : vector<28x96xf32> to vector<28x96xbf16>
    %c420_348 = arith.constant 420 : index
    %c96_349 = arith.constant 96 : index
    %307 = vector.load %arg17[%c420_348, %c96_349] : memref<448x480xbf16, #tpu.memory_space<vmem>>, vector<28x96xbf16>
    tpu.vector_store %arg17[%c420_348, %c96_349], %306 {strides = array<i32>} : memref<448x480xbf16, #tpu.memory_space<vmem>>, vector<28x96xbf16>,
    %c15_350 = arith.constant 15 : index
    %c2_351 = arith.constant 2 : index
    %c0_352 = arith.constant 0 : index
    %308 = vector.load %arg1[%c15_350, %c2_351, %c0_352] : memref<16x32x96xf32, #tpu.memory_space<vmem>>, vector<1x28x96xf32>
    %309 = vector.shape_cast %308 : vector<1x28x96xf32> to vector<28x96xf32>
    %310 = arith.truncf %309 : vector<28x96xf32> to vector<28x96xbf16>
    %c420_353 = arith.constant 420 : index
    %c192_354 = arith.constant 192 : index
    %311 = vector.load %arg17[%c420_353, %c192_354] : memref<448x480xbf16, #tpu.memory_space<vmem>>, vector<28x96xbf16>
    tpu.vector_store %arg17[%c420_353, %c192_354], %310 {strides = array<i32>} : memref<448x480xbf16, #tpu.memory_space<vmem>>, vector<28x96xbf16>,
    %c15_355 = arith.constant 15 : index
    %c3_356 = arith.constant 3 : index
    %c0_357 = arith.constant 0 : index
    %312 = vector.load %arg1[%c15_355, %c3_356, %c0_357] : memref<16x32x96xf32, #tpu.memory_space<vmem>>, vector<1x28x96xf32>
    %313 = vector.shape_cast %312 : vector<1x28x96xf32> to vector<28x96xf32>
    %314 = arith.truncf %313 : vector<28x96xf32> to vector<28x96xbf16>
    %c420_358 = arith.constant 420 : index
    %c288_359 = arith.constant 288 : index
    %315 = vector.load %arg17[%c420_358, %c288_359] : memref<448x480xbf16, #tpu.memory_space<vmem>>, vector<28x96xbf16>
    tpu.vector_store %arg17[%c420_358, %c288_359], %314 {strides = array<i32>} : memref<448x480xbf16, #tpu.memory_space<vmem>>, vector<28x96xbf16>,
    %c15_360 = arith.constant 15 : index
    %c4_361 = arith.constant 4 : index
    %c0_362 = arith.constant 0 : index
    %316 = vector.load %arg1[%c15_360, %c4_361, %c0_362] : memref<16x32x96xf32, #tpu.memory_space<vmem>>, vector<1x28x96xf32>
    %317 = vector.shape_cast %316 : vector<1x28x96xf32> to vector<28x96xf32>
    %318 = arith.truncf %317 : vector<28x96xf32> to vector<28x96xbf16>
    %c420_363 = arith.constant 420 : index
    %c384_364 = arith.constant 384 : index
    %319 = vector.load %arg17[%c420_363, %c384_364] : memref<448x480xbf16, #tpu.memory_space<vmem>>, vector<28x96xbf16>
    tpu.vector_store %arg17[%c420_363, %c384_364], %318 {strides = array<i32>} : memref<448x480xbf16, #tpu.memory_space<vmem>>, vector<28x96xbf16>,
    %c0_365 = arith.constant 0 : index
    %c0_366 = arith.constant 0 : index
    %320 = vector.load %arg17[%c0_365, %c0_366] : memref<448x480xbf16, #tpu.memory_space<vmem>>, vector<448x480xbf16>
    %c0_367 = arith.constant 0 : index
    %c0_368 = arith.constant 0 : index
    %321 = vector.load %arg2[%c0_367, %c0_368] : memref<480x168xbf16, #tpu.memory_space<vmem>>, vector<480x168xbf16>
    %cst = arith.constant dense<0.000000e+00> : vector<448x168xf32>
    %322 = tpu.matmul %320, %321, %cst {dimension_numbers = #tpu.dot_dimension_numbers<[1], [0], [0], [1], [0, 0, 1, 1], [], []>} : vector<448x480xbf16>, vector<480x168xbf16>, vector<448x168xf32> -> vector<448x168xf32>
    %c0_369 = arith.constant 0 : index
    %c0_370 = arith.constant 0 : index
    %323 = vector.load %arg3[%c0_369, %c0_370] : memref<1x168xf32, #tpu.memory_space<vmem>>, vector<1x168xf32>
    %324 = vector.broadcast %323 : vector<1x168xf32> to vector<448x168xf32>
    %325 = arith.addf %322, %324 : vector<448x168xf32>
    %cst_371 = arith.constant 0.000000e+00 : f32
    %326 = vector.broadcast %cst_371 : f32 to vector<448x168xf32>
    %327 = arith.maximumf %325, %326 : vector<448x168xf32>
    %328 = arith.truncf %327 : vector<448x168xf32> to vector<448x168xbf16>
    %c0_372 = arith.constant 0 : index
    %c0_373 = arith.constant 0 : index
    %329 = vector.load %arg18[%c0_372, %c0_373] : memref<448x168xbf16, #tpu.memory_space<vmem>>, vector<448x168xbf16>
    tpu.vector_store %arg18[%c0_372, %c0_373], %328 {strides = array<i32>} : memref<448x168xbf16, #tpu.memory_space<vmem>>, vector<448x168xbf16>,
    %c0_374 = arith.constant 0 : index
    %c0_375 = arith.constant 0 : index
    %330 = vector.load %arg6[%c0_374, %c0_375] : memref<448x448xbf16, #tpu.memory_space<vmem>>, vector<448x448xbf16>
    %c0_376 = arith.constant 0 : index
    %c0_377 = arith.constant 0 : index
    %331 = vector.load %arg18[%c0_376, %c0_377] : memref<448x168xbf16, #tpu.memory_space<vmem>>, vector<448x168xbf16>
    %cst_378 = arith.constant dense<0.000000e+00> : vector<448x168xf32>
    %332 = tpu.matmul %330, %331, %cst_378 {dimension_numbers = #tpu.dot_dimension_numbers<[1], [0], [0], [1], [0, 0, 1, 1], [], []>} : vector<448x448xbf16>, vector<448x168xbf16>, vector<448x168xf32> -> vector<448x168xf32>
    %333 = vector.extract_strided_slice %332 {offsets = [0, 0], sizes = [224, 168], strides = [1, 1]} : vector<448x168xf32> to vector<224x168xf32>
    %334 = vector.extract_strided_slice %332 {offsets = [224, 0], sizes = [224, 168], strides = [1, 1]} : vector<448x168xf32> to vector<224x168xf32>
    %335 = arith.maximumf %333, %334 : vector<224x168xf32>
    %336 = arith.truncf %335 : vector<224x168xf32> to vector<224x168xbf16>
    %c0_379 = arith.constant 0 : index
    %c0_380 = arith.constant 0 : index
    %337 = vector.load %arg7[%c0_379, %c0_380] : memref<168x256xbf16, #tpu.memory_space<vmem>>, vector<168x256xbf16>
    %cst_381 = arith.constant dense<0.000000e+00> : vector<224x256xf32>
    %338 = tpu.matmul %336, %337, %cst_381 {dimension_numbers = #tpu.dot_dimension_numbers<[1], [0], [0], [1], [0, 0, 1, 1], [], []>} : vector<224x168xbf16>, vector<168x256xbf16>, vector<224x256xf32> -> vector<224x256xf32>
    %339 = vector.extract_strided_slice %338 {offsets = [0, 0], sizes = [224, 84], strides = [1, 1]} : vector<224x256xf32> to vector<224x84xf32>
    %340 = vector.extract_strided_slice %338 {offsets = [0, 128], sizes = [224, 84], strides = [1, 1]} : vector<224x256xf32> to vector<224x84xf32>
    %341 = arith.maximumf %339, %340 : vector<224x84xf32>
    %c0_382 = arith.constant 0 : index
    %c0_383 = arith.constant 0 : index
    %342 = vector.load %arg19[%c0_382, %c0_383] : memref<224x84xf32, #tpu.memory_space<vmem>>, vector<224x84xf32>
    tpu.vector_store %arg19[%c0_382, %c0_383], %341 {strides = array<i32>} : memref<224x84xf32, #tpu.memory_space<vmem>>, vector<224x84xf32>,
    %c0_384 = arith.constant 0 : index
    %c0_385 = arith.constant 0 : index
    %343 = vector.load %arg19[%c0_384, %c0_385] : memref<224x84xf32, #tpu.memory_space<vmem>>, vector<10x84xf32>
    %344 = arith.truncf %343 : vector<10x84xf32> to vector<10x84xbf16>
    %c0_386 = arith.constant 0 : index
    %c0_387 = arith.constant 0 : index
    %345 = vector.load %arg20[%c0_386, %c0_387] : memref<160x420xbf16, #tpu.memory_space<vmem>>, vector<10x84xbf16>
    tpu.vector_store %arg20[%c0_386, %c0_387], %344 {strides = array<i32>} : memref<160x420xbf16, #tpu.memory_space<vmem>>, vector<10x84xbf16>,
    %c1_388 = arith.constant 1 : index
    %c0_389 = arith.constant 0 : index
    %346 = vector.load %arg19[%c1_388, %c0_389] : memref<224x84xf32, #tpu.memory_space<vmem>>, vector<10x84xf32>
    %347 = arith.truncf %346 : vector<10x84xf32> to vector<10x84xbf16>
    %c0_390 = arith.constant 0 : index
    %c84_391 = arith.constant 84 : index
    %348 = vector.load %arg20[%c0_390, %c84_391] : memref<160x420xbf16, #tpu.memory_space<vmem>>, vector<10x84xbf16>
    tpu.vector_store %arg20[%c0_390, %c84_391], %347 {strides = array<i32>} : memref<160x420xbf16, #tpu.memory_space<vmem>>, vector<10x84xbf16>,
    %c2_392 = arith.constant 2 : index
    %c0_393 = arith.constant 0 : index
    %349 = vector.load %arg19[%c2_392, %c0_393] : memref<224x84xf32, #tpu.memory_space<vmem>>, vector<10x84xf32>
    %350 = arith.truncf %349 : vector<10x84xf32> to vector<10x84xbf16>
    %c0_394 = arith.constant 0 : index
    %c168_395 = arith.constant 168 : index
    %351 = vector.load %arg20[%c0_394, %c168_395] : memref<160x420xbf16, #tpu.memory_space<vmem>>, vector<10x84xbf16>
    tpu.vector_store %arg20[%c0_394, %c168_395], %350 {strides = array<i32>} : memref<160x420xbf16, #tpu.memory_space<vmem>>, vector<10x84xbf16>,
    %c3_396 = arith.constant 3 : index
    %c0_397 = arith.constant 0 : index
    %352 = vector.load %arg19[%c3_396, %c0_397] : memref<224x84xf32, #tpu.memory_space<vmem>>, vector<10x84xf32>
    %353 = arith.truncf %352 : vector<10x84xf32> to vector<10x84xbf16>
    %c0_398 = arith.constant 0 : index
    %c252_399 = arith.constant 252 : index
    %354 = vector.load %arg20[%c0_398, %c252_399] : memref<160x420xbf16, #tpu.memory_space<vmem>>, vector<10x84xbf16>
    tpu.vector_store %arg20[%c0_398, %c252_399], %353 {strides = array<i32>} : memref<160x420xbf16, #tpu.memory_space<vmem>>, vector<10x84xbf16>,
    %c4_400 = arith.constant 4 : index
    %c0_401 = arith.constant 0 : index
    %355 = vector.load %arg19[%c4_400, %c0_401] : memref<224x84xf32, #tpu.memory_space<vmem>>, vector<10x84xf32>
    %356 = arith.truncf %355 : vector<10x84xf32> to vector<10x84xbf16>
    %c0_402 = arith.constant 0 : index
    %c336_403 = arith.constant 336 : index
    %357 = vector.load %arg20[%c0_402, %c336_403] : memref<160x420xbf16, #tpu.memory_space<vmem>>, vector<10x84xbf16>
    tpu.vector_store %arg20[%c0_402, %c336_403], %356 {strides = array<i32>} : memref<160x420xbf16, #tpu.memory_space<vmem>>, vector<10x84xbf16>,
    %c14_404 = arith.constant 14 : index
    %c0_405 = arith.constant 0 : index
    %358 = vector.load %arg19[%c14_404, %c0_405] : memref<224x84xf32, #tpu.memory_space<vmem>>, vector<10x84xf32>
    %359 = arith.truncf %358 : vector<10x84xf32> to vector<10x84xbf16>
    %c10_406 = arith.constant 10 : index
    %c0_407 = arith.constant 0 : index
    %360 = vector.load %arg20[%c10_406, %c0_407] : memref<160x420xbf16, #tpu.memory_space<vmem>>, vector<10x84xbf16>
    tpu.vector_store %arg20[%c10_406, %c0_407], %359 {strides = array<i32>} : memref<160x420xbf16, #tpu.memory_space<vmem>>, vector<10x84xbf16>,
    %c15_408 = arith.constant 15 : index
    %c0_409 = arith.constant 0 : index
    %361 = vector.load %arg19[%c15_408, %c0_409] : memref<224x84xf32, #tpu.memory_space<vmem>>, vector<10x84xf32>
    %362 = arith.truncf %361 : vector<10x84xf32> to vector<10x84xbf16>
    %c10_410 = arith.constant 10 : index
    %c84_411 = arith.constant 84 : index
    %363 = vector.load %arg20[%c10_410, %c84_411] : memref<160x420xbf16, #tpu.memory_space<vmem>>, vector<10x84xbf16>
    tpu.vector_store %arg20[%c10_410, %c84_411], %362 {strides = array<i32>} : memref<160x420xbf16, #tpu.memory_space<vmem>>, vector<10x84xbf16>,
    %c16 = arith.constant 16 : index
    %c0_412 = arith.constant 0 : index
    %364 = vector.load %arg19[%c16, %c0_412] : memref<224x84xf32, #tpu.memory_space<vmem>>, vector<10x84xf32>
    %365 = arith.truncf %364 : vector<10x84xf32> to vector<10x84xbf16>
    %c10_413 = arith.constant 10 : index
    %c168_414 = arith.constant 168 : index
    %366 = vector.load %arg20[%c10_413, %c168_414] : memref<160x420xbf16, #tpu.memory_space<vmem>>, vector<10x84xbf16>
    tpu.vector_store %arg20[%c10_413, %c168_414], %365 {strides = array<i32>} : memref<160x420xbf16, #tpu.memory_space<vmem>>, vector<10x84xbf16>,
    %c17 = arith.constant 17 : index
    %c0_415 = arith.constant 0 : index
    %367 = vector.load %arg19[%c17, %c0_415] : memref<224x84xf32, #tpu.memory_space<vmem>>, vector<10x84xf32>
    %368 = arith.truncf %367 : vector<10x84xf32> to vector<10x84xbf16>
    %c10_416 = arith.constant 10 : index
    %c252_417 = arith.constant 252 : index
    %369 = vector.load %arg20[%c10_416, %c252_417] : memref<160x420xbf16, #tpu.memory_space<vmem>>, vector<10x84xbf16>
    tpu.vector_store %arg20[%c10_416, %c252_417], %368 {strides = array<i32>} : memref<160x420xbf16, #tpu.memory_space<vmem>>, vector<10x84xbf16>,
    %c18 = arith.constant 18 : index
    %c0_418 = arith.constant 0 : index
    %370 = vector.load %arg19[%c18, %c0_418] : memref<224x84xf32, #tpu.memory_space<vmem>>, vector<10x84xf32>
    %371 = arith.truncf %370 : vector<10x84xf32> to vector<10x84xbf16>
    %c10_419 = arith.constant 10 : index
    %c336_420 = arith.constant 336 : index
    %372 = vector.load %arg20[%c10_419, %c336_420] : memref<160x420xbf16, #tpu.memory_space<vmem>>, vector<10x84xbf16>
    tpu.vector_store %arg20[%c10_419, %c336_420], %371 {strides = array<i32>} : memref<160x420xbf16, #tpu.memory_space<vmem>>, vector<10x84xbf16>,
    %c28_421 = arith.constant 28 : index
    %c0_422 = arith.constant 0 : index
    %373 = vector.load %arg19[%c28_421, %c0_422] : memref<224x84xf32, #tpu.memory_space<vmem>>, vector<10x84xf32>
    %374 = arith.truncf %373 : vector<10x84xf32> to vector<10x84xbf16>
    %c20 = arith.constant 20 : index
    %c0_423 = arith.constant 0 : index
    %375 = vector.load %arg20[%c20, %c0_423] : memref<160x420xbf16, #tpu.memory_space<vmem>>, vector<10x84xbf16>
    tpu.vector_store %arg20[%c20, %c0_423], %374 {strides = array<i32>} : memref<160x420xbf16, #tpu.memory_space<vmem>>, vector<10x84xbf16>,
    %c29 = arith.constant 29 : index
    %c0_424 = arith.constant 0 : index
    %376 = vector.load %arg19[%c29, %c0_424] : memref<224x84xf32, #tpu.memory_space<vmem>>, vector<10x84xf32>
    %377 = arith.truncf %376 : vector<10x84xf32> to vector<10x84xbf16>
    %c20_425 = arith.constant 20 : index
    %c84_426 = arith.constant 84 : index
    %378 = vector.load %arg20[%c20_425, %c84_426] : memref<160x420xbf16, #tpu.memory_space<vmem>>, vector<10x84xbf16>
    tpu.vector_store %arg20[%c20_425, %c84_426], %377 {strides = array<i32>} : memref<160x420xbf16, #tpu.memory_space<vmem>>, vector<10x84xbf16>,
    %c30 = arith.constant 30 : index
    %c0_427 = arith.constant 0 : index
    %379 = vector.load %arg19[%c30, %c0_427] : memref<224x84xf32, #tpu.memory_space<vmem>>, vector<10x84xf32>
    %380 = arith.truncf %379 : vector<10x84xf32> to vector<10x84xbf16>
    %c20_428 = arith.constant 20 : index
    %c168_429 = arith.constant 168 : index
    %381 = vector.load %arg20[%c20_428, %c168_429] : memref<160x420xbf16, #tpu.memory_space<vmem>>, vector<10x84xbf16>
    tpu.vector_store %arg20[%c20_428, %c168_429], %380 {strides = array<i32>} : memref<160x420xbf16, #tpu.memory_space<vmem>>, vector<10x84xbf16>,
    %c31 = arith.constant 31 : index
    %c0_430 = arith.constant 0 : index
    %382 = vector.load %arg19[%c31, %c0_430] : memref<224x84xf32, #tpu.memory_space<vmem>>, vector<10x84xf32>
    %383 = arith.truncf %382 : vector<10x84xf32> to vector<10x84xbf16>
    %c20_431 = arith.constant 20 : index
    %c252_432 = arith.constant 252 : index
    %384 = vector.load %arg20[%c20_431, %c252_432] : memref<160x420xbf16, #tpu.memory_space<vmem>>, vector<10x84xbf16>
    tpu.vector_store %arg20[%c20_431, %c252_432], %383 {strides = array<i32>} : memref<160x420xbf16, #tpu.memory_space<vmem>>, vector<10x84xbf16>,
    %c32 = arith.constant 32 : index
    %c0_433 = arith.constant 0 : index
    %385 = vector.load %arg19[%c32, %c0_433] : memref<224x84xf32, #tpu.memory_space<vmem>>, vector<10x84xf32>
    %386 = arith.truncf %385 : vector<10x84xf32> to vector<10x84xbf16>
    %c20_434 = arith.constant 20 : index
    %c336_435 = arith.constant 336 : index
    %387 = vector.load %arg20[%c20_434, %c336_435] : memref<160x420xbf16, #tpu.memory_space<vmem>>, vector<10x84xbf16>
    tpu.vector_store %arg20[%c20_434, %c336_435], %386 {strides = array<i32>} : memref<160x420xbf16, #tpu.memory_space<vmem>>, vector<10x84xbf16>,
    %c42 = arith.constant 42 : index
    %c0_436 = arith.constant 0 : index
    %388 = vector.load %arg19[%c42, %c0_436] : memref<224x84xf32, #tpu.memory_space<vmem>>, vector<10x84xf32>
    %389 = arith.truncf %388 : vector<10x84xf32> to vector<10x84xbf16>
    %c30_437 = arith.constant 30 : index
    %c0_438 = arith.constant 0 : index
    %390 = vector.load %arg20[%c30_437, %c0_438] : memref<160x420xbf16, #tpu.memory_space<vmem>>, vector<10x84xbf16>
    tpu.vector_store %arg20[%c30_437, %c0_438], %389 {strides = array<i32>} : memref<160x420xbf16, #tpu.memory_space<vmem>>, vector<10x84xbf16>,
    %c43 = arith.constant 43 : index
    %c0_439 = arith.constant 0 : index
    %391 = vector.load %arg19[%c43, %c0_439] : memref<224x84xf32, #tpu.memory_space<vmem>>, vector<10x84xf32>
    %392 = arith.truncf %391 : vector<10x84xf32> to vector<10x84xbf16>
    %c30_440 = arith.constant 30 : index
    %c84_441 = arith.constant 84 : index
    %393 = vector.load %arg20[%c30_440, %c84_441] : memref<160x420xbf16, #tpu.memory_space<vmem>>, vector<10x84xbf16>
    tpu.vector_store %arg20[%c30_440, %c84_441], %392 {strides = array<i32>} : memref<160x420xbf16, #tpu.memory_space<vmem>>, vector<10x84xbf16>,
    %c44 = arith.constant 44 : index
    %c0_442 = arith.constant 0 : index
    %394 = vector.load %arg19[%c44, %c0_442] : memref<224x84xf32, #tpu.memory_space<vmem>>, vector<10x84xf32>
    %395 = arith.truncf %394 : vector<10x84xf32> to vector<10x84xbf16>
    %c30_443 = arith.constant 30 : index
    %c168_444 = arith.constant 168 : index
    %396 = vector.load %arg20[%c30_443, %c168_444] : memref<160x420xbf16, #tpu.memory_space<vmem>>, vector<10x84xbf16>
    tpu.vector_store %arg20[%c30_443, %c168_444], %395 {strides = array<i32>} : memref<160x420xbf16, #tpu.memory_space<vmem>>, vector<10x84xbf16>,
    %c45 = arith.constant 45 : index
    %c0_445 = arith.constant 0 : index
    %397 = vector.load %arg19[%c45, %c0_445] : memref<224x84xf32, #tpu.memory_space<vmem>>, vector<10x84xf32>
    %398 = arith.truncf %397 : vector<10x84xf32> to vector<10x84xbf16>
    %c30_446 = arith.constant 30 : index
    %c252_447 = arith.constant 252 : index
    %399 = vector.load %arg20[%c30_446, %c252_447] : memref<160x420xbf16, #tpu.memory_space<vmem>>, vector<10x84xbf16>
    tpu.vector_store %arg20[%c30_446, %c252_447], %398 {strides = array<i32>} : memref<160x420xbf16, #tpu.memory_space<vmem>>, vector<10x84xbf16>,
    %c46 = arith.constant 46 : index
    %c0_448 = arith.constant 0 : index
    %400 = vector.load %arg19[%c46, %c0_448] : memref<224x84xf32, #tpu.memory_space<vmem>>, vector<10x84xf32>
    %401 = arith.truncf %400 : vector<10x84xf32> to vector<10x84xbf16>
    %c30_449 = arith.constant 30 : index
    %c336_450 = arith.constant 336 : index
    %402 = vector.load %arg20[%c30_449, %c336_450] : memref<160x420xbf16, #tpu.memory_space<vmem>>, vector<10x84xbf16>
    tpu.vector_store %arg20[%c30_449, %c336_450], %401 {strides = array<i32>} : memref<160x420xbf16, #tpu.memory_space<vmem>>, vector<10x84xbf16>,
    %c56_451 = arith.constant 56 : index
    %c0_452 = arith.constant 0 : index
    %403 = vector.load %arg19[%c56_451, %c0_452] : memref<224x84xf32, #tpu.memory_space<vmem>>, vector<10x84xf32>
    %404 = arith.truncf %403 : vector<10x84xf32> to vector<10x84xbf16>
    %c40 = arith.constant 40 : index
    %c0_453 = arith.constant 0 : index
    %405 = vector.load %arg20[%c40, %c0_453] : memref<160x420xbf16, #tpu.memory_space<vmem>>, vector<10x84xbf16>
    tpu.vector_store %arg20[%c40, %c0_453], %404 {strides = array<i32>} : memref<160x420xbf16, #tpu.memory_space<vmem>>, vector<10x84xbf16>,
    %c57 = arith.constant 57 : index
    %c0_454 = arith.constant 0 : index
    %406 = vector.load %arg19[%c57, %c0_454] : memref<224x84xf32, #tpu.memory_space<vmem>>, vector<10x84xf32>
    %407 = arith.truncf %406 : vector<10x84xf32> to vector<10x84xbf16>
    %c40_455 = arith.constant 40 : index
    %c84_456 = arith.constant 84 : index
    %408 = vector.load %arg20[%c40_455, %c84_456] : memref<160x420xbf16, #tpu.memory_space<vmem>>, vector<10x84xbf16>
    tpu.vector_store %arg20[%c40_455, %c84_456], %407 {strides = array<i32>} : memref<160x420xbf16, #tpu.memory_space<vmem>>, vector<10x84xbf16>,
    %c58 = arith.constant 58 : index
    %c0_457 = arith.constant 0 : index
    %409 = vector.load %arg19[%c58, %c0_457] : memref<224x84xf32, #tpu.memory_space<vmem>>, vector<10x84xf32>
    %410 = arith.truncf %409 : vector<10x84xf32> to vector<10x84xbf16>
    %c40_458 = arith.constant 40 : index
    %c168_459 = arith.constant 168 : index
    %411 = vector.load %arg20[%c40_458, %c168_459] : memref<160x420xbf16, #tpu.memory_space<vmem>>, vector<10x84xbf16>
    tpu.vector_store %arg20[%c40_458, %c168_459], %410 {strides = array<i32>} : memref<160x420xbf16, #tpu.memory_space<vmem>>, vector<10x84xbf16>,
    %c59 = arith.constant 59 : index
    %c0_460 = arith.constant 0 : index
    %412 = vector.load %arg19[%c59, %c0_460] : memref<224x84xf32, #tpu.memory_space<vmem>>, vector<10x84xf32>
    %413 = arith.truncf %412 : vector<10x84xf32> to vector<10x84xbf16>
    %c40_461 = arith.constant 40 : index
    %c252_462 = arith.constant 252 : index
    %414 = vector.load %arg20[%c40_461, %c252_462] : memref<160x420xbf16, #tpu.memory_space<vmem>>, vector<10x84xbf16>
    tpu.vector_store %arg20[%c40_461, %c252_462], %413 {strides = array<i32>} : memref<160x420xbf16, #tpu.memory_space<vmem>>, vector<10x84xbf16>,
    %c60 = arith.constant 60 : index
    %c0_463 = arith.constant 0 : index
    %415 = vector.load %arg19[%c60, %c0_463] : memref<224x84xf32, #tpu.memory_space<vmem>>, vector<10x84xf32>
    %416 = arith.truncf %415 : vector<10x84xf32> to vector<10x84xbf16>
    %c40_464 = arith.constant 40 : index
    %c336_465 = arith.constant 336 : index
    %417 = vector.load %arg20[%c40_464, %c336_465] : memref<160x420xbf16, #tpu.memory_space<vmem>>, vector<10x84xbf16>
    tpu.vector_store %arg20[%c40_464, %c336_465], %416 {strides = array<i32>} : memref<160x420xbf16, #tpu.memory_space<vmem>>, vector<10x84xbf16>,
    %c70 = arith.constant 70 : index
    %c0_466 = arith.constant 0 : index
    %418 = vector.load %arg19[%c70, %c0_466] : memref<224x84xf32, #tpu.memory_space<vmem>>, vector<10x84xf32>
    %419 = arith.truncf %418 : vector<10x84xf32> to vector<10x84xbf16>
    %c50 = arith.constant 50 : index
    %c0_467 = arith.constant 0 : index
    %420 = vector.load %arg20[%c50, %c0_467] : memref<160x420xbf16, #tpu.memory_space<vmem>>, vector<10x84xbf16>
    tpu.vector_store %arg20[%c50, %c0_467], %419 {strides = array<i32>} : memref<160x420xbf16, #tpu.memory_space<vmem>>, vector<10x84xbf16>,
    %c71 = arith.constant 71 : index
    %c0_468 = arith.constant 0 : index
    %421 = vector.load %arg19[%c71, %c0_468] : memref<224x84xf32, #tpu.memory_space<vmem>>, vector<10x84xf32>
    %422 = arith.truncf %421 : vector<10x84xf32> to vector<10x84xbf16>
    %c50_469 = arith.constant 50 : index
    %c84_470 = arith.constant 84 : index
    %423 = vector.load %arg20[%c50_469, %c84_470] : memref<160x420xbf16, #tpu.memory_space<vmem>>, vector<10x84xbf16>
    tpu.vector_store %arg20[%c50_469, %c84_470], %422 {strides = array<i32>} : memref<160x420xbf16, #tpu.memory_space<vmem>>, vector<10x84xbf16>,
    %c72 = arith.constant 72 : index
    %c0_471 = arith.constant 0 : index
    %424 = vector.load %arg19[%c72, %c0_471] : memref<224x84xf32, #tpu.memory_space<vmem>>, vector<10x84xf32>
    %425 = arith.truncf %424 : vector<10x84xf32> to vector<10x84xbf16>
    %c50_472 = arith.constant 50 : index
    %c168_473 = arith.constant 168 : index
    %426 = vector.load %arg20[%c50_472, %c168_473] : memref<160x420xbf16, #tpu.memory_space<vmem>>, vector<10x84xbf16>
    tpu.vector_store %arg20[%c50_472, %c168_473], %425 {strides = array<i32>} : memref<160x420xbf16, #tpu.memory_space<vmem>>, vector<10x84xbf16>,
    %c73 = arith.constant 73 : index
    %c0_474 = arith.constant 0 : index
    %427 = vector.load %arg19[%c73, %c0_474] : memref<224x84xf32, #tpu.memory_space<vmem>>, vector<10x84xf32>
    %428 = arith.truncf %427 : vector<10x84xf32> to vector<10x84xbf16>
    %c50_475 = arith.constant 50 : index
    %c252_476 = arith.constant 252 : index
    %429 = vector.load %arg20[%c50_475, %c252_476] : memref<160x420xbf16, #tpu.memory_space<vmem>>, vector<10x84xbf16>
    tpu.vector_store %arg20[%c50_475, %c252_476], %428 {strides = array<i32>} : memref<160x420xbf16, #tpu.memory_space<vmem>>, vector<10x84xbf16>,
    %c74 = arith.constant 74 : index
    %c0_477 = arith.constant 0 : index
    %430 = vector.load %arg19[%c74, %c0_477] : memref<224x84xf32, #tpu.memory_space<vmem>>, vector<10x84xf32>
    %431 = arith.truncf %430 : vector<10x84xf32> to vector<10x84xbf16>
    %c50_478 = arith.constant 50 : index
    %c336_479 = arith.constant 336 : index
    %432 = vector.load %arg20[%c50_478, %c336_479] : memref<160x420xbf16, #tpu.memory_space<vmem>>, vector<10x84xbf16>
    tpu.vector_store %arg20[%c50_478, %c336_479], %431 {strides = array<i32>} : memref<160x420xbf16, #tpu.memory_space<vmem>>, vector<10x84xbf16>,
    %c84_480 = arith.constant 84 : index
    %c0_481 = arith.constant 0 : index
    %433 = vector.load %arg19[%c84_480, %c0_481] : memref<224x84xf32, #tpu.memory_space<vmem>>, vector<10x84xf32>
    %434 = arith.truncf %433 : vector<10x84xf32> to vector<10x84xbf16>
    %c60_482 = arith.constant 60 : index
    %c0_483 = arith.constant 0 : index
    %435 = vector.load %arg20[%c60_482, %c0_483] : memref<160x420xbf16, #tpu.memory_space<vmem>>, vector<10x84xbf16>
    tpu.vector_store %arg20[%c60_482, %c0_483], %434 {strides = array<i32>} : memref<160x420xbf16, #tpu.memory_space<vmem>>, vector<10x84xbf16>,
    %c85 = arith.constant 85 : index
    %c0_484 = arith.constant 0 : index
    %436 = vector.load %arg19[%c85, %c0_484] : memref<224x84xf32, #tpu.memory_space<vmem>>, vector<10x84xf32>
    %437 = arith.truncf %436 : vector<10x84xf32> to vector<10x84xbf16>
    %c60_485 = arith.constant 60 : index
    %c84_486 = arith.constant 84 : index
    %438 = vector.load %arg20[%c60_485, %c84_486] : memref<160x420xbf16, #tpu.memory_space<vmem>>, vector<10x84xbf16>
    tpu.vector_store %arg20[%c60_485, %c84_486], %437 {strides = array<i32>} : memref<160x420xbf16, #tpu.memory_space<vmem>>, vector<10x84xbf16>,
    %c86 = arith.constant 86 : index
    %c0_487 = arith.constant 0 : index
    %439 = vector.load %arg19[%c86, %c0_487] : memref<224x84xf32, #tpu.memory_space<vmem>>, vector<10x84xf32>
    %440 = arith.truncf %439 : vector<10x84xf32> to vector<10x84xbf16>
    %c60_488 = arith.constant 60 : index
    %c168_489 = arith.constant 168 : index
    %441 = vector.load %arg20[%c60_488, %c168_489] : memref<160x420xbf16, #tpu.memory_space<vmem>>, vector<10x84xbf16>
    tpu.vector_store %arg20[%c60_488, %c168_489], %440 {strides = array<i32>} : memref<160x420xbf16, #tpu.memory_space<vmem>>, vector<10x84xbf16>,
    %c87 = arith.constant 87 : index
    %c0_490 = arith.constant 0 : index
    %442 = vector.load %arg19[%c87, %c0_490] : memref<224x84xf32, #tpu.memory_space<vmem>>, vector<10x84xf32>
    %443 = arith.truncf %442 : vector<10x84xf32> to vector<10x84xbf16>
    %c60_491 = arith.constant 60 : index
    %c252_492 = arith.constant 252 : index
    %444 = vector.load %arg20[%c60_491, %c252_492] : memref<160x420xbf16, #tpu.memory_space<vmem>>, vector<10x84xbf16>
    tpu.vector_store %arg20[%c60_491, %c252_492], %443 {strides = array<i32>} : memref<160x420xbf16, #tpu.memory_space<vmem>>, vector<10x84xbf16>,
    %c88 = arith.constant 88 : index
    %c0_493 = arith.constant 0 : index
    %445 = vector.load %arg19[%c88, %c0_493] : memref<224x84xf32, #tpu.memory_space<vmem>>, vector<10x84xf32>
    %446 = arith.truncf %445 : vector<10x84xf32> to vector<10x84xbf16>
    %c60_494 = arith.constant 60 : index
    %c336_495 = arith.constant 336 : index
    %447 = vector.load %arg20[%c60_494, %c336_495] : memref<160x420xbf16, #tpu.memory_space<vmem>>, vector<10x84xbf16>
    tpu.vector_store %arg20[%c60_494, %c336_495], %446 {strides = array<i32>} : memref<160x420xbf16, #tpu.memory_space<vmem>>, vector<10x84xbf16>,
    %c98 = arith.constant 98 : index
    %c0_496 = arith.constant 0 : index
    %448 = vector.load %arg19[%c98, %c0_496] : memref<224x84xf32, #tpu.memory_space<vmem>>, vector<10x84xf32>
    %449 = arith.truncf %448 : vector<10x84xf32> to vector<10x84xbf16>
    %c70_497 = arith.constant 70 : index
    %c0_498 = arith.constant 0 : index
    %450 = vector.load %arg20[%c70_497, %c0_498] : memref<160x420xbf16, #tpu.memory_space<vmem>>, vector<10x84xbf16>
    tpu.vector_store %arg20[%c70_497, %c0_498], %449 {strides = array<i32>} : memref<160x420xbf16, #tpu.memory_space<vmem>>, vector<10x84xbf16>,
    %c99 = arith.constant 99 : index
    %c0_499 = arith.constant 0 : index
    %451 = vector.load %arg19[%c99, %c0_499] : memref<224x84xf32, #tpu.memory_space<vmem>>, vector<10x84xf32>
    %452 = arith.truncf %451 : vector<10x84xf32> to vector<10x84xbf16>
    %c70_500 = arith.constant 70 : index
    %c84_501 = arith.constant 84 : index
    %453 = vector.load %arg20[%c70_500, %c84_501] : memref<160x420xbf16, #tpu.memory_space<vmem>>, vector<10x84xbf16>
    tpu.vector_store %arg20[%c70_500, %c84_501], %452 {strides = array<i32>} : memref<160x420xbf16, #tpu.memory_space<vmem>>, vector<10x84xbf16>,
    %c100 = arith.constant 100 : index
    %c0_502 = arith.constant 0 : index
    %454 = vector.load %arg19[%c100, %c0_502] : memref<224x84xf32, #tpu.memory_space<vmem>>, vector<10x84xf32>
    %455 = arith.truncf %454 : vector<10x84xf32> to vector<10x84xbf16>
    %c70_503 = arith.constant 70 : index
    %c168_504 = arith.constant 168 : index
    %456 = vector.load %arg20[%c70_503, %c168_504] : memref<160x420xbf16, #tpu.memory_space<vmem>>, vector<10x84xbf16>
    tpu.vector_store %arg20[%c70_503, %c168_504], %455 {strides = array<i32>} : memref<160x420xbf16, #tpu.memory_space<vmem>>, vector<10x84xbf16>,
    %c101 = arith.constant 101 : index
    %c0_505 = arith.constant 0 : index
    %457 = vector.load %arg19[%c101, %c0_505] : memref<224x84xf32, #tpu.memory_space<vmem>>, vector<10x84xf32>
    %458 = arith.truncf %457 : vector<10x84xf32> to vector<10x84xbf16>
    %c70_506 = arith.constant 70 : index
    %c252_507 = arith.constant 252 : index
    %459 = vector.load %arg20[%c70_506, %c252_507] : memref<160x420xbf16, #tpu.memory_space<vmem>>, vector<10x84xbf16>
    tpu.vector_store %arg20[%c70_506, %c252_507], %458 {strides = array<i32>} : memref<160x420xbf16, #tpu.memory_space<vmem>>, vector<10x84xbf16>,
    %c102 = arith.constant 102 : index
    %c0_508 = arith.constant 0 : index
    %460 = vector.load %arg19[%c102, %c0_508] : memref<224x84xf32, #tpu.memory_space<vmem>>, vector<10x84xf32>
    %461 = arith.truncf %460 : vector<10x84xf32> to vector<10x84xbf16>
    %c70_509 = arith.constant 70 : index
    %c336_510 = arith.constant 336 : index
    %462 = vector.load %arg20[%c70_509, %c336_510] : memref<160x420xbf16, #tpu.memory_space<vmem>>, vector<10x84xbf16>
    tpu.vector_store %arg20[%c70_509, %c336_510], %461 {strides = array<i32>} : memref<160x420xbf16, #tpu.memory_space<vmem>>, vector<10x84xbf16>,
    %c112_511 = arith.constant 112 : index
    %c0_512 = arith.constant 0 : index
    %463 = vector.load %arg19[%c112_511, %c0_512] : memref<224x84xf32, #tpu.memory_space<vmem>>, vector<10x84xf32>
    %464 = arith.truncf %463 : vector<10x84xf32> to vector<10x84xbf16>
    %c80 = arith.constant 80 : index
    %c0_513 = arith.constant 0 : index
    %465 = vector.load %arg20[%c80, %c0_513] : memref<160x420xbf16, #tpu.memory_space<vmem>>, vector<10x84xbf16>
    tpu.vector_store %arg20[%c80, %c0_513], %464 {strides = array<i32>} : memref<160x420xbf16, #tpu.memory_space<vmem>>, vector<10x84xbf16>,
    %c113 = arith.constant 113 : index
    %c0_514 = arith.constant 0 : index
    %466 = vector.load %arg19[%c113, %c0_514] : memref<224x84xf32, #tpu.memory_space<vmem>>, vector<10x84xf32>
    %467 = arith.truncf %466 : vector<10x84xf32> to vector<10x84xbf16>
    %c80_515 = arith.constant 80 : index
    %c84_516 = arith.constant 84 : index
    %468 = vector.load %arg20[%c80_515, %c84_516] : memref<160x420xbf16, #tpu.memory_space<vmem>>, vector<10x84xbf16>
    tpu.vector_store %arg20[%c80_515, %c84_516], %467 {strides = array<i32>} : memref<160x420xbf16, #tpu.memory_space<vmem>>, vector<10x84xbf16>,
    %c114 = arith.constant 114 : index
    %c0_517 = arith.constant 0 : index
    %469 = vector.load %arg19[%c114, %c0_517] : memref<224x84xf32, #tpu.memory_space<vmem>>, vector<10x84xf32>
    %470 = arith.truncf %469 : vector<10x84xf32> to vector<10x84xbf16>
    %c80_518 = arith.constant 80 : index
    %c168_519 = arith.constant 168 : index
    %471 = vector.load %arg20[%c80_518, %c168_519] : memref<160x420xbf16, #tpu.memory_space<vmem>>, vector<10x84xbf16>
    tpu.vector_store %arg20[%c80_518, %c168_519], %470 {strides = array<i32>} : memref<160x420xbf16, #tpu.memory_space<vmem>>, vector<10x84xbf16>,
    %c115 = arith.constant 115 : index
    %c0_520 = arith.constant 0 : index
    %472 = vector.load %arg19[%c115, %c0_520] : memref<224x84xf32, #tpu.memory_space<vmem>>, vector<10x84xf32>
    %473 = arith.truncf %472 : vector<10x84xf32> to vector<10x84xbf16>
    %c80_521 = arith.constant 80 : index
    %c252_522 = arith.constant 252 : index
    %474 = vector.load %arg20[%c80_521, %c252_522] : memref<160x420xbf16, #tpu.memory_space<vmem>>, vector<10x84xbf16>
    tpu.vector_store %arg20[%c80_521, %c252_522], %473 {strides = array<i32>} : memref<160x420xbf16, #tpu.memory_space<vmem>>, vector<10x84xbf16>,
    %c116 = arith.constant 116 : index
    %c0_523 = arith.constant 0 : index
    %475 = vector.load %arg19[%c116, %c0_523] : memref<224x84xf32, #tpu.memory_space<vmem>>, vector<10x84xf32>
    %476 = arith.truncf %475 : vector<10x84xf32> to vector<10x84xbf16>
    %c80_524 = arith.constant 80 : index
    %c336_525 = arith.constant 336 : index
    %477 = vector.load %arg20[%c80_524, %c336_525] : memref<160x420xbf16, #tpu.memory_space<vmem>>, vector<10x84xbf16>
    tpu.vector_store %arg20[%c80_524, %c336_525], %476 {strides = array<i32>} : memref<160x420xbf16, #tpu.memory_space<vmem>>, vector<10x84xbf16>,
    %c126 = arith.constant 126 : index
    %c0_526 = arith.constant 0 : index
    %478 = vector.load %arg19[%c126, %c0_526] : memref<224x84xf32, #tpu.memory_space<vmem>>, vector<10x84xf32>
    %479 = arith.truncf %478 : vector<10x84xf32> to vector<10x84xbf16>
    %c90 = arith.constant 90 : index
    %c0_527 = arith.constant 0 : index
    %480 = vector.load %arg20[%c90, %c0_527] : memref<160x420xbf16, #tpu.memory_space<vmem>>, vector<10x84xbf16>
    tpu.vector_store %arg20[%c90, %c0_527], %479 {strides = array<i32>} : memref<160x420xbf16, #tpu.memory_space<vmem>>, vector<10x84xbf16>,
    %c127 = arith.constant 127 : index
    %c0_528 = arith.constant 0 : index
    %481 = vector.load %arg19[%c127, %c0_528] : memref<224x84xf32, #tpu.memory_space<vmem>>, vector<10x84xf32>
    %482 = arith.truncf %481 : vector<10x84xf32> to vector<10x84xbf16>
    %c90_529 = arith.constant 90 : index
    %c84_530 = arith.constant 84 : index
    %483 = vector.load %arg20[%c90_529, %c84_530] : memref<160x420xbf16, #tpu.memory_space<vmem>>, vector<10x84xbf16>
    tpu.vector_store %arg20[%c90_529, %c84_530], %482 {strides = array<i32>} : memref<160x420xbf16, #tpu.memory_space<vmem>>, vector<10x84xbf16>,
    %c128 = arith.constant 128 : index
    %c0_531 = arith.constant 0 : index
    %484 = vector.load %arg19[%c128, %c0_531] : memref<224x84xf32, #tpu.memory_space<vmem>>, vector<10x84xf32>
    %485 = arith.truncf %484 : vector<10x84xf32> to vector<10x84xbf16>
    %c90_532 = arith.constant 90 : index
    %c168_533 = arith.constant 168 : index
    %486 = vector.load %arg20[%c90_532, %c168_533] : memref<160x420xbf16, #tpu.memory_space<vmem>>, vector<10x84xbf16>
    tpu.vector_store %arg20[%c90_532, %c168_533], %485 {strides = array<i32>} : memref<160x420xbf16, #tpu.memory_space<vmem>>, vector<10x84xbf16>,
    %c129 = arith.constant 129 : index
    %c0_534 = arith.constant 0 : index
    %487 = vector.load %arg19[%c129, %c0_534] : memref<224x84xf32, #tpu.memory_space<vmem>>, vector<10x84xf32>
    %488 = arith.truncf %487 : vector<10x84xf32> to vector<10x84xbf16>
    %c90_535 = arith.constant 90 : index
    %c252_536 = arith.constant 252 : index
    %489 = vector.load %arg20[%c90_535, %c252_536] : memref<160x420xbf16, #tpu.memory_space<vmem>>, vector<10x84xbf16>
    tpu.vector_store %arg20[%c90_535, %c252_536], %488 {strides = array<i32>} : memref<160x420xbf16, #tpu.memory_space<vmem>>, vector<10x84xbf16>,
    %c130 = arith.constant 130 : index
    %c0_537 = arith.constant 0 : index
    %490 = vector.load %arg19[%c130, %c0_537] : memref<224x84xf32, #tpu.memory_space<vmem>>, vector<10x84xf32>
    %491 = arith.truncf %490 : vector<10x84xf32> to vector<10x84xbf16>
    %c90_538 = arith.constant 90 : index
    %c336_539 = arith.constant 336 : index
    %492 = vector.load %arg20[%c90_538, %c336_539] : memref<160x420xbf16, #tpu.memory_space<vmem>>, vector<10x84xbf16>
    tpu.vector_store %arg20[%c90_538, %c336_539], %491 {strides = array<i32>} : memref<160x420xbf16, #tpu.memory_space<vmem>>, vector<10x84xbf16>,
    %c140_540 = arith.constant 140 : index
    %c0_541 = arith.constant 0 : index
    %493 = vector.load %arg19[%c140_540, %c0_541] : memref<224x84xf32, #tpu.memory_space<vmem>>, vector<10x84xf32>
    %494 = arith.truncf %493 : vector<10x84xf32> to vector<10x84xbf16>
    %c100_542 = arith.constant 100 : index
    %c0_543 = arith.constant 0 : index
    %495 = vector.load %arg20[%c100_542, %c0_543] : memref<160x420xbf16, #tpu.memory_space<vmem>>, vector<10x84xbf16>
    tpu.vector_store %arg20[%c100_542, %c0_543], %494 {strides = array<i32>} : memref<160x420xbf16, #tpu.memory_space<vmem>>, vector<10x84xbf16>,
    %c141 = arith.constant 141 : index
    %c0_544 = arith.constant 0 : index
    %496 = vector.load %arg19[%c141, %c0_544] : memref<224x84xf32, #tpu.memory_space<vmem>>, vector<10x84xf32>
    %497 = arith.truncf %496 : vector<10x84xf32> to vector<10x84xbf16>
    %c100_545 = arith.constant 100 : index
    %c84_546 = arith.constant 84 : index
    %498 = vector.load %arg20[%c100_545, %c84_546] : memref<160x420xbf16, #tpu.memory_space<vmem>>, vector<10x84xbf16>
    tpu.vector_store %arg20[%c100_545, %c84_546], %497 {strides = array<i32>} : memref<160x420xbf16, #tpu.memory_space<vmem>>, vector<10x84xbf16>,
    %c142 = arith.constant 142 : index
    %c0_547 = arith.constant 0 : index
    %499 = vector.load %arg19[%c142, %c0_547] : memref<224x84xf32, #tpu.memory_space<vmem>>, vector<10x84xf32>
    %500 = arith.truncf %499 : vector<10x84xf32> to vector<10x84xbf16>
    %c100_548 = arith.constant 100 : index
    %c168_549 = arith.constant 168 : index
    %501 = vector.load %arg20[%c100_548, %c168_549] : memref<160x420xbf16, #tpu.memory_space<vmem>>, vector<10x84xbf16>
    tpu.vector_store %arg20[%c100_548, %c168_549], %500 {strides = array<i32>} : memref<160x420xbf16, #tpu.memory_space<vmem>>, vector<10x84xbf16>,
    %c143 = arith.constant 143 : index
    %c0_550 = arith.constant 0 : index
    %502 = vector.load %arg19[%c143, %c0_550] : memref<224x84xf32, #tpu.memory_space<vmem>>, vector<10x84xf32>
    %503 = arith.truncf %502 : vector<10x84xf32> to vector<10x84xbf16>
    %c100_551 = arith.constant 100 : index
    %c252_552 = arith.constant 252 : index
    %504 = vector.load %arg20[%c100_551, %c252_552] : memref<160x420xbf16, #tpu.memory_space<vmem>>, vector<10x84xbf16>
    tpu.vector_store %arg20[%c100_551, %c252_552], %503 {strides = array<i32>} : memref<160x420xbf16, #tpu.memory_space<vmem>>, vector<10x84xbf16>,
    %c144 = arith.constant 144 : index
    %c0_553 = arith.constant 0 : index
    %505 = vector.load %arg19[%c144, %c0_553] : memref<224x84xf32, #tpu.memory_space<vmem>>, vector<10x84xf32>
    %506 = arith.truncf %505 : vector<10x84xf32> to vector<10x84xbf16>
    %c100_554 = arith.constant 100 : index
    %c336_555 = arith.constant 336 : index
    %507 = vector.load %arg20[%c100_554, %c336_555] : memref<160x420xbf16, #tpu.memory_space<vmem>>, vector<10x84xbf16>
    tpu.vector_store %arg20[%c100_554, %c336_555], %506 {strides = array<i32>} : memref<160x420xbf16, #tpu.memory_space<vmem>>, vector<10x84xbf16>,
    %c154 = arith.constant 154 : index
    %c0_556 = arith.constant 0 : index
    %508 = vector.load %arg19[%c154, %c0_556] : memref<224x84xf32, #tpu.memory_space<vmem>>, vector<10x84xf32>
    %509 = arith.truncf %508 : vector<10x84xf32> to vector<10x84xbf16>
    %c110 = arith.constant 110 : index
    %c0_557 = arith.constant 0 : index
    %510 = vector.load %arg20[%c110, %c0_557] : memref<160x420xbf16, #tpu.memory_space<vmem>>, vector<10x84xbf16>
    tpu.vector_store %arg20[%c110, %c0_557], %509 {strides = array<i32>} : memref<160x420xbf16, #tpu.memory_space<vmem>>, vector<10x84xbf16>,
    %c155 = arith.constant 155 : index
    %c0_558 = arith.constant 0 : index
    %511 = vector.load %arg19[%c155, %c0_558] : memref<224x84xf32, #tpu.memory_space<vmem>>, vector<10x84xf32>
    %512 = arith.truncf %511 : vector<10x84xf32> to vector<10x84xbf16>
    %c110_559 = arith.constant 110 : index
    %c84_560 = arith.constant 84 : index
    %513 = vector.load %arg20[%c110_559, %c84_560] : memref<160x420xbf16, #tpu.memory_space<vmem>>, vector<10x84xbf16>
    tpu.vector_store %arg20[%c110_559, %c84_560], %512 {strides = array<i32>} : memref<160x420xbf16, #tpu.memory_space<vmem>>, vector<10x84xbf16>,
    %c156 = arith.constant 156 : index
    %c0_561 = arith.constant 0 : index
    %514 = vector.load %arg19[%c156, %c0_561] : memref<224x84xf32, #tpu.memory_space<vmem>>, vector<10x84xf32>
    %515 = arith.truncf %514 : vector<10x84xf32> to vector<10x84xbf16>
    %c110_562 = arith.constant 110 : index
    %c168_563 = arith.constant 168 : index
    %516 = vector.load %arg20[%c110_562, %c168_563] : memref<160x420xbf16, #tpu.memory_space<vmem>>, vector<10x84xbf16>
    tpu.vector_store %arg20[%c110_562, %c168_563], %515 {strides = array<i32>} : memref<160x420xbf16, #tpu.memory_space<vmem>>, vector<10x84xbf16>,
    %c157 = arith.constant 157 : index
    %c0_564 = arith.constant 0 : index
    %517 = vector.load %arg19[%c157, %c0_564] : memref<224x84xf32, #tpu.memory_space<vmem>>, vector<10x84xf32>
    %518 = arith.truncf %517 : vector<10x84xf32> to vector<10x84xbf16>
    %c110_565 = arith.constant 110 : index
    %c252_566 = arith.constant 252 : index
    %519 = vector.load %arg20[%c110_565, %c252_566] : memref<160x420xbf16, #tpu.memory_space<vmem>>, vector<10x84xbf16>
    tpu.vector_store %arg20[%c110_565, %c252_566], %518 {strides = array<i32>} : memref<160x420xbf16, #tpu.memory_space<vmem>>, vector<10x84xbf16>,
    %c158 = arith.constant 158 : index
    %c0_567 = arith.constant 0 : index
    %520 = vector.load %arg19[%c158, %c0_567] : memref<224x84xf32, #tpu.memory_space<vmem>>, vector<10x84xf32>
    %521 = arith.truncf %520 : vector<10x84xf32> to vector<10x84xbf16>
    %c110_568 = arith.constant 110 : index
    %c336_569 = arith.constant 336 : index
    %522 = vector.load %arg20[%c110_568, %c336_569] : memref<160x420xbf16, #tpu.memory_space<vmem>>, vector<10x84xbf16>
    tpu.vector_store %arg20[%c110_568, %c336_569], %521 {strides = array<i32>} : memref<160x420xbf16, #tpu.memory_space<vmem>>, vector<10x84xbf16>,
    %c168_570 = arith.constant 168 : index
    %c0_571 = arith.constant 0 : index
    %523 = vector.load %arg19[%c168_570, %c0_571] : memref<224x84xf32, #tpu.memory_space<vmem>>, vector<10x84xf32>
    %524 = arith.truncf %523 : vector<10x84xf32> to vector<10x84xbf16>
    %c120 = arith.constant 120 : index
    %c0_572 = arith.constant 0 : index
    %525 = vector.load %arg20[%c120, %c0_572] : memref<160x420xbf16, #tpu.memory_space<vmem>>, vector<10x84xbf16>
    tpu.vector_store %arg20[%c120, %c0_572], %524 {strides = array<i32>} : memref<160x420xbf16, #tpu.memory_space<vmem>>, vector<10x84xbf16>,
    %c169 = arith.constant 169 : index
    %c0_573 = arith.constant 0 : index
    %526 = vector.load %arg19[%c169, %c0_573] : memref<224x84xf32, #tpu.memory_space<vmem>>, vector<10x84xf32>
    %527 = arith.truncf %526 : vector<10x84xf32> to vector<10x84xbf16>
    %c120_574 = arith.constant 120 : index
    %c84_575 = arith.constant 84 : index
    %528 = vector.load %arg20[%c120_574, %c84_575] : memref<160x420xbf16, #tpu.memory_space<vmem>>, vector<10x84xbf16>
    tpu.vector_store %arg20[%c120_574, %c84_575], %527 {strides = array<i32>} : memref<160x420xbf16, #tpu.memory_space<vmem>>, vector<10x84xbf16>,
    %c170 = arith.constant 170 : index
    %c0_576 = arith.constant 0 : index
    %529 = vector.load %arg19[%c170, %c0_576] : memref<224x84xf32, #tpu.memory_space<vmem>>, vector<10x84xf32>
    %530 = arith.truncf %529 : vector<10x84xf32> to vector<10x84xbf16>
    %c120_577 = arith.constant 120 : index
    %c168_578 = arith.constant 168 : index
    %531 = vector.load %arg20[%c120_577, %c168_578] : memref<160x420xbf16, #tpu.memory_space<vmem>>, vector<10x84xbf16>
    tpu.vector_store %arg20[%c120_577, %c168_578], %530 {strides = array<i32>} : memref<160x420xbf16, #tpu.memory_space<vmem>>, vector<10x84xbf16>,
    %c171 = arith.constant 171 : index
    %c0_579 = arith.constant 0 : index
    %532 = vector.load %arg19[%c171, %c0_579] : memref<224x84xf32, #tpu.memory_space<vmem>>, vector<10x84xf32>
    %533 = arith.truncf %532 : vector<10x84xf32> to vector<10x84xbf16>
    %c120_580 = arith.constant 120 : index
    %c252_581 = arith.constant 252 : index
    %534 = vector.load %arg20[%c120_580, %c252_581] : memref<160x420xbf16, #tpu.memory_space<vmem>>, vector<10x84xbf16>
    tpu.vector_store %arg20[%c120_580, %c252_581], %533 {strides = array<i32>} : memref<160x420xbf16, #tpu.memory_space<vmem>>, vector<10x84xbf16>,
    %c172 = arith.constant 172 : index
    %c0_582 = arith.constant 0 : index
    %535 = vector.load %arg19[%c172, %c0_582] : memref<224x84xf32, #tpu.memory_space<vmem>>, vector<10x84xf32>
    %536 = arith.truncf %535 : vector<10x84xf32> to vector<10x84xbf16>
    %c120_583 = arith.constant 120 : index
    %c336_584 = arith.constant 336 : index
    %537 = vector.load %arg20[%c120_583, %c336_584] : memref<160x420xbf16, #tpu.memory_space<vmem>>, vector<10x84xbf16>
    tpu.vector_store %arg20[%c120_583, %c336_584], %536 {strides = array<i32>} : memref<160x420xbf16, #tpu.memory_space<vmem>>, vector<10x84xbf16>,
    %c182 = arith.constant 182 : index
    %c0_585 = arith.constant 0 : index
    %538 = vector.load %arg19[%c182, %c0_585] : memref<224x84xf32, #tpu.memory_space<vmem>>, vector<10x84xf32>
    %539 = arith.truncf %538 : vector<10x84xf32> to vector<10x84xbf16>
    %c130_586 = arith.constant 130 : index
    %c0_587 = arith.constant 0 : index
    %540 = vector.load %arg20[%c130_586, %c0_587] : memref<160x420xbf16, #tpu.memory_space<vmem>>, vector<10x84xbf16>
    tpu.vector_store %arg20[%c130_586, %c0_587], %539 {strides = array<i32>} : memref<160x420xbf16, #tpu.memory_space<vmem>>, vector<10x84xbf16>,
    %c183 = arith.constant 183 : index
    %c0_588 = arith.constant 0 : index
    %541 = vector.load %arg19[%c183, %c0_588] : memref<224x84xf32, #tpu.memory_space<vmem>>, vector<10x84xf32>
    %542 = arith.truncf %541 : vector<10x84xf32> to vector<10x84xbf16>
    %c130_589 = arith.constant 130 : index
    %c84_590 = arith.constant 84 : index
    %543 = vector.load %arg20[%c130_589, %c84_590] : memref<160x420xbf16, #tpu.memory_space<vmem>>, vector<10x84xbf16>
    tpu.vector_store %arg20[%c130_589, %c84_590], %542 {strides = array<i32>} : memref<160x420xbf16, #tpu.memory_space<vmem>>, vector<10x84xbf16>,
    %c184 = arith.constant 184 : index
    %c0_591 = arith.constant 0 : index
    %544 = vector.load %arg19[%c184, %c0_591] : memref<224x84xf32, #tpu.memory_space<vmem>>, vector<10x84xf32>
    %545 = arith.truncf %544 : vector<10x84xf32> to vector<10x84xbf16>
    %c130_592 = arith.constant 130 : index
    %c168_593 = arith.constant 168 : index
    %546 = vector.load %arg20[%c130_592, %c168_593] : memref<160x420xbf16, #tpu.memory_space<vmem>>, vector<10x84xbf16>
    tpu.vector_store %arg20[%c130_592, %c168_593], %545 {strides = array<i32>} : memref<160x420xbf16, #tpu.memory_space<vmem>>, vector<10x84xbf16>,
    %c185 = arith.constant 185 : index
    %c0_594 = arith.constant 0 : index
    %547 = vector.load %arg19[%c185, %c0_594] : memref<224x84xf32, #tpu.memory_space<vmem>>, vector<10x84xf32>
    %548 = arith.truncf %547 : vector<10x84xf32> to vector<10x84xbf16>
    %c130_595 = arith.constant 130 : index
    %c252_596 = arith.constant 252 : index
    %549 = vector.load %arg20[%c130_595, %c252_596] : memref<160x420xbf16, #tpu.memory_space<vmem>>, vector<10x84xbf16>
    tpu.vector_store %arg20[%c130_595, %c252_596], %548 {strides = array<i32>} : memref<160x420xbf16, #tpu.memory_space<vmem>>, vector<10x84xbf16>,
    %c186 = arith.constant 186 : index
    %c0_597 = arith.constant 0 : index
    %550 = vector.load %arg19[%c186, %c0_597] : memref<224x84xf32, #tpu.memory_space<vmem>>, vector<10x84xf32>
    %551 = arith.truncf %550 : vector<10x84xf32> to vector<10x84xbf16>
    %c130_598 = arith.constant 130 : index
    %c336_599 = arith.constant 336 : index
    %552 = vector.load %arg20[%c130_598, %c336_599] : memref<160x420xbf16, #tpu.memory_space<vmem>>, vector<10x84xbf16>
    tpu.vector_store %arg20[%c130_598, %c336_599], %551 {strides = array<i32>} : memref<160x420xbf16, #tpu.memory_space<vmem>>, vector<10x84xbf16>,
    %c196_600 = arith.constant 196 : index
    %c0_601 = arith.constant 0 : index
    %553 = vector.load %arg19[%c196_600, %c0_601] : memref<224x84xf32, #tpu.memory_space<vmem>>, vector<10x84xf32>
    %554 = arith.truncf %553 : vector<10x84xf32> to vector<10x84xbf16>
    %c140_602 = arith.constant 140 : index
    %c0_603 = arith.constant 0 : index
    %555 = vector.load %arg20[%c140_602, %c0_603] : memref<160x420xbf16, #tpu.memory_space<vmem>>, vector<10x84xbf16>
    tpu.vector_store %arg20[%c140_602, %c0_603], %554 {strides = array<i32>} : memref<160x420xbf16, #tpu.memory_space<vmem>>, vector<10x84xbf16>,
    %c197 = arith.constant 197 : index
    %c0_604 = arith.constant 0 : index
    %556 = vector.load %arg19[%c197, %c0_604] : memref<224x84xf32, #tpu.memory_space<vmem>>, vector<10x84xf32>
    %557 = arith.truncf %556 : vector<10x84xf32> to vector<10x84xbf16>
    %c140_605 = arith.constant 140 : index
    %c84_606 = arith.constant 84 : index
    %558 = vector.load %arg20[%c140_605, %c84_606] : memref<160x420xbf16, #tpu.memory_space<vmem>>, vector<10x84xbf16>
    tpu.vector_store %arg20[%c140_605, %c84_606], %557 {strides = array<i32>} : memref<160x420xbf16, #tpu.memory_space<vmem>>, vector<10x84xbf16>,
    %c198 = arith.constant 198 : index
    %c0_607 = arith.constant 0 : index
    %559 = vector.load %arg19[%c198, %c0_607] : memref<224x84xf32, #tpu.memory_space<vmem>>, vector<10x84xf32>
    %560 = arith.truncf %559 : vector<10x84xf32> to vector<10x84xbf16>
    %c140_608 = arith.constant 140 : index
    %c168_609 = arith.constant 168 : index
    %561 = vector.load %arg20[%c140_608, %c168_609] : memref<160x420xbf16, #tpu.memory_space<vmem>>, vector<10x84xbf16>
    tpu.vector_store %arg20[%c140_608, %c168_609], %560 {strides = array<i32>} : memref<160x420xbf16, #tpu.memory_space<vmem>>, vector<10x84xbf16>,
    %c199 = arith.constant 199 : index
    %c0_610 = arith.constant 0 : index
    %562 = vector.load %arg19[%c199, %c0_610] : memref<224x84xf32, #tpu.memory_space<vmem>>, vector<10x84xf32>
    %563 = arith.truncf %562 : vector<10x84xf32> to vector<10x84xbf16>
    %c140_611 = arith.constant 140 : index
    %c252_612 = arith.constant 252 : index
    %564 = vector.load %arg20[%c140_611, %c252_612] : memref<160x420xbf16, #tpu.memory_space<vmem>>, vector<10x84xbf16>
    tpu.vector_store %arg20[%c140_611, %c252_612], %563 {strides = array<i32>} : memref<160x420xbf16, #tpu.memory_space<vmem>>, vector<10x84xbf16>,
    %c200 = arith.constant 200 : index
    %c0_613 = arith.constant 0 : index
    %565 = vector.load %arg19[%c200, %c0_613] : memref<224x84xf32, #tpu.memory_space<vmem>>, vector<10x84xf32>
    %566 = arith.truncf %565 : vector<10x84xf32> to vector<10x84xbf16>
    %c140_614 = arith.constant 140 : index
    %c336_615 = arith.constant 336 : index
    %567 = vector.load %arg20[%c140_614, %c336_615] : memref<160x420xbf16, #tpu.memory_space<vmem>>, vector<10x84xbf16>
    tpu.vector_store %arg20[%c140_614, %c336_615], %566 {strides = array<i32>} : memref<160x420xbf16, #tpu.memory_space<vmem>>, vector<10x84xbf16>,
    %c210 = arith.constant 210 : index
    %c0_616 = arith.constant 0 : index
    %568 = vector.load %arg19[%c210, %c0_616] : memref<224x84xf32, #tpu.memory_space<vmem>>, vector<10x84xf32>
    %569 = arith.truncf %568 : vector<10x84xf32> to vector<10x84xbf16>
    %c150 = arith.constant 150 : index
    %c0_617 = arith.constant 0 : index
    %570 = vector.load %arg20[%c150, %c0_617] : memref<160x420xbf16, #tpu.memory_space<vmem>>, vector<10x84xbf16>
    tpu.vector_store %arg20[%c150, %c0_617], %569 {strides = array<i32>} : memref<160x420xbf16, #tpu.memory_space<vmem>>, vector<10x84xbf16>,
    %c211 = arith.constant 211 : index
    %c0_618 = arith.constant 0 : index
    %571 = vector.load %arg19[%c211, %c0_618] : memref<224x84xf32, #tpu.memory_space<vmem>>, vector<10x84xf32>
    %572 = arith.truncf %571 : vector<10x84xf32> to vector<10x84xbf16>
    %c150_619 = arith.constant 150 : index
    %c84_620 = arith.constant 84 : index
    %573 = vector.load %arg20[%c150_619, %c84_620] : memref<160x420xbf16, #tpu.memory_space<vmem>>, vector<10x84xbf16>
    tpu.vector_store %arg20[%c150_619, %c84_620], %572 {strides = array<i32>} : memref<160x420xbf16, #tpu.memory_space<vmem>>, vector<10x84xbf16>,
    %c212 = arith.constant 212 : index
    %c0_621 = arith.constant 0 : index
    %574 = vector.load %arg19[%c212, %c0_621] : memref<224x84xf32, #tpu.memory_space<vmem>>, vector<10x84xf32>
    %575 = arith.truncf %574 : vector<10x84xf32> to vector<10x84xbf16>
    %c150_622 = arith.constant 150 : index
    %c168_623 = arith.constant 168 : index
    %576 = vector.load %arg20[%c150_622, %c168_623] : memref<160x420xbf16, #tpu.memory_space<vmem>>, vector<10x84xbf16>
    tpu.vector_store %arg20[%c150_622, %c168_623], %575 {strides = array<i32>} : memref<160x420xbf16, #tpu.memory_space<vmem>>, vector<10x84xbf16>,
    %c213 = arith.constant 213 : index
    %c0_624 = arith.constant 0 : index
    %577 = vector.load %arg19[%c213, %c0_624] : memref<224x84xf32, #tpu.memory_space<vmem>>, vector<10x84xf32>
    %578 = arith.truncf %577 : vector<10x84xf32> to vector<10x84xbf16>
    %c150_625 = arith.constant 150 : index
    %c252_626 = arith.constant 252 : index
    %579 = vector.load %arg20[%c150_625, %c252_626] : memref<160x420xbf16, #tpu.memory_space<vmem>>, vector<10x84xbf16>
    tpu.vector_store %arg20[%c150_625, %c252_626], %578 {strides = array<i32>} : memref<160x420xbf16, #tpu.memory_space<vmem>>, vector<10x84xbf16>,
    %c214 = arith.constant 214 : index
    %c0_627 = arith.constant 0 : index
    %580 = vector.load %arg19[%c214, %c0_627] : memref<224x84xf32, #tpu.memory_space<vmem>>, vector<10x84xf32>
    %581 = arith.truncf %580 : vector<10x84xf32> to vector<10x84xbf16>
    %c150_628 = arith.constant 150 : index
    %c336_629 = arith.constant 336 : index
    %582 = vector.load %arg20[%c150_628, %c336_629] : memref<160x420xbf16, #tpu.memory_space<vmem>>, vector<10x84xbf16>
    tpu.vector_store %arg20[%c150_628, %c336_629], %581 {strides = array<i32>} : memref<160x420xbf16, #tpu.memory_space<vmem>>, vector<10x84xbf16>,
    %c0_630 = arith.constant 0 : index
    %c0_631 = arith.constant 0 : index
    %583 = vector.load %arg20[%c0_630, %c0_631] : memref<160x420xbf16, #tpu.memory_space<vmem>>, vector<160x420xbf16>
    %c0_632 = arith.constant 0 : index
    %c0_633 = arith.constant 0 : index
    %584 = vector.load %arg4[%c0_632, %c0_633] : memref<420x160xbf16, #tpu.memory_space<vmem>>, vector<420x160xbf16>
    %cst_634 = arith.constant dense<0.000000e+00> : vector<160x160xf32>
    %585 = tpu.matmul %583, %584, %cst_634 {dimension_numbers = #tpu.dot_dimension_numbers<[1], [0], [0], [1], [0, 0, 1, 1], [], []>} : vector<160x420xbf16>, vector<420x160xbf16>, vector<160x160xf32> -> vector<160x160xf32>
    %c0_635 = arith.constant 0 : index
    %c0_636 = arith.constant 0 : index
    %586 = vector.load %arg5[%c0_635, %c0_636] : memref<1x160xf32, #tpu.memory_space<vmem>>, vector<1x160xf32>
    %587 = vector.broadcast %586 : vector<1x160xf32> to vector<160x160xf32>
    %588 = arith.addf %585, %587 : vector<160x160xf32>
    %cst_637 = arith.constant 0.000000e+00 : f32
    %589 = vector.broadcast %cst_637 : f32 to vector<160x160xf32>
    %590 = arith.maximumf %588, %589 : vector<160x160xf32>
    %591 = arith.truncf %590 : vector<160x160xf32> to vector<160x160xbf16>
    %c0_638 = arith.constant 0 : index
    %c0_639 = arith.constant 0 : index
    %592 = vector.load %arg21[%c0_638, %c0_639] : memref<160x160xbf16, #tpu.memory_space<vmem>>, vector<160x160xbf16>
    tpu.vector_store %arg21[%c0_638, %c0_639], %591 {strides = array<i32>} : memref<160x160xbf16, #tpu.memory_space<vmem>>, vector<160x160xbf16>,
    %c0_640 = arith.constant 0 : index
    %c0_641 = arith.constant 0 : index
    %593 = vector.load %arg8[%c0_640, %c0_641] : memref<160x160xbf16, #tpu.memory_space<vmem>>, vector<160x160xbf16>
    %c0_642 = arith.constant 0 : index
    %c0_643 = arith.constant 0 : index
    %594 = vector.load %arg21[%c0_642, %c0_643] : memref<160x160xbf16, #tpu.memory_space<vmem>>, vector<160x160xbf16>
    %cst_644 = arith.constant dense<0.000000e+00> : vector<160x160xf32>
    %595 = tpu.matmul %593, %594, %cst_644 {dimension_numbers = #tpu.dot_dimension_numbers<[1], [0], [0], [1], [0, 0, 1, 1], [], []>} : vector<160x160xbf16>, vector<160x160xbf16>, vector<160x160xf32> -> vector<160x160xf32>
    %596 = vector.extract_strided_slice %595 {offsets = [0, 0], sizes = [80, 160], strides = [1, 1]} : vector<160x160xf32> to vector<80x160xf32>
    %597 = vector.extract_strided_slice %595 {offsets = [80, 0], sizes = [80, 160], strides = [1, 1]} : vector<160x160xf32> to vector<80x160xf32>
    %598 = arith.maximumf %596, %597 : vector<80x160xf32>
    %599 = arith.truncf %598 : vector<80x160xf32> to vector<80x160xbf16>
    %c0_645 = arith.constant 0 : index
    %c0_646 = arith.constant 0 : index
    %600 = vector.load %arg9[%c0_645, %c0_646] : memref<160x256xbf16, #tpu.memory_space<vmem>>, vector<160x256xbf16>
    %cst_647 = arith.constant dense<0.000000e+00> : vector<80x256xf32>
    %601 = tpu.matmul %599, %600, %cst_647 {dimension_numbers = #tpu.dot_dimension_numbers<[1], [0], [0], [1], [0, 0, 1, 1], [], []>} : vector<80x160xbf16>, vector<160x256xbf16>, vector<80x256xf32> -> vector<80x256xf32>
    %602 = vector.extract_strided_slice %601 {offsets = [0, 0], sizes = [80, 80], strides = [1, 1]} : vector<80x256xf32> to vector<80x80xf32>
    %603 = vector.extract_strided_slice %601 {offsets = [0, 128], sizes = [80, 80], strides = [1, 1]} : vector<80x256xf32> to vector<80x80xf32>
    %604 = arith.maximumf %602, %603 : vector<80x80xf32>
    %605 = vector.extract_strided_slice %604 {offsets = [0, 0], sizes = [16, 80], strides = [1, 1]} : vector<80x80xf32> to vector<16x80xf32>
    %606 = arith.truncf %605 : vector<16x80xf32> to vector<16x80xbf16>
    %c0_648 = arith.constant 0 : index
    %c0_649 = arith.constant 0 : index
    %c0_650 = arith.constant 0 : index
    %607 = vector.load %arg10[%c0_648, %c0_649, %c0_650] : memref<5x80x120xbf16, #tpu.memory_space<vmem>>, vector<1x80x120xbf16>
    %608 = vector.shape_cast %607 : vector<1x80x120xbf16> to vector<80x120xbf16>
    %cst_651 = arith.constant dense<0.000000e+00> : vector<16x120xf32>
    %609 = tpu.matmul %606, %608, %cst_651 {dimension_numbers = #tpu.dot_dimension_numbers<[1], [0], [0], [1], [0, 0, 1, 1], [], []>} : vector<16x80xbf16>, vector<80x120xbf16>, vector<16x120xf32> -> vector<16x120xf32>
    %610 = vector.extract_strided_slice %604 {offsets = [16, 0], sizes = [16, 80], strides = [1, 1]} : vector<80x80xf32> to vector<16x80xf32>
    %611 = arith.truncf %610 : vector<16x80xf32> to vector<16x80xbf16>
    %c1_652 = arith.constant 1 : index
    %c0_653 = arith.constant 0 : index
    %c0_654 = arith.constant 0 : index
    %612 = vector.load %arg10[%c1_652, %c0_653, %c0_654] : memref<5x80x120xbf16, #tpu.memory_space<vmem>>, vector<1x80x120xbf16>
    %613 = vector.shape_cast %612 : vector<1x80x120xbf16> to vector<80x120xbf16>
    %cst_655 = arith.constant dense<0.000000e+00> : vector<16x120xf32>
    %614 = tpu.matmul %611, %613, %cst_655 {dimension_numbers = #tpu.dot_dimension_numbers<[1], [0], [0], [1], [0, 0, 1, 1], [], []>} : vector<16x80xbf16>, vector<80x120xbf16>, vector<16x120xf32> -> vector<16x120xf32>
    %615 = vector.extract_strided_slice %604 {offsets = [32, 0], sizes = [16, 80], strides = [1, 1]} : vector<80x80xf32> to vector<16x80xf32>
    %616 = arith.truncf %615 : vector<16x80xf32> to vector<16x80xbf16>
    %c2_656 = arith.constant 2 : index
    %c0_657 = arith.constant 0 : index
    %c0_658 = arith.constant 0 : index
    %617 = vector.load %arg10[%c2_656, %c0_657, %c0_658] : memref<5x80x120xbf16, #tpu.memory_space<vmem>>, vector<1x80x120xbf16>
    %618 = vector.shape_cast %617 : vector<1x80x120xbf16> to vector<80x120xbf16>
    %cst_659 = arith.constant dense<0.000000e+00> : vector<16x120xf32>
    %619 = tpu.matmul %616, %618, %cst_659 {dimension_numbers = #tpu.dot_dimension_numbers<[1], [0], [0], [1], [0, 0, 1, 1], [], []>} : vector<16x80xbf16>, vector<80x120xbf16>, vector<16x120xf32> -> vector<16x120xf32>
    %620 = vector.extract_strided_slice %604 {offsets = [48, 0], sizes = [16, 80], strides = [1, 1]} : vector<80x80xf32> to vector<16x80xf32>
    %621 = arith.truncf %620 : vector<16x80xf32> to vector<16x80xbf16>
    %c3_660 = arith.constant 3 : index
    %c0_661 = arith.constant 0 : index
    %c0_662 = arith.constant 0 : index
    %622 = vector.load %arg10[%c3_660, %c0_661, %c0_662] : memref<5x80x120xbf16, #tpu.memory_space<vmem>>, vector<1x80x120xbf16>
    %623 = vector.shape_cast %622 : vector<1x80x120xbf16> to vector<80x120xbf16>
    %cst_663 = arith.constant dense<0.000000e+00> : vector<16x120xf32>
    %624 = tpu.matmul %621, %623, %cst_663 {dimension_numbers = #tpu.dot_dimension_numbers<[1], [0], [0], [1], [0, 0, 1, 1], [], []>} : vector<16x80xbf16>, vector<80x120xbf16>, vector<16x120xf32> -> vector<16x120xf32>
    %625 = vector.extract_strided_slice %604 {offsets = [64, 0], sizes = [16, 80], strides = [1, 1]} : vector<80x80xf32> to vector<16x80xf32>
    %626 = arith.truncf %625 : vector<16x80xf32> to vector<16x80xbf16>
    %c4_664 = arith.constant 4 : index
    %c0_665 = arith.constant 0 : index
    %c0_666 = arith.constant 0 : index
    %627 = vector.load %arg10[%c4_664, %c0_665, %c0_666] : memref<5x80x120xbf16, #tpu.memory_space<vmem>>, vector<1x80x120xbf16>
    %628 = vector.shape_cast %627 : vector<1x80x120xbf16> to vector<80x120xbf16>
    %cst_667 = arith.constant dense<0.000000e+00> : vector<16x120xf32>
    %629 = tpu.matmul %626, %628, %cst_667 {dimension_numbers = #tpu.dot_dimension_numbers<[1], [0], [0], [1], [0, 0, 1, 1], [], []>} : vector<16x80xbf16>, vector<80x120xbf16>, vector<16x120xf32> -> vector<16x120xf32>
    %630 = arith.addf %609, %614 : vector<16x120xf32>
    %631 = arith.addf %619, %624 : vector<16x120xf32>
    %632 = arith.addf %630, %631 : vector<16x120xf32>
    %633 = arith.addf %632, %629 : vector<16x120xf32>
    %c0_668 = arith.constant 0 : index
    %c0_669 = arith.constant 0 : index
    %634 = vector.load %arg11[%c0_668, %c0_669] : memref<1x120xf32, #tpu.memory_space<vmem>>, vector<1x120xf32>
    %635 = vector.broadcast %634 : vector<1x120xf32> to vector<16x120xf32>
    %636 = arith.addf %633, %635 : vector<16x120xf32>
    %cst_670 = arith.constant 0.000000e+00 : f32
    %637 = vector.broadcast %cst_670 : f32 to vector<16x120xf32>
    %638 = arith.maximumf %636, %637 : vector<16x120xf32>
    %639 = arith.truncf %638 : vector<16x120xf32> to vector<16x120xbf16>
    %c0_671 = arith.constant 0 : index
    %c0_672 = arith.constant 0 : index
    %640 = vector.load %arg12[%c0_671, %c0_672] : memref<120x84xbf16, #tpu.memory_space<vmem>>, vector<120x84xbf16>
    %cst_673 = arith.constant dense<0.000000e+00> : vector<16x84xf32>
    %641 = tpu.matmul %639, %640, %cst_673 {dimension_numbers = #tpu.dot_dimension_numbers<[1], [0], [0], [1], [0, 0, 1, 1], [], []>} : vector<16x120xbf16>, vector<120x84xbf16>, vector<16x84xf32> -> vector<16x84xf32>
    %c0_674 = arith.constant 0 : index
    %c0_675 = arith.constant 0 : index
    %642 = vector.load %arg13[%c0_674, %c0_675] : memref<1x84xf32, #tpu.memory_space<vmem>>, vector<1x84xf32>
    %643 = vector.broadcast %642 : vector<1x84xf32> to vector<16x84xf32>
    %644 = arith.addf %641, %643 : vector<16x84xf32>
    %cst_676 = arith.constant 0.000000e+00 : f32
    %645 = vector.broadcast %cst_676 : f32 to vector<16x84xf32>
    %646 = arith.maximumf %644, %645 : vector<16x84xf32>
    %647 = arith.truncf %646 : vector<16x84xf32> to vector<16x84xbf16>
    %c0_677 = arith.constant 0 : index
    %c0_678 = arith.constant 0 : index
    %648 = vector.load %arg14[%c0_677, %c0_678] : memref<84x128xbf16, #tpu.memory_space<vmem>>, vector<84x128xbf16>
    %cst_679 = arith.constant dense<0.000000e+00> : vector<16x128xf32>
    %649 = tpu.matmul %647, %648, %cst_679 {dimension_numbers = #tpu.dot_dimension_numbers<[1], [0], [0], [1], [0, 0, 1, 1], [], []>} : vector<16x84xbf16>, vector<84x128xbf16>, vector<16x128xf32> -> vector<16x128xf32>
    %c0_680 = arith.constant 0 : index
    %c0_681 = arith.constant 0 : index
    %650 = vector.load %arg15[%c0_680, %c0_681] : memref<1x128xf32, #tpu.memory_space<vmem>>, vector<1x128xf32>
    %651 = vector.broadcast %650 : vector<1x128xf32> to vector<16x128xf32>
    %652 = arith.addf %649, %651 : vector<16x128xf32>
    %c0_682 = arith.constant 0 : index
    %c0_683 = arith.constant 0 : index
    %653 = vector.load %arg16[%c0_682, %c0_683] : memref<16x128xf32, #tpu.memory_space<vmem>>, vector<16x128xf32>
    tpu.vector_store %arg16[%c0_682, %c0_683], %652 {strides = array<i32>} : memref<16x128xf32, #tpu.memory_space<vmem>>, vector<16x128xf32>,
    return
  }
  func.func @transform_0(%arg0: i32) -> (i32, i32, i32) {
    %c0_i32 = arith.constant 0 : i32
    %c0_i32_0 = arith.constant 0 : i32
    %c0_i32_1 = arith.constant 0 : i32
    return %arg0, %c0_i32, %c0_i32_0 : i32, i32, i32
  }
  func.func @transform_1(%arg0: i32) -> (i32, i32) {
    %c0_i32 = arith.constant 0 : i32
    %c0_i32_0 = arith.constant 0 : i32
    %c0_i32_1 = arith.constant 0 : i32
    return %c0_i32, %c0_i32_0 : i32, i32
  }
  func.func @transform_2(%arg0: i32) -> (i32, i32) {
    %c0_i32 = arith.constant 0 : i32
    %c0_i32_0 = arith.constant 0 : i32
    %c0_i32_1 = arith.constant 0 : i32
    return %c0_i32, %c0_i32_0 : i32, i32
  }
  func.func @transform_3(%arg0: i32) -> (i32, i32) {
    %c0_i32 = arith.constant 0 : i32
    %c0_i32_0 = arith.constant 0 : i32
    %c0_i32_1 = arith.constant 0 : i32
    return %c0_i32, %c0_i32_0 : i32, i32
  }
  func.func @transform_4(%arg0: i32) -> (i32, i32) {
    %c0_i32 = arith.constant 0 : i32
    %c0_i32_0 = arith.constant 0 : i32
    %c0_i32_1 = arith.constant 0 : i32
    return %c0_i32, %c0_i32_0 : i32, i32
  }
  func.func @transform_5(%arg0: i32) -> (i32, i32) {
    %c0_i32 = arith.constant 0 : i32
    %c0_i32_0 = arith.constant 0 : i32
    %c0_i32_1 = arith.constant 0 : i32
    return %c0_i32, %c0_i32_0 : i32, i32
  }
  func.func @transform_6(%arg0: i32) -> (i32, i32) {
    %c0_i32 = arith.constant 0 : i32
    %c0_i32_0 = arith.constant 0 : i32
    %c0_i32_1 = arith.constant 0 : i32
    return %c0_i32, %c0_i32_0 : i32, i32
  }
  func.func @transform_7(%arg0: i32) -> (i32, i32) {
    %c0_i32 = arith.constant 0 : i32
    %c0_i32_0 = arith.constant 0 : i32
    %c0_i32_1 = arith.constant 0 : i32
    return %c0_i32, %c0_i32_0 : i32, i32
  }
  func.func @transform_8(%arg0: i32) -> (i32, i32) {
    %c0_i32 = arith.constant 0 : i32
    %c0_i32_0 = arith.constant 0 : i32
    %c0_i32_1 = arith.constant 0 : i32
    return %c0_i32, %c0_i32_0 : i32, i32
  }
  func.func @transform_9(%arg0: i32) -> (i32, i32, i32) {
    %c0_i32 = arith.constant 0 : i32
    %c0_i32_0 = arith.constant 0 : i32
    %c0_i32_1 = arith.constant 0 : i32
    %c0_i32_2 = arith.constant 0 : i32
    return %c0_i32, %c0_i32_0, %c0_i32_1 : i32, i32, i32
  }
  func.func @transform_10(%arg0: i32) -> (i32, i32) {
    %c0_i32 = arith.constant 0 : i32
    %c0_i32_0 = arith.constant 0 : i32
    %c0_i32_1 = arith.constant 0 : i32
    return %c0_i32, %c0_i32_0 : i32, i32
  }
  func.func @transform_11(%arg0: i32) -> (i32, i32) {
    %c0_i32 = arith.constant 0 : i32
    %c0_i32_0 = arith.constant 0 : i32
    %c0_i32_1 = arith.constant 0 : i32
    return %c0_i32, %c0_i32_0 : i32, i32
  }
  func.func @transform_12(%arg0: i32) -> (i32, i32) {
    %c0_i32 = arith.constant 0 : i32
    %c0_i32_0 = arith.constant 0 : i32
    %c0_i32_1 = arith.constant 0 : i32
    return %c0_i32, %c0_i32_0 : i32, i32
  }
  func.func @transform_13(%arg0: i32) -> (i32, i32) {
    %c0_i32 = arith.constant 0 : i32
    %c0_i32_0 = arith.constant 0 : i32
    %c0_i32_1 = arith.constant 0 : i32
    return %c0_i32, %c0_i32_0 : i32, i32
  }
  func.func @transform_14(%arg0: i32) -> (i32, i32) {
    %c0_i32 = arith.constant 0 : i32
    %c0_i32_0 = arith.constant 0 : i32
    %c0_i32_1 = arith.constant 0 : i32
    return %c0_i32, %c0_i32_0 : i32, i32
  }
  func.func @transform_15(%arg0: i32) -> (i32, i32) {
    %c0_i32 = arith.constant 0 : i32
    %c0_i32_0 = arith.constant 0 : i32
    return %arg0, %c0_i32 : i32, i32
  }
}

</mosaic_0001>

<bundles_post_ra>
// kernel: lenet_forward.1
= control target key start
LH: loop header
LB: loop body
LE: loop exit
PB: predicated region body
PF: predicated region fallthrough
CT: control target
= control target key end

     0   :  { %s10232_s18 = smov 0   ;;  %s12897_s0 = inlined_call_operand.vmem [shape: f32[32,32,96], index: 0, kind: input, shape index: {}]   ;;  %s12898_s1 = inlined_call_operand.vmem [shape: bf16[480,168], index: 1, kind: input, shape index: {}]   ;;  %s12899_s2 = inlined_call_operand.vmem [shape: f32[1,168], index: 2, kind: input, shape index: {}]   ;;  %s12900_s3 = inlined_call_operand.vmem [shape: bf16[420,160], index: 3, kind: input, shape index: {}]   ;;  %s12901_s4 = inlined_call_operand.vmem [shape: f32[1,160], index: 4, kind: input, shape index: {}]   ;;  %s12902_s5 = inlined_call_operand.vmem [shape: bf16[448,448], index: 5, kind: input, shape index: {}]   ;;  %s12903_s6 = inlined_call_operand.vmem [shape: bf16[168,256], index: 6, kind: input, shape index: {}]   ;;  %s12904_s7 = inlined_call_operand.vmem [shape: bf16[160,160], index: 7, kind: input, shape index: {}]   ;;  %s12905_s8 = inlined_call_operand.vmem [shape: bf16[160,256], index: 8, kind: input, shape index: {}]   ;;  %s12906_s9 = inlined_call_operand.vmem [shape: bf16[5,80,120], index: 9, kind: input, shape index: {}]   ;;  %s12907_s10 = inlined_call_operand.vmem [shape: f32[1,120], index: 10, kind: input, shape index: {}]   ;;  %s12908_s11 = inlined_call_operand.vmem [shape: bf16[120,84], index: 11, kind: input, shape index: {}]   ;;  %s12909_s12 = inlined_call_operand.vmem [shape: f32[1,84], index: 12, kind: input, shape index: {}]   ;;  %s12910_s13 = inlined_call_operand.vmem [shape: bf16[84,128], index: 13, kind: input, shape index: {}]   ;;  %s12911_s14 = inlined_call_operand.vmem [shape: f32[1,128], index: 14, kind: input, shape index: {}]   ;;  %s12912_s15 = inlined_call_operand.vmem [shape: f32[32,128], index: 15, kind: output, shape index: {}]  }
   0x1 LB: > { %s8295_s19 = sadd.s32 4294967295, %s10141_s18   ;;  %p8299_p0 = scmp.ge.s32.totalorder %s10141_s18, 1  ;;  %s10141_s18 = sphi %s10232_s18, %s25_s18  }
   0x2   : > { %p439_p1 = scmp.lt.s32.totalorder %s10141_s18, 3 }
   0x4   : > { %p440_p2 = pnand %p8299_p0, %p439_p1 }
   0x6   : > { %443 = sbr.rel (%p440_p2) target bundleno = 3268 (0xcc4), region = 80 }
   0xd   : > { %s8300_s20 = sshll.u32 %s8295_s19, 4  ;;  %v9667_v0 = vld [vmem:[%s12898_s1 + $0x4] ss:$8 sps:$4 sm:$0xff]   ;;  %v9669_v1 = vld [vmem:[%s12898_s1] ss:$8 sps:$4 sm:$0xff]   ;;  %s10143_s26 = smov 96  }
   0xe   : > { %p489_p3 = scmp.lt.s32.totalorder %s8300_s20, 31  ;;  %v9670_v2 = vld [vmem:[%s12898_s1 + $0x14] ss:$8 sps:$4 sm:$0xff]   ;;  %2638 = vmatprep.subr.bf16.mxu0 %v9667_v0  ;;  %v9672_v3 = vld [vmem:[%s12898_s1 + $0x10] ss:$8 sps:$4 sm:$0xff]   ;;  %s10144_s16 = smov 64  }
   0xf   : > { %2639 = vmatpush1.bf16.msra.mxu0 %v9669_v1  ;;  %v9673_v4 = vld [vmem:[%s12898_s1 + $0x24] ss:$8 sps:$4 sm:$0xff]   ;;  %v9675_v5 = vld [vmem:[%s12898_s1 + $0x20] ss:$8 sps:$4 sm:$0xff]   ;;  %v9676_v9 = vld [vmem:[%s12898_s1 + $0x34] ss:$8 sps:$4 sm:$0xff]  }
  0x10   : > { %s13218_s20 = smov (!%p489_p3, %s8300_s20), 31  ;;  %2640 = vmatprep.subr.bf16.mxu0 %v9670_v2  ;;  %v9678_v20 = vld [vmem:[%s12898_s1 + $0x30] ss:$8 sps:$4 sm:$0xff]   ;;  %v9679_v32 = vld [vmem:[%s12898_s1 + $0x44] ss:$8 sps:$4 sm:$0xff]   ;;  %vm591_vm0 = vcmask 1045504  }
  0x11   : > { %s9081_s29 = sshll.u32 %s13218_s20, 5  ;;  %v9681_v51 = vld [vmem:[%s12898_s1 + $0x40] ss:$8 sps:$4 sm:$0xff]   ;;  %v9682_v53 = vld [vmem:[%s12898_s1 + $0x54] ss:$8 sps:$4 sm:$0xff]   ;;  %vm12946_vm1 = vcmask 1043456  }
  0x12   : > { %s10260_s22 = scalar_lea.vmem %s12897_s0, %s9081_s29  ;;  %v9684_v54 = vld [vmem:[%s12898_s1 + $0x50] ss:$8 sps:$4 sm:$0xff]   ;;  %v9685_v56 = vld [vmem:[%s12898_s1 + $0x64] ss:$8 sps:$4 sm:$0xff]   ;;  %v9687_v61 = vld [vmem:[%s12898_s1 + $0x60] ss:$8 sps:$4 sm:$0xff]  }
  0x13   : > { %v514_v6 = vld [vmem:[%s10260_s22 + $0x11] sm:$0xff]  ;;  %v515_v7 = vld [vmem:[%s10260_s22 + $0x19] sm:$0xf]  ;;  %v512_v8 = vld [vmem:[%s10260_s22 + $0x1] sm:$0xff]  ;;  %2641 = vmatpush1.bf16.msra.mxu0 %v9672_v3  ;;  %vm12913_vm2 = vcmask 783360   ;;  %vm12917_vm3 = vcmask 1041408  }
  0x14   : > { %v517_v10 = vpack.c.bf16 %v515_v7, %v514_v6  ;;  %v513_v11 = vld [vmem:[%s10260_s22 + $0x9] sm:$0xff]  ;;  %v8309_v12 = vld [vmem:[%s10260_s22 + $0x21] sm:$0xff]  ;;  %2642 = vmatprep.subr.bf16.mxu0 %v9673_v4  ;;  %v8311_v24 = vld [vmem:[%s10260_s22 + $0x31] sm:$0xff]  ;;  %vm508_vm4 = vcmask 785408   ;;  %vm12914_vm5 = vcmask 785414   ;;  %vm12918_vm6 = vcmask 781312  }
  0x15   : > { %v8310_v13 = vld [vmem:[%s10260_s22 + $0x29] sm:$0xff]  ;;  %v516_v14 = vpack.c.bf16 %v513_v11, %v512_v8  ;;  %v8312_v25 = vld [vmem:[%s10260_s22 + $0x39] sm:$0xf]  ;;  %v8329_v36 = vld [vmem:[%s10260_s22 + $0x41] sm:$0xff]  ;;  %vm12919_vm7 = vcmask 785412   ;;  %vm12927_vm8 = vcmask 779264  }
  0x16   : > { %v607_v15 = vpack.c.bf16 %v8310_v13, %v8309_v12  ;;  %v534_v16 = vld [vmem:[%s10260_s22 + $0x2] sm:$0xff]  ;;  %v535_v17 = vld [vmem:[%s10260_s22 + $0xa] sm:$0xff]  ;;  %522 = vrot.lane.b32.xlu1 %v517_v10, %s10143_s26  ;;  %v8315_v26 = vld [vmem:[%s10260_s22 + $0x32] sm:$0xff]  ;;  %v608_v29 = vpack.c.bf16 %v8312_v25, %v8311_v24  ;;  %vm12930_vm9 = vcmask 785410   ;;  %vm12916_vm10 = vcmask 1046272   ;;  %s10146_s21 = smov 84  }
  0x17   : > { %v8313_v18 = vld [vmem:[%s10260_s22 + $0x22] sm:$0xff]  ;;  %v8314_v19 = vld [vmem:[%s10260_s22 + $0x2a] sm:$0xff]  ;;  %520 = vrot.lane.b32.xlu0 %v516_v14, %s10143_s26  ;;  %v538_v22 = vpack.c.bf16 %v535_v17, %v534_v16  ;;  %v536_v27 = vld [vmem:[%s10260_s22 + $0x12] sm:$0xff]  ;;  %2643 = vmatpush1.bf16.msra.mxu0 %v9675_v5  ;;  %vm12915_vm11 = vcmask 521216   ;;  %vm526_vm12 = vcmask 1048320   ;;  %vm528_vm13 = vcmask 523264  }
  0x18   : > { %v611_v21 = vrot.slane %v607_v15, 2  ;;  %v637_v23 = vpack.c.bf16 %v8314_v19, %v8313_v18  ;;  %v537_v28 = vld [vmem:[%s10260_s22 + $0x1a] sm:$0xf]  ;;  %2644 = vmatprep.subr.bf16.mxu0 %v9676_v9  ;;  %v8330_v37 = vld [vmem:[%s10260_s22 + $0x49] sm:$0xff]  ;;  %v612_v38 = vrot.slane %v608_v29, 2  ;;  %v8335_v44 = vld [vmem:[%s10260_s22 + $0x52] sm:$0xff] }
  0x19   : > { %v8316_v30 = vld [vmem:[%s10260_s22 + $0x3a] sm:$0xf]  ;;  %v539_v34 = vpack.c.bf16 %v537_v28, %v536_v27  ;;  %v730_v39 = vpack.c.bf16 %v8330_v37, %v8329_v36  ;;  %v8333_v41 = vld [vmem:[%s10260_s22 + $0x42] sm:$0xff]  ;;  %v8334_v42 = vld [vmem:[%s10260_s22 + $0x4a] sm:$0xff]  ;;  %vm12938_vm14 = vcmask 1048326   ;;  %vm12924_vm15 = vcmask 523270  }
  0x1a   : > { %v638_v31 = vpack.c.bf16 %v8316_v30, %v8315_v26  ;;  %614 = vrot.lane.b32.xlu1 %v611_v21, %s10143_s26  ;;  %v641_v33 = vrot.slane %v637_v23, 2  ;;  %v613_v43 = vsel %vm591_vm0, %v611_v21, %v612_v38  ;;  %v8336_v45 = vld [vmem:[%s10260_s22 + $0x5a] sm:$0xf]  ;;  %v8331_v46 = vld [vmem:[%s10260_s22 + $0x51] sm:$0xff]  ;;  %v760_v49 = vpack.c.bf16 %v8334_v42, %v8333_v41  ;;  %v8349_v58 = vld [vmem:[%s10260_s22 + $0x61] sm:$0xff]  ;;  %s10148_s24 = smov 124  }
  0x1b   : > { %542 = vrot.lane.b32.xlu0 %v538_v22, %s10144_s16  ;;  %2645 = vmatpush1.bf16.msra.mxu0 %v9678_v20  ;;  %v8332_v47 = vld [vmem:[%s10260_s22 + $0x59] sm:$0xf]  ;;  %v734_v48 = vrot.slane %v730_v39, 4  ;;  %v761_v50 = vpack.c.bf16 %v8336_v45, %v8335_v44  ;;  %v8350_v59 = vld [vmem:[%s10260_s22 + $0x69] sm:$0xff]  ;;  %v8351_v6 = vld [vmem:[%s10260_s22 + $0x71] sm:$0xff]  ;;  %s8303_s28 = sshll.u32 %s8295_s19, 1 }
  0x1c   : > { %v642_v35 = vrot.slane %v638_v31, 2  ;;  %2646 = vmatprep.subr.bf16.mxu0 %v9679_v32  ;;  %v731_v52 = vpack.c.bf16 %v8332_v47, %v8331_v46  ;;  %v764_v55 = vrot.slane %v760_v49, 4  ;;  %v850_v62 = vpack.c.bf16 %v8350_v59, %v8349_v58  ;;  %v9688_v63 = vld [vmem:[%s12898_s1 + $0x74] ss:$8 sps:$4 sm:$0xff]   ;;  %v8353_v1 = vld [vmem:[%s10260_s22 + $0x62] sm:$0xff]  ;;  %v8354_v2 = vld [vmem:[%s10260_s22 + $0x6a] sm:$0xff] }
  0x1d   : > { %v765_v57 = vrot.slane %v761_v50, 4  ;;  %v8355_v3 = vld [vmem:[%s10260_s22 + $0x72] sm:$0xff]  ;;  %v8356_v5 = vld [vmem:[%s10260_s22 + $0x7a] sm:$0xf]  ;;  %v873_v10 = vpack.c.bf16 %v8354_v2, %v8353_v1  ;;  %v9691_v11 = vld [vmem:[%s12898_s1 + $0x84] ss:$8 sps:$4 sm:$0xff]  }
  0x1e   : > { %644 = vrot.lane.b32.xlu1 %v641_v33, %s10144_s16  ;;  %v643_v40 = vsel %vm591_vm0, %v641_v33, %v642_v35  ;;  %v735_v60 = vrot.slane %v731_v52, 4  ;;  %v8352_v7 = vld [vmem:[%s10260_s22 + $0x79] sm:$0xf]  ;;  %v854_v9 = vrot.slane %v850_v62, 6  ;;  %v874_v12 = vpack.c.bf16 %v8356_v5, %v8355_v3  ;;  %v9693_v14 = vld [vmem:[%s12898_s1 + $0x80] ss:$8 sps:$4 sm:$0xff]  }
  0x1f   : > { %544 = vrot.lane.b32.xlu0 %v539_v34, %s10144_s16  ;;  %2647 = vmatpush1.bf16.msra.mxu0 %v9681_v51  ;;  %v766_v0 = vsel %vm12946_vm1, %v764_v55, %v765_v57  ;;  %v9690_v8 = vld [vmem:[%s12898_s1 + $0x70] ss:$8 sps:$4 sm:$0xff]   ;;  %v851_v13 = vpack.c.bf16 %v8352_v7, %v8351_v6  ;;  %v877_v15 = vrot.slane %v873_v10, 6  ;;  %v9694_v16 = vld [vmem:[%s12898_s1 + $0x94] ss:$8 sps:$4 sm:$0xff]   ;;  %v502_v22 = vld [vmem:[%s10260_s22] sm:$0xff] }
  0x20   : > { %2648 = vmatprep.subr.bf16.mxu0 %v9682_v53  ;;  %v736_v4 = vsel %vm12946_vm1, %v734_v48, %v735_v60  ;;  %v878_v17 = vrot.slane %v874_v12, 6  ;;  %v504_v18 = vld [vmem:[%s10260_s22 + $0x10] sm:$0xff]  ;;  %v505_v19 = vld [vmem:[%s10260_s22 + $0x18] sm:$0xf]  ;;  %v503_v23 = vld [vmem:[%s10260_s22 + $0x8] sm:$0xff]  ;;  %p496_p4 = scmp.lt.s32.totalorder %s8303_s28, 3 }
  0x21   : > { %v855_v20 = vrot.slane %v851_v13, 6  ;;  %v507_v21 = vpack.c.bf16 %v505_v19, %v504_v18  ;;  %v8373_v24 = vld [vmem:[%s10260_s22 + $0x82] sm:$0xff]  ;;  %v9696_v25 = vld [vmem:[%s12898_s1 + $0x90] ss:$8 sps:$4 sm:$0xff]   ;;  %v506_v26 = vpack.c.bf16 %v503_v23, %v502_v22  ;;  %v9700_v42 = vld [vmem:[%s12898_s1 + $0xb4] ss:$8 sps:$4 sm:$0xff]  }
  0x22   : > { %646 = vrot.lane.b32.xlu1 %v643_v40, %s10144_s16  ;;  %v8369_v27 = vld [vmem:[%s10260_s22 + $0x81] sm:$0xff]  ;;  %v8374_v28 = vld [vmem:[%s10260_s22 + $0x8a] sm:$0xff]  ;;  %v879_v31 = vsel %vm12917_vm3, %v877_v15, %v878_v17  ;;  %v8372_v47 = vld [vmem:[%s10260_s22 + $0x99] sm:$0xf]  ;;  %s13220_s28 = smov (!%p496_p4, %s8303_s28), 3 }
  0x23   : > { %616 = vrot.lane.b32.xlu0 %v613_v43, %s10143_s26  ;;  %2649 = vmatpush1.bf16.msra.mxu0 %v9684_v54  ;;  %v8389_v29 = vld [vmem:[%s10260_s22 + $0xa1] sm:$0xff]  ;;  %511 = vst.msk [vmem:[#allocation2 + $0x20] sm:$0x3f] %vm12913_vm2, %v507_v21  ;;  %v8390_v32 = vld [vmem:[%s10260_s22 + $0xa9] sm:$0xff]  ;;  %v958_v39 = vpack.c.bf16 %v8374_v28, %v8373_v24  ;;  %v8371_v41 = vld [vmem:[%s10260_s22 + $0x91] sm:$0xff] }
  0x24   : > { %2650 = vmatprep.subr.bf16.mxu0 %v9685_v56  ;;  %v9697_v30 = vld [vmem:[%s12898_s1 + $0xa4] ss:$8 sps:$4 sm:$0xff]   ;;  %509 = vst.msk [vmem:[#allocation2] sm:$0xff] %vm508_vm4, %v506_v26  ;;  %v1018_v40 = vpack.c.bf16 %v8390_v32, %v8389_v29  ;;  %v8396_v49 = vld [vmem:[%s10260_s22 + $0xba] sm:$0xf]  ;;  %v8391_v50 = vld [vmem:[%s10260_s22 + $0xb1] sm:$0xff] }
  0x25   : > { %v8305_v33 = vld [vmem:[%s10260_s22 + $0x20] sm:$0xff]  ;;  %v8306_v34 = vld [vmem:[%s10260_s22 + $0x28] sm:$0xff]  ;;  %v8392_v51 = vld [vmem:[%s10260_s22 + $0xb9] sm:$0xf] }
  0x26   : > { %737 = vrot.lane.b32.xlu1 %v734_v48, %s10143_s26  ;;  %v8370_v36 = vld [vmem:[%s10260_s22 + $0x89] sm:$0xff]  ;;  %v587_v37 = vpack.c.bf16 %v8306_v34, %v8305_v33  ;;  %v8395_v48 = vld [vmem:[%s10260_s22 + $0xb2] sm:$0xff]  ;;  %v1022_v53 = vrot.slane %v1018_v40, 2  ;;  %v1019_v62 = vpack.c.bf16 %v8392_v51, %v8391_v50  ;;  %v8409_v10 = vld [vmem:[%s10260_s22 + $0xc1] sm:$0xff] }
  0x27   : > { %618 = vrot.lane.b32.xlu0 %v612_v38, %s10143_s26  ;;  %2651 = vmatpush1.bf16.msra.mxu0 %v9687_v61  ;;  %v9699_v38 = vld [vmem:[%s12898_s1 + $0xa0] ss:$8 sps:$4 sm:$0xff]   ;;  %v940_v44 = vpack.c.bf16 %v8370_v36, %v8369_v27  ;;  %v9702_v52 = vld [vmem:[%s12898_s1 + $0xb0] ss:$8 sps:$4 sm:$0xff]   ;;  %v1045_v59 = vpack.c.bf16 %v8396_v49, %v8395_v48  ;;  %v9706_v5 = vld [vmem:[%s12898_s1 + $0xd4] ss:$8 sps:$4 sm:$0xff]  }
  0x28   : > { %2652 = vmatprep.subr.bf16.mxu0 %v9688_v63  ;;  %v592_v43 = vrot.slane %v587_v37, 2  ;;  %v8393_v45 = vld [vmem:[%s10260_s22 + $0xa2] sm:$0xff]  ;;  %v8394_v46 = vld [vmem:[%s10260_s22 + $0xaa] sm:$0xff]  ;;  %v8375_v58 = vld [vmem:[%s10260_s22 + $0x92] sm:$0xff] }
  0x29   : > { %v1044_v54 = vpack.c.bf16 %v8394_v46, %v8393_v45  ;;  %v8307_v56 = vld [vmem:[%s10260_s22 + $0x30] sm:$0xff]  ;;  %v8376_v61 = vld [vmem:[%s10260_s22 + $0x9a] sm:$0xf]  ;;  %v8326_v1 = vld [vmem:[%s10260_s22 + $0x48] sm:$0xff] }
  0x2a   : > { %767 = vrot.lane.b32.xlu1 %v764_v55, %s10144_s16  ;;  %599 = vst.msk [vmem:[#allocation2 + $0x20] sm:$0xc0] %vm12914_vm5, %v592_v43  ;;  %v9703_v55 = vld [vmem:[%s12898_s1 + $0xc4] ss:$8 sps:$4 sm:$0xff]   ;;  %v9705_v2 = vld [vmem:[%s12898_s1 + $0xc0] ss:$8 sps:$4 sm:$0xff]  }
  0x2b   : > { %648 = vrot.lane.b32.xlu0 %v642_v35, %s10144_s16  ;;  %2653 = vmatpush1.bf16.msra.mxu0 %v9690_v8  ;;  %v856_v35 = vsel %vm12917_vm3, %v854_v9, %v855_v20  ;;  %v8327_v7 = vld [vmem:[%s10260_s22 + $0x50] sm:$0xff]  ;;  %v959_v8 = vpack.c.bf16 %v8376_v61, %v8375_v58  ;;  %v8328_v13 = vld [vmem:[%s10260_s22 + $0x58] sm:$0xf]  ;;  %v8345_v17 = vld [vmem:[%s10260_s22 + $0x60] sm:$0xff] }
  0x2c   : > { %2654 = vmatprep.subr.bf16.mxu0 %v9691_v11  ;;  %v8410_v11 = vld [vmem:[%s10260_s22 + $0xc9] sm:$0xff]  ;;  %v8415_v27 = vld [vmem:[%s10260_s22 + $0xd2] sm:$0xff]  ;;  %v8429_v58 = vld [vmem:[%s10260_s22 + $0xe1] sm:$0xff] }
  0x2d   : > { %v8346_v18 = vld [vmem:[%s10260_s22 + $0x68] sm:$0xff]  ;;  %v9708_v19 = vld [vmem:[%s12898_s1 + $0xd0] ss:$8 sps:$4 sm:$0xff]   ;;  %v1128_v21 = vpack.c.bf16 %v8410_v11, %v8409_v10  ;;  %v9712_v40 = vld [vmem:[%s12898_s1 + $0xf4] ss:$8 sps:$4 sm:$0xff]  }
  0x2e   : > { %769 = vrot.lane.b32.xlu1 %v766_v0, %s10144_s16  ;;  %v8325_v0 = vld [vmem:[%s10260_s22 + $0x40] sm:$0xff]  ;;  %v833_v20 = vpack.c.bf16 %v8346_v18, %v8345_v17  ;;  %v8414_v26 = vld [vmem:[%s10260_s22 + $0xca] sm:$0xff]  ;;  %v8348_v33 = vld [vmem:[%s10260_s22 + $0x78] sm:$0xf] }
  0x2f   : > { %739 = vrot.lane.b32.xlu0 %v736_v4, %s10143_s26  ;;  %2655 = vmatpush1.bf16.msra.mxu0 %v9693_v14  ;;  %v710_v3 = vpack.c.bf16 %v8326_v1, %v8325_v0  ;;  %v1048_v4 = vrot.slane %v1044_v54, 2  ;;  %v10425_v14 = vrot.slane %v1019_v62, 2  ;;  %v9709_v22 = vld [vmem:[%s12898_s1 + $0xe4] ss:$8 sps:$4 sm:$0xff]   ;;  %v8347_v32 = vld [vmem:[%s10260_s22 + $0x70] sm:$0xff] }
  0x30   : > { %2656 = vmatprep.subr.bf16.mxu0 %v9694_v16  ;;  %v711_v16 = vpack.c.bf16 %v8328_v13, %v8327_v7  ;;  %v838_v28 = vrot.slane %v833_v20, 6  ;;  %v8411_v34 = vld [vmem:[%s10260_s22 + $0xd1] sm:$0xff]  ;;  %v9711_v36 = vld [vmem:[%s12898_s1 + $0xe0] ss:$8 sps:$4 sm:$0xff]   ;;  %v834_v37 = vpack.c.bf16 %v8348_v33, %v8347_v32 }
  0x31   : > { %v715_v12 = vrot.slane %v710_v3, 4  ;;  %v1024_v29 = vsel %vm591_vm0, %v1022_v53, %v10425_v14  ;;  %v8386_v48 = vld [vmem:[%s10260_s22 + $0xa8] sm:$0xff]  ;;  %v8367_v49 = vld [vmem:[%s10260_s22 + $0x90] sm:$0xff]  ;;  %v8388_v1 = vld [vmem:[%s10260_s22 + $0xb8] sm:$0xf] }
  0x32   : > { %857 = vrot.lane.b32.xlu1 %v854_v9, %s10143_s26  ;;  %v10420_v9 = vrot.slane %v1045_v59, 2  ;;  %v716_v23 = vrot.slane %v711_v16, 4  ;;  %844 = vst.msk [vmem:[#allocation2 + $0xa0] sm:$0xfc] %vm12930_vm9, %v838_v28  ;;  %v9714_v50 = vld [vmem:[%s12898_s1 + $0xf0] ss:$8 sps:$4 sm:$0xff]  }
  0x33   : > { %741 = vrot.lane.b32.xlu0 %v735_v60, %s10143_s26  ;;  %2657 = vmatpush1.bf16.msra.mxu0 %v9696_v25  ;;  %v8308_v60 = vld [vmem:[%s10260_s22 + $0x38] sm:$0xf]  ;;  %722 = vst.msk [vmem:[#allocation2 + $0x60] sm:$0xf0] %vm12919_vm7, %v715_v12  ;;  %v8413_v25 = vld [vmem:[%s10260_s22 + $0xc2] sm:$0xff]  ;;  %v8387_v0 = vld [vmem:[%s10260_s22 + $0xb0] sm:$0xff] }
  0x34   : > { %2658 = vmatprep.subr.bf16.mxu0 %v9697_v30  ;;  %v588_v63 = vpack.c.bf16 %v8308_v60, %v8307_v56  ;;  %v1050_v24 = vsel %vm591_vm0, %v1048_v4, %v10420_v9  ;;  %v8416_v30 = vld [vmem:[%s10260_s22 + $0xda] sm:$0xf]  ;;  %725 = vst.msk [vmem:[#allocation2 + $0xa0] sm:$0x3] %vm12927_vm8, %v716_v23  ;;  %v8430_v59 = vld [vmem:[%s10260_s22 + $0xe9] sm:$0xff]  ;;  %v8435_v3 = vld [vmem:[%s10260_s22 + $0xf2] sm:$0xff] }
  0x35   : > { %v8433_v62 = vld [vmem:[%s10260_s22 + $0xe2] sm:$0xff]  ;;  %v8431_v7 = vld [vmem:[%s10260_s22 + $0xf1] sm:$0xff] }
  0x36   : > { %880 = vrot.lane.b32.xlu1 %v877_v15, %s10144_s16  ;;  %v593_v6 = vrot.slane %v588_v63, 2  ;;  %v8434_v63 = vld [vmem:[%s10260_s22 + $0xea] sm:$0xff]  ;;  %v8449_v32 = vld [vmem:[%s10260_s22 + $0x101] sm:$0xff] }
  0x37   : > { %771 = vrot.lane.b32.xlu0 %v765_v57, %s10144_s16  ;;  %2659 = vmatpush1.bf16.msra.mxu0 %v9699_v38  ;;  %v941_v57 = vpack.c.bf16 %v8372_v47, %v8371_v41  ;;  %v1132_v38 = vrot.slane %v1128_v21, 4  ;;  %v8365_v41 = vld [vmem:[%s10260_s22 + $0x80] sm:$0xff]  ;;  %v8406_v13 = vld [vmem:[%s10260_s22 + $0xc8] sm:$0xff]  ;;  %v1257_v16 = vpack.c.bf16 %v8434_v63, %v8433_v62 }
  0x38   : > { %2660 = vmatprep.subr.bf16.mxu0 %v9700_v42  ;;  %v594_v15 = vsel %vm591_vm0, %v592_v43, %v593_v6  ;;  %602 = vst.msk [vmem:[#allocation2 + $0x60] sm:$0xf] %vm12918_vm6, %v593_v6  ;;  %v8366_v42 = vld [vmem:[%s10260_s22 + $0x88] sm:$0xff]  ;;  %v1155_v43 = vpack.c.bf16 %v8416_v30, %v8415_v27  ;;  %v8385_v47 = vld [vmem:[%s10260_s22 + $0xa0] sm:$0xff]  ;;  %v8407_v27 = vld [vmem:[%s10260_s22 + $0xd0] sm:$0xff] }
  0x39   : > { %600 = vst.msk [vmem:[#allocation2 + $0x40] sm:$0xff] %vm508_vm4, %v594_v15  ;;  %v932_v45 = vpack.c.bf16 %v8366_v42, %v8365_v41  ;;  %v1261_v20 = vrot.slane %v1257_v16, 6  ;;  %v8450_v33 = vld [vmem:[%s10260_s22 + $0x109] sm:$0xff]  ;;  %v8475_v41 = vld [vmem:[%s10260_s22 + $0x132] sm:$0xff]  ;;  %v8476_v42 = vld [vmem:[%s10260_s22 + $0x13a] sm:$0xf] }
  0x3a   : > { %882 = vrot.lane.b32.xlu1 %v879_v31, %s10144_s16  ;;  %v717_v31 = vsel %vm12946_vm1, %v715_v12, %v716_v23  ;;  %v8405_v12 = vld [vmem:[%s10260_s22 + $0xc0] sm:$0xff] }
  0x3b   : > { %859 = vrot.lane.b32.xlu0 %v856_v35, %s10143_s26  ;;  %2661 = vmatpush1.bf16.msra.mxu0 %v9702_v52  ;;  %v8412_v35 = vld [vmem:[%s10260_s22 + $0xd9] sm:$0xf]  ;;  %723 = vst.msk [vmem:[#allocation2 + $0x80] sm:$0xff] %vm508_vm4, %v717_v31  ;;  %934 = vst.msk [vmem:[#allocation2 + $0xe0] sm:$0xff] %vm508_vm4, %v932_v45  ;;  %v1001_v52 = vpack.c.bf16 %v8386_v48, %v8385_v47  ;;  %v8453_v23 = vld [vmem:[%s10260_s22 + $0x102] sm:$0xff] }
  0x3c   : > { %2662 = vmatprep.subr.bf16.mxu0 %v9703_v55  ;;  %v1129_v46 = vpack.c.bf16 %v8412_v35, %v8411_v34  ;;  %v9717_v55 = vld [vmem:[%s12898_s1 + $0x104] ss:$8 sps:$4 sm:$0xff]   ;;  %v8472_v45 = vld [vmem:[%s10260_s22 + $0x139] sm:$0xf] }
  0x3d   : > { %v1005_v60 = vrot.slane %v1001_v52, 2  ;;  %v8473_v34 = vld [vmem:[%s10260_s22 + $0x122] sm:$0xff]  ;;  %v8474_v35 = vld [vmem:[%s10260_s22 + $0x12a] sm:$0xff] }
  0x3e   : > { %962 = vrot.lane.b32.xlu1 %v958_v39, %s10144_s16  ;;  %v1154_v39 = vpack.c.bf16 %v8414_v26, %v8413_v25  ;;  %v1133_v61 = vrot.slane %v1129_v46, 4  ;;  %v8469_v25 = vld [vmem:[%s10260_s22 + $0x121] sm:$0xff]  ;;  %v8470_v26 = vld [vmem:[%s10260_s22 + $0x129] sm:$0xff] }
  0x3f   : > { %944 = vrot.lane.b32.xlu0 %v940_v44, %s10143_s26  ;;  %2663 = vmatpush1.bf16.msra.mxu0 %v9705_v2  ;;  %v839_v44 = vrot.slane %v834_v37, 6  ;;  %1011 = vst.msk [vmem:[#allocation2 + $0x100] sm:$0xc0] %vm12914_vm5, %v1005_v60  ;;  %v1236_v2 = vpack.c.bf16 %v8430_v59, %v8429_v58  ;;  %v8425_v47 = vld [vmem:[%s10260_s22 + $0xe0] sm:$0xff]  ;;  %v8426_v48 = vld [vmem:[%s10260_s22 + $0xe8] sm:$0xff] }
  0x40   : > { %2664 = vmatprep.subr.bf16.mxu0 %v9706_v5  ;;  %v1158_v54 = vrot.slane %v1154_v39, 4  ;;  %v1002_v5 = vpack.c.bf16 %v8388_v1, %v8387_v0  ;;  %v1134_v10 = vsel %vm12946_vm1, %v1132_v38, %v1133_v61  ;;  %v8451_v39 = vld [vmem:[%s10260_s22 + $0x111] sm:$0xff]  ;;  %v8489_v58 = vld [vmem:[%s10260_s22 + $0x141] sm:$0xff]  ;;  %v8490_v59 = vld [vmem:[%s10260_s22 + $0x149] sm:$0xff] }
  0x41   : > { %v840_v51 = vsel %vm12917_vm3, %v838_v28, %v839_v44  ;;  %v1240_v15 = vrot.slane %v1236_v2, 6  ;;  %v8408_v28 = vld [vmem:[%s10260_s22 + $0xd8] sm:$0xf]  ;;  %v8493_v0 = vld [vmem:[%s10260_s22 + $0x142] sm:$0xff]  ;;  %v8494_v1 = vld [vmem:[%s10260_s22 + $0x14a] sm:$0xff]  ;;  %v1509_v2 = vpack.c.bf16 %v8490_v59, %v8489_v58 }
  0x42   : > { %1025 = vrot.lane.b32.xlu1 %v1022_v53, %s10143_s26  ;;  %v8368_v53 = vld [vmem:[%s10260_s22 + $0x98] sm:$0xf]  ;;  %845 = vst.msk [vmem:[#allocation2 + $0xc0] sm:$0xff] %vm508_vm4, %v840_v51  ;;  %v1006_v11 = vrot.slane %v1002_v5, 2  ;;  %v1112_v30 = vpack.c.bf16 %v8408_v28, %v8407_v27  ;;  %v1425_v51 = vpack.c.bf16 %v8474_v35, %v8473_v34  ;;  %v8427_v5 = vld [vmem:[%s10260_s22 + $0xf0] sm:$0xff]  ;;  %v8465_v35 = vld [vmem:[%s10260_s22 + $0x120] sm:$0xff] }
  0x43   : > { %946 = vrot.lane.b32.xlu0 %v941_v57, %s10143_s26  ;;  %2665 = vmatpush1.bf16.msra.mxu0 %v9708_v19  ;;  %v933_v56 = vpack.c.bf16 %v8368_v53, %v8367_v49  ;;  %v1159_v57 = vrot.slane %v1155_v43, 4  ;;  %v1321_v43 = vpack.c.bf16 %v8450_v33, %v8449_v32  ;;  %v8471_v44 = vld [vmem:[%s10260_s22 + $0x131] sm:$0xff]  ;;  %v1221_v49 = vpack.c.bf16 %v8426_v48, %v8425_v47  ;;  %v8512_v33 = vld [vmem:[%s10260_s22 + $0x179] sm:$0xf] }
  0x44   : > { %2666 = vmatprep.subr.bf16.mxu0 %v9709_v22  ;;  %v1007_v17 = vsel %vm591_vm0, %v1005_v60, %v1006_v11  ;;  %1013 = vst.msk [vmem:[#allocation2 + $0x140] sm:$0xf] %vm12918_vm6, %v1006_v11  ;;  %v8455_v53 = vld [vmem:[%s10260_s22 + $0x112] sm:$0xff]  ;;  %v1429_v60 = vrot.slane %v1425_v51, 2  ;;  %v8533_v51 = vld [vmem:[%s10260_s22 + $0x182] sm:$0xff] }
  0x45   : > { %935 = vst.msk [vmem:[#allocation2 + $0x100] sm:$0x3f] %vm12913_vm2, %v933_v56  ;;  %v1160_v6 = vsel %vm12946_vm1, %v1158_v54, %v1159_v57  ;;  %v1225_v56 = vrot.slane %v1221_v49, 6  ;;  %v8511_v32 = vld [vmem:[%s10260_s22 + $0x171] sm:$0xff]  ;;  %v8529_v49 = vld [vmem:[%s10260_s22 + $0x181] sm:$0xff] }
  0x46   : > { %1051 = vrot.lane.b32.xlu1 %v1048_v4, %s10144_s16  ;;  %v8436_v4 = vld [vmem:[%s10260_s22 + $0xfa] sm:$0xf]  ;;  %1012 = vst.msk [vmem:[#allocation2 + $0x120] sm:$0xff] %vm508_vm4, %v1007_v17 }
  0x47   : > { %964 = vrot.lane.b32.xlu0 %v959_v8, %s10144_s16  ;;  %2667 = vmatpush1.bf16.msra.mxu0 %v9711_v36  ;;  %v8432_v8 = vld [vmem:[%s10260_s22 + $0xf9] sm:$0xf]  ;;  %v1116_v36 = vrot.slane %v1112_v30, 4  ;;  %1230 = vst.msk [vmem:[#allocation2 + $0x180] sm:$0xfc] %vm12930_vm9, %v1225_v56 }
  0x48   : > { %2668 = vmatprep.subr.bf16.mxu0 %v9712_v40  ;;  %v1237_v19 = vpack.c.bf16 %v8432_v8, %v8431_v7  ;;  %v8452_v40 = vld [vmem:[%s10260_s22 + $0x119] sm:$0xf]  ;;  %v8491_v8 = vld [vmem:[%s10260_s22 + $0x151] sm:$0xff] }
  0x49   : > { %1123 = vst.msk [vmem:[#allocation2 + $0x180] sm:$0x3] %vm12927_vm8, %v1116_v36  ;;  %v1322_v52 = vpack.c.bf16 %v8452_v40, %v8451_v39  ;;  %v8516_v30 = vld [vmem:[%s10260_s22 + $0x17a] sm:$0xf]  ;;  %v8447_v40 = vld [vmem:[%s10260_s22 + $0x110] sm:$0xff] }
  0x4a   : > { %1053 = vrot.lane.b32.xlu1 %v1050_v24, %s10144_s16  ;;  %v1241_v22 = vrot.slane %v1237_v19, 6  ;;  %v8454_v24 = vld [vmem:[%s10260_s22 + $0x10a] sm:$0xff] }
  0x4b   : > { %1027 = vrot.lane.b32.xlu0 %v1024_v29, %s10143_s26  ;;  %2669 = vmatpush1.bf16.msra.mxu0 %v9714_v50  ;;  %v1339_v37 = vpack.c.bf16 %v8454_v24, %v8453_v23  ;;  %v8445_v23 = vld [vmem:[%s10260_s22 + $0x100] sm:$0xff]  ;;  %v8446_v24 = vld [vmem:[%s10260_s22 + $0x108] sm:$0xff] }
  0x4c   : > { %2951 = vmatprep.subr.bf16.mxu0 %v9717_v55  ;;  %v1242_v31 = vsel %vm12917_vm3, %v1240_v15, %v1241_v22  ;;  %v1426_v55 = vpack.c.bf16 %v8476_v42, %v8475_v41  ;;  %v1313_v27 = vpack.c.bf16 %v8446_v24, %v8445_v23  ;;  %v8448_v41 = vld [vmem:[%s10260_s22 + $0x118] sm:$0xf] }
  0x4e   : > { %1135 = vrot.lane.b32.xlu1 %v1132_v38, %s10143_s26  ;;  %v1399_v38 = vpack.c.bf16 %v8470_v26, %v8469_v25  ;;  %v1430_v62 = vrot.slane %v1426_v55, 2  ;;  %v8513_v25 = vld [vmem:[%s10260_s22 + $0x162] sm:$0xff]  ;;  %v8514_v26 = vld [vmem:[%s10260_s22 + $0x16a] sm:$0xff]  ;;  %1315 = vst.msk [vmem:[#allocation2 + $0x1c0] sm:$0xff] %vm508_vm4, %v1313_v27 }
  0x4f   : > { %1029 = vrot.lane.b32.xlu0 %v10425_v14, %s10143_s26  ;;  %v1111_v14 = vpack.c.bf16 %v8406_v13, %v8405_v12  ;;  %v1638_v39 = vpack.c.bf16 %v8514_v26, %v8513_v25  ;;  %v8549_v55 = vld [vmem:[%s10260_s22 + $0x1a1] sm:$0xff]  ;;  %v8570_v27 = vld [vmem:[%s10260_s22 + $0x1c9] sm:$0xff] }
  0x50   : > { %v1403_v50 = vrot.slane %v1399_v38, 2  ;;  %v1431_v7 = vsel %vm591_vm0, %v1429_v60, %v1430_v62  ;;  %v8569_v26 = vld [vmem:[%s10260_s22 + $0x1c1] sm:$0xff] }
  0x51   : > { %v1115_v18 = vrot.slane %v1111_v14, 4  ;;  %v1513_v14 = vrot.slane %v1509_v2, 4  ;;  %v8531_v2 = vld [vmem:[%s10260_s22 + $0x191] sm:$0xff] }
  0x52   : > { %1161 = vrot.lane.b32.xlu1 %v1158_v54, %s10144_s16  ;;  %v8456_v54 = vld [vmem:[%s10260_s22 + $0x11a] sm:$0xf] }
  0x53   : > { %1055 = vrot.lane.b32.xlu0 %v10420_v9, %s10144_s16  ;;  %v1258_v9 = vpack.c.bf16 %v8436_v4, %v8435_v3  ;;  %1121 = vst.msk [vmem:[#allocation2 + $0x140] sm:$0xf0] %vm12919_vm7, %v1115_v18  ;;  %v1117_v46 = vsel %vm12946_vm1, %v1115_v18, %v1116_v36  ;;  %v8495_v3 = vld [vmem:[%s10260_s22 + $0x152] sm:$0xff]  ;;  %v8496_v4 = vld [vmem:[%s10260_s22 + $0x15a] sm:$0xf]  ;;  %v8466_v36 = vld [vmem:[%s10260_s22 + $0x128] sm:$0xff] }
  0x54   : > { %1122 = vst.msk [vmem:[#allocation2 + $0x160] sm:$0xff] %vm508_vm4, %v1117_v46  ;;  %v1536_v16 = vpack.c.bf16 %v8496_v4, %v8495_v3  ;;  %v1642_v46 = vrot.slane %v1638_v39, 6  ;;  %v8532_v3 = vld [vmem:[%s10260_s22 + $0x199] sm:$0xf] }
  0x55   : > { %v1262_v21 = vrot.slane %v1258_v9, 6  ;;  %v8555_v4 = vld [vmem:[%s10260_s22 + $0x1b2] sm:$0xff] }
  0x56   : > { %1163 = vrot.lane.b32.xlu1 %v1160_v6, %s10144_s16  ;;  %v8428_v6 = vld [vmem:[%s10260_s22 + $0xf8] sm:$0xf]  ;;  %v1540_v19 = vrot.slane %v1536_v16, 4 }
  0x57   : > { %1137 = vrot.lane.b32.xlu0 %v1134_v10, %s10143_s26  ;;  %v1263_v29 = vsel %vm12917_vm3, %v1261_v20, %v1262_v21  ;;  %v8492_v10 = vld [vmem:[%s10260_s22 + $0x159] sm:$0xf]  ;;  %v1222_v11 = vpack.c.bf16 %v8428_v6, %v8427_v5  ;;  %v8510_v21 = vld [vmem:[%s10260_s22 + $0x169] sm:$0xff] }
  0x58   : > { %v1510_v9 = vpack.c.bf16 %v8492_v10, %v8491_v8  ;;  %v8556_v5 = vld [vmem:[%s10260_s22 + $0x1ba] sm:$0xf]  ;;  %v8551_v8 = vld [vmem:[%s10260_s22 + $0x1b1] sm:$0xff] }
  0x59   : > { %v1226_v13 = vrot.slane %v1222_v11, 6  ;;  %v8552_v10 = vld [vmem:[%s10260_s22 + $0x1b9] sm:$0xf] }
  0x5a   : > { %1243 = vrot.lane.b32.xlu1 %v1240_v15, %s10143_s26  ;;  %v1535_v15 = vpack.c.bf16 %v8494_v1, %v8493_v0  ;;  %v1514_v22 = vrot.slane %v1510_v9, 4  ;;  %v1781_v24 = vpack.c.bf16 %v8552_v10, %v8551_v8  ;;  %v9718_v39 = vld [vmem:[%s12898_s1 + $0x110] ss:$8 sps:$4 sm:$0xff]  }
  0x5b   : > { %1139 = vrot.lane.b32.xlu0 %v1133_v61, %s10143_s26  ;;  %v1340_v61 = vpack.c.bf16 %v8456_v54, %v8455_v53  ;;  %v1227_v17 = vsel %vm12917_vm3, %v1225_v56, %v1226_v13  ;;  %v8467_v53 = vld [vmem:[%s10260_s22 + $0x130] sm:$0xff]  ;;  %v8485_v13 = vld [vmem:[%s10260_s22 + $0x140] sm:$0xff] }
  0x5c   : > { %1231 = vst.msk [vmem:[#allocation2 + $0x1a0] sm:$0xff] %vm508_vm4, %v1227_v17  ;;  %v1539_v18 = vrot.slane %v1535_v15, 4  ;;  %v1515_v34 = vsel %vm12946_vm1, %v1513_v14, %v1514_v22  ;;  %v8550_v56 = vld [vmem:[%s10260_s22 + $0x1a9] sm:$0xff] }
  0x5d   : > { %v1780_v1 = vpack.c.bf16 %v8550_v56, %v8549_v55  ;;  %v8590_v10 = vld [vmem:[%s10260_s22 + $0x1e9] sm:$0xff] }
  0x5e   : > { %1264 = vrot.lane.b32.xlu1 %v1261_v20, %s10144_s16  ;;  %v8509_v20 = vld [vmem:[%s10260_s22 + $0x161] sm:$0xff] }
  0x5f   : > { %1165 = vrot.lane.b32.xlu0 %v1159_v57, %s10144_s16  ;;  %v1400_v57 = vpack.c.bf16 %v8472_v45, %v8471_v44  ;;  %v1617_v28 = vpack.c.bf16 %v8510_v21, %v8509_v20  ;;  %v1314_v44 = vpack.c.bf16 %v8448_v41, %v8447_v40  ;;  %v1618_v45 = vpack.c.bf16 %v8512_v33, %v8511_v32  ;;  %v8536_v20 = vld [vmem:[%s10260_s22 + $0x19a] sm:$0xf]  ;;  %v8574_v41 = vld [vmem:[%s10260_s22 + $0x1ca] sm:$0xff] }
  0x60   : > { %v1784_v17 = vrot.slane %v1780_v1, 2  ;;  %v1807_v21 = vpack.c.bf16 %v8556_v5, %v8555_v4  ;;  %v9720_v33 = vld [vmem:[%s12898_s1 + $0x114] ss:$8 sps:$4 sm:$0xff]   ;;  %v1890_v40 = vpack.c.bf16 %v8570_v27, %v8569_v26  ;;  %v8506_v1 = vld [vmem:[%s10260_s22 + $0x168] sm:$0xff] }
  0x61   : > { %v1404_v63 = vrot.slane %v1400_v57, 2  ;;  %v1621_v38 = vrot.slane %v1617_v28, 6  ;;  %1316 = vst.msk [vmem:[#allocation2 + $0x1e0] sm:$0x3f] %vm12913_vm2, %v1314_v44  ;;  %v1622_v48 = vrot.slane %v1618_v45, 6  ;;  %vm548_vm2 = vcmask 1048064  }
  0x62   : > { %1266 = vrot.lane.b32.xlu1 %v1263_v29, %s10144_s16  ;;  %v8515_v29 = vld [vmem:[%s10260_s22 + $0x172] sm:$0xff]  ;;  %v9715_v28 = vld [vmem:[%s12898_s1 + $0x100] ss:$8 sps:$4 sm:$0xff]   ;;  %v9723_v44 = vld [vmem:[%s12898_s1 + $0x124] ss:$8 sps:$4 sm:$0xff]   ;;  %v10681_v55 = vrot.slane %v1890_v40, 4 }
  0x63   : > { %1245 = vrot.lane.b32.xlu0 %v1242_v31, %s10143_s26  ;;  %v1405_v12 = vsel %vm591_vm0, %v1403_v50, %v1404_v63  ;;  %v1541_v31 = vsel %vm12946_vm1, %v1539_v18, %v1540_v19  ;;  %v1639_v42 = vpack.c.bf16 %v8516_v30, %v8515_v29  ;;  %v8468_v57 = vld [vmem:[%s10260_s22 + $0x138] sm:$0xf]  ;;  %v1623_v59 = vsel %vm12917_vm3, %v1621_v38, %v1622_v48  ;;  %v8589_v4 = vld [vmem:[%s10260_s22 + $0x1e1] sm:$0xff] }
  0x64   : > { %v8571_v45 = vld [vmem:[%s10260_s22 + $0x1d1] sm:$0xff]  ;;  %v8576_v48 = vld [vmem:[%s10260_s22 + $0x1da] sm:$0xf] }
  0x65   : > { %v1643_v47 = vrot.slane %v1639_v42, 6  ;;  %v8487_v42 = vld [vmem:[%s10260_s22 + $0x150] sm:$0xff] }
  0x66   : > { %1343 = vrot.lane.b32.xlu1 %v1339_v37, %s10144_s16  ;;  %v1382_v37 = vpack.c.bf16 %v8466_v36, %v8465_v35 }
  0x67   : > { %1325 = vrot.lane.b32.xlu0 %v1321_v43, %s10143_s26  ;;  %v1644_v54 = vsel %vm12917_vm3, %v1642_v46, %v1643_v47  ;;  %vm12921_vm3 = vcmask 1046016   ;;  %v8575_v47 = vld [vmem:[%s10260_s22 + $0x1d2] sm:$0xff] }
  0x68   : > { %v1386_v43 = vrot.slane %v1382_v37, 2  ;;  %v10652_v37 = vld [vmem:[%s10260_s22 + $0x1c2] sm:$0xff] }
  0x69   : > { %v1916_v56 = vpack.c.bf16 %v8574_v41, %v10652_v37  ;;  %v9735_v41 = vld [vmem:[%s12898_s1 + $0x164] ss:$8 sps:$4 sm:$0xff]  }
  0x6a   : > { %1406 = vrot.lane.b32.xlu1 %v1403_v50, %s10143_s26  ;;  %1392 = vst.msk [vmem:[#allocation2 + $0x1e0] sm:$0xc0] %vm12914_vm5, %v1386_v43  ;;  %v8530_v50 = vld [vmem:[%s10260_s22 + $0x189] sm:$0xff]  ;;  %vm12947_vm5 = vcmask 261120  }
  0x6b   : > { %1327 = vrot.lane.b32.xlu0 %v1322_v52, %s10143_s26  ;;  %v8534_v52 = vld [vmem:[%s10260_s22 + $0x18a] sm:$0xff] }
  0x6c   : > { %v1720_v0 = vpack.c.bf16 %v8534_v52, %v8533_v51 }
  0x6e   : > { %1432 = vrot.lane.b32.xlu1 %v1429_v60, %s10144_s16  ;;  %v1383_v60 = vpack.c.bf16 %v8468_v57, %v8467_v53  ;;  %v9721_v57 = vld [vmem:[%s12898_s1 + $0x120] ss:$8 sps:$4 sm:$0xff]  }
  0x6f   : > { %1345 = vrot.lane.b32.xlu0 %v1340_v61, %s10144_s16 }
  0x70   : > { %v1387_v6 = vrot.slane %v1383_v60, 2  ;;  %v9726_v60 = vld [vmem:[%s12898_s1 + $0x134] ss:$8 sps:$4 sm:$0xff]  }
  0x72   : > { %1434 = vrot.lane.b32.xlu1 %v1431_v7, %s10144_s16  ;;  %v1702_v7 = vpack.c.bf16 %v8530_v50, %v8529_v49  ;;  %1394 = vst.msk [vmem:[#allocation2 + $0x220] sm:$0xf] %vm12918_vm6, %v1387_v6  ;;  %vm12920_vm6 = vcmask 259072   ;;  %v8488_v49 = vld [vmem:[%s10260_s22 + $0x158] sm:$0xf] }
  0x73   : > { %1408 = vrot.lane.b32.xlu0 %v1405_v12, %s10143_s26  ;;  %v1388_v12 = vsel %vm591_vm0, %v1386_v43, %v1387_v6  ;;  %v1493_v52 = vpack.c.bf16 %v8488_v49, %v8487_v42 }
  0x74   : > { %1393 = vst.msk [vmem:[#allocation2 + $0x200] sm:$0xff] %vm508_vm4, %v1388_v12 }
  0x76   : > { %1516 = vrot.lane.b32.xlu1 %v1513_v14, %s10143_s26  ;;  %v8486_v14 = vld [vmem:[%s10260_s22 + $0x148] sm:$0xff] }
  0x77   : > { %1410 = vrot.lane.b32.xlu0 %v1404_v63, %s10143_s26  ;;  %v8554_v63 = vld [vmem:[%s10260_s22 + $0x1aa] sm:$0xff]  ;;  %v1492_v16 = vpack.c.bf16 %v8486_v14, %v8485_v13 }
  0x7a   : > { %1542 = vrot.lane.b32.xlu1 %v1539_v18, %s10144_s16  ;;  %v1703_v18 = vpack.c.bf16 %v8532_v3, %v8531_v2 }
  0x7b   : > { %1436 = vrot.lane.b32.xlu0 %v1430_v62, %s10144_s16  ;;  %v8553_v62 = vld [vmem:[%s10260_s22 + $0x1a2] sm:$0xff] }
  0x7c   : > { %v1806_v9 = vpack.c.bf16 %v8554_v63, %v8553_v62 }
  0x7e   : > { %1544 = vrot.lane.b32.xlu1 %v1541_v31, %s10144_s16  ;;  %v1810_v29 = vrot.slane %v1806_v9, 2  ;;  %v10643_v31 = vrot.slane %v1807_v21, 2  ;;  %v9729_v9 = vld [vmem:[%s12898_s1 + $0x144] ss:$8 sps:$4 sm:$0xff]   ;;  %v9727_v21 = vld [vmem:[%s12898_s1 + $0x140] ss:$8 sps:$4 sm:$0xff]  }
  0x7f   : > { %1518 = vrot.lane.b32.xlu0 %v1515_v34, %s10143_s26  ;;  %v10648_v34 = vrot.slane %v1781_v24, 2  ;;  %v8592_v24 = vld [vmem:[%s10260_s22 + $0x1f9] sm:$0xf] }
  0x80   : > { %v1812_v43 = vsel %vm591_vm0, %v1810_v29, %v10643_v31 }
  0x81   : > { %v1786_v51 = vsel %vm591_vm0, %v1784_v17, %v10648_v34 }
  0x82   : > { %1624 = vrot.lane.b32.xlu1 %v1621_v38, %s10143_s26 }
  0x83   : > { %1520 = vrot.lane.b32.xlu0 %v1514_v22, %s10143_s26  ;;  %v10628_v22 = vrot.slane %v1492_v16, 4  ;;  %v8593_v16 = vld [vmem:[%s10260_s22 + $0x1e2] sm:$0xff] }
  0x85   : > { %1502 = vst.msk [vmem:[#allocation2 + $0x220] sm:$0xf0] %vm12919_vm7, %v10628_v22  ;;  %vm12926_vm7 = vcmask 1048324  }
  0x86   : > { %1645 = vrot.lane.b32.xlu1 %v1642_v46, %s10144_s16  ;;  %v8572_v46 = vld [vmem:[%s10260_s22 + $0x1d9] sm:$0xf] }
  0x87   : > { %1546 = vrot.lane.b32.xlu0 %v1540_v19, %s10144_s16  ;;  %v8535_v19 = vld [vmem:[%s10260_s22 + $0x192] sm:$0xff]  ;;  %v1891_v62 = vpack.c.bf16 %v8572_v46, %v8571_v45  ;;  %v9733_v45 = vld [vmem:[%s12898_s1 + $0x160] ss:$8 sps:$4 sm:$0xff]  }
  0x88   : > { %v523_v58 = vpop.permute.xlu1 %522  ;;  %v1721_v30 = vpack.c.bf16 %v8536_v20, %v8535_v19  ;;  %v8595_v19 = vld [vmem:[%s10260_s22 + $0x1f2] sm:$0xff]  ;;  %v8596_v20 = vld [vmem:[%s10260_s22 + $0x1fa] sm:$0xf] }
  0x89   : > { %531 = vst.msk [vmem:[#allocation2 + $0x20] sm:$0x3f] %vm12916_vm10, %v523_v58  ;;  %v521_v61 = vpop.permute.xlu0 %520  ;;  %vm12922_vm10 = vcmask 261126   ;;  %v10714_v14 = vrot.slane %v1891_v62, 4 }
  0x8a   : > { %533 = vst.msk [vmem:[#allocation2 + $0x28] sm:$0x3f] %vm12915_vm11, %v523_v58  ;;  %1647 = vrot.lane.b32.xlu1 %v1644_v54, %s10144_s16  ;;  %vm12923_vm11 = vcmask 1048070   ;;  %v1497_v58 = vrot.slane %v1493_v52, 4  ;;  %v8317_v52 = vld [vmem:[%s10260_s22 + $0x23] sm:$0xff] }
  0x8b   : > { %527 = vst.msk [vmem:[#allocation2] sm:$0xff] %vm526_vm12, %v521_v61  ;;  %1626 = vrot.lane.b32.xlu0 %v1623_v59, %s10143_s26  ;;  %v1917_v59 = vpack.c.bf16 %v8576_v48, %v8575_v47  ;;  %v1896_v27 = vsel %vm12946_vm1, %v10681_v55, %v10714_v14  ;;  %v9738_v48 = vld [vmem:[%s12898_s1 + $0x174] ss:$8 sps:$4 sm:$0xff]  }
  0x8c   : > { %529 = vst.msk [vmem:[#allocation2 + $0x8] sm:$0xff] %vm528_vm13, %v521_v61  ;;  %v615_v11 = vpop.permute.xlu1 %614  ;;  %v1498_v63 = vsel %vm12946_vm1, %v10628_v22, %v1497_v58 }
  0x8d   : > { %624 = vst.msk [vmem:[#allocation2 + $0x20] sm:$0xc0] %vm12938_vm14, %v615_v11  ;;  %v543_v15 = vpop.permute.xlu0 %542  ;;  %v10706_v8 = vrot.slane %v1917_v59, 4  ;;  %v557_v59 = vld [vmem:[%s10260_s22 + $0xb] sm:$0xff] }
  0x8e   : > { %626 = vst.msk [vmem:[#allocation2 + $0x28] sm:$0xc0] %vm12924_vm15, %v615_v11  ;;  %1724 = vrot.lane.b32.xlu1 %v1720_v0, %s10144_s16  ;;  %vm12931_vm15 = vcmask 261124   ;;  %v8505_v0 = vld [vmem:[%s10260_s22 + $0x160] sm:$0xff]  ;;  %v9724_v11 = vld [vmem:[%s12898_s1 + $0x130] ss:$8 sps:$4 sm:$0xff]  }
  0x8f   : > { %549 = vst.msk [vmem:[#allocation2 + $0x8] sm:$0xff] %vm548_vm2, %v543_v15  ;;  %1706 = vrot.lane.b32.xlu0 %v1702_v7, %s10143_s26  ;;  %v1602_v5 = vpack.c.bf16 %v8506_v1, %v8505_v0  ;;  %v1920_v7 = vrot.slane %v1916_v56, 4  ;;  %v8525_v0 = vld [vmem:[%s10260_s22 + $0x180] sm:$0xff] }
  0x90   : > { %551 = vst.msk [vmem:[#allocation2 + $0x10] sm:$0xff] %vm12947_vm5, %v543_v15  ;;  %v645_v23 = vpop.permute.xlu1 %644 }
  0x91   : > { %654 = vst.msk [vmem:[#allocation2 + $0x28] sm:$0xc0] %vm12923_vm11, %v645_v23  ;;  %v545_v25 = vpop.permute.xlu0 %544  ;;  %vm12932_vm11 = vcmask 1048068   ;;  %v10712_v12 = vrot.slane %v1602_v5, 6  ;;  %v1922_v22 = vsel %vm12946_vm1, %v1920_v7, %v10706_v8 }
  0x92   : > { %656 = vst.msk [vmem:[#allocation2 + $0x30] sm:$0xc0] %vm12922_vm10, %v645_v23  ;;  %1787 = vrot.lane.b32.xlu1 %v1784_v17, %s10143_s26  ;;  %v2070_v38 = vld [vmem:[#allocation2] sm:$0xff]  ;;  %vm12933_vm10 = vcmask 519168   ;;  %v8594_v17 = vld [vmem:[%s10260_s22 + $0x1ea] sm:$0xff] }
  0x93   : > { %553 = vst.msk [vmem:[#allocation2 + $0x28] sm:$0x3f] %vm12921_vm3, %v545_v25  ;;  %1708 = vrot.lane.b32.xlu0 %v1703_v18, %s10143_s26  ;;  %vm629_vm3 = vcmask 1044224   ;;  %v1998_v18 = vpack.c.bf16 %v8590_v10, %v8589_v4  ;;  %v8591_v23 = vld [vmem:[%s10260_s22 + $0x1f1] sm:$0xff] }
  0x94   : > { %555 = vst.msk [vmem:[#allocation2 + $0x30] sm:$0x3f] %vm12920_vm6, %v545_v25  ;;  %v647_v32 = vpop.permute.xlu1 %646  ;;  %vm12925_vm6 = vcmask 523268   ;;  %v2074_v2 = vld [vmem:[#allocation2 + $0x20] sm:$0xff]  ;;  %v9732_v25 = vld [vmem:[%s12898_s1 + $0x154] ss:$8 sps:$4 sm:$0xff]  }
  0x95   : > { %v617_v36 = vpop.permute.xlu0 %616  ;;  %658 = vst.msk [vmem:[#allocation2 + $0x50] sm:$0xff] %vm12947_vm5, %v647_v32 }
  0x96   : > { %v2071_v35 = vld [vmem:[#allocation2 + $0x8] sm:$0xff]  ;;  %627 = vst.msk [vmem:[#allocation2 + $0x40] sm:$0xff] %vm526_vm12, %v617_v36  ;;  %1813 = vrot.lane.b32.xlu1 %v1810_v29, %s10144_s16 }
  0x97   : > { %2670 = vmatprep.mubr.bf16.mxu0 %v2071_v35  ;;  %628 = vst.msk [vmem:[#allocation2 + $0x48] sm:$0xff] %vm528_vm13, %v617_v36  ;;  %1726 = vrot.lane.b32.xlu0 %v1721_v30, %s10144_s16  ;;  %v9730_v35 = vld [vmem:[%s12898_s1 + $0x150] ss:$8 sps:$4 sm:$0xff]  }
  0x98   : > { %2671 = vmatmul.mubr.bf16.vlgmr.msra.gmra.mrb[0].mxu0 %v2070_v38  ;;  %657 = vst.msk [vmem:[#allocation2 + $0x48] sm:$0xff] %vm548_vm2, %v647_v32  ;;  %v738_v50 = vpop.permute.xlu1 %737  ;;  %v2019_v32 = vpack.c.bf16 %v8594_v17, %v8593_v16  ;;  %v8508_v36 = vld [vmem:[%s10260_s22 + $0x178] sm:$0xf]  ;;  %v1999_v38 = vpack.c.bf16 %v8592_v24, %v8591_v23  ;;  %v8545_v16 = vld [vmem:[%s10260_s22 + $0x1a0] sm:$0xff]  ;;  %v8546_v17 = vld [vmem:[%s10260_s22 + $0x1a8] sm:$0xff] }
  0x99   : > { %2952 = vmatpush1.bf16.msra.mxu0 %v9715_v28  ;;  %747 = vst.msk [vmem:[#allocation2 + $0x60] sm:$0xf0] %vm12926_vm7, %v738_v50  ;;  %v619_v54 = vpop.permute.xlu0 %618  ;;  %vm12928_vm7 = vcmask 257024   ;;  %v8527_v23 = vld [vmem:[%s10260_s22 + $0x190] sm:$0xff]  ;;  %v8528_v24 = vld [vmem:[%s10260_s22 + $0x198] sm:$0xf] }
  0x9a   : > { %v2075_v53 = vld [vmem:[#allocation2 + $0x28] sm:$0xff]  ;;  %749 = vst.msk [vmem:[#allocation2 + $0x68] sm:$0xf0] %vm12925_vm6, %v738_v50  ;;  %2953 = vmatprep.subr.bf16.mxu0 %v9720_v33  ;;  %1815 = vrot.lane.b32.xlu1 %v1812_v43, %s10144_s16  ;;  %vm12929_vm6 = vcmask 1043968   ;;  %v8507_v33 = vld [vmem:[%s10260_s22 + $0x170] sm:$0xff]  ;;  %v2023_v42 = vrot.slane %v2019_v32, 6 }
  0x9b   : > { %2680 = vmatprep.mubr.bf16.mxu0 %v2075_v53  ;;  %630 = vst.msk [vmem:[#allocation2 + $0x60] sm:$0xf] %vm629_vm3, %v619_v54  ;;  %1789 = vrot.lane.b32.xlu0 %v1786_v51, %s10143_s26  ;;  %v8319_v43 = vld [vmem:[%s10260_s22 + $0x33] sm:$0xff]  ;;  %v2003_v51 = vrot.slane %v1999_v38, 6  ;;  %v8318_v53 = vld [vmem:[%s10260_s22 + $0x2b] sm:$0xff] }
  0x9c   : > { %632 = vst.msk [vmem:[#allocation2 + $0x68] sm:$0xf] %vm12933_vm10, %v619_v54  ;;  %v768_v61 = vpop.permute.xlu1 %767  ;;  %vm12936_vm10 = vcmask 1041920   ;;  %v667_v5 = vpack.c.bf16 %v8318_v53, %v8317_v52  ;;  %v8359_v32 = vld [vmem:[%s10260_s22 + $0x73] sm:$0xff]  ;;  %v8397_v52 = vld [vmem:[%s10260_s22 + $0xa3] sm:$0xff] }
  0x9d   : > { %2954 = vmatpush1.bf16.msra.mxu0 %v9718_v39  ;;  %1504 = vst.msk [vmem:[#allocation2 + $0x260] sm:$0x3] %vm12927_vm8, %v1497_v58  ;;  %v649_v3 = vpop.permute.xlu0 %648  ;;  %vm12934_vm8 = vcmask 1048322   ;;  %v2078_v30 = vld [vmem:[#allocation2 + $0x40] sm:$0xff]  ;;  %v1603_v39 = vpack.c.bf16 %v8508_v36, %v8507_v33  ;;  %v8360_v33 = vld [vmem:[%s10260_s22 + $0x7b] sm:$0xf] }
  0x9e   : > { %777 = vst.msk [vmem:[#allocation2 + $0x68] sm:$0xf0] %vm12932_vm11, %v768_v61  ;;  %2955 = vmatprep.subr.bf16.mxu0 %v9723_v44  ;;  %1897 = vrot.lane.b32.xlu1 %v10681_v55, %s10143_s26  ;;  %vm12937_vm11 = vcmask 261122   ;;  %v8320_v44 = vld [vmem:[%s10260_s22 + $0x3b] sm:$0xf]  ;;  %v556_v58 = vld [vmem:[%s10260_s22 + $0x3] sm:$0xff]  ;;  %v897_v38 = vpack.c.bf16 %v8360_v33, %v8359_v32 }
  0x9f   : > { %779 = vst.msk [vmem:[#allocation2 + $0x70] sm:$0xf0] %vm12931_vm15, %v768_v61  ;;  %v2079_v6 = vld [vmem:[#allocation2 + $0x48] sm:$0xff]  ;;  %1791 = vrot.lane.b32.xlu0 %v10648_v34, %s10143_s26  ;;  %vm12939_vm15 = vcmask 1048066   ;;  %v2020_v34 = vpack.c.bf16 %v8596_v20, %v8595_v19  ;;  %v1607_v46 = vrot.slane %v1603_v39, 6  ;;  %v668_v62 = vpack.c.bf16 %v8320_v44, %v8319_v43 }
  0xa0   : > { %1503 = vst.msk [vmem:[#allocation2 + $0x240] sm:$0xff] %vm508_vm4, %v1498_v63  ;;  %2681 = vmatmul.mubr.bf16.gmra.mrb[4].mxu0 %v2074_v2  ;;  %v770_v13 = vpop.permute.xlu1 %769  ;;  %v559_v61 = vld [vmem:[%s10260_s22 + $0x1b] sm:$0xf]  ;;  %v671_v19 = vrot.slane %v667_v5, 2  ;;  %v1763_v20 = vpack.c.bf16 %v8546_v17, %v8545_v16  ;;  %v8417_v16 = vld [vmem:[%s10260_s22 + $0xc3] sm:$0xff] }
  0xa1   : > { %660 = vst.msk [vmem:[#allocation2 + $0x68] sm:$0xf] %vm12929_vm6, %v649_v3  ;;  %2690 = vmatprep.mubr.bf16.mxu0 %v2079_v6  ;;  %2956 = vmatpush1.bf16.msra.mxu0 %v9721_v57  ;;  %v740_v15 = vpop.permute.xlu0 %739  ;;  %vm752_vm6 = vcmask 1042176   ;;  %v2024_v47 = vrot.slane %v2020_v34, 6  ;;  %v558_v57 = vld [vmem:[%s10260_s22 + $0x13] sm:$0xff]  ;;  %v8337_v6 = vld [vmem:[%s10260_s22 + $0x43] sm:$0xff] }
  0xa2   : > { %662 = vst.msk [vmem:[#allocation2 + $0x70] sm:$0xf] %vm12928_vm7, %v649_v3  ;;  %2957 = vmatprep.subr.bf16.mxu0 %v9726_v60  ;;  %vm865_vm7 = vcmask 523266   ;;  %1923 = vrot.lane.b32.xlu1 %v1920_v7, %s10144_s16  ;;  %v2082_v49 = vld [vmem:[#allocation2 + $0x60] sm:$0xff]  ;;  %v9736_v63 = vld [vmem:[%s12898_s1 + $0x170] ss:$8 sps:$4 sm:$0xff]   ;;  %v561_v10 = vpack.c.bf16 %v559_v61, %v558_v57 }
  0xa3   : > { %781 = vst.msk [vmem:[#allocation2 + $0x90] sm:$0xff] %vm12947_vm5, %v770_v13  ;;  %1817 = vrot.lane.b32.xlu0 %v10643_v31, %s10144_s16  ;;  %v2002_v31 = vrot.slane %v1998_v18, 6  ;;  %v8526_v3 = vld [vmem:[%s10260_s22 + $0x188] sm:$0xff]  ;;  %v8380_v57 = vld [vmem:[%s10260_s22 + $0x9b] sm:$0xf] }
  0xa4   : > { %1611 = vst.msk [vmem:[#allocation2 + $0x260] sm:$0xfc] %vm12930_vm9, %v10712_v12  ;;  %vm12940_vm9 = vcmask 517120   ;;  %v858_v26 = vpop.permute.xlu1 %857  ;;  %v8338_v7 = vld [vmem:[%s10260_s22 + $0x4b] sm:$0xff] }
  0xa5   : > { %750 = vst.msk [vmem:[#allocation2 + $0x80] sm:$0xff] %vm526_vm12, %v740_v15  ;;  %2958 = vmatpush1.bf16.msra.mxu0 %v9724_v11  ;;  %v742_v29 = vpop.permute.xlu0 %741  ;;  %v560_v11 = vpack.c.bf16 %v557_v59, %v556_v58  ;;  %v8398_v58 = vld [vmem:[%s10260_s22 + $0xab] sm:$0xff]  ;;  %v8377_v59 = vld [vmem:[%s10260_s22 + $0x83] sm:$0xff] }
  0xa6   : > { %751 = vst.msk [vmem:[#allocation2 + $0x88] sm:$0xff] %vm528_vm13, %v740_v15  ;;  %2959 = vmatprep.subr.bf16.mxu0 %v9729_v9  ;;  %1925 = vrot.lane.b32.xlu1 %v1922_v22, %s10144_s16  ;;  %v790_v22 = vpack.c.bf16 %v8338_v7, %v8337_v6  ;;  %v1070_v6 = vpack.c.bf16 %v8398_v58, %v8397_v52 }
  0xa7   : > { %780 = vst.msk [vmem:[#allocation2 + $0x88] sm:$0xff] %vm548_vm2, %v770_v13  ;;  %1899 = vrot.lane.b32.xlu0 %v1896_v27, %s10143_s26  ;;  %v8339_v13 = vld [vmem:[%s10260_s22 + $0x53] sm:$0xff]  ;;  %v1695_v27 = vpack.c.bf16 %v8528_v24, %v8527_v23 }
  0xa8   : > { %v2083_v28 = vld [vmem:[#allocation2 + $0x68] sm:$0xff]  ;;  %864 = vst.msk [vmem:[#allocation2 + $0xa0] sm:$0xfc] %vm12934_vm8, %v858_v26  ;;  %2691 = vmatmul.mubr.bf16.gmra.mrb[8].mxu0 %v2078_v30  ;;  %vm12935_vm8 = vcmask 254976   ;;  %v881_v37 = vpop.permute.xlu1 %880  ;;  %v794_v36 = vrot.slane %v790_v22, 4 }
  0xa9   : > { %866 = vst.msk [vmem:[#allocation2 + $0xa8] sm:$0xfc] %vm865_vm7, %v858_v26  ;;  %2700 = vmatprep.mubr.bf16.mxu0 %v2083_v28  ;;  %2960 = vmatpush1.bf16.msra.mxu0 %v9727_v21  ;;  %v772_v40 = vpop.permute.xlu0 %771  ;;  %v10822_v26 = vrot.slane %v1763_v20, 2  ;;  %v9739_v28 = vld [vmem:[%s12898_s1 + $0x180] ss:$8 sps:$4 sm:$0xff]  }
  0xaa   : > { %753 = vst.msk [vmem:[#allocation2 + $0xa0] sm:$0x3] %vm752_vm6, %v742_v29  ;;  %2961 = vmatprep.subr.bf16.mxu0 %v9732_v25  ;;  %2005 = vrot.lane.b32.xlu1 %v2002_v31, %s10143_s26 }
  0xab   : > { %755 = vst.msk [vmem:[#allocation2 + $0xa8] sm:$0x3] %vm12940_vm9, %v742_v29  ;;  %1901 = vrot.lane.b32.xlu0 %v10714_v14, %s10143_s26  ;;  %v8340_v14 = vld [vmem:[%s10260_s22 + $0x5b] sm:$0xf]  ;;  %v9741_v29 = vld [vmem:[%s12898_s1 + $0x184] ss:$8 sps:$4 sm:$0xff]  }
  0xac   : > { %887 = vst.msk [vmem:[#allocation2 + $0xa8] sm:$0xfc] %vm12939_vm15, %v881_v37  ;;  %v883_v50 = vpop.permute.xlu1 %882  ;;  %v2086_v21 = vld [vmem:[#allocation2 + $0x80] sm:$0xff]  ;;  %vm13017_vm15 = vcmask 1046016   ;;  %vm13018_vm9 = vcmask 259072  }
  0xad   : > { %889 = vst.msk [vmem:[#allocation2 + $0xb0] sm:$0xfc] %vm12937_vm11, %v881_v37  ;;  %2962 = vmatpush1.bf16.msra.mxu0 %v9730_v35  ;;  %v860_v56 = vpop.permute.xlu0 %859  ;;  %vm13012_vm11 = vcmask 521216   ;;  %v8357_v35 = vld [vmem:[%s10260_s22 + $0x63] sm:$0xff]  ;;  %v8358_v37 = vld [vmem:[%s10260_s22 + $0x6b] sm:$0xff] }
  0xae   : > { %783 = vst.msk [vmem:[#allocation2 + $0xa8] sm:$0x3] %vm12936_vm10, %v772_v40  ;;  %v2087_v55 = vld [vmem:[#allocation2 + $0x88] sm:$0xff]  ;;  %2963 = vmatprep.subr.bf16.mxu0 %v9735_v41  ;;  %2026 = vrot.lane.b32.xlu1 %v2023_v42, %s10144_s16  ;;  %v896_v44 = vpack.c.bf16 %v8358_v37, %v8357_v35 }
  0xaf   : > { %785 = vst.msk [vmem:[#allocation2 + $0xb0] sm:$0x3] %vm12935_vm8, %v772_v40  ;;  %vm13008_vm8 = vcmask 1041408   ;;  %1927 = vrot.lane.b32.xlu0 %v10706_v8, %s10144_s16  ;;  %v1694_v8 = vpack.c.bf16 %v8526_v3, %v8525_v0  ;;  %v8566_v3 = vld [vmem:[%s10260_s22 + $0x1c8] sm:$0xff] }
  0xb0   : > { %v1608_v54 = vsel %vm13008_vm8, %v10712_v12, %v1607_v46  ;;  %891 = vst.msk [vmem:[#allocation2 + $0xd0] sm:$0xff] %vm12947_vm5, %v883_v50  ;;  %2701 = vmatmul.mubr.bf16.gmra.mrb[12].mxu0 %v2082_v49  ;;  %v2025_v60 = vsel %vm13008_vm8, %v2023_v42, %v2024_v47  ;;  %v963_v1 = vpop.permute.xlu1 %962  ;;  %vm13009_vm10 = vmmov %vm13008_vm8  ;;  %v10805_v12 = vrot.slane %v668_v62, 2  ;;  %vm13011_vm8 = vcmask 1046272   ;;  %v8400_v46 = vld [vmem:[%s10260_s22 + $0xbb] sm:$0xf]  ;;  %v8547_v47 = vld [vmem:[%s10260_s22 + $0x1b0] sm:$0xff] }
  0xb1   : > { %1612 = vst.msk [vmem:[#allocation2 + $0x280] sm:$0xff] %vm508_vm4, %v1608_v54  ;;  %2710 = vmatprep.mubr.bf16.mxu0 %v2087_v55  ;;  %v2004_v2 = vsel %vm13009_vm10, %v2002_v31, %v2003_v51  ;;  %2964 = vmatpush1.bf16.msra.mxu0 %v9733_v45  ;;  %v945_v4 = vpop.permute.xlu0 %944  ;;  %1696 = vst.msk [vmem:[#allocation2 + $0x2a0] sm:$0xff] %vm508_vm4, %v1694_v8  ;;  %vm13010_vm10 = vcmask 523270   ;;  %v791_v31 = vpack.c.bf16 %v8340_v14, %v8339_v13  ;;  %v2090_v39 = vld [vmem:[#allocation2 + $0xa0] sm:$0xff]  ;;  %v8399_v45 = vld [vmem:[%s10260_s22 + $0xb3] sm:$0xff]  ;;  %v900_v55 = vrot.slane %v896_v44, 6 }
  0xb2   : > { %867 = vst.msk [vmem:[#allocation2 + $0xc0] sm:$0xff] %vm526_vm12, %v860_v56  ;;  %2965 = vmatprep.subr.bf16.mxu0 %v9738_v48  ;;  %950 = vst.msk [vmem:[#allocation2 + $0xe0] sm:$0xff] %vm526_vm12, %v945_v4  ;;  %2028 = vrot.lane.b32.xlu1 %v2025_v60, %s10144_s16  ;;  %v673_v25 = vsel %vm591_vm0, %v671_v19, %v10805_v12  ;;  %v901_v48 = vrot.slane %v897_v38, 6  ;;  %v8548_v49 = vld [vmem:[%s10260_s22 + $0x1b8] sm:$0xf]  ;;  %v8378_v60 = vld [vmem:[%s10260_s22 + $0x8b] sm:$0xff]  ;;  %v1071_v61 = vpack.c.bf16 %v8400_v46, %v8399_v45 }
  0xb3   : > { %868 = vst.msk [vmem:[#allocation2 + $0xc8] sm:$0xff] %vm528_vm13, %v860_v56  ;;  %951 = vst.msk [vmem:[#allocation2 + $0xe8] sm:$0xff] %vm528_vm13, %v945_v4  ;;  %2007 = vrot.lane.b32.xlu0 %v2004_v2, %s10143_s26  ;;  %s10145_s26 = smov 32   ;;  %v795_v41 = vrot.slane %v791_v31, 4  ;;  %v1764_v53 = vpack.c.bf16 %v8548_v49, %v8547_v47  ;;  %v8379_v56 = vld [vmem:[%s10260_s22 + $0x93] sm:$0xff]  ;;  %v8565_v2 = vld [vmem:[%s10260_s22 + $0x1c0] sm:$0xff] }
  0xb4   : > { %890 = vst.msk [vmem:[#allocation2 + $0xc8] sm:$0xff] %vm548_vm2, %v883_v50  ;;  %968 = vst.msk [vmem:[#allocation2 + $0xe8] sm:$0xff] %vm548_vm2, %v963_v1  ;;  %v1026_v15 = vpop.permute.xlu1 %1025  ;;  %v1873_v7 = vpack.c.bf16 %v8566_v3, %v8565_v2  ;;  %v9742_v14 = vld [vmem:[%s12898_s1 + $0x190] ss:$8 sps:$4 sm:$0xff]   ;;  %v9745_v47 = vld [vmem:[%s12898_s1 + $0x1a0] ss:$8 sps:$4 sm:$0xff]  }
  0xb5   : > { %969 = vst.msk [vmem:[#allocation2 + $0xf0] sm:$0xff] %vm12947_vm5, %v963_v1  ;;  %2966 = vmatpush1.bf16.msra.mxu0 %v9736_v63  ;;  %v2091_v9 = vld [vmem:[#allocation2 + $0xa8] sm:$0xff]  ;;  %v947_v18 = vpop.permute.xlu0 %946  ;;  %v796_v51 = vsel %vm12946_vm1, %v794_v36, %v795_v41  ;;  %v1768_v62 = vrot.slane %v1764_v53, 2  ;;  %v8568_v31 = vld [vmem:[%s10260_s22 + $0x1d8] sm:$0xf]  ;;  %s8304_s16 = sshll.u32 %s13220_s28, 3 }
  0xb6   : > { %1034 = vst.msk [vmem:[#allocation2 + $0x100] sm:$0xc0] %vm12938_vm14, %v1026_v15  ;;  %566 = vrot.lane.b32.xlu1 %v561_v10, %s10145_s26  ;;  %vm13016_vm14 = vcmask 783360   ;;  %2967 = vmatprep.subr.bf16.mxu0 %v9741_v29  ;;  %v977_v10 = vpack.c.bf16 %v8380_v57, %v8379_v56  ;;  %v1877_v13 = vrot.slane %v1873_v7, 4  ;;  %v8567_v29 = vld [vmem:[%s10260_s22 + $0x1d0] sm:$0xff]  ;;  %v8437_v49 = vld [vmem:[%s10260_s22 + $0xe3] sm:$0xff]  ;;  %s499_s30 = scalar_lea.vmem %s12912_s15, %s8304_s16 }
  0xb7   : > { %1035 = vst.msk [vmem:[#allocation2 + $0x108] sm:$0xc0] %vm13010_vm10, %v1026_v15  ;;  %564 = vrot.lane.b32.xlu0 %v560_v11, %s10145_s26  ;;  %vm13014_vm10 = vcmask 261126   ;;  %v1769_v1 = vsel %vm591_vm0, %v10822_v26, %v1768_v62  ;;  %v1075_v11 = vrot.slane %v1071_v61, 2  ;;  %v9744_v15 = vld [vmem:[%s12898_s1 + $0x194] ss:$8 sps:$4 sm:$0xff]   ;;  %v1874_v33 = vpack.c.bf16 %v8568_v31, %v8567_v29 }
  0xb8   : > { %952 = vst.msk [vmem:[#allocation2 + $0x100] sm:$0x3f] %vm13011_vm8, %v947_v18  ;;  %2711 = vmatmul.mubr.bf16.gmra.mrb[16].mxu0 %v2086_v21  ;;  %v1052_v30 = vpop.permute.xlu1 %1051  ;;  %vm13015_vm8 = vcmask 785414   ;;  %v8459_v29 = vld [vmem:[%s10260_s22 + $0x113] sm:$0xff]  ;;  %v8460_v31 = vld [vmem:[%s10260_s22 + $0x11b] sm:$0xf] }
  0xb9   : > { %953 = vst.msk [vmem:[#allocation2 + $0x108] sm:$0x3f] %vm13012_vm11, %v947_v18  ;;  %2720 = vmatprep.mubr.bf16.mxu0 %v2091_v9  ;;  %vm13013_vm11 = vcmask 1048070   ;;  %v965_v34 = vpop.permute.xlu0 %964  ;;  %2968 = vmatpush1.bf16.msra.mxu0 %v9739_v28  ;;  %v2094_v8 = vld [vmem:[#allocation2 + $0xc0] sm:$0xff]  ;;  %v8418_v9 = vld [vmem:[%s10260_s22 + $0xcb] sm:$0xff] }
  0xba   : > { %1060 = vst.msk [vmem:[#allocation2 + $0x108] sm:$0xc0] %vm13013_vm11, %v1052_v30  ;;  %676 = vrot.lane.b32.xlu1 %v673_v25, %s10145_s26  ;;  %vm13022_vm11 = vcmask 1041408   ;;  %2969 = vmatprep.subr.bf16.mxu0 %v9744_v15  ;;  %v1180_v20 = vpack.c.bf16 %v8418_v9, %v8417_v16  ;;  %v2098_v22 = vld [vmem:[#allocation2 + $0xe0] sm:$0xff]  ;;  %v8420_v28 = vld [vmem:[%s10260_s22 + $0xdb] sm:$0xf] }
  0xbb   : > { %1061 = vst.msk [vmem:[#allocation2 + $0x110] sm:$0xc0] %vm13014_vm10, %v1052_v30  ;;  %674 = vrot.lane.b32.xlu0 %v671_v19, %s10145_s26  ;;  %v2095_v42 = vld [vmem:[#allocation2 + $0xc8] sm:$0xff]  ;;  %v902_v63 = vsel %vm13022_vm11, %v900_v55, %v901_v48  ;;  %vm13023_vm10 = vcmask 781312   ;;  %v1074_v19 = vrot.slane %v1070_v6, 2  ;;  %vm13028_vm11 = vcmask 785412  }
  0xbc   : > { %1773 = vst.msk [vmem:[#allocation2 + $0x2c0] sm:$0xc0] %vm13015_vm8, %v10822_v26  ;;  %v1054_v40 = vpop.permute.xlu1 %1053  ;;  %v2099_v4 = vld [vmem:[#allocation2 + $0xe8] sm:$0xff]  ;;  %vm13024_vm8 = vcmask 1048068   ;;  %v1184_v26 = vrot.slane %v1180_v20, 4 }
  0xbd   : > { %1697 = vst.msk [vmem:[#allocation2 + $0x2c0] sm:$0x3f] %vm13016_vm14, %v1695_v27  ;;  %v1028_v43 = vpop.permute.xlu0 %1027  ;;  %vm13020_vm14 = vcmask 523268   ;;  %2970 = vmatpush1.bf16.msra.mxu0 %v9742_v14  ;;  %v1076_v21 = vsel %vm591_vm0, %v1074_v19, %v1075_v11  ;;  %v8419_v27 = vld [vmem:[%s10260_s22 + $0xd3] sm:$0xff]  ;;  %v9747_v48 = vld [vmem:[%s12898_s1 + $0x1a4] ss:$8 sps:$4 sm:$0xff]  }
  0xbe   : > { %970 = vst.msk [vmem:[#allocation2 + $0x108] sm:$0x3f] %vm13017_vm15, %v965_v34  ;;  %797 = vrot.lane.b32.xlu1 %v794_v36, %s10145_s26  ;;  %vm13021_vm15 = vcmask 519168   ;;  %v1181_v30 = vpack.c.bf16 %v8420_v28, %v8419_v27  ;;  %v1878_v36 = vrot.slane %v1874_v33, 4  ;;  %2971 = vmatprep.subr.bf16.mxu0 %v9747_v48  ;;  %v8457_v14 = vld [vmem:[%s10260_s22 + $0x103] sm:$0xff]  ;;  %v8458_v16 = vld [vmem:[%s10260_s22 + $0x10b] sm:$0xff] }
  0xbf   : > { %971 = vst.msk [vmem:[#allocation2 + $0x110] sm:$0x3f] %vm13018_vm9, %v965_v34  ;;  %678 = vrot.lane.b32.xlu0 %v10805_v12, %s10145_s26  ;;  %vm13019_vm9 = vcmask 1048324   ;;  %v976_v12 = vpack.c.bf16 %v8378_v60, %v8377_v59  ;;  %v2102_v37 = vld [vmem:[#allocation2 + $0x100] sm:$0xff]  ;;  %v8439_v59 = vld [vmem:[%s10260_s22 + $0xf3] sm:$0xff]  ;;  %v1357_v9 = vpack.c.bf16 %v8458_v16, %v8457_v14  ;;  %v8478_v33 = vld [vmem:[%s10260_s22 + $0x12b] sm:$0xff] }
  0xc0   : > { %1063 = vst.msk [vmem:[#allocation2 + $0x130] sm:$0xff] %vm12947_vm5, %v1054_v40  ;;  %2721 = vmatmul.mubr.bf16.gmra.mrb[20].mxu0 %v2090_v39  ;;  %v1136_v50 = vpop.permute.xlu1 %1135  ;;  %v1185_v35 = vrot.slane %v1181_v30, 4  ;;  %v8440_v60 = vld [vmem:[%s10260_s22 + $0xfb] sm:$0xf]  ;;  %v8499_v16 = vld [vmem:[%s10260_s22 + $0x153] sm:$0xff] }
  0xc1   : > { %1036 = vst.msk [vmem:[#allocation2 + $0x120] sm:$0xff] %vm526_vm12, %v1028_v43  ;;  %2730 = vmatprep.mubr.bf16.mxu0 %v2095_v42  ;;  %v1030_v54 = vpop.permute.xlu0 %1029  ;;  %v8586_v42 = vld [vmem:[%s10260_s22 + $0x1e8] sm:$0xff]  ;;  %2972 = vmatpush1.bf16.msra.mxu0 %v9745_v47  ;;  %v1279_v61 = vpack.c.bf16 %v8440_v60, %v8439_v59  ;;  %v9754_v27 = vld [vmem:[%s12898_s1 + $0x1d0] ss:$8 sps:$4 sm:$0xff]   ;;  %v9756_v28 = vld [vmem:[%s12898_s1 + $0x1d4] ss:$8 sps:$4 sm:$0xff]  }
  0xc2   : > { %1037 = vst.msk [vmem:[#allocation2 + $0x128] sm:$0xff] %vm528_vm13, %v1028_v43  ;;  %801 = vrot.lane.b32.xlu1 %v795_v41, %s10145_s26  ;;  %v1186_v39 = vsel %vm12946_vm1, %v1184_v26, %v1185_v35  ;;  %v8585_v41 = vld [vmem:[%s10260_s22 + $0x1e0] sm:$0xff] }
  0xc3   : > { %1062 = vst.msk [vmem:[#allocation2 + $0x128] sm:$0xff] %vm548_vm2, %v1054_v40  ;;  %799 = vrot.lane.b32.xlu0 %v796_v51, %s10145_s26  ;;  %v1879_v40 = vsel %vm12946_vm1, %v1877_v13, %v1878_v36  ;;  %v1983_v45 = vpack.c.bf16 %v8586_v42, %v8585_v41  ;;  %v8438_v51 = vld [vmem:[%s10260_s22 + $0xeb] sm:$0xff]  ;;  %v1283_v3 = vrot.slane %v1279_v61, 6  ;;  %v576_v41 = vld [vmem:[%s10260_s22 + $0x14] sm:$0xff]  ;;  %v577_v42 = vld [vmem:[%s10260_s22 + $0x1c] sm:$0xf] }
  0xc4   : > { %1144 = vst.msk [vmem:[#allocation2 + $0x140] sm:$0xf0] %vm13019_vm9, %v1136_v50  ;;  %v1162_v0 = vpop.permute.xlu1 %1161  ;;  %vm13025_vm9 = vcmask 261124   ;;  %v1278_v53 = vpack.c.bf16 %v8438_v51, %v8437_v49  ;;  %v8479_v49 = vld [vmem:[%s10260_s22 + $0x133] sm:$0xff] }
  0xc5   : > { %1145 = vst.msk [vmem:[#allocation2 + $0x148] sm:$0xf0] %vm13020_vm14, %v1136_v50  ;;  %v1056_v5 = vpop.permute.xlu0 %1055  ;;  %vm13026_vm14 = vcmask 1043968   ;;  %v2103_v24 = vld [vmem:[#allocation2 + $0x108] sm:$0xff]  ;;  %v1987_v46 = vrot.slane %v1983_v45, 6 }
  0xc6   : > { %1038 = vst.msk [vmem:[#allocation2 + $0x140] sm:$0xf] %vm629_vm3, %v1030_v54  ;;  %905 = vrot.lane.b32.xlu1 %v902_v63, %s10145_s26  ;;  %v8588_v63 = vld [vmem:[%s10260_s22 + $0x1f8] sm:$0xf] }
  0xc7   : > { %1039 = vst.msk [vmem:[#allocation2 + $0x148] sm:$0xf] %vm13021_vm15, %v1030_v54  ;;  %vm13027_vm15 = vcmask 257024   ;;  %903 = vrot.lane.b32.xlu0 %v900_v55, %s10145_s26  ;;  %v1282_v54 = vrot.slane %v1278_v53, 6  ;;  %v8323_v53 = vld [vmem:[%s10260_s22 + $0x34] sm:$0xff] }
  0xc8   : > { %1775 = vst.msk [vmem:[#allocation2 + $0x300] sm:$0xf] %vm13023_vm10, %v1768_v62  ;;  %2731 = vmatmul.mubr.bf16.gmra.mrb[24].mxu0 %v2094_v8  ;;  %v1164_v17 = vpop.permute.xlu1 %1163  ;;  %vm13029_vm10 = vcmask 1048322   ;;  %v2106_v58 = vld [vmem:[#allocation2 + $0x120] sm:$0xff]  ;;  %v8587_v62 = vld [vmem:[%s10260_s22 + $0x1f0] sm:$0xff] }
  0xc9   : > { %1170 = vst.msk [vmem:[#allocation2 + $0x148] sm:$0xf0] %vm13024_vm8, %v1162_v0  ;;  %2740 = vmatprep.mubr.bf16.mxu0 %v2099_v4  ;;  %v1138_v18 = vpop.permute.xlu0 %1137  ;;  %vm13030_vm8 = vcmask 517120  }
  0xca   : > { %1171 = vst.msk [vmem:[#allocation2 + $0x150] sm:$0xf0] %vm13025_vm9, %v1162_v0  ;;  %982 = vrot.lane.b32.xlu1 %v977_v10, %s10145_s26  ;;  %vm13031_vm9 = vcmask 1048066   ;;  %v2107_v43 = vld [vmem:[#allocation2 + $0x128] sm:$0xff] }
  0xcb   : > { %1774 = vst.msk [vmem:[#allocation2 + $0x2e0] sm:$0xff] %vm508_vm4, %v1769_v1  ;;  %980 = vrot.lane.b32.xlu0 %v976_v12, %s10145_s26  ;;  %1884 = vst.msk [vmem:[#allocation2 + $0x320] sm:$0xff] %vm508_vm4, %v1879_v40  ;;  %v1984_v1 = vpack.c.bf16 %v8588_v63, %v8587_v62  ;;  %v9748_v12 = vld [vmem:[%s12898_s1 + $0x1b0] ss:$8 sps:$4 sm:$0xff]  }
  0xcc   : > { %1064 = vst.msk [vmem:[#allocation2 + $0x148] sm:$0xf] %vm13026_vm14, %v1056_v5  ;;  %v1244_v23 = vpop.permute.xlu1 %1243  ;;  %vm13032_vm14 = vcmask 261122  }
  0xcd   : > { %1065 = vst.msk [vmem:[#allocation2 + $0x150] sm:$0xf] %vm13027_vm15, %v1056_v5  ;;  %v1140_v25 = vpop.permute.xlu0 %1139  ;;  %vm13033_vm15 = vcmask 1041920   ;;  %v1988_v4 = vrot.slane %v1984_v1, 6  ;;  %v2110_v6 = vld [vmem:[#allocation2 + $0x140] sm:$0xff] }
  0xce   : > { %1173 = vst.msk [vmem:[#allocation2 + $0x170] sm:$0xff] %vm12947_vm5, %v1164_v17  ;;  %1079 = vrot.lane.b32.xlu1 %v1076_v21, %s10145_s26  ;;  %v8497_v1 = vld [vmem:[%s10260_s22 + $0x143] sm:$0xff] }
  0xcf   : > { %1883 = vst.msk [vmem:[#allocation2 + $0x300] sm:$0xf0] %vm13028_vm11, %v1877_v13  ;;  %1077 = vrot.lane.b32.xlu0 %v1074_v19, %s10145_s26  ;;  %vm13034_vm11 = vcmask 254976   ;;  %v9750_v13 = vld [vmem:[%s12898_s1 + $0x1b4] ss:$8 sps:$4 sm:$0xff]   ;;  %v575_v19 = vld [vmem:[%s10260_s22 + $0xc] sm:$0xff] }
  0xd0   : > { %1146 = vst.msk [vmem:[#allocation2 + $0x160] sm:$0xff] %vm526_vm12, %v1138_v18  ;;  %2741 = vmatmul.mubr.bf16.gmra.mrb[28].mxu0 %v2098_v22  ;;  %v1265_v32 = vpop.permute.xlu1 %1264  ;;  %2973 = vmatprep.subr.bf16.mxu0 %v9750_v13 }
  0xd1   : > { %1147 = vst.msk [vmem:[#allocation2 + $0x168] sm:$0xff] %vm528_vm13, %v1138_v18  ;;  %2750 = vmatprep.mubr.bf16.mxu0 %v2103_v24  ;;  %v1166_v34 = vpop.permute.xlu0 %1165  ;;  %2974 = vmatpush1.bf16.msra.mxu0 %v9748_v12  ;;  %v574_v18 = vld [vmem:[%s10260_s22 + $0x4] sm:$0xff] }
  0xd2   : > { %1172 = vst.msk [vmem:[#allocation2 + $0x168] sm:$0xff] %vm548_vm2, %v1164_v17  ;;  %1187 = vrot.lane.b32.xlu1 %v1184_v26, %s10145_s26  ;;  %v578_v21 = vpack.c.bf16 %v575_v19, %v574_v18  ;;  %v9753_v24 = vld [vmem:[%s12898_s1 + $0x1c4] ss:$8 sps:$4 sm:$0xff]   ;;  %v9751_v26 = vld [vmem:[%s12898_s1 + $0x1c0] ss:$8 sps:$4 sm:$0xff]   ;;  %v8343_v19 = vld [vmem:[%s10260_s22 + $0x54] sm:$0xff] }
  0xd3   : > { %1249 = vst.msk [vmem:[#allocation2 + $0x180] sm:$0xfc] %vm13029_vm10, %v1244_v23  ;;  %1081 = vrot.lane.b32.xlu0 %v1075_v11, %s10145_s26  ;;  %vm13035_vm10 = vcmask 779264   ;;  %v2111_v56 = vld [vmem:[#allocation2 + $0x148] sm:$0xff]  ;;  %2975 = vmatprep.subr.bf16.mxu0 %v9753_v24 }
  0xd4   : > { %1250 = vst.msk [vmem:[#allocation2 + $0x188] sm:$0xfc] %vm865_vm7, %v1244_v23  ;;  %v1267_v38 = vpop.permute.xlu1 %1266 }
  0xd5   : > { %1148 = vst.msk [vmem:[#allocation2 + $0x180] sm:$0x3] %vm752_vm6, %v1140_v25  ;;  %v1246_v44 = vpop.permute.xlu0 %1245  ;;  %2976 = vmatpush1.bf16.msra.mxu0 %v9751_v26 }
  0xd6   : > { %1149 = vst.msk [vmem:[#allocation2 + $0x188] sm:$0x3] %vm13030_vm8, %v1140_v25  ;;  %1191 = vrot.lane.b32.xlu1 %v1185_v35, %s10145_s26  ;;  %vm13036_vm8 = vcmask 785410   ;;  %2977 = vmatprep.subr.bf16.mxu0 %v9756_v28  ;;  %v1358_v35 = vpack.c.bf16 %v8460_v31, %v8459_v29  ;;  %v8517_v31 = vld [vmem:[%s10260_s22 + $0x163] sm:$0xff] }
  0xd7   : > { %1270 = vst.msk [vmem:[#allocation2 + $0x188] sm:$0xfc] %vm13031_vm9, %v1265_v32  ;;  %1189 = vrot.lane.b32.xlu0 %v1186_v39, %s10145_s26  ;;  %vm13037_vm9 = vcmask 1048326   ;;  %v2114_v25 = vld [vmem:[#allocation2 + $0x160] sm:$0xff] }
  0xd8   : > { %1271 = vst.msk [vmem:[#allocation2 + $0x190] sm:$0xfc] %vm13032_vm14, %v1265_v32  ;;  %2751 = vmatmul.mubr.bf16.gmra.mrb[32].mxu0 %v2102_v37  ;;  %v1344_v50 = vpop.permute.xlu1 %1343  ;;  %vm13038_vm14 = vcmask 523270   ;;  %v8477_v32 = vld [vmem:[%s10260_s22 + $0x123] sm:$0xff] }
  0xd9   : > { %1174 = vst.msk [vmem:[#allocation2 + $0x188] sm:$0x3] %vm13033_vm15, %v1166_v34  ;;  %2760 = vmatprep.mubr.bf16.mxu0 %v2107_v43  ;;  %v1326_v52 = vpop.permute.xlu0 %1325  ;;  %vm13039_vm15 = vcmask 1046272   ;;  %v2115_v10 = vld [vmem:[#allocation2 + $0x168] sm:$0xff]  ;;  %2978 = vmatpush1.bf16.msra.mxu0 %v9754_v27 }
  0xda   : > { %1175 = vst.msk [vmem:[#allocation2 + $0x190] sm:$0x3] %vm13034_vm11, %v1166_v34  ;;  %vm13040_vm11 = vcmask 521216   ;;  %v8321_v37 = vld [vmem:[%s10260_s22 + $0x24] sm:$0xff] }
  0xdb   : > { %1885 = vst.msk [vmem:[#allocation2 + $0x340] sm:$0x3] %vm13035_vm10, %v1878_v36  ;;  %1285 = vrot.lane.b32.xlu0 %v1282_v54, %s10145_s26  ;;  %vm13041_vm10 = vcmask 1048070   ;;  %v1451_v36 = vpack.c.bf16 %v8478_v33, %v8477_v32  ;;  %v8518_v32 = vld [vmem:[%s10260_s22 + $0x16b] sm:$0xff] }
  0xdc   : > { %1273 = vst.msk [vmem:[#allocation2 + $0x1b0] sm:$0xff] %vm12947_vm5, %v1267_v38  ;;  %1350 = vst.msk [vmem:[#allocation2 + $0x1d0] sm:$0xff] %vm12947_vm5, %v1344_v50  ;;  %v1407_v55 = vpop.permute.xlu1 %1406  ;;  %v2118_v48 = vld [vmem:[#allocation2 + $0x180] sm:$0xff] }
  0xdd   : > { %1251 = vst.msk [vmem:[#allocation2 + $0x1a0] sm:$0xff] %vm526_vm12, %v1246_v44  ;;  %1331 = vst.msk [vmem:[#allocation2 + $0x1c0] sm:$0xff] %vm526_vm12, %v1326_v52  ;;  %v1328_v57 = vpop.permute.xlu0 %1327  ;;  %v1455_v40 = vrot.slane %v1451_v36, 2  ;;  %v8361_v36 = vld [vmem:[%s10260_s22 + $0x64] sm:$0xff] }
  0xde   : > { %1252 = vst.msk [vmem:[#allocation2 + $0x1a8] sm:$0xff] %vm528_vm13, %v1246_v44  ;;  %1332 = vst.msk [vmem:[#allocation2 + $0x1c8] sm:$0xff] %vm528_vm13, %v1326_v52  ;;  %v579_v44 = vpack.c.bf16 %v577_v42, %v576_v41 }
  0xdf   : > { %1272 = vst.msk [vmem:[#allocation2 + $0x1a8] sm:$0xff] %vm548_vm2, %v1267_v38  ;;  %1349 = vst.msk [vmem:[#allocation2 + $0x1c8] sm:$0xff] %vm548_vm2, %v1344_v50  ;;  %1361 = vrot.lane.b32.xlu0 %v1357_v9, %s10145_s26  ;;  %v8322_v38 = vld [vmem:[%s10260_s22 + $0x2c] sm:$0xff]  ;;  %v8480_v50 = vld [vmem:[%s10260_s22 + $0x13b] sm:$0xf] }
  0xe0   : > { %1992 = vst.msk [vmem:[#allocation2 + $0x340] sm:$0xfc] %vm13036_vm8, %v1987_v46  ;;  %2761 = vmatmul.mubr.bf16.gmra.mrb[36].mxu0 %v2106_v58  ;;  %v1433_v0 = vpop.permute.xlu1 %1432  ;;  %vm13042_vm8 = vcmask 261126   ;;  %v2119_v22 = vld [vmem:[#allocation2 + $0x188] sm:$0xff]  ;;  %v692_v39 = vpack.c.bf16 %v8322_v38, %v8321_v37  ;;  %v1452_v51 = vpack.c.bf16 %v8480_v50, %v8479_v49  ;;  %v8363_v49 = vld [vmem:[%s10260_s22 + $0x74] sm:$0xff] }
  0xe1   : > { %1415 = vst.msk [vmem:[#allocation2 + $0x1e0] sm:$0xc0] %vm13037_vm9, %v1407_v55  ;;  %2770 = vmatprep.mubr.bf16.mxu0 %v2111_v56  ;;  %v1346_v2 = vpop.permute.xlu0 %1345  ;;  %vm13043_vm9 = vcmask 1046016   ;;  %v8362_v37 = vld [vmem:[%s10260_s22 + $0x6c] sm:$0xff]  ;;  %v8364_v50 = vld [vmem:[%s10260_s22 + $0x7c] sm:$0xf] }
  0xe2   : > { %1416 = vst.msk [vmem:[#allocation2 + $0x1e8] sm:$0xc0] %vm13038_vm14, %v1407_v55  ;;  %vm13044_vm14 = vcmask 259072   ;;  %v696_v45 = vrot.slane %v692_v39, 2  ;;  %v1456_v56 = vrot.slane %v1452_v51, 2  ;;  %v916_v39 = vpack.c.bf16 %v8362_v37, %v8361_v36 }
  0xe3   : > { %1333 = vst.msk [vmem:[#allocation2 + $0x1e0] sm:$0x3f] %vm13039_vm15, %v1328_v57  ;;  %vm13045_vm15 = vcmask 1041408   ;;  %1458 = vrot.lane.b32.xlu0 %v1455_v40, %s10145_s26 }
  0xe4   : > { %1334 = vst.msk [vmem:[#allocation2 + $0x1e8] sm:$0x3f] %vm13040_vm11, %v1328_v57  ;;  %v1284_v5 = vsel %vm13045_vm15, %v1282_v54, %v1283_v3  ;;  %v1435_v7 = vpop.permute.xlu1 %1434  ;;  %vm13046_vm11 = vmmov %vm13045_vm15  ;;  %vm13051_vm15 = vcmask 261124   ;;  %v8324_v54 = vld [vmem:[%s10260_s22 + $0x3c] sm:$0xf]  ;;  %v1457_v58 = vsel %vm591_vm0, %v1455_v40, %v1456_v56  ;;  %v920_v41 = vrot.slane %v916_v39, 6 }
  0xe5   : > { %1441 = vst.msk [vmem:[#allocation2 + $0x1e8] sm:$0xc0] %vm13041_vm10, %v1433_v0  ;;  %1287 = vrot.lane.b32.xlu1 %v1284_v5, %s10145_s26  ;;  %v1989_v8 = vsel %vm13046_vm11, %v1987_v46, %v1988_v4  ;;  %v1409_v11 = vpop.permute.xlu0 %1408  ;;  %vm13047_vm10 = vcmask 1048324   ;;  %vm13052_vm11 = vcmask 1043968   ;;  %v693_v57 = vpack.c.bf16 %v8324_v54, %v8323_v53 }
  0xe6   : > { %1442 = vst.msk [vmem:[#allocation2 + $0x1f0] sm:$0xc0] %vm13042_vm8, %v1433_v0  ;;  %vm13048_vm8 = vcmask 523268   ;;  %v2123_v46 = vld [vmem:[#allocation2 + $0x1a8] sm:$0xff]  ;;  %v2122_v0 = vld [vmem:[#allocation2 + $0x1a0] sm:$0xff]  ;;  %v917_v53 = vpack.c.bf16 %v8364_v50, %v8363_v49 }
  0xe7   : > { %1351 = vst.msk [vmem:[#allocation2 + $0x1e8] sm:$0x3f] %vm13043_vm9, %v1346_v2  ;;  %vm13049_vm9 = vcmask 519168   ;;  %1462 = vrot.lane.b32.xlu0 %v1456_v56, %s10145_s26  ;;  %v697_v59 = vrot.slane %v693_v57, 2  ;;  %v2127_v61 = vld [vmem:[#allocation2 + $0x1c8] sm:$0xff] }
  0xe8   : > { %1352 = vst.msk [vmem:[#allocation2 + $0x1f0] sm:$0x3f] %vm13044_vm14, %v1346_v2  ;;  %2771 = vmatmul.mubr.bf16.gmra.mrb[40].mxu0 %v2110_v6  ;;  %v1517_v15 = vpop.permute.xlu1 %1516  ;;  %vm13050_vm14 = vcmask 1048068   ;;  %v8498_v2 = vld [vmem:[%s10260_s22 + $0x14b] sm:$0xff] }
  0xe9   : > { %1444 = vst.msk [vmem:[#allocation2 + $0x210] sm:$0xff] %vm12947_vm5, %v1435_v7  ;;  %2780 = vmatprep.mubr.bf16.mxu0 %v2115_v10  ;;  %v1411_v17 = vpop.permute.xlu0 %1410  ;;  %1363 = vrot.lane.b32.xlu1 %v1358_v35, %s10145_s26  ;;  %v698_v63 = vsel %vm591_vm0, %v696_v45, %v697_v59  ;;  %v1561_v4 = vpack.c.bf16 %v8498_v2, %v8497_v1  ;;  %v8341_v6 = vld [vmem:[%s10260_s22 + $0x44] sm:$0xff] }
  0xea   : > { %1993 = vst.msk [vmem:[#allocation2 + $0x360] sm:$0xff] %vm508_vm4, %v1989_v8  ;;  %580 = vst.msk [vmem:[#allocation2 + $0x18] sm:$0xff] %vm508_vm4, %v578_v21  ;;  %v8381_v2 = vld [vmem:[%s10260_s22 + $0x84] sm:$0xff] }
  0xeb   : > { %1417 = vst.msk [vmem:[#allocation2 + $0x200] sm:$0xff] %vm526_vm12, %v1409_v11  ;;  %v1565_v8 = vrot.slane %v1561_v4, 4  ;;  %v8421_v50 = vld [vmem:[%s10260_s22 + $0xc4] sm:$0xff] }
  0xec   : > { %1418 = vst.msk [vmem:[#allocation2 + $0x208] sm:$0xff] %vm528_vm13, %v1409_v11  ;;  %v1543_v20 = vpop.permute.xlu1 %1542 }
  0xed   : > { %1443 = vst.msk [vmem:[#allocation2 + $0x208] sm:$0xff] %vm548_vm2, %v1435_v7  ;;  %v1437_v23 = vpop.permute.xlu0 %1436  ;;  %1460 = vrot.lane.b32.xlu1 %v1457_v58, %s10145_s26  ;;  %v8342_v7 = vld [vmem:[%s10260_s22 + $0x4c] sm:$0xff] }
  0xee   : > { %1525 = vst.msk [vmem:[#allocation2 + $0x220] sm:$0xf0] %vm13047_vm10, %v1517_v15  ;;  %vm13053_vm10 = vcmask 257024   ;;  %v815_v10 = vpack.c.bf16 %v8342_v7, %v8341_v6  ;;  %v2131_v13 = vld [vmem:[#allocation2 + $0x1e8] sm:$0xff] }
  0xef   : > { %1526 = vst.msk [vmem:[#allocation2 + $0x228] sm:$0xf0] %vm13048_vm8, %v1517_v15  ;;  %vm13054_vm8 = vcmask 1048322   ;;  %v2126_v15 = vld [vmem:[#allocation2 + $0x1c0] sm:$0xff] }
  0xf0   : > { %1419 = vst.msk [vmem:[#allocation2 + $0x220] sm:$0xf] %vm629_vm3, %v1411_v17  ;;  %2781 = vmatmul.mubr.bf16.gmra.mrb[44].mxu0 %v2114_v25  ;;  %v1545_v30 = vpop.permute.xlu1 %1544  ;;  %v819_v12 = vrot.slane %v815_v10, 4  ;;  %v8539_v10 = vld [vmem:[%s10260_s22 + $0x193] sm:$0xff] }
  0xf1   : > { %1420 = vst.msk [vmem:[#allocation2 + $0x228] sm:$0xf] %vm13049_vm9, %v1411_v17  ;;  %2790 = vmatprep.mubr.bf16.mxu0 %v2119_v22  ;;  %v1519_v34 = vpop.permute.xlu0 %1518  ;;  %vm13055_vm9 = vcmask 517120   ;;  %1568 = vrot.lane.b32.xlu1 %v1565_v8, %s10145_s26  ;;  %v8500_v17 = vld [vmem:[%s10260_s22 + $0x15b] sm:$0xf] }
  0xf2   : > { %1551 = vst.msk [vmem:[#allocation2 + $0x228] sm:$0xf0] %vm13050_vm14, %v1543_v20  ;;  %vm13056_vm14 = vcmask 783360   ;;  %v1562_v9 = vpack.c.bf16 %v8500_v17, %v8499_v16 }
  0xf3   : > { %1552 = vst.msk [vmem:[#allocation2 + $0x230] sm:$0xf0] %vm13051_vm15, %v1543_v20  ;;  %vm13057_vm15 = vcmask 785414   ;;  %v8344_v20 = vld [vmem:[%s10260_s22 + $0x5c] sm:$0xf] }
  0xf4   : > { %1445 = vst.msk [vmem:[#allocation2 + $0x228] sm:$0xf] %vm13052_vm11, %v1437_v23  ;;  %v1625_v43 = vpop.permute.xlu1 %1624  ;;  %vm13058_vm11 = vcmask 1048066   ;;  %v1566_v22 = vrot.slane %v1562_v9, 4  ;;  %v2135_v27 = vld [vmem:[#allocation2 + $0x208] sm:$0xff] }
  0xf5   : > { %1446 = vst.msk [vmem:[#allocation2 + $0x230] sm:$0xf] %vm13053_vm10, %v1437_v23  ;;  %v1521_v47 = vpop.permute.xlu0 %1520  ;;  %vm13059_vm10 = vcmask 261122   ;;  %v816_v23 = vpack.c.bf16 %v8344_v20, %v8343_v19  ;;  %v8401_v9 = vld [vmem:[%s10260_s22 + $0xa4] sm:$0xff] }
  0xf6   : > { %1554 = vst.msk [vmem:[#allocation2 + $0x250] sm:$0xff] %vm12947_vm5, %v1545_v30  ;;  %v1567_v24 = vsel %vm12946_vm1, %v1565_v8, %v1566_v22  ;;  %1572 = vrot.lane.b32.xlu1 %v1566_v22, %s10145_s26  ;;  %v8384_v22 = vld [vmem:[%s10260_s22 + $0x9c] sm:$0xf] }
  0xf7   : > { %1527 = vst.msk [vmem:[#allocation2 + $0x240] sm:$0xff] %vm526_vm12, %v1519_v34  ;;  %v820_v25 = vrot.slane %v816_v23, 4  ;;  %1570 = vrot.lane.b32.xlu0 %v1567_v24, %s10145_s26 }
  0xf8   : > { %1528 = vst.msk [vmem:[#allocation2 + $0x248] sm:$0xff] %vm528_vm13, %v1519_v34  ;;  %2791 = vmatmul.mubr.bf16.gmra.mrb[48].mxu0 %v2118_v48  ;;  %v1646_v52 = vpop.permute.xlu1 %1645  ;;  %v1659_v34 = vpack.c.bf16 %v8518_v32, %v8517_v31 }
  0xf9   : > { %1553 = vst.msk [vmem:[#allocation2 + $0x248] sm:$0xff] %vm548_vm2, %v1545_v30  ;;  %2800 = vmatprep.mubr.bf16.mxu0 %v2123_v46  ;;  %v1547_v55 = vpop.permute.xlu0 %1546  ;;  %v821_v29 = vsel %vm12946_vm1, %v819_v12, %v820_v25  ;;  %v2130_v30 = vld [vmem:[#allocation2 + $0x1e0] sm:$0xff]  ;;  %v8520_v46 = vld [vmem:[%s10260_s22 + $0x17b] sm:$0xf] }
  0xfa   : > { %1630 = vst.msk [vmem:[#allocation2 + $0x260] sm:$0xfc] %vm13054_vm8, %v1625_v43  ;;  %vm13060_vm8 = vcmask 1041920   ;;  %v1663_v38 = vrot.slane %v1659_v34, 6  ;;  %v8404_v34 = vld [vmem:[%s10260_s22 + $0xbc] sm:$0xf] }
  0xfb   : > { %1631 = vst.msk [vmem:[#allocation2 + $0x268] sm:$0xfc] %vm865_vm7, %v1625_v43  ;;  %v2139_v42 = vld [vmem:[#allocation2 + $0x228] sm:$0xff] }
  0xfc   : > { %1529 = vst.msk [vmem:[#allocation2 + $0x260] sm:$0x3] %vm752_vm6, %v1521_v47  ;;  %v1648_v60 = vpop.permute.xlu1 %1647  ;;  %1666 = vrot.lane.b32.xlu0 %v1663_v38, %s10145_s26 }
  0xfd   : > { %1530 = vst.msk [vmem:[#allocation2 + $0x268] sm:$0x3] %vm13055_vm9, %v1521_v47  ;;  %vm13061_vm9 = vcmask 254976   ;;  %v1627_v62 = vpop.permute.xlu0 %1626 }
  0xfe   : > { %581 = vst.msk [vmem:[#allocation2 + $0x38] sm:$0x3f] %vm13056_vm14, %v579_v44  ;;  %vm13062_vm14 = vcmask 781312   ;;  %v2134_v44 = vld [vmem:[#allocation2 + $0x200] sm:$0xff] }
  0xff   : > { %702 = vst.msk [vmem:[#allocation2 + $0x38] sm:$0xc0] %vm13057_vm15, %v696_v45  ;;  %vm13063_vm15 = vcmask 1048326   ;;  %v8519_v45 = vld [vmem:[%s10260_s22 + $0x173] sm:$0xff]  ;;  %v2142_v8 = vld [vmem:[#allocation2 + $0x240] sm:$0xff] }
 0x100   : > { %1651 = vst.msk [vmem:[#allocation2 + $0x268] sm:$0xfc] %vm13058_vm11, %v1646_v52  ;;  %2801 = vmatmul.mubr.bf16.gmra.mrb[52].mxu0 %v2122_v0  ;;  %v1725_v3 = vpop.permute.xlu1 %1724  ;;  %vm13064_vm11 = vcmask 523270   ;;  %v1660_v47 = vpack.c.bf16 %v8520_v46, %v8519_v45  ;;  %v2143_v57 = vld [vmem:[#allocation2 + $0x248] sm:$0xff] }
 0x101   : > { %1652 = vst.msk [vmem:[#allocation2 + $0x270] sm:$0xfc] %vm13059_vm10, %v1646_v52  ;;  %2810 = vmatprep.mubr.bf16.mxu0 %v2127_v61  ;;  %v1707_v5 = vpop.permute.xlu0 %1706  ;;  %vm13065_vm10 = vcmask 1046272   ;;  %v8537_v61 = vld [vmem:[%s10260_s22 + $0x183] sm:$0xff]  ;;  %v8578_v46 = vld [vmem:[%s10260_s22 + $0x1cb] sm:$0xff] }
 0x102   : > { %1555 = vst.msk [vmem:[#allocation2 + $0x268] sm:$0x3] %vm13060_vm8, %v1547_v55  ;;  %vm13066_vm8 = vcmask 521216   ;;  %v1664_v52 = vrot.slane %v1660_v47, 6  ;;  %v8577_v45 = vld [vmem:[%s10260_s22 + $0x1c3] sm:$0xff] }
 0x103   : > { %1556 = vst.msk [vmem:[#allocation2 + $0x270] sm:$0x3] %vm13061_vm9, %v1547_v55  ;;  %vm13067_vm9 = vcmask 785412   ;;  %v921_v55 = vrot.slane %v917_v53, 6 }
 0x104   : > { %1654 = vst.msk [vmem:[#allocation2 + $0x290] sm:$0xff] %vm12947_vm5, %v1648_v60  ;;  %1731 = vst.msk [vmem:[#allocation2 + $0x2b0] sm:$0xff] %vm12947_vm5, %v1725_v3  ;;  %v1788_v11 = vpop.permute.xlu1 %1787 }
 0x105   : > { %704 = vst.msk [vmem:[#allocation2 + $0x78] sm:$0xf] %vm13062_vm14, %v697_v59  ;;  %v1709_v14 = vpop.permute.xlu0 %1708  ;;  %vm13068_vm14 = vcmask 1048070  }
 0x106   : > { %1632 = vst.msk [vmem:[#allocation2 + $0x280] sm:$0xff] %vm526_vm12, %v1627_v62  ;;  %1712 = vst.msk [vmem:[#allocation2 + $0x2a0] sm:$0xff] %vm526_vm12, %v1707_v5 }
 0x107   : > { %1633 = vst.msk [vmem:[#allocation2 + $0x288] sm:$0xff] %vm528_vm13, %v1627_v62  ;;  %1713 = vst.msk [vmem:[#allocation2 + $0x2a8] sm:$0xff] %vm528_vm13, %v1707_v5  ;;  %v8538_v62 = vld [vmem:[%s10260_s22 + $0x18b] sm:$0xff] }
 0x108   : > { %703 = vst.msk [vmem:[#allocation2 + $0x58] sm:$0xff] %vm508_vm4, %v698_v63  ;;  %2811 = vmatmul.mubr.bf16.gmra.mrb[56].mxu0 %v2126_v15  ;;  %v1814_v18 = vpop.permute.xlu1 %1813  ;;  %826 = vst.msk [vmem:[#allocation2 + $0x98] sm:$0xff] %vm508_vm4, %v821_v29  ;;  %v1738_v0 = vpack.c.bf16 %v8538_v62, %v8537_v61  ;;  %v8558_v15 = vld [vmem:[%s10260_s22 + $0x1ab] sm:$0xff]  ;;  %v8559_v29 = vld [vmem:[%s10260_s22 + $0x1b3] sm:$0xff] }
 0x109   : > { %1653 = vst.msk [vmem:[#allocation2 + $0x288] sm:$0xff] %vm548_vm2, %v1648_v60  ;;  %1730 = vst.msk [vmem:[#allocation2 + $0x2a8] sm:$0xff] %vm548_vm2, %v1725_v3  ;;  %2820 = vmatprep.mubr.bf16.mxu0 %v2131_v13  ;;  %v1727_v21 = vpop.permute.xlu0 %1726  ;;  %v2138_v60 = vld [vmem:[#allocation2 + $0x220] sm:$0xff]  ;;  %v8382_v3 = vld [vmem:[%s10260_s22 + $0x8c] sm:$0xff] }
 0x10a   : > { %1796 = vst.msk [vmem:[#allocation2 + $0x2c0] sm:$0xc0] %vm13063_vm15, %v1788_v11  ;;  %vm13069_vm15 = vcmask 261126   ;;  %1742 = vrot.lane.b32.xlu0 %v1738_v0, %s10145_s26  ;;  %v992_v5 = vpack.c.bf16 %v8382_v3, %v8381_v2  ;;  %v2147_v6 = vld [vmem:[#allocation2 + $0x268] sm:$0xff]  ;;  %v8424_v0 = vld [vmem:[%s10260_s22 + $0xdc] sm:$0xf] }
 0x10b   : > { %1797 = vst.msk [vmem:[#allocation2 + $0x2c8] sm:$0xc0] %vm13064_vm11, %v1788_v11  ;;  %vm13070_vm11 = vcmask 1046016   ;;  %v8540_v11 = vld [vmem:[%s10260_s22 + $0x19b] sm:$0xf] }
 0x10c   : > { %1714 = vst.msk [vmem:[#allocation2 + $0x2c0] sm:$0x3f] %vm13065_vm10, %v1709_v14  ;;  %vm13071_vm10 = vcmask 259072   ;;  %v1816_v26 = vpop.permute.xlu1 %1815 }
 0x10d   : > { %1715 = vst.msk [vmem:[#allocation2 + $0x2c8] sm:$0x3f] %vm13066_vm8, %v1709_v14  ;;  %v1790_v28 = vpop.permute.xlu0 %1789  ;;  %vm13072_vm8 = vcmask 779264   ;;  %v1739_v14 = vpack.c.bf16 %v8540_v11, %v8539_v10 }
 0x10e   : > { %825 = vst.msk [vmem:[#allocation2 + $0x78] sm:$0xf0] %vm13067_vm9, %v819_v12  ;;  %vm13073_vm9 = vcmask 1048324   ;;  %v8557_v12 = vld [vmem:[%s10260_s22 + $0x1a3] sm:$0xff] }
 0x10f   : > { %1822 = vst.msk [vmem:[#allocation2 + $0x2c8] sm:$0xc0] %vm13068_vm14, %v1814_v18  ;;  %vm13074_vm14 = vcmask 523268   ;;  %v1832_v17 = vpack.c.bf16 %v8558_v15, %v8557_v12  ;;  %v8597_v12 = vld [vmem:[%s10260_s22 + $0x1e3] sm:$0xff] }
 0x110   : > { %1823 = vst.msk [vmem:[#allocation2 + $0x2d0] sm:$0xc0] %vm13069_vm15, %v1814_v18  ;;  %2821 = vmatmul.mubr.bf16.gmra.mrb[60].mxu0 %v2130_v30  ;;  %v1898_v33 = vpop.permute.xlu1 %1897  ;;  %vm13075_vm15 = vcmask 519168   ;;  %v8402_v18 = vld [vmem:[%s10260_s22 + $0xac] sm:$0xff]  ;;  %v8560_v30 = vld [vmem:[%s10260_s22 + $0x1bb] sm:$0xf] }
 0x111   : > { %1732 = vst.msk [vmem:[#allocation2 + $0x2c8] sm:$0x3f] %vm13070_vm11, %v1727_v21  ;;  %2830 = vmatprep.mubr.bf16.mxu0 %v2135_v27  ;;  %v1792_v35 = vpop.permute.xlu0 %1791  ;;  %vm13076_vm11 = vcmask 1048068   ;;  %v1093_v19 = vpack.c.bf16 %v8402_v18, %v8401_v9  ;;  %v1836_v20 = vrot.slane %v1832_v17, 2  ;;  %v1833_v31 = vpack.c.bf16 %v8560_v30, %v8559_v29  ;;  %v8441_v17 = vld [vmem:[%s10260_s22 + $0xe4] sm:$0xff]  ;;  %v8442_v9 = vld [vmem:[%s10260_s22 + $0xec] sm:$0xff] }
 0x112   : > { %1733 = vst.msk [vmem:[#allocation2 + $0x2d0] sm:$0x3f] %vm13071_vm10, %v1727_v21  ;;  %vm13077_vm10 = vcmask 261124   ;;  %v8383_v21 = vld [vmem:[%s10260_s22 + $0x94] sm:$0xff] }
 0x113   : > { %1825 = vst.msk [vmem:[#allocation2 + $0x2f0] sm:$0xff] %vm12947_vm5, %v1816_v26  ;;  %v993_v24 = vpack.c.bf16 %v8384_v22, %v8383_v21  ;;  %1839 = vrot.lane.b32.xlu0 %v1836_v20, %s10145_s26  ;;  %v1837_v36 = vrot.slane %v1833_v31, 2  ;;  %v2158_v11 = vld [vmem:[#allocation2 + $0x2c0] sm:$0xff] }
 0x114   : > { %827 = vst.msk [vmem:[#allocation2 + $0xb8] sm:$0x3] %vm13072_vm8, %v820_v25  ;;  %v1924_v40 = vpop.permute.xlu1 %1923  ;;  %vm13078_vm8 = vcmask 1043968   ;;  %v1097_v25 = vrot.slane %v1093_v19, 2  ;;  %v1297_v19 = vpack.c.bf16 %v8442_v9, %v8441_v17  ;;  %v8522_v17 = vld [vmem:[%s10260_s22 + $0x16c] sm:$0xff] }
 0x115   : > { %1798 = vst.msk [vmem:[#allocation2 + $0x2e0] sm:$0xff] %vm526_vm12, %v1790_v28  ;;  %v1818_v43 = vpop.permute.xlu0 %1817 }
 0x116   : > { %1799 = vst.msk [vmem:[#allocation2 + $0x2e8] sm:$0xff] %vm528_vm13, %v1790_v28  ;;  %v2146_v28 = vld [vmem:[#allocation2 + $0x260] sm:$0xff] }
 0x117   : > { %1824 = vst.msk [vmem:[#allocation2 + $0x2e8] sm:$0xff] %vm548_vm2, %v1816_v26  ;;  %v2151_v26 = vld [vmem:[#allocation2 + $0x288] sm:$0xff]  ;;  %1843 = vrot.lane.b32.xlu0 %v1837_v36, %s10145_s26 }
 0x118   : > { %1906 = vst.msk [vmem:[#allocation2 + $0x300] sm:$0xf0] %vm13073_vm9, %v1898_v33  ;;  %vm13080_vm9 = vcmask 785410   ;;  %2831 = vmatmul.mubr.bf16.gmra.mrb[64].mxu0 %v2134_v44  ;;  %v1926_v48 = vpop.permute.xlu1 %1925  ;;  %v2150_v44 = vld [vmem:[#allocation2 + $0x280] sm:$0xff] }
 0x119   : > { %1907 = vst.msk [vmem:[#allocation2 + $0x308] sm:$0xf0] %vm13074_vm14, %v1898_v33  ;;  %2840 = vmatprep.mubr.bf16.mxu0 %v2139_v42  ;;  %v1900_v51 = vpop.permute.xlu0 %1899  ;;  %vm13081_vm14 = vcmask 1041408   ;;  %v8403_v33 = vld [vmem:[%s10260_s22 + $0xb4] sm:$0xff] }
 0x11a   : > { %1800 = vst.msk [vmem:[#allocation2 + $0x300] sm:$0xf] %vm629_vm3, %v1792_v35  ;;  %vm13079_vm3 = vcmask 257024   ;;  %v1665_v54 = vsel %vm13081_vm14, %v1663_v38, %v1664_v52  ;;  %v1094_v37 = vpack.c.bf16 %v8404_v34, %v8403_v33  ;;  %v1838_v38 = vsel %vm591_vm0, %v1836_v20, %v1837_v36 }
 0x11b   : > { %1801 = vst.msk [vmem:[#allocation2 + $0x308] sm:$0xf] %vm13075_vm15, %v1792_v35  ;;  %1668 = vrot.lane.b32.xlu1 %v1665_v54, %s10145_s26  ;;  %vm13082_vm15 = vcmask 1048322   ;;  %v1301_v20 = vrot.slane %v1297_v19, 6 }
 0x11c   : > { %1932 = vst.msk [vmem:[#allocation2 + $0x308] sm:$0xf0] %vm13076_vm11, %v1924_v40  ;;  %v2006_v56 = vpop.permute.xlu1 %2005  ;;  %vm13083_vm11 = vmmov %vm13081_vm14  ;;  %vm570_vm14 = vcmask 1047808   ;;  %v1098_v39 = vrot.slane %v1094_v37, 2  ;;  %v2162_v22 = vld [vmem:[#allocation2 + $0x2e0] sm:$0xff] }
 0x11d   : > { %1933 = vst.msk [vmem:[#allocation2 + $0x310] sm:$0xf0] %vm13077_vm10, %v1924_v40  ;;  %v1902_v58 = vpop.permute.xlu0 %1901  ;;  %v922_v59 = vsel %vm13083_vm11, %v920_v41, %v921_v55  ;;  %vm13084_vm10 = vcmask 517120   ;;  %vm13090_vm11 = vcmask 785414   ;;  %v8461_v37 = vld [vmem:[%s10260_s22 + $0x104] sm:$0xff] }
 0x11e   : > { %1826 = vst.msk [vmem:[#allocation2 + $0x308] sm:$0xf] %vm13078_vm8, %v1818_v43  ;;  %vm13085_vm8 = vcmask 1048066  }
 0x11f   : > { %1827 = vst.msk [vmem:[#allocation2 + $0x310] sm:$0xf] %vm13079_vm3, %v1818_v43  ;;  %vm13087_vm3 = vcmask 1041920   ;;  %1744 = vrot.lane.b32.xlu1 %v1739_v14, %s10145_s26  ;;  %v1099_v43 = vsel %vm591_vm0, %v1097_v25, %v1098_v39 }
 0x120   : > { %925 = vst.msk [vmem:[#allocation2 + $0xb8] sm:$0xfc] %vm13080_vm9, %v920_v41  ;;  %2841 = vmatmul.mubr.bf16.gmra.mrb[68].mxu0 %v2138_v60  ;;  %v2027_v63 = vpop.permute.xlu1 %2026  ;;  %vm13088_vm9 = vcmask 254976   ;;  %v2155_v41 = vld [vmem:[#allocation2 + $0x2a8] sm:$0xff]  ;;  %v8580_v60 = vld [vmem:[%s10260_s22 + $0x1db] sm:$0xf] }
 0x121   : > { %1935 = vst.msk [vmem:[#allocation2 + $0x330] sm:$0xff] %vm12947_vm5, %v1926_v48  ;;  %2850 = vmatprep.mubr.bf16.mxu0 %v2143_v57  ;;  %v1928_v1 = vpop.permute.xlu0 %1927 }
 0x122   : > { %1908 = vst.msk [vmem:[#allocation2 + $0x320] sm:$0xff] %vm526_vm12, %v1900_v51 }
 0x123   : > { %1909 = vst.msk [vmem:[#allocation2 + $0x328] sm:$0xff] %vm528_vm13, %v1900_v51  ;;  %1841 = vrot.lane.b32.xlu1 %v1838_v38, %s10145_s26  ;;  %v8422_v51 = vld [vmem:[%s10260_s22 + $0xcc] sm:$0xff] }
 0x124   : > { %1934 = vst.msk [vmem:[#allocation2 + $0x328] sm:$0xff] %vm548_vm2, %v1926_v48  ;;  %v2029_v4 = vpop.permute.xlu1 %2028  ;;  %v1942_v48 = vpack.c.bf16 %v8578_v46, %v8577_v45  ;;  %v1203_v53 = vpack.c.bf16 %v8422_v51, %v8421_v50  ;;  %v8462_v38 = vld [vmem:[%s10260_s22 + $0x10c] sm:$0xff]  ;;  %v8463_v46 = vld [vmem:[%s10260_s22 + $0x114] sm:$0xff] }
 0x125   : > { %2011 = vst.msk [vmem:[#allocation2 + $0x340] sm:$0xfc] %vm13082_vm15, %v2006_v56  ;;  %v2008_v7 = vpop.permute.xlu0 %2007  ;;  %vm13089_vm15 = vcmask 783360   ;;  %v2167_v21 = vld [vmem:[#allocation2 + $0x308] sm:$0xff] }
 0x126   : > { %2012 = vst.msk [vmem:[#allocation2 + $0x348] sm:$0xfc] %vm865_vm7, %v2006_v56  ;;  %vm13086_vm7 = vcmask 261122   ;;  %v1946_v52 = vrot.slane %v1942_v48, 4  ;;  %v1207_v55 = vrot.slane %v1203_v53, 4  ;;  %v2159_v56 = vld [vmem:[#allocation2 + $0x2c8] sm:$0xff] }
 0x127   : > { %1910 = vst.msk [vmem:[#allocation2 + $0x340] sm:$0x3] %vm752_vm6, %v1902_v58  ;;  %vm572_vm6 = vcmask 1045760  }
 0x128   : > { %1911 = vst.msk [vmem:[#allocation2 + $0x348] sm:$0x3] %vm13084_vm10, %v1902_v58  ;;  %2851 = vmatmul.mubr.bf16.gmra.mrb[72].mxu0 %v2142_v8  ;;  %v567_v13 = vpop.permute.xlu1 %566  ;;  %vm686_vm10 = vcmask 1043712   ;;  %1949 = vrot.lane.b32.xlu1 %v1946_v52, %s10145_s26  ;;  %v2154_v58 = vld [vmem:[#allocation2 + $0x2a0] sm:$0xff] }
 0x129   : > { %926 = vst.msk [vmem:[#allocation2 + $0xd8] sm:$0xff] %vm508_vm4, %v922_v59  ;;  %994 = vst.msk [vmem:[#allocation2 + $0xf8] sm:$0xff] %vm508_vm4, %v992_v5  ;;  %2860 = vmatprep.mubr.bf16.mxu0 %v2147_v6  ;;  %v565_v16 = vpop.permute.xlu0 %564  ;;  %v8579_v59 = vld [vmem:[%s10260_s22 + $0x1d3] sm:$0xff] }
 0x12a   : > { %2032 = vst.msk [vmem:[#allocation2 + $0x348] sm:$0xfc] %vm13085_vm8, %v2027_v63  ;;  %vm809_vm8 = vcmask 1041664   ;;  %v1943_v61 = vpack.c.bf16 %v8580_v60, %v8579_v59 }
 0x12b   : > { %2033 = vst.msk [vmem:[#allocation2 + $0x350] sm:$0xfc] %vm13086_vm7, %v2027_v63  ;;  %vm13091_vm7 = vcmask 781312   ;;  %v8423_v63 = vld [vmem:[%s10260_s22 + $0xd4] sm:$0xff]  ;;  %v2171_v33 = vld [vmem:[#allocation2 + $0x328] sm:$0xff] }
 0x12c   : > { %1936 = vst.msk [vmem:[#allocation2 + $0x348] sm:$0x3] %vm13087_vm3, %v1928_v1  ;;  %v677_v23 = vpop.permute.xlu1 %676  ;;  %vm909_vm3 = vcmask 1047810   ;;  %v1947_v2 = vrot.slane %v1943_v61, 4  ;;  %v1204_v3 = vpack.c.bf16 %v8424_v0, %v8423_v63  ;;  %v8501_v63 = vld [vmem:[%s10260_s22 + $0x144] sm:$0xff]  ;;  %v8502_v0 = vld [vmem:[%s10260_s22 + $0x14c] sm:$0xff] }
 0x12d   : > { %1937 = vst.msk [vmem:[#allocation2 + $0x350] sm:$0x3] %vm13088_vm9, %v1928_v1  ;;  %v675_v27 = vpop.permute.xlu0 %674  ;;  %vm13092_vm9 = vcmask 785412  }
 0x12e   : > { %2035 = vst.msk [vmem:[#allocation2 + $0x370] sm:$0xff] %vm12947_vm5, %v2029_v4  ;;  %1953 = vrot.lane.b32.xlu1 %v1947_v2, %s10145_s26  ;;  %v1208_v5 = vrot.slane %v1204_v3, 4  ;;  %vm12954_vm5 = vcmask 1042400  }
 0x12f   : > { %2013 = vst.msk [vmem:[#allocation2 + $0x360] sm:$0xff] %vm526_vm12, %v2008_v7  ;;  %vm806_vm12 = vcmask 1047812  }
 0x130   : > { %2014 = vst.msk [vmem:[#allocation2 + $0x368] sm:$0xff] %vm528_vm13, %v2008_v7  ;;  %2861 = vmatmul.mubr.bf16.gmra.mrb[76].mxu0 %v2146_v28  ;;  %v798_v32 = vpop.permute.xlu1 %797  ;;  %v2163_v7 = vld [vmem:[#allocation2 + $0x2e8] sm:$0xff]  ;;  %v1209_v10 = vsel %vm12946_vm1, %v1207_v55, %v1208_v5  ;;  %v8444_v28 = vld [vmem:[%s10260_s22 + $0xfc] sm:$0xf] }
 0x131   : > { %2034 = vst.msk [vmem:[#allocation2 + $0x368] sm:$0xff] %vm548_vm2, %v2029_v4  ;;  %vm683_vm2 = vcmask 1047814   ;;  %2870 = vmatprep.mubr.bf16.mxu0 %v2151_v26  ;;  %v679_v35 = vpop.permute.xlu0 %678  ;;  %v1948_v4 = vsel %vm12946_vm1, %v1946_v52, %v1947_v2  ;;  %v2174_v52 = vld [vmem:[#allocation2 + $0x340] sm:$0xff] }
 0x132   : > { %573 = vst.msk [vmem:[#allocation2 + $0x30] sm:$0x3f] %vm572_vm6, %v567_v13  ;;  %1951 = vrot.lane.b32.xlu0 %v1948_v4, %s10145_s26  ;;  %v8598_v13 = vld [vmem:[%s10260_s22 + $0x1eb] sm:$0xff]  ;;  %v2077_v4 = vld [vmem:[#allocation2 + $0x38] sm:$0xff] }
 0x133   : > { %571 = vst.msk [vmem:[#allocation2 + $0x10] sm:$0xff] %vm570_vm14, %v565_v16  ;;  %685 = vst.msk [vmem:[#allocation2 + $0x50] sm:$0xff] %vm570_vm14, %v677_v23  ;;  %v2040_v14 = vpack.c.bf16 %v8598_v13, %v8597_v12  ;;  %v8599_v23 = vld [vmem:[%s10260_s22 + $0x1f3] sm:$0xff] }
 0x134   : > { %684 = vst.msk [vmem:[#allocation2 + $0x30] sm:$0xc0] %vm683_vm2, %v675_v27  ;;  %v802_v40 = vpop.permute.xlu1 %801  ;;  %v8443_v27 = vld [vmem:[%s10260_s22 + $0xf4] sm:$0xff] }
 0x135   : > { %995 = vst.msk [vmem:[#allocation2 + $0x118] sm:$0x3f] %vm13089_vm15, %v993_v24  ;;  %v800_v42 = vpop.permute.xlu0 %799  ;;  %vm13093_vm15 = vcmask 779264   ;;  %v2044_v18 = vrot.slane %v2040_v14, 6  ;;  %v8600_v24 = vld [vmem:[%s10260_s22 + $0x1fb] sm:$0xf]  ;;  %v1298_v30 = vpack.c.bf16 %v8444_v28, %v8443_v27 }
 0x136   : > { %1103 = vst.msk [vmem:[#allocation2 + $0x118] sm:$0xc0] %vm13090_vm11, %v1097_v25  ;;  %vm13094_vm11 = vcmask 785410   ;;  %v2041_v26 = vpack.c.bf16 %v8600_v24, %v8599_v23  ;;  %v2178_v60 = vld [vmem:[#allocation2 + $0x360] sm:$0xff]  ;;  %v2081_v12 = vld [vmem:[#allocation2 + $0x58] sm:$0xff] }
 0x137   : > { %807 = vst.msk [vmem:[#allocation2 + $0x70] sm:$0xf0] %vm806_vm12, %v798_v32  ;;  %2047 = vrot.lane.b32.xlu0 %v2044_v18, %s10145_s26  ;;  %v1302_v32 = vrot.slane %v1298_v30, 6  ;;  %v8524_v23 = vld [vmem:[%s10260_s22 + $0x17c] sm:$0xf]  ;;  %v8541_v30 = vld [vmem:[%s10260_s22 + $0x184] sm:$0xff] }
 0x138   : > { %687 = vst.msk [vmem:[#allocation2 + $0x70] sm:$0xf] %vm686_vm10, %v679_v35  ;;  %2871 = vmatmul.mubr.bf16.gmra.mrb[80].mxu0 %v2150_v44  ;;  %v906_v47 = vpop.permute.xlu1 %905  ;;  %v2045_v29 = vrot.slane %v2041_v26, 6  ;;  %v2166_v35 = vld [vmem:[#allocation2 + $0x300] sm:$0xff]  ;;  %v8482_v44 = vld [vmem:[%s10260_s22 + $0x12c] sm:$0xff]  ;;  %v2089_v27 = vld [vmem:[#allocation2 + $0x98] sm:$0xff] }
 0x139   : > { %810 = vst.msk [vmem:[#allocation2 + $0xb0] sm:$0x3] %vm809_vm8, %v802_v40  ;;  %2880 = vmatprep.mubr.bf16.mxu0 %v2155_v41  ;;  %v904_v49 = vpop.permute.xlu0 %903  ;;  %v2175_v40 = vld [vmem:[#allocation2 + $0x348] sm:$0xff] }
 0x13a   : > { %1105 = vst.msk [vmem:[#allocation2 + $0x158] sm:$0xf] %vm13091_vm7, %v1098_v39  ;;  %vm13095_vm7 = vcmask 1041408   ;;  %v1373_v39 = vpack.c.bf16 %v8462_v38, %v8461_v37  ;;  %v2179_v50 = vld [vmem:[#allocation2 + $0x368] sm:$0xff]  ;;  %v2072_v2 = vld [vmem:[#allocation2 + $0x10] sm:$0xff] }
 0x13b   : > { %808 = vst.msk [vmem:[#allocation2 + $0x90] sm:$0xff] %vm570_vm14, %v800_v42  ;;  %911 = vst.msk [vmem:[#allocation2 + $0xd0] sm:$0xff] %vm570_vm14, %v906_v47  ;;  %v2046_v31 = vsel %vm13095_vm7, %v2044_v18, %v2045_v29  ;;  %v2170_v42 = vld [vmem:[#allocation2 + $0x320] sm:$0xff]  ;;  %v8464_v47 = vld [vmem:[%s10260_s22 + $0x11c] sm:$0xf] }
 0x13c   : > { %1104 = vst.msk [vmem:[#allocation2 + $0x138] sm:$0xff] %vm508_vm4, %v1099_v43  ;;  %v983_v54 = vpop.permute.xlu1 %982  ;;  %1214 = vst.msk [vmem:[#allocation2 + $0x178] sm:$0xff] %vm508_vm4, %v1209_v10  ;;  %2049 = vrot.lane.b32.xlu1 %v2046_v31, %s10145_s26  ;;  %v8481_v43 = vld [vmem:[%s10260_s22 + $0x124] sm:$0xff]  ;;  %v1374_v48 = vpack.c.bf16 %v8464_v47, %v8463_v46  ;;  %v2080_v18 = vld [vmem:[#allocation2 + $0x50] sm:$0xff] }
 0x13d   : > { %910 = vst.msk [vmem:[#allocation2 + $0xb0] sm:$0xfc] %vm909_vm3, %v904_v49  ;;  %v981_v57 = vpop.permute.xlu0 %980  ;;  %v1474_v45 = vpack.c.bf16 %v8482_v44, %v8481_v43  ;;  %v8542_v31 = vld [vmem:[%s10260_s22 + $0x18c] sm:$0xff]  ;;  %v8563_v47 = vld [vmem:[%s10260_s22 + $0x1b4] sm:$0xff] }
 0x13e   : > { %987 = vst.msk [vmem:[#allocation2 + $0x110] sm:$0x3f] %vm572_vm6, %v983_v54  ;;  %v8483_v54 = vld [vmem:[%s10260_s22 + $0x134] sm:$0xff]  ;;  %v8562_v37 = vld [vmem:[%s10260_s22 + $0x1ac] sm:$0xff] }
 0x13f   : > { %986 = vst.msk [vmem:[#allocation2 + $0xf0] sm:$0xff] %vm570_vm14, %v981_v57  ;;  %v1478_v49 = vrot.slane %v1474_v45, 2  ;;  %v2084_v26 = vld [vmem:[#allocation2 + $0x70] sm:$0xff]  ;;  %v2097_v45 = vld [vmem:[#allocation2 + $0xd8] sm:$0xff] }
 0x140   : > { %1213 = vst.msk [vmem:[#allocation2 + $0x158] sm:$0xf0] %vm13092_vm9, %v1207_v55  ;;  %2881 = vmatmul.mubr.bf16.gmra.mrb[84].mxu0 %v2154_v58  ;;  %v1080_v62 = vpop.permute.xlu1 %1079  ;;  %vm13096_vm9 = vmmov %vm13095_vm7  ;;  %v8484_v55 = vld [vmem:[%s10260_s22 + $0x13c] sm:$0xf]  ;;  %vm13099_vm7 = vcmask 781312  }
 0x141   : > { %2890 = vmatprep.mubr.bf16.mxu0 %v2159_v56  ;;  %v1078_v1 = vpop.permute.xlu0 %1077  ;;  %1087 = vst.msk [vmem:[#allocation2 + $0x130] sm:$0xff] %vm570_vm14, %v1080_v62  ;;  %v1303_v34 = vsel %vm13096_vm9, %v1301_v20, %v1302_v32  ;;  %v1475_v56 = vpack.c.bf16 %v8484_v55, %v8483_v54  ;;  %v2073_v58 = vld [vmem:[#allocation2 + $0x18] sm:$0xff]  ;;  %vm13100_vm9 = vcmask 785412  }
 0x142   : > { %1086 = vst.msk [vmem:[#allocation2 + $0x110] sm:$0xc0] %vm683_vm2, %v1078_v1  ;;  %v1584_v1 = vpack.c.bf16 %v8502_v0, %v8501_v63  ;;  %v2088_v32 = vld [vmem:[#allocation2 + $0x90] sm:$0xff]  ;;  %v8584_v0 = vld [vmem:[%s10260_s22 + $0x1dc] sm:$0xf] }
 0x143   : > { %1215 = vst.msk [vmem:[#allocation2 + $0x198] sm:$0x3] %vm13093_vm15, %v1208_v5  ;;  %vm13097_vm15 = vcmask 783360   ;;  %v1479_v57 = vrot.slane %v1475_v56, 2  ;;  %v8581_v56 = vld [vmem:[%s10260_s22 + $0x1c4] sm:$0xff]  ;;  %v8583_v63 = vld [vmem:[%s10260_s22 + $0x1d4] sm:$0xff] }
 0x144   : > { %v1188_v6 = vpop.permute.xlu1 %1187  ;;  %1306 = vst.msk [vmem:[#allocation2 + $0x198] sm:$0xfc] %vm13094_vm11, %v1301_v20  ;;  %vm13098_vm11 = vcmask 785414   ;;  %v1588_v3 = vrot.slane %v1584_v1, 4  ;;  %v2085_v20 = vld [vmem:[#allocation2 + $0x78] sm:$0xff]  ;;  %v1966_v1 = vpack.c.bf16 %v8584_v0, %v8583_v63 }
 0x145   : > { %1196 = vst.msk [vmem:[#allocation2 + $0x150] sm:$0xf0] %vm806_vm12, %v1188_v6  ;;  %v1082_v8 = vpop.permute.xlu0 %1081  ;;  %v1480_v59 = vsel %vm591_vm0, %v1478_v49, %v1479_v57  ;;  %v8503_v6 = vld [vmem:[%s10260_s22 + $0x154] sm:$0xff] }
 0x146   : > { %1088 = vst.msk [vmem:[#allocation2 + $0x150] sm:$0xf] %vm686_vm10, %v1082_v8 }
 0x147   : > { %1307 = vst.msk [vmem:[#allocation2 + $0x1b8] sm:$0xff] %vm508_vm4, %v1303_v34  ;;  %1375 = vst.msk [vmem:[#allocation2 + $0x1d8] sm:$0xff] %vm508_vm4, %v1373_v39  ;;  %v1754_v34 = vpack.c.bf16 %v8542_v31, %v8541_v30  ;;  %v8543_v39 = vld [vmem:[%s10260_s22 + $0x194] sm:$0xff] }
 0x148   : > { %2891 = vmatmul.mubr.bf16.gmra.mrb[88].mxu0 %v2158_v11  ;;  %v1192_v15 = vpop.permute.xlu1 %1191  ;;  %1376 = vst.msk [vmem:[#allocation2 + $0x1f8] sm:$0x3f] %vm13097_vm15, %v1374_v48  ;;  %v2076_v11 = vld [vmem:[#allocation2 + $0x30] sm:$0xff]  ;;  %vm13101_vm15 = vcmask 779264   ;;  %v8564_v48 = vld [vmem:[%s10260_s22 + $0x1bc] sm:$0xf] }
 0x149   : > { %2900 = vmatprep.mubr.bf16.mxu0 %v2163_v7  ;;  %v1190_v16 = vpop.permute.xlu0 %1189  ;;  %1198 = vst.msk [vmem:[#allocation2 + $0x190] sm:$0x3] %vm809_vm8, %v1192_v15  ;;  %v8504_v7 = vld [vmem:[%s10260_s22 + $0x15c] sm:$0xf] }
 0x14a   : > { %1197 = vst.msk [vmem:[#allocation2 + $0x170] sm:$0xff] %vm570_vm14, %v1190_v16  ;;  %v1585_v8 = vpack.c.bf16 %v8504_v7, %v8503_v6  ;;  %v8521_v16 = vld [vmem:[%s10260_s22 + $0x164] sm:$0xff] }
 0x14b   : > { %1484 = vst.msk [vmem:[#allocation2 + $0x1f8] sm:$0xc0] %vm13098_vm11, %v1478_v49  ;;  %v1678_v9 = vpack.c.bf16 %v8522_v17, %v8521_v16  ;;  %vm13102_vm11 = vcmask 785410   ;;  %v1856_v49 = vpack.c.bf16 %v8564_v48, %v8563_v47  ;;  %v8603_v16 = vld [vmem:[%s10260_s22 + $0x1f4] sm:$0xff]  ;;  %v8604_v17 = vld [vmem:[%s10260_s22 + $0x1fc] sm:$0xf] }
 0x14c   : > { %1486 = vst.msk [vmem:[#allocation2 + $0x238] sm:$0xf] %vm13099_vm7, %v1479_v57  ;;  %v1589_v10 = vrot.slane %v1585_v8, 4  ;;  %vm13103_vm7 = vcmask 1041408   ;;  %v8582_v57 = vld [vmem:[%s10260_s22 + $0x1cc] sm:$0xff]  ;;  %v8601_v8 = vld [vmem:[%s10260_s22 + $0x1e4] sm:$0xff] }
 0x14d   : > { %v1286_v25 = vpop.permute.xlu0 %1285  ;;  %1485 = vst.msk [vmem:[#allocation2 + $0x218] sm:$0xff] %vm508_vm4, %v1480_v59  ;;  %v1682_v19 = vrot.slane %v1678_v9, 6  ;;  %1756 = vst.msk [vmem:[#allocation2 + $0x2b8] sm:$0xff] %vm508_vm4, %v1754_v34  ;;  %v2100_v59 = vld [vmem:[#allocation2 + $0xf0] sm:$0xff]  ;;  %v2060_v9 = vpack.c.bf16 %v8604_v17, %v8603_v16 }
 0x14e   : > { %1291 = vst.msk [vmem:[#allocation2 + $0x190] sm:$0xfc] %vm909_vm3, %v1286_v25  ;;  %v1590_v13 = vsel %vm12946_vm1, %v1588_v3, %v1589_v10 }
 0x14f   : > { %1594 = vst.msk [vmem:[#allocation2 + $0x238] sm:$0xf0] %vm13100_vm9, %v1588_v3  ;;  %vm13104_vm9 = vcmask 783360   ;;  %v2104_v3 = vld [vmem:[#allocation2 + $0x110] sm:$0xff] }
 0x150   : > { %2901 = vmatmul.mubr.bf16.gmra.mrb[92].mxu0 %v2162_v22  ;;  %1596 = vst.msk [vmem:[#allocation2 + $0x278] sm:$0x3] %vm13101_vm15, %v1589_v10  ;;  %v8523_v22 = vld [vmem:[%s10260_s22 + $0x174] sm:$0xff]  ;;  %vm13105_vm15 = vcmask 785414   ;;  %v8602_v10 = vld [vmem:[%s10260_s22 + $0x1ec] sm:$0xff] }
 0x151   : > { %2910 = vmatprep.mubr.bf16.mxu0 %v2167_v21  ;;  %v1362_v41 = vpop.permute.xlu0 %1361  ;;  %1595 = vst.msk [vmem:[#allocation2 + $0x258] sm:$0xff] %vm508_vm4, %v1590_v13  ;;  %v1679_v24 = vpack.c.bf16 %v8524_v23, %v8523_v22  ;;  %v2116_v23 = vld [vmem:[#allocation2 + $0x170] sm:$0xff] }
 0x152   : > { %1367 = vst.msk [vmem:[#allocation2 + $0x1d0] sm:$0xff] %vm570_vm14, %v1362_v41  ;;  %v2092_v41 = vld [vmem:[#allocation2 + $0xb0] sm:$0xff]  ;;  %v2133_v30 = vld [vmem:[#allocation2 + $0x1f8] sm:$0xff] }
 0x153   : > { %1687 = vst.msk [vmem:[#allocation2 + $0x278] sm:$0xfc] %vm13102_vm11, %v1682_v19  ;;  %v1683_v25 = vrot.slane %v1679_v24, 6  ;;  %v2121_v24 = vld [vmem:[#allocation2 + $0x198] sm:$0xff] }
 0x155   : > { %v1459_v53 = vpop.permute.xlu0 %1458  ;;  %v1684_v28 = vsel %vm13103_vm7, %v1682_v19, %v1683_v25  ;;  %v2112_v19 = vld [vmem:[#allocation2 + $0x150] sm:$0xff] }
 0x156   : > { %1467 = vst.msk [vmem:[#allocation2 + $0x1f0] sm:$0xc0] %vm683_vm2, %v1459_v53  ;;  %v2120_v25 = vld [vmem:[#allocation2 + $0x190] sm:$0xff]  ;;  %v2141_v34 = vld [vmem:[#allocation2 + $0x238] sm:$0xff] }
 0x157   : > { %v1288_v36 = vpop.permute.xlu1 %1287  ;;  %1688 = vst.msk [vmem:[#allocation2 + $0x298] sm:$0xff] %vm508_vm4, %v1684_v28  ;;  %v2129_v28 = vld [vmem:[#allocation2 + $0x1d8] sm:$0xff] }
 0x158   : > { %2911 = vmatmul.mubr.bf16.gmra.mrb[96].mxu0 %v2166_v35  ;;  %1292 = vst.msk [vmem:[#allocation2 + $0x1b0] sm:$0xff] %vm570_vm14, %v1288_v36  ;;  %v2093_v35 = vld [vmem:[#allocation2 + $0xb8] sm:$0xff]  ;;  %v8561_v36 = vld [vmem:[%s10260_s22 + $0x1a4] sm:$0xff] }
 0x159   : > { %2920 = vmatprep.mubr.bf16.mxu0 %v2171_v33  ;;  %v1463_v62 = vpop.permute.xlu0 %1462  ;;  %v1855_v38 = vpack.c.bf16 %v8562_v37, %v8561_v36  ;;  %v2145_v36 = vld [vmem:[#allocation2 + $0x258] sm:$0xff] }
 0x15a   : > { %1469 = vst.msk [vmem:[#allocation2 + $0x230] sm:$0xf] %vm686_vm10, %v1463_v62 }
 0x15b   : > { %v1364_v51 = vpop.permute.xlu1 %1363  ;;  %v1859_v44 = vrot.slane %v1855_v38, 2  ;;  %v2149_v38 = vld [vmem:[#allocation2 + $0x278] sm:$0xff] }
 0x15c   : > { %1368 = vst.msk [vmem:[#allocation2 + $0x1f0] sm:$0x3f] %vm572_vm6, %v1364_v51  ;;  %v2096_v51 = vld [vmem:[#allocation2 + $0xd0] sm:$0xff] }
 0x15d   : > { %1865 = vst.msk [vmem:[#allocation2 + $0x2d8] sm:$0xc0] %vm13105_vm15, %v1859_v44  ;;  %vm5635_vm15 = vcmask 687108  }
 0x15f   : > { %v1461_v61 = vpop.permute.xlu1 %1460 }
 0x160   : > { %2921 = vmatmul.mubr.bf16.gmra.mrb[100].mxu0 %v2170_v42  ;;  %1468 = vst.msk [vmem:[#allocation2 + $0x210] sm:$0xff] %vm570_vm14, %v1461_v61  ;;  %v2105_v61 = vld [vmem:[#allocation2 + $0x118] sm:$0xff] }
 0x161   : > { %2930 = vmatprep.mubr.bf16.mxu0 %v2175_v40  ;;  %v8544_v40 = vld [vmem:[%s10260_s22 + $0x19c] sm:$0xf]  ;;  %s10147_s22 = smov 40  }
 0x162   : > { %v1755_v43 = vpack.c.bf16 %v8544_v40, %v8543_v39  ;;  %v2153_v40 = vld [vmem:[#allocation2 + $0x298] sm:$0xff] }
 0x163   : > { %v1569_v5 = vpop.permute.xlu1 %1568  ;;  %v2132_v31 = vld [vmem:[#allocation2 + $0x1f0] sm:$0xff] }
 0x164   : > { %1577 = vst.msk [vmem:[#allocation2 + $0x230] sm:$0xf0] %vm806_vm12, %v1569_v5 }
 0x165   : > { %1757 = vst.msk [vmem:[#allocation2 + $0x2d8] sm:$0x3f] %vm13104_vm9, %v1755_v43  ;;  %vm5567_vm9 = vcmask 683008  }
 0x168   : > { %2931 = vmatmul.mubr.bf16.gmra.mrb[104].mxu0 %v2174_v52  ;;  %v1573_v15 = vpop.permute.xlu1 %1572  ;;  %v2101_v52 = vld [vmem:[#allocation2 + $0xf8] sm:$0xff] }
 0x169   : > { %2940 = vmatprep.mubr.bf16.mxu0 %v2179_v50  ;;  %v1571_v14 = vpop.permute.xlu0 %1570  ;;  %1579 = vst.msk [vmem:[#allocation2 + $0x270] sm:$0x3] %vm809_vm8, %v1573_v15  ;;  %v1860_v50 = vrot.slane %v1856_v49, 2 }
 0x16a   : > { %1578 = vst.msk [vmem:[#allocation2 + $0x250] sm:$0xff] %vm570_vm14, %v1571_v14  ;;  %v2113_v14 = vld [vmem:[#allocation2 + $0x158] sm:$0xff] }
 0x16b   : > { %v1861_v53 = vsel %vm591_vm0, %v1859_v44, %v1860_v50  ;;  %vm13107_vm0 = vcmask 785412  }
 0x16c   : > { %1866 = vst.msk [vmem:[#allocation2 + $0x2f8] sm:$0xff] %vm508_vm4, %v1861_v53  ;;  %v2161_v44 = vld [vmem:[#allocation2 + $0x2d8] sm:$0xff] }
 0x16e   : > { %v1667_v21 = vpop.permute.xlu0 %1666 }
 0x16f   : > { %1672 = vst.msk [vmem:[#allocation2 + $0x270] sm:$0xfc] %vm909_vm3, %v1667_v21 }
 0x170   : > { %2941 = vmatmul.mubr.bf16.gmra.mrb[108].mxu0 %v2178_v60 }
 0x171   : > { %8665 = vmatprep.mubr.msk.bf16.mxu0 %vm508_vm4, %v2073_v58  ;;  %v1965_v58 = vpack.c.bf16 %v8582_v57, %v8581_v56  ;;  %v2144_v37 = vld [vmem:[#allocation2 + $0x250] sm:$0xff]  ;;  %v2242_v57 = vld [vmem:[%s12899_s2] sm:$0x3] }
 0x173   : > { %v1969_v60 = vrot.slane %v1965_v58, 4 }
 0x175   : > { %1975 = vst.msk [vmem:[#allocation2 + $0x318] sm:$0xf0] %vm13107_vm0, %v1969_v60  ;;  %vm5705_vm0 = vcmask 685057  }
 0x176   : > { %v2148_v39 = vld [vmem:[#allocation2 + $0x270] sm:$0xff] }
 0x178   : > { %2984 = vmatmul.mubr.bf16.vlgmr.msra.gmra.mrb[0].mxu0 %v2072_v2  ;;  %v1970_v2 = vrot.slane %v1966_v1, 4 }
 0x179   : > { %8666 = vmatprep.mubr.msk.bf16.mxu0 %vm508_vm4, %v2077_v4  ;;  %v2109_v4 = vld [vmem:[#allocation2 + $0x138] sm:$0xff] }
 0x17a   : > { %v1971_v5 = vsel %vm12946_vm1, %v1969_v60, %v1970_v2 }
 0x17b   : > { %1976 = vst.msk [vmem:[#allocation2 + $0x338] sm:$0xff] %vm508_vm4, %v1971_v5 }
 0x17c   : > { %v1743_v33 = vpop.permute.xlu0 %1742 }
 0x17d   : > { %1748 = vst.msk [vmem:[#allocation2 + $0x2b0] sm:$0xff] %vm570_vm14, %v1743_v33  ;;  %v2136_v33 = vld [vmem:[#allocation2 + $0x210] sm:$0xff] }
 0x180   : > { %2994 = vmatmul.mubr.bf16.gmra.mrb[4].mxu0 %v2076_v11  ;;  %v2059_v11 = vpack.c.bf16 %v8602_v10, %v8601_v8 }
 0x181   : > { %8667 = vmatprep.mubr.msk.bf16.mxu0 %vm508_vm4, %v2081_v12  ;;  %v2108_v12 = vld [vmem:[#allocation2 + $0x130] sm:$0xff] }
 0x182   : > { %v2063_v13 = vrot.slane %v2059_v11, 6 }
 0x184   : > { %v2156_v43 = vld [vmem:[#allocation2 + $0x2b0] sm:$0xff] }
 0x185   : > { %v1840_v46 = vpop.permute.xlu0 %1839 }
 0x186   : > { %1848 = vst.msk [vmem:[#allocation2 + $0x2d0] sm:$0xc0] %vm683_vm2, %v1840_v46  ;;  %vm13108_vm2 = vcmask 779264   ;;  %v2165_v46 = vld [vmem:[#allocation2 + $0x2f8] sm:$0xff] }
 0x187   : > { %1977 = vst.msk [vmem:[#allocation2 + $0x358] sm:$0x3] %vm13108_vm2, %v1970_v2  ;;  %vm5759_vm2 = vcmask 687110  }
 0x188   : > { %3004 = vmatmul.mubr.bf16.gmra.mrb[8].mxu0 %v2080_v18  ;;  %v2064_v18 = vrot.slane %v2060_v9, 6 }
 0x189   : > { %8668 = vmatprep.mubr.msk.bf16.mxu0 %vm508_vm4, %v2085_v20  ;;  %v1844_v55 = vpop.permute.xlu0 %1843  ;;  %v2117_v20 = vld [vmem:[#allocation2 + $0x178] sm:$0xff] }
 0x18a   : > { %1850 = vst.msk [vmem:[#allocation2 + $0x310] sm:$0xf] %vm686_vm10, %v1844_v55  ;;  %vm13110_vm10 = vmmov %vm13103_vm7  ;;  %vm5565_vm7 = vcmask 687111  }
 0x18b   : > { %v2065_v21 = vsel %vm13110_vm10, %v2063_v13, %v2064_v18  ;;  %vm5829_vm10 = vcmask 687107  }
 0x18c   : > { %2069 = vst.msk [vmem:[#allocation2 + $0x378] sm:$0xff] %vm508_vm4, %v2065_v21 }
 0x18d   : > { %v1669_v29 = vpop.permute.xlu1 %1668 }
 0x18e   : > { %1673 = vst.msk [vmem:[#allocation2 + $0x290] sm:$0xff] %vm570_vm14, %v1669_v29  ;;  %v2128_v29 = vld [vmem:[#allocation2 + $0x1d0] sm:$0xff] }
 0x190   : > { %3014 = vmatmul.mubr.bf16.gmra.mrb[12].mxu0 %v2084_v26  ;;  %v2125_v26 = vld [vmem:[#allocation2 + $0x1b8] sm:$0xff] }
 0x191   : > { %8669 = vmatprep.mubr.msk.bf16.mxu0 %vm508_vm4, %v2089_v27  ;;  %v1745_v42 = vpop.permute.xlu1 %1744  ;;  %v2124_v27 = vld [vmem:[#allocation2 + $0x1b0] sm:$0xff] }
 0x192   : > { %1749 = vst.msk [vmem:[#allocation2 + $0x2d0] sm:$0x3f] %vm572_vm6, %v1745_v42  ;;  %vm13106_vm6 = vcmask 781312   ;;  %v2157_v42 = vld [vmem:[#allocation2 + $0x2b8] sm:$0xff] }
 0x193   : > { %1867 = vst.msk [vmem:[#allocation2 + $0x318] sm:$0xf] %vm13106_vm6, %v1860_v50  ;;  %v2173_v50 = vld [vmem:[#allocation2 + $0x338] sm:$0xff]  ;;  %vm5637_vm6 = vcmask 679936  }
 0x195   : > { %v1842_v54 = vpop.permute.xlu1 %1841 }
 0x196   : > { %1849 = vst.msk [vmem:[#allocation2 + $0x2f0] sm:$0xff] %vm570_vm14, %v1842_v54 }
 0x198   : > { %3024 = vmatmul.mubr.bf16.gmra.mrb[16].mxu0 %v2088_v32  ;;  %v2137_v32 = vld [vmem:[#allocation2 + $0x218] sm:$0xff] }
 0x199   : > { %8670 = vmatprep.mubr.msk.bf16.mxu0 %vm508_vm4, %v2093_v35  ;;  %v2140_v35 = vld [vmem:[#allocation2 + $0x230] sm:$0xff] }
 0x19a   : > { %v1950_v62 = vpop.permute.xlu1 %1949  ;;  %v2169_v48 = vld [vmem:[#allocation2 + $0x318] sm:$0xff] }
 0x19b   : > { %1958 = vst.msk [vmem:[#allocation2 + $0x310] sm:$0xf0] %vm806_vm12, %v1950_v62  ;;  %vm13109_vm12 = vmmov %vm13102_vm11  ;;  %vm5511_vm11 = vcmask 686082  }
 0x19c   : > { %2068 = vst.msk [vmem:[#allocation2 + $0x358] sm:$0xfc] %vm13109_vm12, %v2063_v13  ;;  %vm5761_vm12 = vcmask 681984  }
 0x19d   : > { %v2164_v47 = vld [vmem:[#allocation2 + $0x2f0] sm:$0xff] }
 0x1a0   : > { %3034 = vmatmul.mubr.bf16.gmra.mrb[20].mxu0 %v2092_v41  ;;  %v1954_v7 = vpop.permute.xlu1 %1953  ;;  %v2152_v41 = vld [vmem:[#allocation2 + $0x290] sm:$0xff] }
 0x1a1   : > { %8671 = vmatprep.mubr.msk.bf16.mxu0 %vm508_vm4, %v2097_v45  ;;  %1960 = vst.msk [vmem:[#allocation2 + $0x350] sm:$0x3] %vm809_vm8, %v1954_v7  ;;  %v2160_v45 = vld [vmem:[#allocation2 + $0x2d0] sm:$0xff]  ;;  %vm5441_vm8 = vcmask 687109  }
 0x1a2   : > { %v2168_v49 = vld [vmem:[#allocation2 + $0x310] sm:$0xff] }
 0x1a3   : > { %v2177_v53 = vld [vmem:[#allocation2 + $0x358] sm:$0xff] }
 0x1a4   : > { %v1952_v6 = vpop.permute.xlu0 %1951 }
 0x1a5   : > { %1959 = vst.msk [vmem:[#allocation2 + $0x330] sm:$0xff] %vm570_vm14, %v1952_v6 }
 0x1a8   : > { %3044 = vmatmul.mubr.bf16.gmra.mrb[24].mxu0 %v2096_v51  ;;  %v2244_v51 = vlaneseq }
 0x1a9   : > { %8672 = vmatprep.mubr.msk.bf16.mxu0 %vm508_vm4, %v2101_v52  ;;  %v2048_v15 = vpop.permute.xlu0 %2047 }
 0x1aa   : > { %2053 = vst.msk [vmem:[#allocation2 + $0x350] sm:$0xfc] %vm909_vm3, %v2048_v15  ;;  %v11280_v54 = vshrl.u32 %v2244_v51, 7  ;;  %vm5443_vm3 = vcmask 680960  }
 0x1ac   : > { %v2172_v52 = vld [vmem:[#allocation2 + $0x330] sm:$0xff]  ;;  %13111 = vst [vmem:[#allocation7_spill] sm:$0xff] %v11280_v54  ;;  %v12942_v55 = vsub.s32 0, %v11280_v54  ;;  %v12941_v58 = vsub.s32 1, %v11280_v54 }
 0x1ae   : > { %v2050_v22 = vpop.permute.xlu1 %2049  ;;  %v11290_v60 = vrot.slane %v2242_v57, %v12942_v55 }
 0x1af   : > { %2054 = vst.msk [vmem:[#allocation2 + $0x370] sm:$0xff] %vm570_vm14, %v2050_v22  ;;  %vm5391_vm14 = vcmask 684032  }
 0x1b0   : > { %3054 = vmatmul.mubr.bf16.gmra.mrb[28].mxu0 %v2100_v59  ;;  %v2181_v59 = vld [vmem:[#allocation2 + $0x378] sm:$0xff] }
 0x1b1   : > { %8673 = vmatprep.mubr.msk.bf16.mxu0 %vm508_vm4, %v2105_v61  ;;  %v2176_v56 = vld [vmem:[#allocation2 + $0x350] sm:$0xff]  ;;  %v11294_v61 = vrot.slane %v2242_v57, %v12941_v58 }
 0x1b8   : > { %3064 = vmatmul.mubr.bf16.gmra.mrb[32].mxu0 %v2104_v3  ;;  %v2180_v3 = vld [vmem:[#allocation2 + $0x370] sm:$0xff] }
 0x1b9   : > { %8674 = vmatprep.mubr.msk.bf16.mxu0 %vm508_vm4, %v2109_v4 }
 0x1c0   : > { %3074 = vmatmul.mubr.bf16.gmra.mrb[36].mxu0 %v2108_v12 }
 0x1c1   : > { %8675 = vmatprep.mubr.msk.bf16.mxu0 %vm508_vm4, %v2113_v14 }
 0x1c8   : > { %3084 = vmatmul.mubr.bf16.gmra.mrb[40].mxu0 %v2112_v19 }
 0x1c9   : > { %8676 = vmatprep.mubr.msk.bf16.mxu0 %vm508_vm4, %v2117_v20  ;;  %v9759_v20 = vld [vmem:[%s12902_s5 + $0x4] ss:$16 sps:$4 sm:$0xff]  }
 0x1ca   : > { %4305 = vmatprep.mubr.bf16.mxu1 %v9759_v20 }
 0x1d0   : > { %3094 = vmatmul.mubr.bf16.gmra.mrb[44].mxu0 %v2116_v23 }
 0x1d1   : > { %8677 = vmatprep.mubr.msk.bf16.mxu0 %vm508_vm4, %v2121_v24 }
 0x1d8   : > { %3104 = vmatmul.mubr.bf16.gmra.mrb[48].mxu0 %v2120_v25 }
 0x1d9   : > { %8678 = vmatprep.mubr.msk.bf16.mxu0 %vm508_vm4, %v2125_v26 }
 0x1e0   : > { %3114 = vmatmul.mubr.bf16.gmra.mrb[52].mxu0 %v2124_v27 }
 0x1e1   : > { %8679 = vmatprep.mubr.msk.bf16.mxu0 %vm508_vm4, %v2129_v28 }
 0x1e8   : > { %3124 = vmatmul.mubr.bf16.gmra.mrb[56].mxu0 %v2128_v29 }
 0x1e9   : > { %8680 = vmatprep.mubr.msk.bf16.mxu0 %vm508_vm4, %v2133_v30 }
 0x1f0   : > { %3134 = vmatmul.mubr.bf16.gmra.mrb[60].mxu0 %v2132_v31 }
 0x1f1   : > { %8681 = vmatprep.mubr.msk.bf16.mxu0 %vm508_vm4, %v2137_v32 }
 0x1f8   : > { %3144 = vmatmul.mubr.bf16.gmra.mrb[64].mxu0 %v2136_v33 }
 0x1f9   : > { %8682 = vmatprep.mubr.msk.bf16.mxu0 %vm508_vm4, %v2141_v34 }
 0x200   : > { %3154 = vmatmul.mubr.bf16.gmra.mrb[68].mxu0 %v2140_v35 }
 0x201   : > { %8683 = vmatprep.mubr.msk.bf16.mxu0 %vm508_vm4, %v2145_v36 }
 0x208   : > { %3164 = vmatmul.mubr.bf16.gmra.mrb[72].mxu0 %v2144_v37 }
 0x209   : > { %8684 = vmatprep.mubr.msk.bf16.mxu0 %vm508_vm4, %v2149_v38 }
 0x210   : > { %3174 = vmatmul.mubr.bf16.gmra.mrb[76].mxu0 %v2148_v39 }
 0x211   : > { %8685 = vmatprep.mubr.msk.bf16.mxu0 %vm508_vm4, %v2153_v40 }
 0x218   : > { %3184 = vmatmul.mubr.bf16.gmra.mrb[80].mxu0 %v2152_v41 }
 0x219   : > { %8686 = vmatprep.mubr.msk.bf16.mxu0 %vm508_vm4, %v2157_v42 }
 0x220   : > { %3194 = vmatmul.mubr.bf16.gmra.mrb[84].mxu0 %v2156_v43 }
 0x221   : > { %8687 = vmatprep.mubr.msk.bf16.mxu0 %vm508_vm4, %v2161_v44 }
 0x228   : > { %3204 = vmatmul.mubr.bf16.gmra.mrb[88].mxu0 %v2160_v45 }
 0x229   : > { %8688 = vmatprep.mubr.msk.bf16.mxu0 %vm508_vm4, %v2165_v46 }
 0x230   : > { %3214 = vmatmul.mubr.bf16.gmra.mrb[92].mxu0 %v2164_v47 }
 0x231   : > { %8689 = vmatprep.mubr.msk.bf16.mxu0 %vm508_vm4, %v2169_v48 }
 0x238   : > { %3224 = vmatmul.mubr.bf16.gmra.mrb[96].mxu0 %v2168_v49 }
 0x239   : > { %8690 = vmatprep.mubr.msk.bf16.mxu0 %vm508_vm4, %v2173_v50 }
 0x240   : > { %3234 = vmatmul.mubr.bf16.gmra.mrb[100].mxu0 %v2172_v52 }
 0x241   : > { %8691 = vmatprep.mubr.msk.bf16.mxu0 %vm508_vm4, %v2177_v53 }
 0x248   : > { %3244 = vmatmul.mubr.bf16.gmra.mrb[104].mxu0 %v2176_v56 }
 0x249   : > { %8692 = vmatprep.mubr.msk.bf16.mxu0 %vm508_vm4, %v2181_v59  ;;  %vm3433_vm4 = vcmask 326656  }
 0x24b   : > { %v2985_v62 = vpop.f32.mrb[0].mxu0 }
 0x24c   : > { %v9234_v63 = vadd.f32 %v2985_v62, %v11290_v60  ;;  %v2987_v0 = vpop.f32.mrb[1].mxu0 }
 0x24d   : > { %v9235_v1 = vadd.f32 %v2987_v0, %v11294_v61  ;;  %v2989_v2 = vpop.f32.mrb[2].mxu0 }
 0x24e   : > { %v9236_v4 = vadd.f32 %v2989_v2, %v11290_v60  ;;  %v2991_v5 = vpop.f32.mrb[3].mxu0  ;;  %v3264_v7 = vmax.f32 %v9234_v63, 0.0 }
 0x24f   : > { %v9237_v6 = vadd.f32 %v2991_v5, %v11294_v61  ;;  %v3265_v10 = vmax.f32 %v9235_v1, 0.0 }
 0x250   : > { %v3266_v8 = vmax.f32 %v9236_v4, 0.0  ;;  %3254 = vmatmul.mubr.bf16.gmra.mrb[108].mxu0 %v2180_v3 }
 0x251   : > { %v3267_v11 = vmax.f32 %v9237_v6, 0.0 }
 0x252   : > { %v3376_v12 = vpack.c.bf16 %v3266_v8, %v3264_v7 }
 0x253   : > { %v3377_v13 = vpack.c.bf16 %v3267_v11, %v3265_v10  ;;  %v2995_v14 = vpop.f32.mrb[4].mxu0 }
 0x254   : > { %v9238_v15 = vadd.f32 %v2995_v14, %v11290_v60  ;;  %v2997_v16 = vpop.f32.mrb[5].mxu0 }
 0x255   : > { %3434 = vst.msk [vmem:[#allocation3 + $0x8] sm:$0xff] %vm3433_vm4, %v3377_v13  ;;  %v9239_v17 = vadd.f32 %v2997_v16, %v11294_v61  ;;  %v2999_v9 = vpop.f32.mrb[6].mxu0 }
 0x256   : > { %v9240_v18 = vadd.f32 %v2999_v9, %v11290_v60  ;;  %v3001_v19 = vpop.f32.mrb[7].mxu0  ;;  %v3268_v22 = vmax.f32 %v9238_v15, 0.0 }
 0x257   : > { %v9241_v21 = vadd.f32 %v3001_v19, %v11294_v61  ;;  %v3269_v24 = vmax.f32 %v9239_v17, 0.0 }
 0x258   : > { %v3270_v23 = vmax.f32 %v9240_v18, 0.0 }
 0x259   : > { %v3271_v25 = vmax.f32 %v9241_v21, 0.0 }
 0x25a   : > { %v3378_v26 = vpack.c.bf16 %v3270_v23, %v3268_v22 }
 0x25b   : > { %v3379_v27 = vpack.c.bf16 %v3271_v25, %v3269_v24  ;;  %v3005_v28 = vpop.f32.mrb[8].mxu0 }
 0x25c   : > { %v9242_v29 = vadd.f32 %v3005_v28, %v11290_v60  ;;  %v3007_v30 = vpop.f32.mrb[9].mxu0  ;;  %v3602_v31 = vld [vmem:[#allocation3 + $0x8] sm:$0xff] }
 0x25d   : > { %3436 = vst.msk [vmem:[#allocation3 + $0x18] sm:$0xff] %vm3433_vm4, %v3379_v27  ;;  %v9243_v32 = vadd.f32 %v3007_v30, %v11294_v61  ;;  %v3009_v33 = vpop.f32.mrb[10].mxu0  ;;  %4273 = vmatprep.subr.bf16.mxu1 %v3602_v31 }
 0x25e   : > { %v9244_v34 = vadd.f32 %v3009_v33, %v11290_v60  ;;  %v3011_v35 = vpop.f32.mrb[11].mxu0  ;;  %4274 = vmatpush1.bf16.msra.mxu1 %v3376_v12  ;;  %v3272_v37 = vmax.f32 %v9242_v29, 0.0 }
 0x25f   : > { %v9245_v36 = vadd.f32 %v3011_v35, %v11294_v61  ;;  %v3273_v39 = vmax.f32 %v9243_v32, 0.0 }
 0x260   : > { %v3274_v38 = vmax.f32 %v9244_v34, 0.0 }
 0x261   : > { %v3275_v40 = vmax.f32 %v9245_v36, 0.0 }
 0x262   : > { %v3380_v41 = vpack.c.bf16 %v3274_v38, %v3272_v37 }
 0x263   : > { %v3381_v42 = vpack.c.bf16 %v3275_v40, %v3273_v39  ;;  %v3015_v43 = vpop.f32.mrb[12].mxu0 }
 0x264   : > { %v9246_v44 = vadd.f32 %v3015_v43, %v11290_v60  ;;  %v3017_v45 = vpop.f32.mrb[13].mxu0  ;;  %v3604_v46 = vld [vmem:[#allocation3 + $0x18] sm:$0xff] }
 0x265   : > { %3438 = vst.msk [vmem:[#allocation3 + $0x28] sm:$0xff] %vm3433_vm4, %v3381_v42  ;;  %v9247_v47 = vadd.f32 %v3017_v45, %v11294_v61  ;;  %v3019_v48 = vpop.f32.mrb[14].mxu0  ;;  %4275 = vmatprep.subr.bf16.mxu1 %v3604_v46 }
 0x266   : > { %v9248_v49 = vadd.f32 %v3019_v48, %v11290_v60  ;;  %v3021_v50 = vpop.f32.mrb[15].mxu0  ;;  %4276 = vmatpush1.bf16.msra.mxu1 %v3378_v26  ;;  %v3276_v52 = vmax.f32 %v9246_v44, 0.0 }
 0x267   : > { %v9249_v51 = vadd.f32 %v3021_v50, %v11294_v61  ;;  %v3277_v56 = vmax.f32 %v9247_v47, 0.0 }
 0x268   : > { %v3278_v53 = vmax.f32 %v9248_v49, 0.0 }
 0x269   : > { %v3279_v57 = vmax.f32 %v9249_v51, 0.0 }
 0x26a   : > { %v3382_v59 = vpack.c.bf16 %v3278_v53, %v3276_v52 }
 0x26b   : > { %v3383_v62 = vpack.c.bf16 %v3279_v57, %v3277_v56  ;;  %v3025_v63 = vpop.f32.mrb[16].mxu0 }
 0x26c   : > { %v9250_v0 = vadd.f32 %v3025_v63, %v11290_v60  ;;  %v3027_v1 = vpop.f32.mrb[17].mxu0  ;;  %v3606_v2 = vld [vmem:[#allocation3 + $0x28] sm:$0xff] }
 0x26d   : > { %3440 = vst.msk [vmem:[#allocation3 + $0x38] sm:$0xff] %vm3433_vm4, %v3383_v62  ;;  %v9251_v3 = vadd.f32 %v3027_v1, %v11294_v61  ;;  %v3029_v4 = vpop.f32.mrb[18].mxu0  ;;  %4277 = vmatprep.subr.bf16.mxu1 %v3606_v2 }
 0x26e   : > { %v9252_v5 = vadd.f32 %v3029_v4, %v11290_v60  ;;  %v3031_v6 = vpop.f32.mrb[19].mxu0  ;;  %4278 = vmatpush1.bf16.msra.mxu1 %v3380_v41  ;;  %v3280_v8 = vmax.f32 %v9250_v0, 0.0 }
 0x26f   : > { %v9253_v7 = vadd.f32 %v3031_v6, %v11294_v61  ;;  %v3281_v11 = vmax.f32 %v9251_v3, 0.0 }
 0x270   : > { %v3282_v10 = vmax.f32 %v9252_v5, 0.0 }
 0x271   : > { %v3283_v12 = vmax.f32 %v9253_v7, 0.0 }
 0x272   : > { %v3384_v13 = vpack.c.bf16 %v3282_v10, %v3280_v8 }
 0x273   : > { %v3385_v14 = vpack.c.bf16 %v3283_v12, %v3281_v11  ;;  %v3035_v15 = vpop.f32.mrb[20].mxu0 }
 0x274   : > { %v9254_v16 = vadd.f32 %v3035_v15, %v11290_v60  ;;  %v3037_v17 = vpop.f32.mrb[21].mxu0  ;;  %v3608_v9 = vld [vmem:[#allocation3 + $0x38] sm:$0xff] }
 0x275   : > { %3442 = vst.msk [vmem:[#allocation3 + $0x48] sm:$0xff] %vm3433_vm4, %v3385_v14  ;;  %v9255_v18 = vadd.f32 %v3037_v17, %v11294_v61  ;;  %v3039_v19 = vpop.f32.mrb[22].mxu0  ;;  %4279 = vmatprep.subr.bf16.mxu1 %v3608_v9 }
 0x276   : > { %v9256_v20 = vadd.f32 %v3039_v19, %v11290_v60  ;;  %v3041_v21 = vpop.f32.mrb[23].mxu0  ;;  %4280 = vmatpush1.bf16.msra.mxu1 %v3382_v59  ;;  %v3284_v23 = vmax.f32 %v9254_v16, 0.0 }
 0x277   : > { %v9257_v22 = vadd.f32 %v3041_v21, %v11294_v61  ;;  %v3285_v25 = vmax.f32 %v9255_v18, 0.0 }
 0x278   : > { %v3286_v24 = vmax.f32 %v9256_v20, 0.0 }
 0x279   : > { %v3287_v26 = vmax.f32 %v9257_v22, 0.0 }
 0x27a   : > { %v3386_v27 = vpack.c.bf16 %v3286_v24, %v3284_v23 }
 0x27b   : > { %v3387_v28 = vpack.c.bf16 %v3287_v26, %v3285_v25  ;;  %v3045_v29 = vpop.f32.mrb[24].mxu0 }
 0x27c   : > { %v9258_v30 = vadd.f32 %v3045_v29, %v11290_v60  ;;  %v3047_v31 = vpop.f32.mrb[25].mxu0  ;;  %v3610_v32 = vld [vmem:[#allocation3 + $0x48] sm:$0xff] }
 0x27d   : > { %3444 = vst.msk [vmem:[#allocation3 + $0x58] sm:$0xff] %vm3433_vm4, %v3387_v28  ;;  %v9259_v33 = vadd.f32 %v3047_v31, %v11294_v61  ;;  %v3049_v34 = vpop.f32.mrb[26].mxu0  ;;  %4281 = vmatprep.subr.bf16.mxu1 %v3610_v32 }
 0x27e   : > { %v9260_v35 = vadd.f32 %v3049_v34, %v11290_v60  ;;  %v3051_v36 = vpop.f32.mrb[27].mxu0  ;;  %4282 = vmatpush1.bf16.msra.mxu1 %v3384_v13  ;;  %v3288_v38 = vmax.f32 %v9258_v30, 0.0 }
 0x27f   : > { %v9261_v37 = vadd.f32 %v3051_v36, %v11294_v61  ;;  %v3289_v40 = vmax.f32 %v9259_v33, 0.0 }
 0x280   : > { %v3290_v39 = vmax.f32 %v9260_v35, 0.0 }
 0x281   : > { %v3291_v41 = vmax.f32 %v9261_v37, 0.0 }
 0x282   : > { %v3388_v42 = vpack.c.bf16 %v3290_v39, %v3288_v38 }
 0x283   : > { %v3389_v43 = vpack.c.bf16 %v3291_v41, %v3289_v40  ;;  %v3055_v44 = vpop.f32.mrb[28].mxu0 }
 0x284   : > { %v9262_v45 = vadd.f32 %v3055_v44, %v11290_v60  ;;  %v3057_v46 = vpop.f32.mrb[29].mxu0  ;;  %v3612_v47 = vld [vmem:[#allocation3 + $0x58] sm:$0xff] }
 0x285   : > { %3446 = vst.msk [vmem:[#allocation3 + $0x68] sm:$0xff] %vm3433_vm4, %v3389_v43  ;;  %v9263_v48 = vadd.f32 %v3057_v46, %v11294_v61  ;;  %v3059_v49 = vpop.f32.mrb[30].mxu0  ;;  %4283 = vmatprep.subr.bf16.mxu1 %v3612_v47 }
 0x286   : > { %v9264_v50 = vadd.f32 %v3059_v49, %v11290_v60  ;;  %v3061_v51 = vpop.f32.mrb[31].mxu0  ;;  %4284 = vmatpush1.bf16.msra.mxu1 %v3386_v27  ;;  %v3292_v53 = vmax.f32 %v9262_v45, 0.0 }
 0x287   : > { %v9265_v52 = vadd.f32 %v3061_v51, %v11294_v61  ;;  %v3293_v57 = vmax.f32 %v9263_v48, 0.0 }
 0x288   : > { %v3294_v56 = vmax.f32 %v9264_v50, 0.0 }
 0x289   : > { %v3295_v59 = vmax.f32 %v9265_v52, 0.0 }
 0x28a   : > { %v3390_v62 = vpack.c.bf16 %v3294_v56, %v3292_v53 }
 0x28b   : > { %v3391_v63 = vpack.c.bf16 %v3295_v59, %v3293_v57  ;;  %v3065_v0 = vpop.f32.mrb[32].mxu0 }
 0x28c   : > { %v9266_v1 = vadd.f32 %v3065_v0, %v11290_v60  ;;  %v3067_v2 = vpop.f32.mrb[33].mxu0  ;;  %v3614_v3 = vld [vmem:[#allocation3 + $0x68] sm:$0xff] }
 0x28d   : > { %3448 = vst.msk [vmem:[#allocation3 + $0x78] sm:$0xff] %vm3433_vm4, %v3391_v63  ;;  %v9267_v4 = vadd.f32 %v3067_v2, %v11294_v61  ;;  %v3069_v5 = vpop.f32.mrb[34].mxu0  ;;  %4285 = vmatprep.subr.bf16.mxu1 %v3614_v3 }
 0x28e   : > { %v9268_v6 = vadd.f32 %v3069_v5, %v11290_v60  ;;  %v3071_v7 = vpop.f32.mrb[35].mxu0  ;;  %4286 = vmatpush1.bf16.msra.mxu1 %v3388_v42  ;;  %v3296_v10 = vmax.f32 %v9266_v1, 0.0 }
 0x28f   : > { %v9269_v8 = vadd.f32 %v3071_v7, %v11294_v61  ;;  %v3297_v12 = vmax.f32 %v9267_v4, 0.0 }
 0x290   : > { %v3298_v11 = vmax.f32 %v9268_v6, 0.0 }
 0x291   : > { %v3299_v13 = vmax.f32 %v9269_v8, 0.0 }
 0x292   : > { %v3392_v14 = vpack.c.bf16 %v3298_v11, %v3296_v10 }
 0x293   : > { %v3393_v15 = vpack.c.bf16 %v3299_v13, %v3297_v12  ;;  %v3075_v16 = vpop.f32.mrb[36].mxu0 }
 0x294   : > { %v9270_v17 = vadd.f32 %v3075_v16, %v11290_v60  ;;  %v3077_v9 = vpop.f32.mrb[37].mxu0  ;;  %v3616_v18 = vld [vmem:[#allocation3 + $0x78] sm:$0xff] }
 0x295   : > { %3450 = vst.msk [vmem:[#allocation3 + $0x88] sm:$0xff] %vm3433_vm4, %v3393_v15  ;;  %v9271_v19 = vadd.f32 %v3077_v9, %v11294_v61  ;;  %v3079_v20 = vpop.f32.mrb[38].mxu0  ;;  %4287 = vmatprep.subr.bf16.mxu1 %v3616_v18 }
 0x296   : > { %v9272_v21 = vadd.f32 %v3079_v20, %v11290_v60  ;;  %v3081_v22 = vpop.f32.mrb[39].mxu0  ;;  %4288 = vmatpush1.bf16.msra.mxu1 %v3390_v62  ;;  %v3300_v24 = vmax.f32 %v9270_v17, 0.0 }
 0x297   : > { %v9273_v23 = vadd.f32 %v3081_v22, %v11294_v61  ;;  %v3301_v26 = vmax.f32 %v9271_v19, 0.0 }
 0x298   : > { %v3302_v25 = vmax.f32 %v9272_v21, 0.0 }
 0x299   : > { %v3303_v27 = vmax.f32 %v9273_v23, 0.0 }
 0x29a   : > { %v3394_v28 = vpack.c.bf16 %v3302_v25, %v3300_v24 }
 0x29b   : > { %v3395_v29 = vpack.c.bf16 %v3303_v27, %v3301_v26  ;;  %v3085_v30 = vpop.f32.mrb[40].mxu0 }
 0x29c   : > { %v9274_v31 = vadd.f32 %v3085_v30, %v11290_v60  ;;  %v3087_v32 = vpop.f32.mrb[41].mxu0  ;;  %v3618_v33 = vld [vmem:[#allocation3 + $0x88] sm:$0xff] }
 0x29d   : > { %3452 = vst.msk [vmem:[#allocation3 + $0x98] sm:$0xff] %vm3433_vm4, %v3395_v29  ;;  %v9275_v34 = vadd.f32 %v3087_v32, %v11294_v61  ;;  %v3089_v35 = vpop.f32.mrb[42].mxu0  ;;  %4289 = vmatprep.subr.bf16.mxu1 %v3618_v33 }
 0x29e   : > { %v9276_v36 = vadd.f32 %v3089_v35, %v11290_v60  ;;  %v3091_v37 = vpop.f32.mrb[43].mxu0  ;;  %4290 = vmatpush1.bf16.msra.mxu1 %v3392_v14  ;;  %v3304_v39 = vmax.f32 %v9274_v31, 0.0 }
 0x29f   : > { %v9277_v38 = vadd.f32 %v3091_v37, %v11294_v61  ;;  %v3305_v41 = vmax.f32 %v9275_v34, 0.0 }
 0x2a0   : > { %v3306_v40 = vmax.f32 %v9276_v36, 0.0 }
 0x2a1   : > { %v3307_v42 = vmax.f32 %v9277_v38, 0.0 }
 0x2a2   : > { %v3396_v43 = vpack.c.bf16 %v3306_v40, %v3304_v39 }
 0x2a3   : > { %v3397_v44 = vpack.c.bf16 %v3307_v42, %v3305_v41  ;;  %v3095_v45 = vpop.f32.mrb[44].mxu0 }
 0x2a4   : > { %v9278_v46 = vadd.f32 %v3095_v45, %v11290_v60  ;;  %v3097_v47 = vpop.f32.mrb[45].mxu0  ;;  %v3620_v48 = vld [vmem:[#allocation3 + $0x98] sm:$0xff] }
 0x2a5   : > { %3454 = vst.msk [vmem:[#allocation3 + $0xa8] sm:$0xff] %vm3433_vm4, %v3397_v44  ;;  %v9279_v49 = vadd.f32 %v3097_v47, %v11294_v61  ;;  %v3099_v50 = vpop.f32.mrb[46].mxu0  ;;  %4291 = vmatprep.subr.bf16.mxu1 %v3620_v48 }
 0x2a6   : > { %v9280_v51 = vadd.f32 %v3099_v50, %v11290_v60  ;;  %v3101_v52 = vpop.f32.mrb[47].mxu0  ;;  %4292 = vmatpush1.bf16.msra.mxu1 %v3394_v28  ;;  %v3308_v56 = vmax.f32 %v9278_v46, 0.0 }
 0x2a7   : > { %v9281_v53 = vadd.f32 %v3101_v52, %v11294_v61  ;;  %v3309_v59 = vmax.f32 %v9279_v49, 0.0 }
 0x2a8   : > { %v3310_v57 = vmax.f32 %v9280_v51, 0.0 }
 0x2a9   : > { %v3311_v62 = vmax.f32 %v9281_v53, 0.0 }
 0x2aa   : > { %v3398_v63 = vpack.c.bf16 %v3310_v57, %v3308_v56 }
 0x2ab   : > { %v3399_v0 = vpack.c.bf16 %v3311_v62, %v3309_v59  ;;  %v3105_v1 = vpop.f32.mrb[48].mxu0 }
 0x2ac   : > { %v9282_v2 = vadd.f32 %v3105_v1, %v11290_v60  ;;  %v3107_v3 = vpop.f32.mrb[49].mxu0  ;;  %v3622_v4 = vld [vmem:[#allocation3 + $0xa8] sm:$0xff] }
 0x2ad   : > { %3456 = vst.msk [vmem:[#allocation3 + $0xb8] sm:$0xff] %vm3433_vm4, %v3399_v0  ;;  %v9283_v5 = vadd.f32 %v3107_v3, %v11294_v61  ;;  %v3109_v6 = vpop.f32.mrb[50].mxu0  ;;  %4293 = vmatprep.subr.bf16.mxu1 %v3622_v4 }
 0x2ae   : > { %v9284_v7 = vadd.f32 %v3109_v6, %v11290_v60  ;;  %v3111_v8 = vpop.f32.mrb[51].mxu0  ;;  %4294 = vmatpush1.bf16.msra.mxu1 %v3396_v43  ;;  %v3312_v11 = vmax.f32 %v9282_v2, 0.0 }
 0x2af   : > { %v9285_v10 = vadd.f32 %v3111_v8, %v11294_v61  ;;  %v3313_v13 = vmax.f32 %v9283_v5, 0.0 }
 0x2b0   : > { %v3314_v12 = vmax.f32 %v9284_v7, 0.0 }
 0x2b1   : > { %v3315_v14 = vmax.f32 %v9285_v10, 0.0 }
 0x2b2   : > { %v3400_v15 = vpack.c.bf16 %v3314_v12, %v3312_v11 }
 0x2b3   : > { %v3401_v16 = vpack.c.bf16 %v3315_v14, %v3313_v13  ;;  %v3115_v17 = vpop.f32.mrb[52].mxu0 }
 0x2b4   : > { %v9286_v9 = vadd.f32 %v3115_v17, %v11290_v60  ;;  %v3117_v18 = vpop.f32.mrb[53].mxu0  ;;  %v3624_v19 = vld [vmem:[#allocation3 + $0xb8] sm:$0xff] }
 0x2b5   : > { %3458 = vst.msk [vmem:[#allocation3 + $0xc8] sm:$0xff] %vm3433_vm4, %v3401_v16  ;;  %v9287_v20 = vadd.f32 %v3117_v18, %v11294_v61  ;;  %v3119_v21 = vpop.f32.mrb[54].mxu0  ;;  %4295 = vmatprep.subr.bf16.mxu1 %v3624_v19 }
 0x2b6   : > { %v9288_v22 = vadd.f32 %v3119_v21, %v11290_v60  ;;  %v3121_v23 = vpop.f32.mrb[55].mxu0  ;;  %4296 = vmatpush1.bf16.msra.mxu1 %v3398_v63  ;;  %v3316_v25 = vmax.f32 %v9286_v9, 0.0 }
 0x2b7   : > { %v9289_v24 = vadd.f32 %v3121_v23, %v11294_v61  ;;  %v3317_v27 = vmax.f32 %v9287_v20, 0.0  ;;  %v9757_v23 = vld [vmem:[%s12902_s5] ss:$16 sps:$4 sm:$0xff]  }
 0x2b8   : > { %v3318_v26 = vmax.f32 %v9288_v22, 0.0 }
 0x2b9   : > { %v3319_v28 = vmax.f32 %v9289_v24, 0.0 }
 0x2ba   : > { %v3402_v29 = vpack.c.bf16 %v3318_v26, %v3316_v25  ;;  %v9760_v26 = vld [vmem:[%s12902_s5 + $0x24] ss:$16 sps:$4 sm:$0xff]  }
 0x2bb   : > { %v3403_v30 = vpack.c.bf16 %v3319_v28, %v3317_v27  ;;  %v3125_v31 = vpop.f32.mrb[56].mxu0 }
 0x2bc   : > { %v9290_v32 = vadd.f32 %v3125_v31, %v11290_v60  ;;  %v3127_v33 = vpop.f32.mrb[57].mxu0  ;;  %v3626_v34 = vld [vmem:[#allocation3 + $0xc8] sm:$0xff] }
 0x2bd   : > { %3460 = vst.msk [vmem:[#allocation3 + $0xd8] sm:$0xff] %vm3433_vm4, %v3403_v30  ;;  %v9291_v35 = vadd.f32 %v3127_v33, %v11294_v61  ;;  %v3129_v36 = vpop.f32.mrb[58].mxu0  ;;  %4297 = vmatprep.subr.bf16.mxu1 %v3626_v34 }
 0x2be   : > { %v9292_v37 = vadd.f32 %v3129_v36, %v11290_v60  ;;  %v3131_v38 = vpop.f32.mrb[59].mxu0  ;;  %4298 = vmatpush1.bf16.msra.mxu1 %v3400_v15  ;;  %v3320_v40 = vmax.f32 %v9290_v32, 0.0 }
 0x2bf   : > { %v9293_v39 = vadd.f32 %v3131_v38, %v11294_v61  ;;  %v3321_v42 = vmax.f32 %v9291_v35, 0.0 }
 0x2c0   : > { %v3322_v41 = vmax.f32 %v9292_v37, 0.0 }
 0x2c1   : > { %v3323_v43 = vmax.f32 %v9293_v39, 0.0 }
 0x2c2   : > { %v3404_v44 = vpack.c.bf16 %v3322_v41, %v3320_v40  ;;  %v9762_v40 = vld [vmem:[%s12902_s5 + $0x20] ss:$16 sps:$4 sm:$0xff]  }
 0x2c3   : > { %v3405_v45 = vpack.c.bf16 %v3323_v43, %v3321_v42  ;;  %v3135_v46 = vpop.f32.mrb[60].mxu0  ;;  %v9763_v43 = vld [vmem:[%s12902_s5 + $0x44] ss:$16 sps:$4 sm:$0xff]  }
 0x2c4   : > { %v9294_v47 = vadd.f32 %v3135_v46, %v11290_v60  ;;  %v3137_v48 = vpop.f32.mrb[61].mxu0  ;;  %v3628_v49 = vld [vmem:[#allocation3 + $0xd8] sm:$0xff] }
 0x2c5   : > { %3462 = vst.msk [vmem:[#allocation3 + $0xe8] sm:$0xff] %vm3433_vm4, %v3405_v45  ;;  %v9295_v50 = vadd.f32 %v3137_v48, %v11294_v61  ;;  %v3139_v51 = vpop.f32.mrb[62].mxu0  ;;  %4299 = vmatprep.subr.bf16.mxu1 %v3628_v49 }
 0x2c6   : > { %v9296_v52 = vadd.f32 %v3139_v51, %v11290_v60  ;;  %v3141_v53 = vpop.f32.mrb[63].mxu0  ;;  %4300 = vmatpush1.bf16.msra.mxu1 %v3402_v29  ;;  %v3324_v57 = vmax.f32 %v9294_v47, 0.0 }
 0x2c7   : > { %v9297_v56 = vadd.f32 %v3141_v53, %v11294_v61  ;;  %v3325_v62 = vmax.f32 %v9295_v50, 0.0 }
 0x2c8   : > { %v3326_v59 = vmax.f32 %v9296_v52, 0.0 }
 0x2c9   : > { %v3327_v63 = vmax.f32 %v9297_v56, 0.0 }
 0x2ca   : > { %v3406_v0 = vpack.c.bf16 %v3326_v59, %v3324_v57 }
 0x2cb   : > { %v3407_v1 = vpack.c.bf16 %v3327_v63, %v3325_v62  ;;  %v3145_v2 = vpop.f32.mrb[64].mxu0  ;;  %v9765_v62 = vld [vmem:[%s12902_s5 + $0x40] ss:$16 sps:$4 sm:$0xff]  }
 0x2cc   : > { %v9298_v3 = vadd.f32 %v3145_v2, %v11290_v60  ;;  %v3147_v4 = vpop.f32.mrb[65].mxu0  ;;  %v3630_v5 = vld [vmem:[#allocation3 + $0xe8] sm:$0xff] }
 0x2cd   : > { %3464 = vst.msk [vmem:[#allocation3 + $0xf8] sm:$0xff] %vm3433_vm4, %v3407_v1  ;;  %v9299_v6 = vadd.f32 %v3147_v4, %v11294_v61  ;;  %v3149_v7 = vpop.f32.mrb[66].mxu0  ;;  %4301 = vmatprep.subr.bf16.mxu1 %v3630_v5  ;;  %v9766_v1 = vld [vmem:[%s12902_s5 + $0x64] ss:$16 sps:$4 sm:$0xff]  }
 0x2ce   : > { %v9300_v8 = vadd.f32 %v3149_v7, %v11290_v60  ;;  %v3151_v10 = vpop.f32.mrb[67].mxu0  ;;  %4302 = vmatpush1.bf16.msra.mxu1 %v3404_v44  ;;  %v3328_v12 = vmax.f32 %v9298_v3, 0.0 }
 0x2cf   : > { %v9301_v11 = vadd.f32 %v3151_v10, %v11294_v61  ;;  %v3329_v14 = vmax.f32 %v9299_v6, 0.0 }
 0x2d0   : > { %v3330_v13 = vmax.f32 %v9300_v8, 0.0 }
 0x2d1   : > { %v3331_v15 = vmax.f32 %v9301_v11, 0.0 }
 0x2d2   : > { %v3408_v16 = vpack.c.bf16 %v3330_v13, %v3328_v12 }
 0x2d3   : > { %v3409_v17 = vpack.c.bf16 %v3331_v15, %v3329_v14  ;;  %v3155_v9 = vpop.f32.mrb[68].mxu0 }
 0x2d4   : > { %v9302_v18 = vadd.f32 %v3155_v9, %v11290_v60  ;;  %v3157_v19 = vpop.f32.mrb[69].mxu0  ;;  %v3632_v20 = vld [vmem:[#allocation3 + $0xf8] sm:$0xff] }
 0x2d5   : > { %3466 = vst.msk [vmem:[#allocation3 + $0x108] sm:$0xff] %vm3433_vm4, %v3409_v17  ;;  %v9303_v21 = vadd.f32 %v3157_v19, %v11294_v61  ;;  %v3159_v22 = vpop.f32.mrb[70].mxu0  ;;  %4303 = vmatprep.subr.bf16.mxu1 %v3632_v20 }
 0x2d6   : > { %v9304_v24 = vadd.f32 %v3159_v22, %v11290_v60  ;;  %v3161_v25 = vpop.f32.mrb[71].mxu0  ;;  %4304 = vmatpush1.bf16.msra.mxu1 %v3406_v0  ;;  %v3332_v28 = vmax.f32 %v9302_v18, 0.0  ;;  %v9769_v18 = vld [vmem:[%s12902_s5 + $0x84] ss:$16 sps:$4 sm:$0xff]  }
 0x2d7   : > { %v9305_v27 = vadd.f32 %v3161_v25, %v11294_v61  ;;  %v3333_v30 = vmax.f32 %v9303_v21, 0.0 }
 0x2d8   : > { %v3334_v29 = vmax.f32 %v9304_v24, 0.0 }
 0x2d9   : > { %v3335_v31 = vmax.f32 %v9305_v27, 0.0  ;;  %4306 = vmatmul.mubr.bf16.vlgmr.msra.gmra.mrb[0].mxu1 %v9757_v23 }
 0x2da   : > { %v3410_v32 = vpack.c.bf16 %v3334_v29, %v3332_v28  ;;  %4315 = vmatprep.mubr.bf16.mxu1 %v9760_v26 }
 0x2db   : > { %v3411_v33 = vpack.c.bf16 %v3335_v31, %v3333_v30  ;;  %v3165_v34 = vpop.f32.mrb[72].mxu0 }
 0x2dc   : > { %v9306_v35 = vadd.f32 %v3165_v34, %v11290_v60  ;;  %v3167_v36 = vpop.f32.mrb[73].mxu0  ;;  %v3634_v37 = vld [vmem:[#allocation3 + $0x108] sm:$0xff] }
 0x2dd   : > { %3468 = vst.msk [vmem:[#allocation3 + $0x118] sm:$0xff] %vm3433_vm4, %v3411_v33  ;;  %v9307_v38 = vadd.f32 %v3167_v36, %v11294_v61  ;;  %v3169_v39 = vpop.f32.mrb[74].mxu0  ;;  %4586 = vmatprep.subr.bf16.mxu1 %v3634_v37 }
 0x2de   : > { %v9308_v41 = vadd.f32 %v3169_v39, %v11290_v60  ;;  %v3171_v42 = vpop.f32.mrb[75].mxu0  ;;  %4587 = vmatpush1.bf16.msra.mxu1 %v3408_v16  ;;  %v3336_v45 = vmax.f32 %v9306_v35, 0.0  ;;  %v9768_v16 = vld [vmem:[%s12902_s5 + $0x60] ss:$16 sps:$4 sm:$0xff]   ;;  %v9772_v35 = vld [vmem:[%s12902_s5 + $0xa4] ss:$16 sps:$4 sm:$0xff]  }
 0x2df   : > { %v9309_v44 = vadd.f32 %v3171_v42, %v11294_v61  ;;  %v3337_v47 = vmax.f32 %v9307_v38, 0.0 }
 0x2e0   : > { %v3338_v46 = vmax.f32 %v9308_v41, 0.0 }
 0x2e1   : > { %v3339_v48 = vmax.f32 %v9309_v44, 0.0  ;;  %4316 = vmatmul.mubr.bf16.gmra.mrb[4].mxu1 %v9762_v40 }
 0x2e2   : > { %v3412_v49 = vpack.c.bf16 %v3338_v46, %v3336_v45  ;;  %4325 = vmatprep.mubr.bf16.mxu1 %v9763_v43 }
 0x2e3   : > { %v3413_v50 = vpack.c.bf16 %v3339_v48, %v3337_v47  ;;  %v3175_v51 = vpop.f32.mrb[76].mxu0 }
 0x2e4   : > { %v9310_v52 = vadd.f32 %v3175_v51, %v11290_v60  ;;  %v3177_v53 = vpop.f32.mrb[77].mxu0  ;;  %v3636_v56 = vld [vmem:[#allocation3 + $0x118] sm:$0xff] }
 0x2e5   : > { %3470 = vst.msk [vmem:[#allocation3 + $0x128] sm:$0xff] %vm3433_vm4, %v3413_v50  ;;  %v9311_v57 = vadd.f32 %v3177_v53, %v11294_v61  ;;  %v3179_v59 = vpop.f32.mrb[78].mxu0  ;;  %4588 = vmatprep.subr.bf16.mxu1 %v3636_v56 }
 0x2e6   : > { %v9312_v63 = vadd.f32 %v3179_v59, %v11290_v60  ;;  %v3181_v0 = vpop.f32.mrb[79].mxu0  ;;  %4589 = vmatpush1.bf16.msra.mxu1 %v3410_v32  ;;  %v3340_v3 = vmax.f32 %v9310_v52, 0.0  ;;  %v9771_v32 = vld [vmem:[%s12902_s5 + $0x80] ss:$16 sps:$4 sm:$0xff]   ;;  %v9775_v52 = vld [vmem:[%s12902_s5 + $0xc4] ss:$16 sps:$4 sm:$0xff]  }
 0x2e7   : > { %v9313_v2 = vadd.f32 %v3181_v0, %v11294_v61  ;;  %v3341_v5 = vmax.f32 %v9311_v57, 0.0 }
 0x2e8   : > { %v3342_v4 = vmax.f32 %v9312_v63, 0.0 }
 0x2e9   : > { %v3343_v6 = vmax.f32 %v9313_v2, 0.0  ;;  %4326 = vmatmul.mubr.bf16.gmra.mrb[8].mxu1 %v9765_v62 }
 0x2ea   : > { %v3414_v7 = vpack.c.bf16 %v3342_v4, %v3340_v3  ;;  %4335 = vmatprep.mubr.bf16.mxu1 %v9766_v1 }
 0x2eb   : > { %v3415_v8 = vpack.c.bf16 %v3343_v6, %v3341_v5  ;;  %v3185_v10 = vpop.f32.mrb[80].mxu0 }
 0x2ec   : > { %v9314_v11 = vadd.f32 %v3185_v10, %v11290_v60  ;;  %v3187_v12 = vpop.f32.mrb[81].mxu0  ;;  %v3638_v13 = vld [vmem:[#allocation3 + $0x128] sm:$0xff] }
 0x2ed   : > { %3472 = vst.msk [vmem:[#allocation3 + $0x138] sm:$0xff] %vm3433_vm4, %v3415_v8  ;;  %v9315_v14 = vadd.f32 %v3187_v12, %v11294_v61  ;;  %v3189_v15 = vpop.f32.mrb[82].mxu0  ;;  %4590 = vmatprep.subr.bf16.mxu1 %v3638_v13 }
 0x2ee   : > { %v9316_v17 = vadd.f32 %v3189_v15, %v11290_v60  ;;  %v3191_v9 = vpop.f32.mrb[83].mxu0  ;;  %4591 = vmatpush1.bf16.msra.mxu1 %v3412_v49  ;;  %v3344_v20 = vmax.f32 %v9314_v11, 0.0  ;;  %v9774_v49 = vld [vmem:[%s12902_s5 + $0xa0] ss:$16 sps:$4 sm:$0xff]   ;;  %v9778_v11 = vld [vmem:[%s12902_s5 + $0xe4] ss:$16 sps:$4 sm:$0xff]  }
 0x2ef   : > { %v9317_v19 = vadd.f32 %v3191_v9, %v11294_v61  ;;  %v3345_v22 = vmax.f32 %v9315_v14, 0.0 }
 0x2f0   : > { %v3346_v21 = vmax.f32 %v9316_v17, 0.0 }
 0x2f1   : > { %v3347_v23 = vmax.f32 %v9317_v19, 0.0  ;;  %4336 = vmatmul.mubr.bf16.gmra.mrb[12].mxu1 %v9768_v16 }
 0x2f2   : > { %v3416_v24 = vpack.c.bf16 %v3346_v21, %v3344_v20  ;;  %4345 = vmatprep.mubr.bf16.mxu1 %v9769_v18 }
 0x2f3   : > { %v3417_v25 = vpack.c.bf16 %v3347_v23, %v3345_v22  ;;  %v3195_v26 = vpop.f32.mrb[84].mxu0 }
 0x2f4   : > { %v9318_v27 = vadd.f32 %v3195_v26, %v11290_v60  ;;  %v3197_v28 = vpop.f32.mrb[85].mxu0  ;;  %v3640_v29 = vld [vmem:[#allocation3 + $0x138] sm:$0xff] }
 0x2f5   : > { %3474 = vst.msk [vmem:[#allocation3 + $0x148] sm:$0xff] %vm3433_vm4, %v3417_v25  ;;  %v9319_v30 = vadd.f32 %v3197_v28, %v11294_v61  ;;  %v3199_v31 = vpop.f32.mrb[86].mxu0  ;;  %4592 = vmatprep.subr.bf16.mxu1 %v3640_v29 }
 0x2f6   : > { %v9320_v33 = vadd.f32 %v3199_v31, %v11290_v60  ;;  %v3201_v34 = vpop.f32.mrb[87].mxu0  ;;  %4593 = vmatpush1.bf16.msra.mxu1 %v3414_v7  ;;  %v3348_v37 = vmax.f32 %v9318_v27, 0.0  ;;  %v9777_v7 = vld [vmem:[%s12902_s5 + $0xc0] ss:$16 sps:$4 sm:$0xff]   ;;  %v9781_v27 = vld [vmem:[%s12902_s5 + $0x104] ss:$16 sps:$4 sm:$0xff]  }
 0x2f7   : > { %v9321_v36 = vadd.f32 %v3201_v34, %v11294_v61  ;;  %v3349_v39 = vmax.f32 %v9319_v30, 0.0 }
 0x2f8   : > { %v3350_v38 = vmax.f32 %v9320_v33, 0.0 }
 0x2f9   : > { %v3351_v40 = vmax.f32 %v9321_v36, 0.0  ;;  %4346 = vmatmul.mubr.bf16.gmra.mrb[16].mxu1 %v9771_v32 }
 0x2fa   : > { %v3418_v41 = vpack.c.bf16 %v3350_v38, %v3348_v37  ;;  %4355 = vmatprep.mubr.bf16.mxu1 %v9772_v35 }
 0x2fb   : > { %v3419_v42 = vpack.c.bf16 %v3351_v40, %v3349_v39  ;;  %v3205_v43 = vpop.f32.mrb[88].mxu0 }
 0x2fc   : > { %v9322_v44 = vadd.f32 %v3205_v43, %v11290_v60  ;;  %v3207_v45 = vpop.f32.mrb[89].mxu0  ;;  %v3642_v46 = vld [vmem:[#allocation3 + $0x148] sm:$0xff] }
 0x2fd   : > { %3476 = vst.msk [vmem:[#allocation3 + $0x158] sm:$0xff] %vm3433_vm4, %v3419_v42  ;;  %v9323_v47 = vadd.f32 %v3207_v45, %v11294_v61  ;;  %v3209_v48 = vpop.f32.mrb[90].mxu0  ;;  %4594 = vmatprep.subr.bf16.mxu1 %v3642_v46 }
 0x2fe   : > { %v9324_v50 = vadd.f32 %v3209_v48, %v11290_v60  ;;  %v3211_v51 = vpop.f32.mrb[91].mxu0  ;;  %4595 = vmatpush1.bf16.msra.mxu1 %v3416_v24  ;;  %v3352_v56 = vmax.f32 %v9322_v44, 0.0  ;;  %v9780_v24 = vld [vmem:[%s12902_s5 + $0xe0] ss:$16 sps:$4 sm:$0xff]   ;;  %v9784_v44 = vld [vmem:[%s12902_s5 + $0x124] ss:$16 sps:$4 sm:$0xff]  }
 0x2ff   : > { %v9325_v53 = vadd.f32 %v3211_v51, %v11294_v61  ;;  %v3353_v59 = vmax.f32 %v9323_v47, 0.0 }
 0x300   : > { %v3354_v57 = vmax.f32 %v9324_v50, 0.0 }
 0x301   : > { %v3355_v62 = vmax.f32 %v9325_v53, 0.0  ;;  %4356 = vmatmul.mubr.bf16.gmra.mrb[20].mxu1 %v9774_v49 }
 0x302   : > { %v3420_v63 = vpack.c.bf16 %v3354_v57, %v3352_v56  ;;  %4365 = vmatprep.mubr.bf16.mxu1 %v9775_v52 }
 0x303   : > { %v3421_v0 = vpack.c.bf16 %v3355_v62, %v3353_v59  ;;  %v3215_v1 = vpop.f32.mrb[92].mxu0 }
 0x304   : > { %v9326_v2 = vadd.f32 %v3215_v1, %v11290_v60  ;;  %v3217_v3 = vpop.f32.mrb[93].mxu0  ;;  %v3644_v4 = vld [vmem:[#allocation3 + $0x158] sm:$0xff] }
 0x305   : > { %3478 = vst.msk [vmem:[#allocation3 + $0x168] sm:$0xff] %vm3433_vm4, %v3421_v0  ;;  %v9327_v5 = vadd.f32 %v3217_v3, %v11294_v61  ;;  %v3219_v6 = vpop.f32.mrb[94].mxu0  ;;  %4596 = vmatprep.subr.bf16.mxu1 %v3644_v4 }
 0x306   : > { %v9328_v8 = vadd.f32 %v3219_v6, %v11290_v60  ;;  %v3221_v10 = vpop.f32.mrb[95].mxu0  ;;  %4597 = vmatpush1.bf16.msra.mxu1 %v3418_v41  ;;  %v3356_v13 = vmax.f32 %v9326_v2, 0.0  ;;  %v9783_v41 = vld [vmem:[%s12902_s5 + $0x100] ss:$16 sps:$4 sm:$0xff]   ;;  %v9787_v2 = vld [vmem:[%s12902_s5 + $0x144] ss:$16 sps:$4 sm:$0xff]  }
 0x307   : > { %v9329_v12 = vadd.f32 %v3221_v10, %v11294_v61  ;;  %v3357_v15 = vmax.f32 %v9327_v5, 0.0 }
 0x308   : > { %v3358_v14 = vmax.f32 %v9328_v8, 0.0 }
 0x309   : > { %v3359_v16 = vmax.f32 %v9329_v12, 0.0  ;;  %4366 = vmatmul.mubr.bf16.gmra.mrb[24].mxu1 %v9777_v7 }
 0x30a   : > { %v3422_v17 = vpack.c.bf16 %v3358_v14, %v3356_v13  ;;  %4375 = vmatprep.mubr.bf16.mxu1 %v9778_v11 }
 0x30b   : > { %v3423_v9 = vpack.c.bf16 %v3359_v16, %v3357_v15  ;;  %v3225_v18 = vpop.f32.mrb[96].mxu0 }
 0x30c   : > { %v9330_v19 = vadd.f32 %v3225_v18, %v11290_v60  ;;  %v3227_v20 = vpop.f32.mrb[97].mxu0  ;;  %v3646_v21 = vld [vmem:[#allocation3 + $0x168] sm:$0xff] }
 0x30d   : > { %3480 = vst.msk [vmem:[#allocation3 + $0x178] sm:$0xff] %vm3433_vm4, %v3423_v9  ;;  %v9331_v22 = vadd.f32 %v3227_v20, %v11294_v61  ;;  %v3229_v23 = vpop.f32.mrb[98].mxu0  ;;  %4598 = vmatprep.subr.bf16.mxu1 %v3646_v21 }
 0x30e   : > { %v9332_v25 = vadd.f32 %v3229_v23, %v11290_v60  ;;  %v3231_v26 = vpop.f32.mrb[99].mxu0  ;;  %4599 = vmatpush1.bf16.msra.mxu1 %v3420_v63  ;;  %v3360_v29 = vmax.f32 %v9330_v19, 0.0  ;;  %v9786_v63 = vld [vmem:[%s12902_s5 + $0x120] ss:$16 sps:$4 sm:$0xff]   ;;  %v9790_v19 = vld [vmem:[%s12902_s5 + $0x164] ss:$16 sps:$4 sm:$0xff]  }
 0x30f   : > { %v9333_v28 = vadd.f32 %v3231_v26, %v11294_v61  ;;  %v3361_v31 = vmax.f32 %v9331_v22, 0.0 }
 0x310   : > { %v3362_v30 = vmax.f32 %v9332_v25, 0.0 }
 0x311   : > { %v3363_v32 = vmax.f32 %v9333_v28, 0.0  ;;  %4376 = vmatmul.mubr.bf16.gmra.mrb[28].mxu1 %v9780_v24 }
 0x312   : > { %v3424_v33 = vpack.c.bf16 %v3362_v30, %v3360_v29  ;;  %4385 = vmatprep.mubr.bf16.mxu1 %v9781_v27  ;;  %v9795_v29 = vld [vmem:[%s12902_s5 + $0x180] ss:$16 sps:$4 sm:$0xff]   ;;  %v9796_v30 = vld [vmem:[%s12902_s5 + $0x1a4] ss:$16 sps:$4 sm:$0xff]  }
 0x313   : > { %v3425_v34 = vpack.c.bf16 %v3363_v32, %v3361_v31  ;;  %v3235_v35 = vpop.f32.mrb[100].mxu0  ;;  %v9798_v31 = vld [vmem:[%s12902_s5 + $0x1a0] ss:$16 sps:$4 sm:$0xff]   ;;  %v9799_v32 = vld [vmem:[%s12902_s5 + $0x1c4] ss:$16 sps:$4 sm:$0xff]  }
 0x314   : > { %v9334_v36 = vadd.f32 %v3235_v35, %v11290_v60  ;;  %v3237_v37 = vpop.f32.mrb[101].mxu0  ;;  %v3648_v38 = vld [vmem:[#allocation3 + $0x178] sm:$0xff]  ;;  %v9804_v35 = vld [vmem:[%s12902_s5 + $0x1e0] ss:$16 sps:$4 sm:$0xff]  }
 0x315   : > { %3482 = vst.msk [vmem:[#allocation3 + $0x188] sm:$0xff] %vm3433_vm4, %v3425_v34  ;;  %v9335_v39 = vadd.f32 %v3237_v37, %v11294_v61  ;;  %v3239_v40 = vpop.f32.mrb[102].mxu0  ;;  %4600 = vmatprep.subr.bf16.mxu1 %v3648_v38  ;;  %v9802_v34 = vld [vmem:[%s12902_s5 + $0x1e4] ss:$16 sps:$4 sm:$0xff]   ;;  %v9807_v37 = vld [vmem:[%s12902_s5 + $0x200] ss:$16 sps:$4 sm:$0xff]  }
 0x316   : > { %v9336_v42 = vadd.f32 %v3239_v40, %v11290_v60  ;;  %v3241_v43 = vpop.f32.mrb[103].mxu0  ;;  %4601 = vmatpush1.bf16.msra.mxu1 %v3422_v17  ;;  %v3364_v46 = vmax.f32 %v9334_v36, 0.0  ;;  %v9789_v17 = vld [vmem:[%s12902_s5 + $0x140] ss:$16 sps:$4 sm:$0xff]   ;;  %v9805_v36 = vld [vmem:[%s12902_s5 + $0x204] ss:$16 sps:$4 sm:$0xff]  }
 0x317   : > { %v9337_v45 = vadd.f32 %v3241_v43, %v11294_v61  ;;  %v3365_v48 = vmax.f32 %v9335_v39, 0.0  ;;  %v9808_v38 = vld [vmem:[%s12902_s5 + $0x224] ss:$16 sps:$4 sm:$0xff]   ;;  %v9810_v39 = vld [vmem:[%s12902_s5 + $0x220] ss:$16 sps:$4 sm:$0xff]  }
 0x318   : > { %v3366_v47 = vmax.f32 %v9336_v42, 0.0  ;;  %v9811_v40 = vld [vmem:[%s12902_s5 + $0x244] ss:$16 sps:$4 sm:$0xff]   ;;  %v9816_v43 = vld [vmem:[%s12902_s5 + $0x260] ss:$16 sps:$4 sm:$0xff]  }
 0x319   : > { %v3367_v49 = vmax.f32 %v9337_v45, 0.0  ;;  %4386 = vmatmul.mubr.bf16.gmra.mrb[32].mxu1 %v9783_v41  ;;  %v9813_v41 = vld [vmem:[%s12902_s5 + $0x240] ss:$16 sps:$4 sm:$0xff]   ;;  %v9814_v42 = vld [vmem:[%s12902_s5 + $0x264] ss:$16 sps:$4 sm:$0xff]  }
 0x31a   : > { %v3426_v50 = vpack.c.bf16 %v3366_v47, %v3364_v46  ;;  %4395 = vmatprep.mubr.bf16.mxu1 %v9784_v44  ;;  %v9817_v44 = vld [vmem:[%s12902_s5 + $0x284] ss:$16 sps:$4 sm:$0xff]   ;;  %v9819_v45 = vld [vmem:[%s12902_s5 + $0x280] ss:$16 sps:$4 sm:$0xff]  }
 0x31b   : > { %v3427_v51 = vpack.c.bf16 %v3367_v49, %v3365_v48  ;;  %v3245_v52 = vpop.f32.mrb[104].mxu0  ;;  %v9820_v46 = vld [vmem:[%s12902_s5 + $0x2a4] ss:$16 sps:$4 sm:$0xff]   ;;  %v9822_v47 = vld [vmem:[%s12902_s5 + $0x2a0] ss:$16 sps:$4 sm:$0xff]  }
 0x31c   : > { %v9338_v53 = vadd.f32 %v3245_v52, %v11290_v60  ;;  %v3247_v56 = vpop.f32.mrb[105].mxu0  ;;  %v3650_v57 = vld [vmem:[#allocation3 + $0x188] sm:$0xff]  ;;  %v9823_v48 = vld [vmem:[%s12902_s5 + $0x2c4] ss:$16 sps:$4 sm:$0xff]   ;;  %v9825_v49 = vld [vmem:[%s12902_s5 + $0x2c0] ss:$16 sps:$4 sm:$0xff]  }
 0x31d   : > { %3484 = vst.msk [vmem:[#allocation3 + $0x198] sm:$0xff] %vm3433_vm4, %v3427_v51  ;;  %v9339_v59 = vadd.f32 %v3247_v56, %v11294_v61  ;;  %v3249_v62 = vpop.f32.mrb[106].mxu0  ;;  %4602 = vmatprep.subr.bf16.mxu1 %v3650_v57  ;;  %v9828_v51 = vld [vmem:[%s12902_s5 + $0x2e0] ss:$16 sps:$4 sm:$0xff]   ;;  %v9829_v52 = vld [vmem:[%s12902_s5 + $0x304] ss:$16 sps:$4 sm:$0xff]  }
 0x31e   : > { %v9340_v0 = vadd.f32 %v3249_v62, %v11290_v60  ;;  %v3251_v1 = vpop.f32.mrb[107].mxu0  ;;  %4603 = vmatpush1.bf16.msra.mxu1 %v3424_v33  ;;  %v3368_v4 = vmax.f32 %v9338_v53, 0.0  ;;  %v9801_v33 = vld [vmem:[%s12902_s5 + $0x1c0] ss:$16 sps:$4 sm:$0xff]   ;;  %v9832_v56 = vld [vmem:[%s12902_s5 + $0x324] ss:$16 sps:$4 sm:$0xff]  }
 0x31f   : > { %v9341_v3 = vadd.f32 %v3251_v1, %v11294_v61  ;;  %v3369_v6 = vmax.f32 %v9339_v59, 0.0  ;;  %v9831_v53 = vld [vmem:[%s12902_s5 + $0x300] ss:$16 sps:$4 sm:$0xff]   ;;  %v9835_v59 = vld [vmem:[%s12902_s5 + $0x344] ss:$16 sps:$4 sm:$0xff]  }
 0x320   : > { %v3370_v5 = vmax.f32 %v9340_v0, 0.0  ;;  %v9834_v57 = vld [vmem:[%s12902_s5 + $0x320] ss:$16 sps:$4 sm:$0xff]   ;;  %v9843_v1 = vld [vmem:[%s12902_s5 + $0xc] ss:$16 sps:$4 sm:$0xff]  }
 0x321   : > { %v3371_v7 = vmax.f32 %v9341_v3, 0.0  ;;  %4396 = vmatmul.mubr.bf16.gmra.mrb[36].mxu1 %v9786_v63  ;;  %v9837_v62 = vld [vmem:[%s12902_s5 + $0x340] ss:$16 sps:$4 sm:$0xff]   ;;  %v9838_v63 = vld [vmem:[%s12902_s5 + $0x364] ss:$16 sps:$4 sm:$0xff]  }
 0x322   : > { %v3428_v8 = vpack.c.bf16 %v3370_v5, %v3368_v4  ;;  %4405 = vmatprep.mubr.bf16.mxu1 %v9787_v2  ;;  %v9840_v0 = vld [vmem:[%s12902_s5 + $0x360] ss:$16 sps:$4 sm:$0xff]   ;;  %v9841_v2 = vld [vmem:[%s12902_s5 + $0x8] ss:$16 sps:$4 sm:$0xff]   ;;  %v9844_v3 = vld [vmem:[%s12902_s5 + $0x2c] ss:$16 sps:$4 sm:$0xff]  }
 0x323   : > { %v3429_v10 = vpack.c.bf16 %v3371_v7, %v3369_v6  ;;  %v3255_v11 = vpop.f32.mrb[108].mxu0  ;;  %v9846_v4 = vld [vmem:[%s12902_s5 + $0x28] ss:$16 sps:$4 sm:$0xff]   ;;  %v9847_v5 = vld [vmem:[%s12902_s5 + $0x4c] ss:$16 sps:$4 sm:$0xff]  }
 0x324   : > { %v9342_v12 = vadd.f32 %v3255_v11, %v11290_v60  ;;  %v3257_v13 = vpop.f32.mrb[109].mxu0  ;;  %v3652_v14 = vld [vmem:[#allocation3 + $0x198] sm:$0xff] }
 0x325   : > { %3486 = vst.msk [vmem:[#allocation3 + $0x1a8] sm:$0xff] %vm3433_vm4, %v3429_v10  ;;  %v9343_v15 = vadd.f32 %v3257_v13, %v11294_v61  ;;  %v3259_v16 = vpop.f32.mrb[110].mxu0  ;;  %4604 = vmatprep.subr.bf16.mxu1 %v3652_v14  ;;  %v9849_v6 = vld [vmem:[%s12902_s5 + $0x48] ss:$16 sps:$4 sm:$0xff]   ;;  %v9850_v7 = vld [vmem:[%s12902_s5 + $0x6c] ss:$16 sps:$4 sm:$0xff]  }
 0x326   : > { %v9344_v9 = vadd.f32 %v3259_v16, %v11290_v60  ;;  %v3261_v18 = vpop.f32.mrb[111].mxu0  ;;  %4605 = vmatpush1.bf16.msra.mxu1 %v3426_v50  ;;  %v3372_v21 = vmax.f32 %v9342_v12, 0.0  ;;  %v9792_v60 = vld [vmem:[%s12902_s5 + $0x160] ss:$16 sps:$4 sm:$0xff]   ;;  %v9826_v50 = vld [vmem:[%s12902_s5 + $0x2e4] ss:$16 sps:$4 sm:$0xff]  }
 0x327   : > { %v9345_v20 = vadd.f32 %v3261_v18, %v11294_v61  ;;  %v3373_v23 = vmax.f32 %v9343_v15, 0.0  ;;  %v9793_v61 = vld [vmem:[%s12902_s5 + $0x184] ss:$16 sps:$4 sm:$0xff]   ;;  %v9852_v11 = vld [vmem:[%s12902_s5 + $0x68] ss:$16 sps:$4 sm:$0xff]  }
 0x328   : > { %v3374_v22 = vmax.f32 %v9344_v9, 0.0  ;;  %v9900_v10 = vld [vmem:[%s12903_s6 + $0x4] ss:$8 sps:$4 sm:$0xff]   ;;  %v9855_v13 = vld [vmem:[%s12902_s5 + $0x88] ss:$16 sps:$4 sm:$0xff]  }
 0x329   : > { %v3375_v24 = vmax.f32 %v9345_v20, 0.0  ;;  %4406 = vmatmul.mubr.bf16.gmra.mrb[40].mxu1 %v9789_v17  ;;  %5158 = vmatprep.subr.bf16.mxu0 %v9900_v10  ;;  %v9853_v12 = vld [vmem:[%s12902_s5 + $0x8c] ss:$16 sps:$4 sm:$0xff]   ;;  %v9907_v15 = vld [vmem:[%s12903_s6 + $0x10] ss:$8 sps:$4 sm:$0xff]  }
 0x32a   : > { %v3430_v25 = vpack.c.bf16 %v3374_v22, %v3372_v21  ;;  %4415 = vmatprep.mubr.bf16.mxu1 %v9790_v19  ;;  %v9856_v14 = vld [vmem:[%s12902_s5 + $0xac] ss:$16 sps:$4 sm:$0xff]   ;;  %v9858_v17 = vld [vmem:[%s12902_s5 + $0xa8] ss:$16 sps:$4 sm:$0xff]  }
 0x32b   : > { %v3431_v26 = vpack.c.bf16 %v3375_v24, %v3373_v23  ;;  %v9909_v16 = vld [vmem:[%s12903_s6 + $0x14] ss:$8 sps:$4 sm:$0xff]   ;;  %v9861_v18 = vld [vmem:[%s12902_s5 + $0xc8] ss:$16 sps:$4 sm:$0xff]   ;;  %v9921_v23 = vld [vmem:[%s12903_s6 + $0x24] ss:$8 sps:$4 sm:$0xff]  }
 0x32c   : > { %v3654_v27 = vld [vmem:[#allocation3 + $0x1a8] sm:$0xff]  ;;  %v9954_v10 = vld [vmem:[%s12903_s6 + $0x94] ss:$8 sps:$4 sm:$0xff]  }
 0x32d   : > { %3488 = vst.msk [vmem:[#allocation3 + $0x1b8] sm:$0xff] %vm3433_vm4, %v3431_v26  ;;  %4606 = vmatprep.subr.bf16.mxu1 %v3654_v27  ;;  %v9859_v9 = vld [vmem:[%s12902_s5 + $0xcc] ss:$16 sps:$4 sm:$0xff]   ;;  %v9864_v20 = vld [vmem:[%s12902_s5 + $0xe8] ss:$16 sps:$4 sm:$0xff]  }
 0x32e   : > { %4607 = vmatpush1.bf16.msra.mxu1 %v3428_v8  ;;  %v9898_v8 = vld [vmem:[%s12903_s6] ss:$8 sps:$4 sm:$0xff]   ;;  %v9862_v19 = vld [vmem:[%s12902_s5 + $0xec] ss:$16 sps:$4 sm:$0xff]  }
 0x32f   : > { %5159 = vmatpush1.bf16.msra.mxu0 %v9898_v8  ;;  %v9865_v21 = vld [vmem:[%s12902_s5 + $0x10c] ss:$16 sps:$4 sm:$0xff]   ;;  %v9919_v22 = vld [vmem:[%s12903_s6 + $0x20] ss:$8 sps:$4 sm:$0xff]  }
 0x330   : > { %5160 = vmatprep.subr.bf16.mxu0 %v9909_v16  ;;  %v9867_v24 = vld [vmem:[%s12902_s5 + $0x108] ss:$16 sps:$4 sm:$0xff]   ;;  %v9871_v27 = vld [vmem:[%s12902_s5 + $0x14c] ss:$16 sps:$4 sm:$0xff]  }
 0x331   : > { %4416 = vmatmul.mubr.bf16.gmra.mrb[44].mxu1 %v9792_v60  ;;  %v9870_v26 = vld [vmem:[%s12902_s5 + $0x128] ss:$16 sps:$4 sm:$0xff]   ;;  %v9925_v8 = vld [vmem:[%s12902_s5 + $0x32c] ss:$16 sps:$4 sm:$0xff]  }
 0x332   : > { %4425 = vmatprep.mubr.bf16.mxu1 %v9793_v61  ;;  %v9928_v60 = vld [vmem:[%s12903_s6 + $0x30] ss:$8 sps:$4 sm:$0xff]   ;;  %v9930_v61 = vld [vmem:[%s12903_s6 + $0x34] ss:$8 sps:$4 sm:$0xff]  }
 0x333   : > { %5161 = vmatpush1.bf16.msra.mxu0 %v9907_v15 }
 0x334   : > { %v3656_v28 = vld [vmem:[#allocation3 + $0x1b8] sm:$0xff]  ;;  %5162 = vmatprep.subr.bf16.mxu0 %v9921_v23 }
 0x335   : > { %4608 = vmatprep.subr.bf16.mxu1 %v3656_v28  ;;  %v9873_v28 = vld [vmem:[%s12902_s5 + $0x148] ss:$16 sps:$4 sm:$0xff]  }
 0x336   : > { %4609 = vmatpush1.bf16.msra.mxu1 %v3430_v25  ;;  %v9868_v25 = vld [vmem:[%s12902_s5 + $0x12c] ss:$16 sps:$4 sm:$0xff]  }
 0x337   : > { %5163 = vmatpush1.bf16.msra.mxu0 %v9919_v22 }
 0x338   : > { %5164 = vmatprep.subr.bf16.mxu0 %v9930_v61 }
 0x339   : > { %4426 = vmatmul.mubr.bf16.gmra.mrb[48].mxu1 %v9795_v29  ;;  %v9874_v29 = vld [vmem:[%s12902_s5 + $0x16c] ss:$16 sps:$4 sm:$0xff]  }
 0x33a   : > { %4435 = vmatprep.mubr.bf16.mxu1 %v9796_v30  ;;  %v9876_v30 = vld [vmem:[%s12902_s5 + $0x168] ss:$16 sps:$4 sm:$0xff]  }
 0x33b   : > { %5165 = vmatpush1.bf16.msra.mxu0 %v9928_v60 }
 0x341   : > { %4436 = vmatmul.mubr.bf16.gmra.mrb[52].mxu1 %v9798_v31  ;;  %v9877_v31 = vld [vmem:[%s12902_s5 + $0x18c] ss:$16 sps:$4 sm:$0xff]  }
 0x342   : > { %4445 = vmatprep.mubr.bf16.mxu1 %v9799_v32  ;;  %v9879_v32 = vld [vmem:[%s12902_s5 + $0x188] ss:$16 sps:$4 sm:$0xff]  }
 0x349   : > { %4446 = vmatmul.mubr.bf16.gmra.mrb[56].mxu1 %v9801_v33  ;;  %v9880_v33 = vld [vmem:[%s12902_s5 + $0x1ac] ss:$16 sps:$4 sm:$0xff]  }
 0x34a   : > { %4455 = vmatprep.mubr.bf16.mxu1 %v9802_v34  ;;  %v9937_v34 = vld [vmem:[%s12903_s6 + $0x40] ss:$8 sps:$4 sm:$0xff]  }
 0x351   : > { %4456 = vmatmul.mubr.bf16.gmra.mrb[60].mxu1 %v9804_v35  ;;  %v9939_v35 = vld [vmem:[%s12903_s6 + $0x44] ss:$8 sps:$4 sm:$0xff]  }
 0x352   : > { %4465 = vmatprep.mubr.bf16.mxu1 %v9805_v36  ;;  %5166 = vmatprep.subr.bf16.mxu0 %v9939_v35  ;;  %v9882_v36 = vld [vmem:[%s12902_s5 + $0x1a8] ss:$16 sps:$4 sm:$0xff]  }
 0x353   : > { %5167 = vmatpush1.bf16.msra.mxu0 %v9937_v34 }
 0x359   : > { %4466 = vmatmul.mubr.bf16.gmra.mrb[64].mxu1 %v9807_v37  ;;  %v9883_v37 = vld [vmem:[%s12902_s5 + $0x1cc] ss:$16 sps:$4 sm:$0xff]  }
 0x35a   : > { %4475 = vmatprep.mubr.bf16.mxu1 %v9808_v38  ;;  %v9885_v38 = vld [vmem:[%s12902_s5 + $0x1c8] ss:$16 sps:$4 sm:$0xff]  }
 0x361   : > { %4476 = vmatmul.mubr.bf16.gmra.mrb[68].mxu1 %v9810_v39  ;;  %v9886_v39 = vld [vmem:[%s12902_s5 + $0x1ec] ss:$16 sps:$4 sm:$0xff]  }
 0x362   : > { %4485 = vmatprep.mubr.bf16.mxu1 %v9811_v40  ;;  %v9888_v40 = vld [vmem:[%s12902_s5 + $0x1e8] ss:$16 sps:$4 sm:$0xff]  }
 0x369   : > { %4486 = vmatmul.mubr.bf16.gmra.mrb[72].mxu1 %v9813_v41  ;;  %v9889_v41 = vld [vmem:[%s12902_s5 + $0x20c] ss:$16 sps:$4 sm:$0xff]  }
 0x36a   : > { %4495 = vmatprep.mubr.bf16.mxu1 %v9814_v42  ;;  %v9940_v42 = vld [vmem:[%s12903_s6 + $0x50] ss:$8 sps:$4 sm:$0xff]  }
 0x371   : > { %4496 = vmatmul.mubr.bf16.gmra.mrb[76].mxu1 %v9816_v43  ;;  %v9942_v43 = vld [vmem:[%s12903_s6 + $0x54] ss:$8 sps:$4 sm:$0xff]  }
 0x372   : > { %4505 = vmatprep.mubr.bf16.mxu1 %v9817_v44  ;;  %5168 = vmatprep.subr.bf16.mxu0 %v9942_v43  ;;  %v9891_v44 = vld [vmem:[%s12902_s5 + $0x208] ss:$16 sps:$4 sm:$0xff]  }
 0x373   : > { %5169 = vmatpush1.bf16.msra.mxu0 %v9940_v42 }
 0x379   : > { %4506 = vmatmul.mubr.bf16.gmra.mrb[80].mxu1 %v9819_v45  ;;  %v9892_v45 = vld [vmem:[%s12902_s5 + $0x22c] ss:$16 sps:$4 sm:$0xff]  }
 0x37a   : > { %4515 = vmatprep.mubr.bf16.mxu1 %v9820_v46  ;;  %v9894_v46 = vld [vmem:[%s12902_s5 + $0x228] ss:$16 sps:$4 sm:$0xff]  }
 0x381   : > { %4516 = vmatmul.mubr.bf16.gmra.mrb[84].mxu1 %v9822_v47  ;;  %v9895_v47 = vld [vmem:[%s12902_s5 + $0x24c] ss:$16 sps:$4 sm:$0xff]  }
 0x382   : > { %4525 = vmatprep.mubr.bf16.mxu1 %v9823_v48  ;;  %v9943_v48 = vld [vmem:[%s12903_s6 + $0x60] ss:$8 sps:$4 sm:$0xff]  }
 0x389   : > { %4526 = vmatmul.mubr.bf16.gmra.mrb[88].mxu1 %v9825_v49  ;;  %v9945_v49 = vld [vmem:[%s12903_s6 + $0x64] ss:$8 sps:$4 sm:$0xff]  }
 0x38a   : > { %4535 = vmatprep.mubr.bf16.mxu1 %v9826_v50  ;;  %v9897_v50 = vld [vmem:[%s12902_s5 + $0x248] ss:$16 sps:$4 sm:$0xff]   ;;  %5170 = vmatprep.subr.bf16.mxu0 %v9945_v49 }
 0x38b   : > { %5171 = vmatpush1.bf16.msra.mxu0 %v9943_v48 }
 0x391   : > { %4536 = vmatmul.mubr.bf16.gmra.mrb[92].mxu1 %v9828_v51  ;;  %v9901_v51 = vld [vmem:[%s12902_s5 + $0x26c] ss:$16 sps:$4 sm:$0xff]  }
 0x392   : > { %4545 = vmatprep.mubr.bf16.mxu1 %v9829_v52  ;;  %v9903_v52 = vld [vmem:[%s12902_s5 + $0x268] ss:$16 sps:$4 sm:$0xff]  }
 0x399   : > { %4546 = vmatmul.mubr.bf16.gmra.mrb[96].mxu1 %v9831_v53  ;;  %v9904_v53 = vld [vmem:[%s12902_s5 + $0x28c] ss:$16 sps:$4 sm:$0xff]  }
 0x39a   : > { %4555 = vmatprep.mubr.bf16.mxu1 %v9832_v56  ;;  %v9906_v56 = vld [vmem:[%s12902_s5 + $0x288] ss:$16 sps:$4 sm:$0xff]  }
 0x3a1   : > { %4556 = vmatmul.mubr.bf16.gmra.mrb[100].mxu1 %v9834_v57  ;;  %v9910_v57 = vld [vmem:[%s12902_s5 + $0x2ac] ss:$16 sps:$4 sm:$0xff]  }
 0x3a2   : > { %4565 = vmatprep.mubr.bf16.mxu1 %v9835_v59  ;;  %v9946_v59 = vld [vmem:[%s12903_s6 + $0x70] ss:$8 sps:$4 sm:$0xff]  }
 0x3a9   : > { %4566 = vmatmul.mubr.bf16.gmra.mrb[104].mxu1 %v9837_v62  ;;  %v9948_v62 = vld [vmem:[%s12903_s6 + $0x74] ss:$8 sps:$4 sm:$0xff]  }
 0x3aa   : > { %4575 = vmatprep.mubr.bf16.mxu1 %v9838_v63  ;;  %5172 = vmatprep.subr.bf16.mxu0 %v9948_v62  ;;  %v9912_v63 = vld [vmem:[%s12902_s5 + $0x2a8] ss:$16 sps:$4 sm:$0xff]  }
 0x3ab   : > { %5173 = vmatpush1.bf16.msra.mxu0 %v9946_v59 }
 0x3b1   : > { %4576 = vmatmul.mubr.bf16.gmra.mrb[108].mxu1 %v9840_v0  ;;  %v9913_v0 = vld [vmem:[%s12902_s5 + $0x2cc] ss:$16 sps:$4 sm:$0xff]  }
 0x3b2   : > { %8805 = vmatprep.mubr.msk.bf16.mxu1 %vm528_vm13, %v9843_v1  ;;  %v9915_v1 = vld [vmem:[%s12902_s5 + $0x2c8] ss:$16 sps:$4 sm:$0xff]  }
 0x3b9   : > { %4619 = vmatmul.mubr.bf16.vlgmr.msra.gmra.mrb[0].mxu1 %v9841_v2  ;;  %v9916_v2 = vld [vmem:[%s12902_s5 + $0x2ec] ss:$16 sps:$4 sm:$0xff]  }
 0x3ba   : > { %8806 = vmatprep.mubr.msk.bf16.mxu1 %vm528_vm13, %v9844_v3  ;;  %v9949_v3 = vld [vmem:[%s12903_s6 + $0x80] ss:$8 sps:$4 sm:$0xff]  }
 0x3c1   : > { %4629 = vmatmul.mubr.bf16.gmra.mrb[4].mxu1 %v9846_v4  ;;  %v9951_v4 = vld [vmem:[%s12903_s6 + $0x84] ss:$8 sps:$4 sm:$0xff]  }
 0x3c2   : > { %8807 = vmatprep.mubr.msk.bf16.mxu1 %vm528_vm13, %v9847_v5  ;;  %v9918_v5 = vld [vmem:[%s12902_s5 + $0x2e8] ss:$16 sps:$4 sm:$0xff]   ;;  %5174 = vmatprep.subr.bf16.mxu0 %v9951_v4 }
 0x3c3   : > { %5175 = vmatpush1.bf16.msra.mxu0 %v9949_v3 }
 0x3c4   : > { %5176 = vmatprep.subr.bf16.mxu0 %v9954_v10  ;;  %v9957_v10 = vld [vmem:[%s12900_s3] ss:$8 sps:$4 sm:$0xff]  }
 0x3c9   : > { %4639 = vmatmul.mubr.bf16.gmra.mrb[8].mxu1 %v9849_v6  ;;  %v9922_v6 = vld [vmem:[%s12902_s5 + $0x30c] ss:$16 sps:$4 sm:$0xff]  }
 0x3ca   : > { %8808 = vmatprep.mubr.msk.bf16.mxu1 %vm528_vm13, %v9850_v7  ;;  %v9924_v7 = vld [vmem:[%s12902_s5 + $0x308] ss:$16 sps:$4 sm:$0xff]  }
 0x3d1   : > { %4649 = vmatmul.mubr.bf16.gmra.mrb[12].mxu1 %v9852_v11  ;;  %v9952_v11 = vld [vmem:[%s12903_s6 + $0x90] ss:$8 sps:$4 sm:$0xff]  }
 0x3d2   : > { %8809 = vmatprep.mubr.msk.bf16.mxu1 %vm528_vm13, %v9853_v12  ;;  %v9927_v12 = vld [vmem:[%s12902_s5 + $0x328] ss:$16 sps:$4 sm:$0xff]   ;;  %5177 = vmatpush1.bf16.msra.mxu0 %v9952_v11  ;;  %v9959_v11 = vld [vmem:[%s12900_s3 + $0x4] ss:$8 sps:$4 sm:$0xff]  }
 0x3d3   : > { %6678 = vmatprep.subr.bf16.mxu1 %v9959_v11 }
 0x3d4   : > { %6679 = vmatpush1.bf16.msra.mxu1 %v9957_v10 }
 0x3d9   : > { %4659 = vmatmul.mubr.bf16.gmra.mrb[16].mxu1 %v9855_v13  ;;  %v9931_v13 = vld [vmem:[%s12902_s5 + $0x34c] ss:$16 sps:$4 sm:$0xff]  }
 0x3da   : > { %8810 = vmatprep.mubr.msk.bf16.mxu1 %vm528_vm13, %v9856_v14  ;;  %v5003_v14 = vld [vmem:[%s12903_s6 + $0xa0] sm:$0xff] }
 0x3db   : > { %v8854_v15 = vcombine.high %v5003_v14, %v5003_v14  ;;  %v8853_v16 = vcombine.low %v5003_v14, %v5003_v14 }
 0x3dd   : > { %8855 = vmatprep.subr.msk.bf16.mxu0 %vm12946_vm1, %v8854_v15 }
 0x3e1   : > { %4669 = vmatmul.mubr.bf16.gmra.mrb[20].mxu1 %v9858_v17  ;;  %v5153_v17 = vsel %vm12946_vm1, %v8853_v16, 0  ;;  %vm12957_vm1 = vcmask 654341  }
 0x3e2   : > { %8811 = vmatprep.mubr.msk.bf16.mxu1 %vm528_vm13, %v9859_v9  ;;  %5179 = vmatpush1.bf16.msra.mxu0 %v5153_v17  ;;  %v9933_v9 = vld [vmem:[%s12902_s5 + $0x348] ss:$16 sps:$4 sm:$0xff]  }
 0x3e9   : > { %4679 = vmatmul.mubr.bf16.gmra.mrb[24].mxu1 %v9861_v18  ;;  %v9934_v18 = vld [vmem:[%s12902_s5 + $0x36c] ss:$16 sps:$4 sm:$0xff]  }
 0x3ea   : > { %8812 = vmatprep.mubr.msk.bf16.mxu1 %vm528_vm13, %v9862_v19 }
 0x3f1   : > { %4689 = vmatmul.mubr.bf16.gmra.mrb[28].mxu1 %v9864_v20 }
 0x3f2   : > { %8813 = vmatprep.mubr.msk.bf16.mxu1 %vm528_vm13, %v9865_v21  ;;  %v9936_v21 = vld [vmem:[%s12902_s5 + $0x368] ss:$16 sps:$4 sm:$0xff]  }
 0x3f9   : > { %4699 = vmatmul.mubr.bf16.gmra.mrb[32].mxu1 %v9867_v24 }
 0x3fa   : > { %8814 = vmatprep.mubr.msk.bf16.mxu1 %vm528_vm13, %v9868_v25 }
 0x401   : > { %4709 = vmatmul.mubr.bf16.gmra.mrb[36].mxu1 %v9870_v26 }
 0x402   : > { %8815 = vmatprep.mubr.msk.bf16.mxu1 %vm528_vm13, %v9871_v27 }
 0x409   : > { %4719 = vmatmul.mubr.bf16.gmra.mrb[40].mxu1 %v9873_v28 }
 0x40a   : > { %8816 = vmatprep.mubr.msk.bf16.mxu1 %vm528_vm13, %v9874_v29 }
 0x411   : > { %4729 = vmatmul.mubr.bf16.gmra.mrb[44].mxu1 %v9876_v30 }
 0x412   : > { %8817 = vmatprep.mubr.msk.bf16.mxu1 %vm528_vm13, %v9877_v31 }
 0x419   : > { %4739 = vmatmul.mubr.bf16.gmra.mrb[48].mxu1 %v9879_v32 }
 0x41a   : > { %8818 = vmatprep.mubr.msk.bf16.mxu1 %vm528_vm13, %v9880_v33 }
 0x421   : > { %4749 = vmatmul.mubr.bf16.gmra.mrb[52].mxu1 %v9882_v36 }
 0x422   : > { %8819 = vmatprep.mubr.msk.bf16.mxu1 %vm528_vm13, %v9883_v37 }
 0x429   : > { %4759 = vmatmul.mubr.bf16.gmra.mrb[56].mxu1 %v9885_v38 }
 0x42a   : > { %8820 = vmatprep.mubr.msk.bf16.mxu1 %vm528_vm13, %v9886_v39 }
 0x431   : > { %4769 = vmatmul.mubr.bf16.gmra.mrb[60].mxu1 %v9888_v40 }
 0x432   : > { %8821 = vmatprep.mubr.msk.bf16.mxu1 %vm528_vm13, %v9889_v41 }
 0x439   : > { %4779 = vmatmul.mubr.bf16.gmra.mrb[64].mxu1 %v9891_v44 }
 0x43a   : > { %8822 = vmatprep.mubr.msk.bf16.mxu1 %vm528_vm13, %v9892_v45 }
 0x441   : > { %4789 = vmatmul.mubr.bf16.gmra.mrb[68].mxu1 %v9894_v46 }
 0x442   : > { %8823 = vmatprep.mubr.msk.bf16.mxu1 %vm528_vm13, %v9895_v47 }
 0x449   : > { %4799 = vmatmul.mubr.bf16.gmra.mrb[72].mxu1 %v9897_v50 }
 0x44a   : > { %8824 = vmatprep.mubr.msk.bf16.mxu1 %vm528_vm13, %v9901_v51 }
 0x451   : > { %4809 = vmatmul.mubr.bf16.gmra.mrb[76].mxu1 %v9903_v52 }
 0x452   : > { %8825 = vmatprep.mubr.msk.bf16.mxu1 %vm528_vm13, %v9904_v53 }
 0x459   : > { %4819 = vmatmul.mubr.bf16.gmra.mrb[80].mxu1 %v9906_v56 }
 0x45a   : > { %8826 = vmatprep.mubr.msk.bf16.mxu1 %vm528_vm13, %v9910_v57 }
 0x461   : > { %4829 = vmatmul.mubr.bf16.gmra.mrb[84].mxu1 %v9912_v63 }
 0x462   : > { %8827 = vmatprep.mubr.msk.bf16.mxu1 %vm528_vm13, %v9913_v0 }
 0x469   : > { %4839 = vmatmul.mubr.bf16.gmra.mrb[88].mxu1 %v9915_v1 }
 0x46a   : > { %8828 = vmatprep.mubr.msk.bf16.mxu1 %vm528_vm13, %v9916_v2 }
 0x471   : > { %4849 = vmatmul.mubr.bf16.gmra.mrb[92].mxu1 %v9918_v5 }
 0x472   : > { %8829 = vmatprep.mubr.msk.bf16.mxu1 %vm528_vm13, %v9922_v6 }
 0x479   : > { %4859 = vmatmul.mubr.bf16.gmra.mrb[96].mxu1 %v9924_v7 }
 0x47a   : > { %8830 = vmatprep.mubr.msk.bf16.mxu1 %vm528_vm13, %v9925_v8 }
 0x481   : > { %4869 = vmatmul.mubr.bf16.gmra.mrb[100].mxu1 %v9927_v12 }
 0x482   : > { %8831 = vmatprep.mubr.msk.bf16.mxu1 %vm528_vm13, %v9931_v13 }
 0x489   : > { %4879 = vmatmul.mubr.bf16.gmra.mrb[104].mxu1 %v9933_v9 }
 0x48a   : > { %8832 = vmatprep.mubr.msk.bf16.mxu1 %vm528_vm13, %v9934_v18  ;;  %vm12945_vm13 = vcmask 687104  }
 0x48c   : > { %v11863_v19 = vpop.f32.mrb[0].mxu1 }
 0x48d   : > { %v11865_v20 = vpop.f32.mrb[1].mxu1 }
 0x48e   : > { %v11870_v22 = vpop.f32.mrb[2].mxu1 }
 0x48f   : > { %v11872_v23 = vpop.f32.mrb[3].mxu1 }
 0x491   : > { %4889 = vmatmul.mubr.bf16.gmra.mrb[108].mxu1 %v9936_v21 }
 0x494   : > { %v11874_v24 = vpop.f32.mrb[4].mxu1 }
 0x495   : > { %v11876_v25 = vpop.f32.mrb[5].mxu1 }
 0x496   : > { %v11878_v26 = vpop.f32.mrb[6].mxu1 }
 0x497   : > { %v11880_v27 = vpop.f32.mrb[7].mxu1 }
 0x49c   : > { %v11882_v60 = vpop.f32.mrb[8].mxu1 }
 0x49d   : > { %v11884_v61 = vpop.f32.mrb[9].mxu1 }
 0x49e   : > { %v11886_v28 = vpop.f32.mrb[10].mxu1 }
 0x49f   : > { %v11888_v29 = vpop.f32.mrb[11].mxu1 }
 0x4a4   : > { %v11890_v30 = vpop.f32.mrb[12].mxu1 }
 0x4a5   : > { %v11892_v31 = vpop.f32.mrb[13].mxu1 }
 0x4a6   : > { %v11894_v32 = vpop.f32.mrb[14].mxu1 }
 0x4a7   : > { %v11896_v33 = vpop.f32.mrb[15].mxu1 }
 0x4ac   : > { %v11898_v34 = vpop.f32.mrb[16].mxu1 }
 0x4ad   : > { %v11900_v35 = vpop.f32.mrb[17].mxu1 }
 0x4ae   : > { %v11902_v36 = vpop.f32.mrb[18].mxu1 }
 0x4af   : > { %v11904_v37 = vpop.f32.mrb[19].mxu1 }
 0x4b4   : > { %v11906_v38 = vpop.f32.mrb[20].mxu1 }
 0x4b5   : > { %v11908_v39 = vpop.f32.mrb[21].mxu1 }
 0x4b6   : > { %v11910_v40 = vpop.f32.mrb[22].mxu1 }
 0x4b7   : > { %v11912_v41 = vpop.f32.mrb[23].mxu1 }
 0x4bc   : > { %v11914_v42 = vpop.f32.mrb[24].mxu1 }
 0x4bd   : > { %v11916_v43 = vpop.f32.mrb[25].mxu1 }
 0x4be   : > { %v11918_v44 = vpop.f32.mrb[26].mxu1 }
 0x4bf   : > { %v11920_v45 = vpop.f32.mrb[27].mxu1 }
 0x4c4   : > { %v11922_v46 = vpop.f32.mrb[28].mxu1 }
 0x4c5   : > { %v11924_v47 = vpop.f32.mrb[29].mxu1 }
 0x4c6   : > { %v11926_v48 = vpop.f32.mrb[30].mxu1 }
 0x4c7   : > { %v11928_v49 = vpop.f32.mrb[31].mxu1 }
 0x4cc   : > { %v11930_v50 = vpop.f32.mrb[32].mxu1 }
 0x4cd   : > { %v11932_v51 = vpop.f32.mrb[33].mxu1 }
 0x4ce   : > { %v11934_v52 = vpop.f32.mrb[34].mxu1 }
 0x4cf   : > { %v11936_v53 = vpop.f32.mrb[35].mxu1 }
 0x4d4   : > { %v11938_v56 = vpop.f32.mrb[36].mxu1 }
 0x4d5   : > { %v11940_v57 = vpop.f32.mrb[37].mxu1 }
 0x4d6   : > { %v11942_v59 = vpop.f32.mrb[38].mxu1 }
 0x4d7   : > { %v11944_v62 = vpop.f32.mrb[39].mxu1 }
 0x4dc   : > { %v11946_v63 = vpop.f32.mrb[40].mxu1 }
 0x4dd   : > { %v11948_v0 = vpop.f32.mrb[41].mxu1 }
 0x4de   : > { %v11950_v1 = vpop.f32.mrb[42].mxu1 }
 0x4df   : > { %v11952_v2 = vpop.f32.mrb[43].mxu1 }
 0x4e4   : > { %v11954_v3 = vpop.f32.mrb[44].mxu1 }
 0x4e5   : > { %v11956_v4 = vpop.f32.mrb[45].mxu1 }
 0x4e6   : > { %v11958_v5 = vpop.f32.mrb[46].mxu1 }
 0x4e7   : > { %v11960_v6 = vpop.f32.mrb[47].mxu1 }
 0x4ec   : > { %v11962_v7 = vpop.f32.mrb[48].mxu1 }
 0x4ed   : > { %v11964_v8 = vpop.f32.mrb[49].mxu1 }
 0x4ee   : > { %v11972_v12 = vpop.f32.mrb[50].mxu1 }
 0x4ef   : > { %13112 = vst [vmem:[#allocation8_spill] sm:$0xff] %v11972_v12  ;;  %v11974_v13 = vpop.f32.mrb[51].mxu1 }
 0x4f0   : > { %13113 = vst [vmem:[#allocation9_spill] sm:$0xff] %v11974_v13 }
 0x4f4   : > { %v11976_v14 = vpop.f32.mrb[52].mxu1 }
 0x4f5   : > { %13114 = vst [vmem:[#allocation10_spill] sm:$0xff] %v11976_v14  ;;  %v11978_v15 = vpop.f32.mrb[53].mxu1 }
 0x4f6   : > { %13115 = vst [vmem:[#allocation11_spill] sm:$0xff] %v11978_v15  ;;  %v11980_v16 = vpop.f32.mrb[54].mxu1 }
 0x4f7   : > { %13116 = vst [vmem:[#allocation12_spill] sm:$0xff] %v11980_v16  ;;  %v11982_v17 = vpop.f32.mrb[55].mxu1 }
 0x4f8   : > { %13117 = vst [vmem:[#allocation13_spill] sm:$0xff] %v11982_v17 }
 0x4fc   : > { %v4760_v9 = vpop.f32.mrb[56].mxu1 }
 0x4fd   : > { %v4899_v18 = vmax.f32 %v11863_v19, %v4760_v9  ;;  %v4762_v21 = vpop.f32.mrb[57].mxu1 }
 0x4fe   : > { %v4900_v58 = vmax.f32 %v11865_v20, %v4762_v21  ;;  %v4764_v55 = vpop.f32.mrb[58].mxu1 }
 0x4ff   : > { %v4901_v54 = vmax.f32 %v11870_v22, %v4764_v55  ;;  %v4766_v13 = vpop.f32.mrb[59].mxu1 }
 0x500   : > { %v4902_v10 = vmax.f32 %v11872_v23, %v4766_v13 }
 0x501   : > { %v4955_v11 = vpack.c.bf16 %v4901_v54, %v4899_v18 }
 0x502   : > { %v4956_v14 = vpack.c.bf16 %v4902_v10, %v4900_v58 }
 0x504   : > { %v4770_v12 = vpop.f32.mrb[60].mxu1  ;;  %8856 = vmatprep.mubr.msk.bf16.mxu0 %vm3433_vm4, %v4956_v14 }
 0x505   : > { %v4903_v16 = vmax.f32 %v11874_v24, %v4770_v12  ;;  %v4772_v17 = vpop.f32.mrb[61].mxu1  ;;  %5191 = vmatmul.mubr.bf16.vlgmr.msra.gmra.mrb[112].mxu0 %v4955_v11 }
 0x506   : > { %v4904_v19 = vmax.f32 %v11876_v25, %v4772_v17  ;;  %v4774_v9 = vpop.f32.mrb[62].mxu1 }
 0x507   : > { %v4905_v20 = vmax.f32 %v11878_v26, %v4774_v9  ;;  %v4776_v21 = vpop.f32.mrb[63].mxu1 }
 0x508   : > { %v4906_v55 = vmax.f32 %v11880_v27, %v4776_v21 }
 0x509   : > { %v4957_v22 = vpack.c.bf16 %v4905_v20, %v4903_v16 }
 0x50a   : > { %v4958_v15 = vpack.c.bf16 %v4906_v55, %v4904_v19 }
 0x50c   : > { %v4780_v23 = vpop.f32.mrb[64].mxu1  ;;  %8857 = vmatprep.mubr.msk.bf16.mxu0 %vm3433_vm4, %v4958_v15 }
 0x50d   : > { %v4907_v54 = vmax.f32 %v11882_v60, %v4780_v23  ;;  %v4782_v58 = vpop.f32.mrb[65].mxu1  ;;  %5201 = vmatmul.mubr.bf16.gmra.mrb[116].mxu0 %v4957_v22 }
 0x50e   : > { %v4908_v24 = vmax.f32 %v11884_v61, %v4782_v58  ;;  %v4784_v12 = vpop.f32.mrb[66].mxu1 }
 0x50f   : > { %v4909_v25 = vmax.f32 %v11886_v28, %v4784_v12  ;;  %v4786_v13 = vpop.f32.mrb[67].mxu1 }
 0x510   : > { %v4910_v26 = vmax.f32 %v11888_v29, %v4786_v13 }
 0x511   : > { %v4959_v14 = vpack.c.bf16 %v4909_v25, %v4907_v54 }
 0x512   : > { %v4960_v17 = vpack.c.bf16 %v4910_v26, %v4908_v24 }
 0x514   : > { %v4790_v27 = vpop.f32.mrb[68].mxu1  ;;  %8858 = vmatprep.mubr.msk.bf16.mxu0 %vm3433_vm4, %v4960_v17 }
 0x515   : > { %v4911_v16 = vmax.f32 %v11890_v30, %v4790_v27  ;;  %v4792_v15 = vpop.f32.mrb[69].mxu1  ;;  %5211 = vmatmul.mubr.bf16.gmra.mrb[120].mxu0 %v4959_v14 }
 0x516   : > { %v4912_v60 = vmax.f32 %v11892_v31, %v4792_v15  ;;  %v4794_v18 = vpop.f32.mrb[70].mxu1 }
 0x517   : > { %v4913_v61 = vmax.f32 %v11894_v32, %v4794_v18  ;;  %v4796_v10 = vpop.f32.mrb[71].mxu1 }
 0x518   : > { %v4914_v28 = vmax.f32 %v11896_v33, %v4796_v10 }
 0x519   : > { %v4961_v11 = vpack.c.bf16 %v4913_v61, %v4911_v16 }
 0x51a   : > { %v4962_v19 = vpack.c.bf16 %v4914_v28, %v4912_v60 }
 0x51c   : > { %v4800_v29 = vpop.f32.mrb[72].mxu1  ;;  %8859 = vmatprep.mubr.msk.bf16.mxu0 %vm3433_vm4, %v4962_v19 }
 0x51d   : > { %v4915_v9 = vmax.f32 %v11898_v34, %v4800_v29  ;;  %v4802_v20 = vpop.f32.mrb[73].mxu1  ;;  %5221 = vmatmul.mubr.bf16.gmra.mrb[124].mxu0 %v4961_v11 }
 0x51e   : > { %v4916_v30 = vmax.f32 %v11900_v35, %v4802_v20  ;;  %v4804_v21 = vpop.f32.mrb[74].mxu1 }
 0x51f   : > { %v4917_v31 = vmax.f32 %v11902_v36, %v4804_v21  ;;  %v4806_v55 = vpop.f32.mrb[75].mxu1 }
 0x520   : > { %v4918_v32 = vmax.f32 %v11904_v37, %v4806_v55 }
 0x521   : > { %v4963_v22 = vpack.c.bf16 %v4917_v31, %v4915_v9 }
 0x522   : > { %v4964_v23 = vpack.c.bf16 %v4918_v32, %v4916_v30 }
 0x524   : > { %v4810_v33 = vpop.f32.mrb[76].mxu1  ;;  %8860 = vmatprep.mubr.msk.bf16.mxu0 %vm3433_vm4, %v4964_v23 }
 0x525   : > { %v4919_v54 = vmax.f32 %v11906_v38, %v4810_v33  ;;  %v4812_v58 = vpop.f32.mrb[77].mxu1  ;;  %5231 = vmatmul.mubr.bf16.gmra.mrb[128].mxu0 %v4963_v22 }
 0x526   : > { %v4920_v34 = vmax.f32 %v11908_v39, %v4812_v58  ;;  %v4814_v24 = vpop.f32.mrb[78].mxu1 }
 0x527   : > { %v4921_v35 = vmax.f32 %v11910_v40, %v4814_v24  ;;  %v4816_v12 = vpop.f32.mrb[79].mxu1 }
 0x528   : > { %v4922_v36 = vmax.f32 %v11912_v41, %v4816_v12 }
 0x529   : > { %v4965_v25 = vpack.c.bf16 %v4921_v35, %v4919_v54 }
 0x52a   : > { %v4966_v13 = vpack.c.bf16 %v4922_v36, %v4920_v34 }
 0x52c   : > { %v4820_v37 = vpop.f32.mrb[80].mxu1  ;;  %8861 = vmatprep.mubr.msk.bf16.mxu0 %vm3433_vm4, %v4966_v13 }
 0x52d   : > { %v4923_v26 = vmax.f32 %v11914_v42, %v4820_v37  ;;  %v4822_v14 = vpop.f32.mrb[81].mxu1  ;;  %5241 = vmatmul.mubr.bf16.gmra.mrb[132].mxu0 %v4965_v25 }
 0x52e   : > { %v4924_v38 = vmax.f32 %v11916_v43, %v4822_v14  ;;  %v4824_v17 = vpop.f32.mrb[82].mxu1 }
 0x52f   : > { %v4925_v39 = vmax.f32 %v11918_v44, %v4824_v17  ;;  %v4826_v27 = vpop.f32.mrb[83].mxu1 }
 0x530   : > { %v4926_v40 = vmax.f32 %v11920_v45, %v4826_v27  ;;  %v13118_v27 = vld [vmem:[#allocation8_spill] sm:$0xff] }
 0x531   : > { %v4967_v16 = vpack.c.bf16 %v4925_v39, %v4923_v26 }
 0x532   : > { %v4968_v15 = vpack.c.bf16 %v4926_v40, %v4924_v38 }
 0x534   : > { %v4830_v41 = vpop.f32.mrb[84].mxu1  ;;  %8862 = vmatprep.mubr.msk.bf16.mxu0 %vm3433_vm4, %v4968_v15  ;;  %v9962_v15 = vld [vmem:[%s12900_s3 + $0x14] ss:$8 sps:$4 sm:$0xff]  }
 0x535   : > { %v4927_v60 = vmax.f32 %v11922_v46, %v4830_v41  ;;  %v4832_v18 = vpop.f32.mrb[85].mxu1  ;;  %5251 = vmatmul.mubr.bf16.gmra.mrb[136].mxu0 %v4967_v16  ;;  %v13119_v16 = vld [vmem:[#allocation9_spill] sm:$0xff]  ;;  %6680 = vmatprep.subr.bf16.mxu1 %v9962_v15 }
 0x536   : > { %v4928_v42 = vmax.f32 %v11924_v47, %v4832_v18  ;;  %v4834_v61 = vpop.f32.mrb[86].mxu1 }
 0x537   : > { %v4929_v43 = vmax.f32 %v11926_v48, %v4834_v61  ;;  %v4836_v10 = vpop.f32.mrb[87].mxu1  ;;  %v13121_v61 = vld [vmem:[#allocation11_spill] sm:$0xff] }
 0x538   : > { %v4930_v44 = vmax.f32 %v11928_v49, %v4836_v10 }
 0x539   : > { %v4969_v28 = vpack.c.bf16 %v4929_v43, %v4927_v60 }
 0x53a   : > { %v4970_v11 = vpack.c.bf16 %v4930_v44, %v4928_v42  ;;  %v13122_v44 = vld [vmem:[#allocation12_spill] sm:$0xff] }
 0x53c   : > { %v4840_v45 = vpop.f32.mrb[88].mxu1  ;;  %8863 = vmatprep.mubr.msk.bf16.mxu0 %vm3433_vm4, %v4970_v11 }
 0x53d   : > { %v4931_v19 = vmax.f32 %v11930_v50, %v4840_v45  ;;  %v4842_v29 = vpop.f32.mrb[89].mxu1  ;;  %5261 = vmatmul.mubr.bf16.gmra.mrb[140].mxu0 %v4969_v28  ;;  %v13123_v45 = vld [vmem:[#allocation13_spill] sm:$0xff] }
 0x53e   : > { %v4932_v46 = vmax.f32 %v11932_v51, %v4842_v29  ;;  %v4844_v9 = vpop.f32.mrb[90].mxu1 }
 0x53f   : > { %v4933_v47 = vmax.f32 %v11934_v52, %v4844_v9  ;;  %v4846_v20 = vpop.f32.mrb[91].mxu1  ;;  %v9963_v9 = vld [vmem:[%s12900_s3 + $0x20] ss:$8 sps:$4 sm:$0xff]  }
 0x540   : > { %v4934_v48 = vmax.f32 %v11936_v53, %v4846_v20  ;;  %v9966_v20 = vld [vmem:[%s12900_s3 + $0x30] ss:$8 sps:$4 sm:$0xff]  }
 0x541   : > { %v4971_v30 = vpack.c.bf16 %v4933_v47, %v4931_v19  ;;  %v9965_v47 = vld [vmem:[%s12900_s3 + $0x24] ss:$8 sps:$4 sm:$0xff]  }
 0x542   : > { %v4972_v21 = vpack.c.bf16 %v4934_v48, %v4932_v46  ;;  %v9968_v48 = vld [vmem:[%s12900_s3 + $0x34] ss:$8 sps:$4 sm:$0xff]  }
 0x544   : > { %v4850_v49 = vpop.f32.mrb[92].mxu1  ;;  %8864 = vmatprep.mubr.msk.bf16.mxu0 %vm3433_vm4, %v4972_v21  ;;  %v9971_v21 = vld [vmem:[%s12900_s3 + $0x44] ss:$8 sps:$4 sm:$0xff]  }
 0x545   : > { %v4935_v31 = vmax.f32 %v11938_v56, %v4850_v49  ;;  %v4852_v55 = vpop.f32.mrb[93].mxu1  ;;  %5271 = vmatmul.mubr.bf16.gmra.mrb[144].mxu0 %v4971_v30  ;;  %v9969_v30 = vld [vmem:[%s12900_s3 + $0x40] ss:$8 sps:$4 sm:$0xff]   ;;  %v9972_v49 = vld [vmem:[%s12900_s3 + $0x50] ss:$8 sps:$4 sm:$0xff]  }
 0x546   : > { %v4936_v50 = vmax.f32 %v11940_v57, %v4852_v55  ;;  %v4854_v32 = vpop.f32.mrb[94].mxu1  ;;  %v9975_v55 = vld [vmem:[%s12900_s3 + $0x60] ss:$8 sps:$4 sm:$0xff]  }
 0x547   : > { %v4937_v51 = vmax.f32 %v11942_v59, %v4854_v32  ;;  %v4856_v22 = vpop.f32.mrb[95].mxu1  ;;  %v9978_v32 = vld [vmem:[%s12900_s3 + $0x70] ss:$8 sps:$4 sm:$0xff]  }
 0x548   : > { %v4938_v52 = vmax.f32 %v11944_v62, %v4856_v22  ;;  %v9981_v22 = vld [vmem:[%s12900_s3 + $0x80] ss:$8 sps:$4 sm:$0xff]  }
 0x549   : > { %v4973_v23 = vpack.c.bf16 %v4937_v51, %v4935_v31  ;;  %v9974_v31 = vld [vmem:[%s12900_s3 + $0x54] ss:$8 sps:$4 sm:$0xff]  }
 0x54a   : > { %v4974_v33 = vpack.c.bf16 %v4938_v52, %v4936_v50  ;;  %v9977_v50 = vld [vmem:[%s12900_s3 + $0x64] ss:$8 sps:$4 sm:$0xff]   ;;  %v9980_v51 = vld [vmem:[%s12900_s3 + $0x74] ss:$8 sps:$4 sm:$0xff]  }
 0x54b   : > { %v9983_v52 = vld [vmem:[%s12900_s3 + $0x84] ss:$8 sps:$4 sm:$0xff]  }
 0x54c   : > { %v4860_v53 = vpop.f32.mrb[96].mxu1  ;;  %8865 = vmatprep.mubr.msk.bf16.mxu0 %vm3433_vm4, %v4974_v33  ;;  %v9986_v33 = vld [vmem:[%s12900_s3 + $0x94] ss:$8 sps:$4 sm:$0xff]  }
 0x54d   : > { %v4939_v54 = vmax.f32 %v11946_v63, %v4860_v53  ;;  %v4862_v58 = vpop.f32.mrb[97].mxu1  ;;  %5281 = vmatmul.mubr.bf16.gmra.mrb[148].mxu0 %v4973_v23  ;;  %v9984_v23 = vld [vmem:[%s12900_s3 + $0x90] ss:$8 sps:$4 sm:$0xff]  }
 0x54e   : > { %v4940_v56 = vmax.f32 %v11948_v0, %v4862_v58  ;;  %v4864_v34 = vpop.f32.mrb[98].mxu1 }
 0x54f   : > { %v4941_v57 = vmax.f32 %v11950_v1, %v4864_v34  ;;  %v4866_v24 = vpop.f32.mrb[99].mxu1 }
 0x550   : > { %v4942_v59 = vmax.f32 %v11952_v2, %v4866_v24  ;;  %v9987_v24 = vld [vmem:[%s12900_s3 + $0xa0] ss:$8 sps:$4 sm:$0xff]  }
 0x551   : > { %v4975_v35 = vpack.c.bf16 %v4941_v57, %v4939_v54 }
 0x552   : > { %v4976_v12 = vpack.c.bf16 %v4942_v59, %v4940_v56  ;;  %v9989_v59 = vld [vmem:[%s12900_s3 + $0xa4] ss:$8 sps:$4 sm:$0xff]  }
 0x554   : > { %v4870_v62 = vpop.f32.mrb[100].mxu1  ;;  %8866 = vmatprep.mubr.msk.bf16.mxu0 %vm3433_vm4, %v4976_v12  ;;  %v9990_v12 = vld [vmem:[%s12900_s3 + $0xb0] ss:$8 sps:$4 sm:$0xff]  }
 0x555   : > { %v4943_v36 = vmax.f32 %v11954_v3, %v4870_v62  ;;  %v4872_v25 = vpop.f32.mrb[101].mxu1  ;;  %5291 = vmatmul.mubr.bf16.gmra.mrb[152].mxu0 %v4975_v35  ;;  %v9992_v62 = vld [vmem:[%s12900_s3 + $0xb4] ss:$8 sps:$4 sm:$0xff]  }
 0x556   : > { %v4944_v63 = vmax.f32 %v11956_v4, %v4872_v25  ;;  %v4874_v13 = vpop.f32.mrb[102].mxu1 }
 0x557   : > { %v4945_v0 = vmax.f32 %v11958_v5, %v4874_v13  ;;  %v4876_v37 = vpop.f32.mrb[103].mxu1 }
 0x558   : > { %v4946_v1 = vmax.f32 %v11960_v6, %v4876_v37  ;;  %v9960_v6 = vld [vmem:[%s12900_s3 + $0x10] ss:$8 sps:$4 sm:$0xff]  }
 0x559   : > { %v4977_v26 = vpack.c.bf16 %v4945_v0, %v4943_v36  ;;  %6681 = vmatpush1.bf16.msra.mxu1 %v9960_v6 }
 0x55a   : > { %v4978_v14 = vpack.c.bf16 %v4946_v1, %v4944_v63  ;;  %6682 = vmatprep.subr.bf16.mxu1 %v9965_v47 }
 0x55c   : > { %v4880_v2 = vpop.f32.mrb[104].mxu1  ;;  %8867 = vmatprep.mubr.msk.bf16.mxu0 %vm3433_vm4, %v4978_v14 }
 0x55d   : > { %v4947_v38 = vmax.f32 %v11962_v7, %v4880_v2  ;;  %v4882_v17 = vpop.f32.mrb[105].mxu1  ;;  %5301 = vmatmul.mubr.bf16.gmra.mrb[156].mxu0 %v4977_v26  ;;  %6683 = vmatpush1.bf16.msra.mxu1 %v9963_v9  ;;  %v10001_v9 = vld [vmem:[%s12900_s3 + $0xe4] ss:$8 sps:$4 sm:$0xff]  }
 0x55e   : > { %v4948_v3 = vmax.f32 %v11964_v8, %v4882_v17  ;;  %v4884_v39 = vpop.f32.mrb[106].mxu1  ;;  %v13120_v8 = vld [vmem:[#allocation10_spill] sm:$0xff]  ;;  %6684 = vmatprep.subr.bf16.mxu1 %v9968_v48 }
 0x55f   : > { %v4949_v4 = vmax.f32 %v13118_v27, %v4884_v39  ;;  %v4886_v40 = vpop.f32.mrb[107].mxu1  ;;  %v9993_v27 = vld [vmem:[%s12900_s3 + $0xc0] ss:$8 sps:$4 sm:$0xff]  }
 0x560   : > { %v4950_v5 = vmax.f32 %v13119_v16, %v4886_v40  ;;  %v9998_v16 = vld [vmem:[%s12900_s3 + $0xd4] ss:$8 sps:$4 sm:$0xff]  }
 0x561   : > { %v4979_v41 = vpack.c.bf16 %v4949_v4, %v4947_v38  ;;  %6685 = vmatpush1.bf16.msra.mxu1 %v9966_v20  ;;  %v9995_v4 = vld [vmem:[%s12900_s3 + $0xc4] ss:$8 sps:$4 sm:$0xff]  }
 0x562   : > { %v4980_v7 = vpack.c.bf16 %v4950_v5, %v4948_v3  ;;  %6686 = vmatprep.subr.bf16.mxu1 %v9971_v21 }
 0x564   : > { %v4890_v60 = vpop.f32.mrb[108].mxu1  ;;  %8868 = vmatprep.mubr.msk.bf16.mxu0 %vm3433_vm4, %v4980_v7 }
 0x565   : > { %v4951_v18 = vmax.f32 %v13120_v8, %v4890_v60  ;;  %v4892_v42 = vpop.f32.mrb[109].mxu1  ;;  %5311 = vmatmul.mubr.bf16.gmra.mrb[160].mxu0 %v4979_v41  ;;  %6687 = vmatpush1.bf16.msra.mxu1 %v9969_v30 }
 0x566   : > { %v4952_v43 = vmax.f32 %v13121_v61, %v4892_v42  ;;  %v4894_v10 = vpop.f32.mrb[110].mxu1  ;;  %6688 = vmatprep.subr.bf16.mxu1 %v9974_v31  ;;  %v10004_v31 = vld [vmem:[%s12900_s3 + $0xf4] ss:$8 sps:$4 sm:$0xff]  }
 0x567   : > { %v4953_v28 = vmax.f32 %v13122_v44, %v4894_v10  ;;  %v4896_v11 = vpop.f32.mrb[111].mxu1 }
 0x568   : > { %v4954_v19 = vmax.f32 %v13123_v45, %v4896_v11 }
 0x569   : > { %v4981_v29 = vpack.c.bf16 %v4953_v28, %v4951_v18  ;;  %6689 = vmatpush1.bf16.msra.mxu1 %v9972_v49  ;;  %v9996_v18 = vld [vmem:[%s12900_s3 + $0xd0] ss:$8 sps:$4 sm:$0xff]  }
 0x56a   : > { %v4982_v46 = vpack.c.bf16 %v4954_v19, %v4952_v43  ;;  %6690 = vmatprep.subr.bf16.mxu1 %v9977_v50 }
 0x56c   : > { %8869 = vmatprep.mubr.msk.bf16.mxu0 %vm3433_vm4, %v4982_v46  ;;  %v9999_v46 = vld [vmem:[%s12900_s3 + $0xe0] ss:$8 sps:$4 sm:$0xff]   ;;  %vm5400_vm4 = vcmask 1045152  }
 0x56d   : > { %5321 = vmatmul.mubr.bf16.gmra.mrb[164].mxu0 %v4981_v29  ;;  %6691 = vmatpush1.bf16.msra.mxu1 %v9975_v55 }
 0x56e   : > { %6692 = vmatprep.subr.bf16.mxu1 %v9980_v51 }
 0x571   : > { %6693 = vmatpush1.bf16.msra.mxu1 %v9978_v32  ;;  %v10002_v32 = vld [vmem:[%s12900_s3 + $0xf0] ss:$8 sps:$4 sm:$0xff]  }
 0x572   : > { %6694 = vmatprep.subr.bf16.mxu1 %v9983_v52 }
 0x575   : > { %6695 = vmatpush1.bf16.msra.mxu1 %v9981_v22 }
 0x576   : > { %6696 = vmatprep.subr.bf16.mxu1 %v9986_v33 }
 0x579   : > { %6697 = vmatpush1.bf16.msra.mxu1 %v9984_v23 }
 0x57a   : > { %6698 = vmatprep.subr.bf16.mxu1 %v9989_v59 }
 0x57d   : > { %6699 = vmatpush1.bf16.msra.mxu1 %v9987_v24 }
 0x57e   : > { %6700 = vmatprep.subr.bf16.mxu1 %v9992_v62 }
 0x581   : > { %6701 = vmatpush1.bf16.msra.mxu1 %v9990_v12 }
 0x582   : > { %6702 = vmatprep.subr.bf16.mxu1 %v9995_v4 }
 0x585   : > { %6703 = vmatpush1.bf16.msra.mxu1 %v9993_v27 }
 0x586   : > { %6704 = vmatprep.subr.bf16.mxu1 %v9998_v16 }
 0x589   : > { %6705 = vmatpush1.bf16.msra.mxu1 %v9996_v18 }
 0x58a   : > { %6706 = vmatprep.subr.bf16.mxu1 %v10001_v9 }
 0x58d   : > { %6707 = vmatpush1.bf16.msra.mxu1 %v9999_v46 }
 0x58e   : > { %6708 = vmatprep.subr.bf16.mxu1 %v10004_v31 }
 0x591   : > { %6709 = vmatpush1.bf16.msra.mxu1 %v10002_v32 }
 0x5d8   : > { %v5192_v53 = vpop.f32.mrb[112].mxu0 }
 0x5d9   : > { %v5194_v54 = vpop.f32.mrb[113].mxu0 }
 0x5da   : > { %v5331_v58 = vmax.f32 %v5192_v53, %v5194_v54  ;;  %v5196_v56 = vpop.f32.mrb[114].mxu0 }
 0x5db   : > { %v5198_v34 = vpop.f32.mrb[115].mxu0 }
 0x5dc   : > { %5360 = vst.msk [vmem:[#allocation4] sm:$0xff] %vm12945_vm13, %v5331_v58  ;;  %v5332_v57 = vmax.f32 %v5196_v56, %v5198_v34 }
 0x5de   : > { %5361 = vst.msk [vmem:[#allocation4 + $0x8] sm:$0xff] %vm12945_vm13, %v5332_v57 }
 0x5e0   : > { %v5202_v35 = vpop.f32.mrb[116].mxu0 }
 0x5e1   : > { %v5204_v36 = vpop.f32.mrb[117].mxu0 }
 0x5e2   : > { %v5333_v25 = vmax.f32 %v5202_v35, %v5204_v36  ;;  %v5206_v63 = vpop.f32.mrb[118].mxu0 }
 0x5e3   : > { %v5208_v13 = vpop.f32.mrb[119].mxu0  ;;  %v5388_v14 = vld [vmem:[#allocation4] sm:$0xff] }
 0x5e4   : > { %5362 = vst.msk [vmem:[#allocation4 + $0x10] sm:$0xff] %vm12945_vm13, %v5333_v25  ;;  %v5334_v0 = vmax.f32 %v5206_v63, %v5208_v13 }
 0x5e5   : > { %v5393_v37 = vld [vmem:[#allocation4 + $0x1] sm:$0xff]  ;;  %v5394_v1 = vld [vmem:[#allocation4 + $0x9] sm:$0x3]  ;;  %v5414_v60 = vld [vmem:[#allocation4 + $0xb] sm:$0x3] }
 0x5e6   : > { %5363 = vst.msk [vmem:[#allocation4 + $0x18] sm:$0xff] %vm12945_vm13, %v5334_v0  ;;  %v5395_v26 = vpack.c.bf16 %v5394_v1, %v5393_v37  ;;  %v5404_v2 = vld [vmem:[#allocation4 + $0x2] sm:$0xff]  ;;  %v5405_v38 = vld [vmem:[#allocation4 + $0xa] sm:$0x3] }
 0x5e7   : > { %v5389_v17 = vld [vmem:[#allocation4 + $0x8] sm:$0x3]  ;;  %v5406_v15 = vpack.c.bf16 %v5405_v38, %v5404_v2 }
 0x5e8   : > { %5397 = vrot.lane.b32.xlu0 %v5395_v26, %s10146_s21  ;;  %v5212_v3 = vpop.f32.mrb[120].mxu0  ;;  %v5390_v39 = vpack.c.bf16 %v5389_v17, %v5388_v14  ;;  %v5413_v41 = vld [vmem:[#allocation4 + $0x3] sm:$0xff] }
 0x5e9   : > { %v5214_v40 = vpop.f32.mrb[121].mxu0  ;;  %v5415_v11 = vpack.c.bf16 %v5414_v60, %v5413_v41 }
 0x5ea   : > { %v5335_v5 = vmax.f32 %v5212_v3, %v5214_v40  ;;  %v5216_v6 = vpop.f32.mrb[122].mxu0  ;;  %5392 = vst.msk [vmem:[#allocation5] sm:$0x1f] %vm5391_vm14, %v5390_v39 }
 0x5eb   : > { %v5218_v7 = vpop.f32.mrb[123].mxu0  ;;  %v5435_v8 = vld [vmem:[#allocation4 + $0xe] sm:$0xff]  ;;  %v5436_v61 = vld [vmem:[#allocation4 + $0x16] sm:$0x3] }
 0x5ec   : > { %5364 = vst.msk [vmem:[#allocation4 + $0x20] sm:$0xff] %vm12945_vm13, %v5335_v5  ;;  %v5336_v42 = vmax.f32 %v5216_v6, %v5218_v7  ;;  %5408 = vrot.lane.b32.xlu0 %v5406_v15, %s10147_s22  ;;  %v5445_v43 = vld [vmem:[#allocation4 + $0xf] sm:$0xff]  ;;  %v5437_v28 = vpack.c.bf16 %v5436_v61, %v5435_v8 }
 0x5ed   : > { %v5446_v10 = vld [vmem:[#allocation4 + $0x17] sm:$0x3]  ;;  %v5474_v49 = vld [vmem:[#allocation4 + $0x19] sm:$0x3] }
 0x5ee   : > { %v5462_v44 = vld [vmem:[#allocation4 + $0x18] sm:$0x3]  ;;  %5365 = vst.msk [vmem:[#allocation4 + $0x28] sm:$0xff] %vm12945_vm13, %v5336_v42  ;;  %v5447_v45 = vpack.c.bf16 %v5446_v10, %v5445_v43  ;;  %v5461_v19 = vld [vmem:[#allocation4 + $0x10] sm:$0xff]  ;;  %v5439_v29 = vrot.slane %v5437_v28, 3 }
 0x5ef   : > { %v5463_v48 = vpack.c.bf16 %v5462_v44, %v5461_v19  ;;  %v5473_v21 = vld [vmem:[#allocation4 + $0x11] sm:$0xff] }
 0x5f0   : > { %5417 = vrot.lane.b32.xlu0 %v5415_v11, %s10148_s24  ;;  %v5222_v47 = vpop.f32.mrb[124].mxu0  ;;  %v5449_v20 = vrot.slane %v5447_v45, 3  ;;  %5442 = vst.msk [vmem:[#allocation5] sm:$0xe0] %vm5441_vm8, %v5439_v29  ;;  %v5475_v58 = vpack.c.bf16 %v5474_v49, %v5473_v21 }
 0x5f1   : > { %v5224_v30 = vpop.f32.mrb[125].mxu0  ;;  %5444 = vst.msk [vmem:[#allocation5 + $0x20] sm:$0x3] %vm5443_vm3, %v5439_v29  ;;  %v5465_v53 = vrot.slane %v5463_v48, 3 }
 0x5f2   : > { %v5337_v55 = vmax.f32 %v5222_v47, %v5224_v30  ;;  %5450 = vrot.lane.b32.xlu1 %v5449_v20, %s10146_s21  ;;  %v5226_v50 = vpop.f32.mrb[126].mxu0  ;;  %v5477_v36 = vrot.slane %v5475_v58, 3 }
 0x5f3   : > { %v5228_v51 = vpop.f32.mrb[127].mxu0  ;;  %v5513_v22 = vld [vmem:[#allocation4 + $0x1d] sm:$0xff]  ;;  %v5514_v52 = vld [vmem:[#allocation4 + $0x25] sm:$0x3] }
 0x5f4   : > { %v5525_v23 = vld [vmem:[#allocation4 + $0x1e] sm:$0xff]  ;;  %5366 = vst.msk [vmem:[#allocation4 + $0x30] sm:$0xff] %vm12945_vm13, %v5337_v55  ;;  %v5338_v33 = vmax.f32 %v5226_v50, %v5228_v51  ;;  %v5515_v54 = vpack.c.bf16 %v5514_v52, %v5513_v22  ;;  %v5526_v56 = vld [vmem:[#allocation4 + $0x26] sm:$0x3] }
 0x5f5   : > { %v5505_v34 = vld [vmem:[#allocation4 + $0x1c] sm:$0xff]  ;;  %v5527_v24 = vpack.c.bf16 %v5526_v56, %v5525_v23  ;;  %v5506_v59 = vld [vmem:[#allocation4 + $0x24] sm:$0x3]  ;;  %v5536_v35 = vld [vmem:[#allocation4 + $0x27] sm:$0x3] }
 0x5f6   : > { %5367 = vst.msk [vmem:[#allocation4 + $0x38] sm:$0xff] %vm12945_vm13, %v5338_v33  ;;  %5466 = vrot.lane.b32.xlu1 %v5465_v53, %s10147_s22  ;;  %v5517_v57 = vrot.slane %v5515_v54, 6  ;;  %v5507_v12 = vpack.c.bf16 %v5506_v59, %v5505_v34  ;;  %v5535_v63 = vld [vmem:[#allocation4 + $0x1f] sm:$0xff] }
 0x5f7   : > { %v5529_v1 = vrot.slane %v5527_v24, 6  ;;  %v5537_v26 = vpack.c.bf16 %v5536_v35, %v5535_v63 }
 0x5f8   : > { %5518 = vrot.lane.b32.xlu0 %v5517_v57, %s10146_s21  ;;  %v5232_v62 = vpop.f32.mrb[128].mxu0  ;;  %v5509_v13 = vrot.slane %v5507_v12, 6 }
 0x5f9   : > { %v5234_v25 = vpop.f32.mrb[129].mxu0  ;;  %v5539_v40 = vrot.slane %v5537_v26, 6 }
 0x5fa   : > { %v5339_v0 = vmax.f32 %v5232_v62, %v5234_v25  ;;  %5478 = vrot.lane.b32.xlu1 %v5477_v36, %s10148_s24  ;;  %v5236_v37 = vpop.f32.mrb[130].mxu0  ;;  %5512 = vst.msk [vmem:[#allocation5 + $0x20] sm:$0x7c] %vm5511_vm11, %v5509_v13 }
 0x5fb   : > { %v5238_v14 = vpop.f32.mrb[131].mxu0  ;;  %v5569_v2 = vld [vmem:[#allocation4 + $0x2b] sm:$0xff]  ;;  %v5570_v38 = vld [vmem:[#allocation4 + $0x33] sm:$0x3]  ;;  %v5598_v41 = vld [vmem:[#allocation4 + $0x35] sm:$0x3] }
 0x5fc   : > { %v5585_v17 = vld [vmem:[#allocation4 + $0x2c] sm:$0xff]  ;;  %5368 = vst.msk [vmem:[#allocation4 + $0x40] sm:$0xff] %vm12945_vm13, %v5339_v0  ;;  %v5340_v3 = vmax.f32 %v5236_v37, %v5238_v14  ;;  %5530 = vrot.lane.b32.xlu0 %v5529_v1, %s10147_s22  ;;  %v5571_v39 = vpack.c.bf16 %v5570_v38, %v5569_v2  ;;  %v5586_v27 = vld [vmem:[#allocation4 + $0x34] sm:$0x3] }
 0x5fd   : > { %v5559_v4 = vld [vmem:[#allocation4 + $0x2a] sm:$0xff]  ;;  %v5587_v5 = vpack.c.bf16 %v5586_v27, %v5585_v17  ;;  %v5560_v6 = vld [vmem:[#allocation4 + $0x32] sm:$0x3]  ;;  %v5629_v49 = vld [vmem:[#allocation4 + $0x38] sm:$0xff] }
 0x5fe   : > { %5369 = vst.msk [vmem:[#allocation4 + $0x48] sm:$0xff] %vm12945_vm13, %v5340_v3  ;;  %v5573_v16 = vrot.slane %v5571_v39, 1  ;;  %v5597_v15 = vld [vmem:[#allocation4 + $0x2d] sm:$0xff]  ;;  %v5561_v7 = vpack.c.bf16 %v5560_v6, %v5559_v4 }
 0x5ff   : > { %v5589_v43 = vrot.slane %v5587_v5, 1  ;;  %v5599_v10 = vpack.c.bf16 %v5598_v41, %v5597_v15 }
 0x600   : > { %5540 = vrot.lane.b32.xlu0 %v5539_v40, %s10148_s24  ;;  %5574 = vrot.lane.b32.xlu1 %v5573_v16, %s10146_s21  ;;  %v5242_v60 = vpop.f32.mrb[132].mxu0  ;;  %v5563_v18 = vrot.slane %v5561_v7, 1 }
 0x601   : > { %v5244_v8 = vpop.f32.mrb[133].mxu0  ;;  %v5601_v20 = vrot.slane %v5599_v10, 1 }
 0x602   : > { %v5341_v42 = vmax.f32 %v5242_v60, %v5244_v8  ;;  %v5246_v61 = vpop.f32.mrb[134].mxu0  ;;  %5566 = vst.msk [vmem:[#allocation5 + $0x20] sm:$0x80] %vm5565_vm7, %v5563_v18 }
 0x603   : > { %v5248_v44 = vpop.f32.mrb[135].mxu0  ;;  %v5639_v28 = vld [vmem:[#allocation4 + $0x39] sm:$0xff]  ;;  %v5640_v11 = vld [vmem:[#allocation4 + $0x41] sm:$0x3]  ;;  %5568 = vst.msk [vmem:[#allocation5 + $0x40] sm:$0xf] %vm5567_vm9, %v5563_v18 }
 0x604   : > { %v5655_v45 = vld [vmem:[#allocation4 + $0x3a] sm:$0xff]  ;;  %5370 = vst.msk [vmem:[#allocation4 + $0x50] sm:$0xff] %vm12945_vm13, %v5341_v42  ;;  %v5342_v19 = vmax.f32 %v5246_v61, %v5248_v44  ;;  %5590 = vrot.lane.b32.xlu1 %v5589_v43, %s10147_s22  ;;  %v5641_v29 = vpack.c.bf16 %v5640_v11, %v5639_v28  ;;  %v5656_v46 = vld [vmem:[#allocation4 + $0x42] sm:$0x3] }
 0x605   : > { %v5667_v9 = vld [vmem:[#allocation4 + $0x3b] sm:$0xff]  ;;  %v5668_v47 = vld [vmem:[#allocation4 + $0x43] sm:$0x3]  ;;  %v5657_v30 = vpack.c.bf16 %v5656_v46, %v5655_v45  ;;  %v5699_v55 = vld [vmem:[#allocation4 + $0x46] sm:$0xff] }
 0x606   : > { %5371 = vst.msk [vmem:[#allocation4 + $0x58] sm:$0xff] %vm12945_vm13, %v5342_v19  ;;  %v5643_v48 = vrot.slane %v5641_v29, 4  ;;  %v5669_v21 = vpack.c.bf16 %v5668_v47, %v5667_v9  ;;  %v5630_v31 = vld [vmem:[#allocation4 + $0x40] sm:$0x3]  ;;  %v5700_v32 = vld [vmem:[#allocation4 + $0x4e] sm:$0x3] }
 0x607   : > { %v5631_v50 = vpack.c.bf16 %v5630_v31, %v5629_v49  ;;  %v5701_v22 = vpack.c.bf16 %v5700_v32, %v5699_v55  ;;  %v5659_v54 = vrot.slane %v5657_v30, 4  ;;  %v5707_v57 = vld [vmem:[#allocation4 + $0x47] sm:$0xff] }
 0x608   : > { %5602 = vrot.lane.b32.xlu1 %v5601_v20, %s10148_s24  ;;  %5644 = vrot.lane.b32.xlu0 %v5643_v48, %s10146_s21  ;;  %v5252_v51 = vpop.f32.mrb[136].mxu0  ;;  %v5671_v58 = vrot.slane %v5669_v21, 4  ;;  %v5719_v62 = vld [vmem:[#allocation4 + $0x48] sm:$0xff] }
 0x609   : > { %v5254_v52 = vpop.f32.mrb[137].mxu0  ;;  %v5633_v23 = vrot.slane %v5631_v50, 4  ;;  %v5703_v56 = vrot.slane %v5701_v22, 7 }
 0x60a   : > { %v5343_v33 = vmax.f32 %v5252_v51, %v5254_v52  ;;  %v5256_v53 = vpop.f32.mrb[138].mxu0 }
 0x60b   : > { %v5258_v34 = vpop.f32.mrb[139].mxu0  ;;  %v5708_v24 = vld [vmem:[#allocation4 + $0x4f] sm:$0x3]  ;;  %5636 = vst.msk [vmem:[#allocation5 + $0x40] sm:$0xf0] %vm5635_vm15, %v5633_v23 }
 0x60c   : > { %v5720_v59 = vld [vmem:[#allocation4 + $0x50] sm:$0x3]  ;;  %5638 = vst.msk [vmem:[#allocation5 + $0x60] sm:$0x1] %vm5637_vm6, %v5633_v23  ;;  %v5344_v35 = vmax.f32 %v5256_v53, %v5258_v34  ;;  %5660 = vrot.lane.b32.xlu1 %v5659_v54, %s10147_s22  ;;  %5672 = vrot.lane.b32.xlu0 %v5671_v58, %s10148_s24  ;;  %v5709_v12 = vpack.c.bf16 %v5708_v24, %v5707_v57 }
 0x60d   : > { %5372 = vst.msk [vmem:[#allocation4 + $0x60] sm:$0xff] %vm12945_vm13, %v5343_v33  ;;  %v5763_v36 = vld [vmem:[#allocation4 + $0x55] sm:$0xff]  ;;  %v5764_v25 = vld [vmem:[#allocation4 + $0x5d] sm:$0x3]  ;;  %v5721_v37 = vpack.c.bf16 %v5720_v59, %v5719_v62  ;;  %v5729_v26 = vld [vmem:[#allocation4 + $0x49] sm:$0xff] }
 0x60e   : > { %5706 = vst.msk [vmem:[#allocation5 + $0x60] sm:$0x3e] %vm5705_vm0, %v5703_v56  ;;  %v5779_v63 = vld [vmem:[#allocation4 + $0x56] sm:$0xff]  ;;  %v5711_v13 = vrot.slane %v5709_v12, 7  ;;  %v5765_v0 = vpack.c.bf16 %v5764_v25, %v5763_v36  ;;  %v5780_v1 = vld [vmem:[#allocation4 + $0x5e] sm:$0x3] }
 0x60f   : > { %5373 = vst.msk [vmem:[#allocation4 + $0x68] sm:$0xff] %vm12945_vm13, %v5344_v35  ;;  %v5730_v14 = vld [vmem:[#allocation4 + $0x51] sm:$0x3]  ;;  %v5753_v2 = vld [vmem:[#allocation4 + $0x54] sm:$0xff]  ;;  %v5754_v38 = vld [vmem:[#allocation4 + $0x5c] sm:$0x3]  ;;  %v5781_v39 = vpack.c.bf16 %v5780_v1, %v5779_v63 }
 0x610   : > { %5712 = vrot.lane.b32.xlu1 %v5711_v13, %s10146_s21  ;;  %v5262_v17 = vpop.f32.mrb[140].mxu0  ;;  %v5767_v3 = vrot.slane %v5765_v0, 2  ;;  %v5755_v27 = vpack.c.bf16 %v5754_v38, %v5753_v2  ;;  %v5723_v5 = vrot.slane %v5721_v37, 7  ;;  %v5731_v6 = vpack.c.bf16 %v5730_v14, %v5729_v26  ;;  %v5791_v7 = vld [vmem:[#allocation4 + $0x57] sm:$0xff] }
 0x611   : > { %v5264_v4 = vpop.f32.mrb[141].mxu0  ;;  %v5783_v18 = vrot.slane %v5781_v39, 2 }
 0x612   : > { %v5345_v40 = vmax.f32 %v5262_v17, %v5264_v4  ;;  %5768 = vrot.lane.b32.xlu0 %v5767_v3, %s10146_s21  ;;  %v5266_v16 = vpop.f32.mrb[142].mxu0  ;;  %v5757_v15 = vrot.slane %v5755_v27, 2  ;;  %v5733_v44 = vrot.slane %v5731_v6, 7 }
 0x613   : > { %v5268_v41 = vpop.f32.mrb[143].mxu0 }
 0x614   : > { %v5792_v60 = vld [vmem:[#allocation4 + $0x5f] sm:$0x3]  ;;  %5374 = vst.msk [vmem:[#allocation4 + $0x70] sm:$0xff] %vm12945_vm13, %v5345_v40  ;;  %v5346_v8 = vmax.f32 %v5266_v16, %v5268_v41  ;;  %5724 = vrot.lane.b32.xlu1 %v5723_v5, %s10147_s22 }
 0x615   : > { %v5793_v42 = vpack.c.bf16 %v5792_v60, %v5791_v7  ;;  %5760 = vst.msk [vmem:[#allocation5 + $0x60] sm:$0xc0] %vm5759_vm2, %v5757_v15 }
 0x616   : > { %5762 = vst.msk [vmem:[#allocation5 + $0x80] sm:$0x7] %vm5761_vm12, %v5757_v15  ;;  %v5831_v61 = vld [vmem:[#allocation4 + $0x63] sm:$0xff]  ;;  %v5832_v43 = vld [vmem:[#allocation4 + $0x6b] sm:$0x3]  ;;  %5784 = vrot.lane.b32.xlu0 %v5783_v18, %s10147_s22 }
 0x617   : > { %v5843_v10 = vld [vmem:[#allocation4 + $0x64] sm:$0xff]  ;;  %5375 = vst.msk [vmem:[#allocation4 + $0x78] sm:$0xff] %vm12945_vm13, %v5346_v8  ;;  %v5833_v28 = vpack.c.bf16 %v5832_v43, %v5831_v61  ;;  %v5844_v11 = vld [vmem:[#allocation4 + $0x6c] sm:$0x3]  ;;  %v5795_v9 = vrot.slane %v5793_v42, 2 }
 0x618   : > { %v5853_v45 = vld [vmem:[#allocation4 + $0x65] sm:$0xff]  ;;  %v5854_v19 = vld [vmem:[#allocation4 + $0x6d] sm:$0x3]  ;;  %5734 = vrot.lane.b32.xlu1 %v5733_v44, %s10148_s24  ;;  %v5272_v46 = vpop.f32.mrb[144].mxu0  ;;  %v5845_v47 = vpack.c.bf16 %v5844_v11, %v5843_v10 }
 0x619   : > { %v5823_v29 = vld [vmem:[#allocation4 + $0x62] sm:$0xff]  ;;  %v5824_v20 = vld [vmem:[#allocation4 + $0x6a] sm:$0x3]  ;;  %v5274_v48 = vpop.f32.mrb[145].mxu0  ;;  %v5835_v31 = vrot.slane %v5833_v28, 5  ;;  %v5855_v55 = vpack.c.bf16 %v5854_v19, %v5853_v45 }
 0x61a   : > { %v5825_v30 = vpack.c.bf16 %v5824_v20, %v5823_v29  ;;  %v5347_v21 = vmax.f32 %v5272_v46, %v5274_v48  ;;  %5796 = vrot.lane.b32.xlu0 %v5795_v9, %s10148_s24  ;;  %v5276_v49 = vpop.f32.mrb[146].mxu0  ;;  %v5847_v22 = vrot.slane %v5845_v47, 5  ;;  %v10007_v9 = vld [vmem:[%s12900_s3 + $0x104] ss:$8 sps:$4 sm:$0xff]  }
 0x61b   : > { %v5278_v50 = vpop.f32.mrb[147].mxu0  ;;  %v5857_v33 = vrot.slane %v5855_v55, 5  ;;  %v5877_v53 = vld [vmem:[#allocation4 + $0x70] sm:$0xff]  ;;  %6811 = vmatprep.subr.bf16.mxu1 %v10007_v9 }
 0x61c   : > { %v5827_v32 = vrot.slane %v5825_v30, 5  ;;  %5376 = vst.msk [vmem:[#allocation4 + $0x80] sm:$0xff] %vm12945_vm13, %v5347_v21  ;;  %v5348_v51 = vmax.f32 %v5276_v49, %v5278_v50  ;;  %5836 = vrot.lane.b32.xlu1 %v5835_v31, %s10146_s21 }
 0x61e   : > { %v5881_v52 = vld [vmem:[#allocation4 + $0x71] sm:$0xff]  ;;  %v5882_v23 = vld [vmem:[#allocation4 + $0x79] sm:$0x3]  ;;  %5830 = vst.msk [vmem:[#allocation5 + $0x80] sm:$0xf8] %vm5829_vm10, %v5827_v32  ;;  %5848 = vrot.lane.b32.xlu0 %v5847_v22, %s10147_s22 }
 0x61f   : > { %5377 = vst.msk [vmem:[#allocation4 + $0x88] sm:$0xff] %vm12945_vm13, %v5348_v51  ;;  %v5878_v54 = vld [vmem:[#allocation4 + $0x78] sm:$0x3]  ;;  %v5883_v56 = vpack.c.bf16 %v5882_v23, %v5881_v52  ;;  %v5891_v59 = vld [vmem:[#allocation4 + $0x7a] sm:$0x3] }
 0x620   : > { %5858 = vrot.lane.b32.xlu1 %v5857_v33, %s10148_s24  ;;  %v5282_v58 = vpop.f32.mrb[148].mxu0  ;;  %v5879_v34 = vpack.c.bf16 %v5878_v54, %v5877_v53  ;;  %v5890_v24 = vld [vmem:[#allocation4 + $0x72] sm:$0xff]  ;;  %v5899_v0 = vld [vmem:[#allocation4 + $0x7b] sm:$0x3] }
 0x621   : > { %v5284_v57 = vpop.f32.mrb[149].mxu0  ;;  %v5892_v63 = vpack.c.bf16 %v5891_v59, %v5890_v24  ;;  %v5898_v13 = vld [vmem:[#allocation4 + $0x73] sm:$0xff] }
 0x622   : > { %v5349_v35 = vmax.f32 %v5282_v58, %v5284_v57  ;;  %5885 = vrot.lane.b32.xlu0 %v5883_v56, %s10146_s21  ;;  %v5286_v12 = vpop.f32.mrb[150].mxu0  ;;  %5880 = vst.msk [vmem:[#allocation5 + $0xa0] sm:$0x1f] %vm5391_vm14, %v5879_v34  ;;  %v5900_v27 = vpack.c.bf16 %v5899_v0, %v5898_v13  ;;  %vm5402_vm14 = vcmask 323584  }
 0x623   : > { %v5288_v62 = vpop.f32.mrb[151].mxu0  ;;  %v5916_v36 = vld [vmem:[#allocation4 + $0x7e] sm:$0xff]  ;;  %v5917_v37 = vld [vmem:[#allocation4 + $0x86] sm:$0x3] }
 0x624   : > { %5378 = vst.msk [vmem:[#allocation4 + $0x90] sm:$0xff] %vm12945_vm13, %v5349_v35  ;;  %v5350_v25 = vmax.f32 %v5286_v12, %v5288_v62  ;;  %v5924_v1 = vld [vmem:[#allocation4 + $0x7f] sm:$0xff]  ;;  %v5918_v2 = vpack.c.bf16 %v5917_v37, %v5916_v36 }
 0x625   : > { %v5936_v17 = vld [vmem:[#allocation4 + $0x80] sm:$0xff] }
 0x626   : > { %v5925_v26 = vld [vmem:[#allocation4 + $0x87] sm:$0x3]  ;;  %5379 = vst.msk [vmem:[#allocation4 + $0x98] sm:$0xff] %vm12945_vm13, %v5350_v25  ;;  %5894 = vrot.lane.b32.xlu0 %v5892_v63, %s10147_s22  ;;  %v5920_v3 = vrot.slane %v5918_v2, 3  ;;  %v5947_v6 = vld [vmem:[#allocation4 + $0x89] sm:$0x3] }
 0x627   : > { %v5937_v14 = vld [vmem:[#allocation4 + $0x88] sm:$0x3]  ;;  %v5926_v38 = vpack.c.bf16 %v5925_v26, %v5924_v1 }
 0x628   : > { %v5292_v39 = vpop.f32.mrb[152].mxu0  ;;  %v5938_v40 = vpack.c.bf16 %v5937_v14, %v5936_v17  ;;  %v5946_v5 = vld [vmem:[#allocation4 + $0x81] sm:$0xff]  ;;  %5922 = vst.msk [vmem:[#allocation5 + $0xa0] sm:$0xe0] %vm5441_vm8, %v5920_v3  ;;  %vm5411_vm8 = vcmask 1012032  }
 0x629   : > { %v5928_v4 = vrot.slane %v5926_v38, 3  ;;  %v5294_v16 = vpop.f32.mrb[153].mxu0  ;;  %5923 = vst.msk [vmem:[#allocation5 + $0xc0] sm:$0x3] %vm5443_vm3, %v5920_v3  ;;  %v5948_v10 = vpack.c.bf16 %v5947_v6, %v5946_v5  ;;  %vm5420_vm3 = vcmask 1045472  }
 0x62a   : > { %v5351_v15 = vmax.f32 %v5292_v39, %v5294_v16  ;;  %5902 = vrot.lane.b32.xlu0 %v5900_v27, %s10148_s24  ;;  %v5296_v41 = vpop.f32.mrb[154].mxu0  ;;  %v5940_v61 = vrot.slane %v5938_v40, 3 }
 0x62b   : > { %5929 = vrot.lane.b32.xlu1 %v5928_v4, %s10146_s21  ;;  %v5298_v7 = vpop.f32.mrb[155].mxu0  ;;  %v5977_v60 = vld [vmem:[#allocation4 + $0x8d] sm:$0xff]  ;;  %v5978_v8 = vld [vmem:[#allocation4 + $0x95] sm:$0x3]  ;;  %v5950_v20 = vrot.slane %v5948_v10, 3 }
 0x62c   : > { %v5987_v18 = vld [vmem:[#allocation4 + $0x8e] sm:$0xff]  ;;  %5380 = vst.msk [vmem:[#allocation4 + $0xa0] sm:$0xff] %vm12945_vm13, %v5351_v15  ;;  %v5352_v42 = vmax.f32 %v5296_v41, %v5298_v7  ;;  %v5979_v43 = vpack.c.bf16 %v5978_v8, %v5977_v60  ;;  %v5988_v44 = vld [vmem:[#allocation4 + $0x96] sm:$0x3] }
 0x62d   : > { %v5970_v28 = vld [vmem:[#allocation4 + $0x8c] sm:$0xff]  ;;  %v5989_v45 = vpack.c.bf16 %v5988_v44, %v5987_v18  ;;  %v5971_v19 = vld [vmem:[#allocation4 + $0x94] sm:$0x3]  ;;  %v5997_v29 = vld [vmem:[#allocation4 + $0x97] sm:$0x3] }
 0x62e   : > { %5381 = vst.msk [vmem:[#allocation4 + $0xa8] sm:$0xff] %vm12945_vm13, %v5352_v42  ;;  %v5981_v11 = vrot.slane %v5979_v43, 6  ;;  %v5972_v46 = vpack.c.bf16 %v5971_v19, %v5970_v28  ;;  %v5996_v30 = vld [vmem:[#allocation4 + $0x8f] sm:$0xff] }
 0x62f   : > { %5941 = vrot.lane.b32.xlu1 %v5940_v61, %s10147_s22  ;;  %v5991_v55 = vrot.slane %v5989_v45, 6  ;;  %v5998_v50 = vpack.c.bf16 %v5997_v29, %v5996_v30 }
 0x630   : > { %5982 = vrot.lane.b32.xlu0 %v5981_v11, %s10146_s21  ;;  %v5302_v47 = vpop.f32.mrb[156].mxu0  ;;  %v5974_v21 = vrot.slane %v5972_v46, 6 }
 0x631   : > { %v5304_v48 = vpop.f32.mrb[157].mxu0  ;;  %v6000_v58 = vrot.slane %v5998_v50, 6 }
 0x632   : > { %v5353_v49 = vmax.f32 %v5302_v47, %v5304_v48  ;;  %v5306_v31 = vpop.f32.mrb[158].mxu0  ;;  %5976 = vst.msk [vmem:[#allocation5 + $0xc0] sm:$0x7c] %vm5511_vm11, %v5974_v21  ;;  %vm5422_vm11 = vcmask 651264  }
 0x633   : > { %5951 = vrot.lane.b32.xlu1 %v5950_v20, %s10148_s24  ;;  %v5308_v32 = vpop.f32.mrb[159].mxu0  ;;  %v6024_v51 = vld [vmem:[#allocation4 + $0x9b] sm:$0xff]  ;;  %v6025_v22 = vld [vmem:[#allocation4 + $0xa3] sm:$0x3]  ;;  %v6047_v59 = vld [vmem:[#allocation4 + $0xa5] sm:$0x3] }
 0x634   : > { %v6036_v52 = vld [vmem:[#allocation4 + $0x9c] sm:$0xff]  ;;  %5382 = vst.msk [vmem:[#allocation4 + $0xb0] sm:$0xff] %vm12945_vm13, %v5353_v49  ;;  %v5354_v23 = vmax.f32 %v5306_v31, %v5308_v32  ;;  %5992 = vrot.lane.b32.xlu0 %v5991_v55, %s10147_s22  ;;  %v6026_v33 = vpack.c.bf16 %v6025_v22, %v6024_v51  ;;  %v6037_v53 = vld [vmem:[#allocation4 + $0xa4] sm:$0x3] }
 0x635   : > { %v6016_v54 = vld [vmem:[#allocation4 + $0x9a] sm:$0xff]  ;;  %v6038_v34 = vpack.c.bf16 %v6037_v53, %v6036_v52  ;;  %v6017_v57 = vld [vmem:[#allocation4 + $0xa2] sm:$0x3]  ;;  %v6070_v5 = vld [vmem:[#allocation4 + $0xa8] sm:$0xff] }
 0x636   : > { %5383 = vst.msk [vmem:[#allocation4 + $0xb8] sm:$0xff] %vm12945_vm13, %v5354_v23  ;;  %v6028_v56 = vrot.slane %v6026_v33, 1  ;;  %v6046_v24 = vld [vmem:[#allocation4 + $0x9d] sm:$0xff]  ;;  %v6018_v35 = vpack.c.bf16 %v6017_v57, %v6016_v54 }
 0x637   : > { %v6040_v13 = vrot.slane %v6038_v34, 1  ;;  %v6048_v0 = vpack.c.bf16 %v6047_v59, %v6046_v24 }
 0x638   : > { %6001 = vrot.lane.b32.xlu0 %v6000_v58, %s10148_s24  ;;  %6029 = vrot.lane.b32.xlu1 %v6028_v56, %s10146_s21  ;;  %v5312_v12 = vpop.f32.mrb[160].mxu0  ;;  %v6020_v36 = vrot.slane %v6018_v35, 1 }
 0x639   : > { %v5314_v62 = vpop.f32.mrb[161].mxu0  ;;  %v6050_v27 = vrot.slane %v6048_v0, 1 }
 0x63a   : > { %v5355_v25 = vmax.f32 %v5312_v12, %v5314_v62  ;;  %v5316_v63 = vpop.f32.mrb[162].mxu0  ;;  %6022 = vst.msk [vmem:[#allocation5 + $0xc0] sm:$0x80] %vm5565_vm7, %v6020_v36  ;;  %vm5453_vm7 = vcmask 1048229  }
 0x63b   : > { %v5318_v37 = vpop.f32.mrb[163].mxu0  ;;  %v6078_v1 = vld [vmem:[#allocation4 + $0xa9] sm:$0xff]  ;;  %v6079_v26 = vld [vmem:[#allocation4 + $0xb1] sm:$0x3]  ;;  %6023 = vst.msk [vmem:[#allocation5 + $0xe0] sm:$0xf] %vm5567_vm9, %v6020_v36 }
 0x63c   : > { %v6090_v14 = vld [vmem:[#allocation4 + $0xaa] sm:$0xff]  ;;  %5384 = vst.msk [vmem:[#allocation4 + $0xc0] sm:$0xff] %vm12945_vm13, %v5355_v25  ;;  %v5356_v2 = vmax.f32 %v5316_v63, %v5318_v37  ;;  %6041 = vrot.lane.b32.xlu1 %v6040_v13, %s10147_s22  ;;  %v6080_v38 = vpack.c.bf16 %v6079_v26, %v6078_v1  ;;  %v6091_v17 = vld [vmem:[#allocation4 + $0xb2] sm:$0x3]  ;;  %vm12965_vm9 = vcmask 1042080  }
 0x63d   : > { %v6100_v3 = vld [vmem:[#allocation4 + $0xab] sm:$0xff]  ;;  %v6101_v39 = vld [vmem:[#allocation4 + $0xb3] sm:$0x3]  ;;  %v6092_v40 = vpack.c.bf16 %v6091_v17, %v6090_v14  ;;  %v6124_v15 = vld [vmem:[#allocation4 + $0xb6] sm:$0xff] }
 0x63e   : > { %5385 = vst.msk [vmem:[#allocation4 + $0xc8] sm:$0xff] %vm12945_vm13, %v5356_v2  ;;  %v6082_v4 = vrot.slane %v6080_v38, 4  ;;  %v6102_v16 = vpack.c.bf16 %v6101_v39, %v6100_v3  ;;  %v6071_v6 = vld [vmem:[#allocation4 + $0xb0] sm:$0x3]  ;;  %v6125_v7 = vld [vmem:[#allocation4 + $0xbe] sm:$0x3] }
 0x63f   : > { %v6072_v41 = vpack.c.bf16 %v6071_v6, %v6070_v5  ;;  %v6126_v8 = vpack.c.bf16 %v6125_v7, %v6124_v15  ;;  %v6094_v10 = vrot.slane %v6092_v40, 4  ;;  %v6131_v45 = vld [vmem:[#allocation4 + $0xb7] sm:$0xff]  ;;  %v5425_v40 = vld [vmem:[#allocation4 + $0xc] sm:$0x3]  ;;  %v5547_v15 = vld [vmem:[#allocation4 + $0x20] sm:$0xff] }
 0x640   : > { %6051 = vrot.lane.b32.xlu1 %v6050_v27, %s10148_s24  ;;  %6083 = vrot.lane.b32.xlu0 %v6082_v4, %s10146_s21  ;;  %v5322_v60 = vpop.f32.mrb[164].mxu0  ;;  %v6104_v44 = vrot.slane %v6102_v16, 4  ;;  %v6141_v47 = vld [vmem:[#allocation4 + $0xb8] sm:$0xff]  ;;  %v5424_v4 = vld [vmem:[#allocation4 + $0x4] sm:$0xff]  ;;  %v5614_v7 = vld [vmem:[#allocation4 + $0x36] sm:$0x3] }
 0x641   : > { %v5324_v18 = vpop.f32.mrb[165].mxu0  ;;  %v6074_v42 = vrot.slane %v6072_v41, 4  ;;  %v6128_v28 = vrot.slane %v6126_v8, 7  ;;  %v5489_v17 = vld [vmem:[#allocation4 + $0x12] sm:$0xff]  ;;  %v5490_v3 = vld [vmem:[#allocation4 + $0x1a] sm:$0x3] }
 0x642   : > { %v5357_v61 = vmax.f32 %v5322_v60, %v5324_v18  ;;  %v5326_v43 = vpop.f32.mrb[166].mxu0  ;;  %v5548_v16 = vld [vmem:[#allocation4 + $0x28] sm:$0x3]  ;;  %v5491_v6 = vpack.c.bf16 %v5490_v3, %v5489_v17  ;;  %v5613_v41 = vld [vmem:[#allocation4 + $0x2e] sm:$0xff]  ;;  %v5426_v60 = vpack.c.bf16 %v5425_v40, %v5424_v4  ;;  %v5683_v18 = vld [vmem:[#allocation4 + $0x3c] sm:$0xff] }
 0x643   : > { %v5328_v11 = vpop.f32.mrb[167].mxu0  ;;  %v6132_v19 = vld [vmem:[#allocation4 + $0xbf] sm:$0x3]  ;;  %6076 = vst.msk [vmem:[#allocation5 + $0xe0] sm:$0xf0] %vm5635_vm15, %v6074_v42  ;;  %v5549_v8 = vpack.c.bf16 %v5548_v16, %v5547_v15  ;;  %vm12953_vm15 = vcmask 326661  }
 0x644   : > { %v6142_v29 = vld [vmem:[#allocation4 + $0xc0] sm:$0x3]  ;;  %6077 = vst.msk [vmem:[#allocation5 + $0x100] sm:$0x1] %vm5637_vm6, %v6074_v42  ;;  %v5358_v46 = vmax.f32 %v5326_v43, %v5328_v11  ;;  %6095 = vrot.lane.b32.xlu1 %v6094_v10, %s10147_s22  ;;  %6105 = vrot.lane.b32.xlu0 %v6104_v44, %s10148_s24  ;;  %v6133_v9 = vpack.c.bf16 %v6132_v19, %v6131_v45  ;;  %v5684_v42 = vld [vmem:[#allocation4 + $0x44] sm:$0x3] }
 0x645   : > { %5386 = vst.msk [vmem:[#allocation4 + $0xd0] sm:$0xff] %vm12945_vm13, %v5357_v61  ;;  %v6178_v20 = vld [vmem:[#allocation4 + $0xc5] sm:$0xff]  ;;  %v6179_v48 = vld [vmem:[#allocation4 + $0xcd] sm:$0x3]  ;;  %v6143_v31 = vpack.c.bf16 %v6142_v29, %v6141_v47  ;;  %v6150_v50 = vld [vmem:[#allocation4 + $0xb9] sm:$0xff]  ;;  %v5493_v43 = vrot.slane %v5491_v6, 3  ;;  %v5615_v10 = vpack.c.bf16 %v5614_v7, %v5613_v41  ;;  %v5685_v45 = vpack.c.bf16 %v5684_v42, %v5683_v18 }
 0x646   : > { %6130 = vst.msk [vmem:[#allocation5 + $0x100] sm:$0x3e] %vm5705_vm0, %v6128_v28  ;;  %v6190_v30 = vld [vmem:[#allocation4 + $0xc6] sm:$0xff]  ;;  %v6135_v21 = vrot.slane %v6133_v9, 7  ;;  %v6180_v49 = vpack.c.bf16 %v6179_v48, %v6178_v20  ;;  %v6191_v55 = vld [vmem:[#allocation4 + $0xce] sm:$0x3] }
 0x647   : > { %5387 = vst.msk [vmem:[#allocation4 + $0xd8] sm:$0xff] %vm12945_vm13, %v5358_v46  ;;  %v6151_v32 = vld [vmem:[#allocation4 + $0xc1] sm:$0x3]  ;;  %v6170_v51 = vld [vmem:[#allocation4 + $0xc4] sm:$0xff]  ;;  %v6171_v22 = vld [vmem:[#allocation4 + $0xcc] sm:$0x3]  ;;  %v6192_v23 = vpack.c.bf16 %v6191_v55, %v6190_v30 }
 0x648   : > { %6136 = vrot.lane.b32.xlu1 %v6135_v21, %s10146_s21  ;;  %v6182_v52 = vrot.slane %v6180_v49, 2  ;;  %v6172_v33 = vpack.c.bf16 %v6171_v22, %v6170_v51  ;;  %v6145_v53 = vrot.slane %v6143_v31, 7  ;;  %v6152_v54 = vpack.c.bf16 %v6151_v32, %v6150_v50  ;;  %v6200_v56 = vld [vmem:[#allocation4 + $0xc7] sm:$0xff]  ;;  %v5742_v28 = vld [vmem:[#allocation4 + $0x52] sm:$0x3]  ;;  %v5807_v47 = vld [vmem:[#allocation4 + $0x58] sm:$0xff] }
 0x649   : > { %v6194_v57 = vrot.slane %v6192_v23, 2  ;;  %v5741_v44 = vld [vmem:[#allocation4 + $0x4a] sm:$0xff]  ;;  %v5551_v11 = vrot.slane %v5549_v8, 6  ;;  %v5808_v19 = vld [vmem:[#allocation4 + $0x60] sm:$0x3]  ;;  %v5617_v46 = vrot.slane %v5615_v10, 1 }
 0x64a   : > { %6183 = vrot.lane.b32.xlu0 %v6182_v52, %s10146_s21  ;;  %v6174_v58 = vrot.slane %v6172_v33, 2  ;;  %v6154_v62 = vrot.slane %v6152_v54, 7  ;;  %v5743_v9 = vpack.c.bf16 %v5742_v28, %v5741_v44  ;;  %v5865_v20 = vld [vmem:[#allocation4 + $0x66] sm:$0xff]  ;;  %v5866_v48 = vld [vmem:[#allocation4 + $0x6e] sm:$0x3]  ;;  %v5687_v30 = vrot.slane %v5685_v45, 4 }
 0x64b   : > { %v5809_v21 = vpack.c.bf16 %v5808_v19, %v5807_v47  ;;  %vm12948_vm6 = vcmask 320512   ;;  %v5867_v55 = vpack.c.bf16 %v5866_v48, %v5865_v20  ;;  %v5958_v50 = vld [vmem:[#allocation4 + $0x82] sm:$0xff]  ;;  %v5959_v32 = vld [vmem:[#allocation4 + $0x8a] sm:$0x3]  ;;  %v5907_v52 = vld [vmem:[#allocation4 + $0x74] sm:$0xff]  ;;  %vm12952_vm0 = vcmask 1015109  }
 0x64c   : > { %v6201_v34 = vld [vmem:[#allocation4 + $0xcf] sm:$0x3]  ;;  %6146 = vrot.lane.b32.xlu1 %v6145_v53, %s10147_s22  ;;  %6176 = vst.msk [vmem:[#allocation5 + $0x100] sm:$0xc0] %vm5759_vm2, %v6174_v58  ;;  %v5745_v31 = vrot.slane %v5743_v9, 7  ;;  %vm12949_vm2 = vcmask 1008960   ;;  %v5960_v54 = vpack.c.bf16 %v5959_v32, %v5958_v50 }
 0x64d   : > { %v6202_v24 = vpack.c.bf16 %v6201_v34, %v6200_v56  ;;  %6177 = vst.msk [vmem:[#allocation5 + $0x120] sm:$0x7] %vm5761_vm12, %v6174_v58  ;;  %v5811_v22 = vrot.slane %v5809_v21, 2  ;;  %v5908_v23 = vld [vmem:[#allocation4 + $0x7c] sm:$0x3]  ;;  %v5869_v53 = vrot.slane %v5867_v55, 5 }
 0x64e   : > { %v6231_v59 = vld [vmem:[#allocation4 + $0xd3] sm:$0xff]  ;;  %v6232_v35 = vld [vmem:[#allocation4 + $0xdb] sm:$0x3]  ;;  %6195 = vrot.lane.b32.xlu0 %v6194_v57, %s10147_s22  ;;  %v6251_v13 = vld [vmem:[#allocation4 + $0xdd] sm:$0x3]  ;;  %vm12951_vm12 = vcmask 1047202  }
 0x64f   : > { %v6241_v12 = vld [vmem:[#allocation4 + $0xd4] sm:$0xff]  ;;  %v6233_v36 = vpack.c.bf16 %v6232_v35, %v6231_v59  ;;  %v6242_v25 = vld [vmem:[#allocation4 + $0xdc] sm:$0x3]  ;;  %v6204_v37 = vrot.slane %v6202_v24, 2  ;;  %v6058_v56 = vld [vmem:[#allocation4 + $0x9e] sm:$0xff]  ;;  %v5909_v24 = vpack.c.bf16 %v5908_v23, %v5907_v52  ;;  %vm12964_vm13 = vcmask 1048549  }
 0x650   : > { %v6250_v63 = vld [vmem:[#allocation4 + $0xd5] sm:$0xff]  ;;  %6155 = vrot.lane.b32.xlu1 %v6154_v62, %s10148_s24  ;;  %v6243_v1 = vpack.c.bf16 %v6242_v25, %v6241_v12  ;;  %v6059_v34 = vld [vmem:[#allocation4 + $0xa6] sm:$0x3]  ;;  %v6112_v35 = vld [vmem:[#allocation4 + $0xac] sm:$0xff] }
 0x651   : > { %v6224_v0 = vld [vmem:[#allocation4 + $0xd2] sm:$0xff]  ;;  %v6225_v26 = vld [vmem:[#allocation4 + $0xda] sm:$0x3]  ;;  %v6235_v2 = vrot.slane %v6233_v36, 5  ;;  %v6252_v38 = vpack.c.bf16 %v6251_v13, %v6250_v63  ;;  %v5962_v36 = vrot.slane %v5960_v54, 3  ;;  %v6060_v25 = vpack.c.bf16 %v6059_v34, %v6058_v56  ;;  %v6212_v17 = vld [vmem:[#allocation4 + $0xc8] sm:$0xff] }
 0x652   : > { %v6226_v14 = vpack.c.bf16 %v6225_v26, %v6224_v0  ;;  %6205 = vrot.lane.b32.xlu0 %v6204_v37, %s10148_s24  ;;  %v6245_v27 = vrot.slane %v6243_v1, 5  ;;  %v6007_v33 = vld [vmem:[#allocation4 + $0x98] sm:$0x3]  ;;  %v6006_v58 = vld [vmem:[#allocation4 + $0x90] sm:$0xff]  ;;  %v6160_v63 = vld [vmem:[#allocation4 + $0xba] sm:$0xff] }
 0x653   : > { %v6254_v5 = vrot.slane %v6252_v38, 5  ;;  %v6008_v59 = vpack.c.bf16 %v6007_v33, %v6006_v58  ;;  %v6113_v12 = vld [vmem:[#allocation4 + $0xb4] sm:$0x3]  ;;  %v6161_v13 = vld [vmem:[#allocation4 + $0xc2] sm:$0x3]  ;;  %v6260_v3 = vld [vmem:[#allocation4 + $0xd6] sm:$0xff] }
 0x654   : > { %v6228_v39 = vrot.slane %v6226_v14, 5  ;;  %6236 = vrot.lane.b32.xlu1 %v6235_v2, %s10146_s21  ;;  %s10149_s21 = smov 80   ;;  %v6114_v1 = vpack.c.bf16 %v6113_v12, %v6112_v35  ;;  %v6213_v26 = vld [vmem:[#allocation4 + $0xd0] sm:$0x3]  ;;  %v6062_v2 = vrot.slane %v6060_v25, 1  ;;  %v6162_v38 = vpack.c.bf16 %v6161_v13, %v6160_v63 }
 0x655   : > { %v6010_v37 = vrot.slane %v6008_v59, 6  ;;  %v6214_v4 = vpack.c.bf16 %v6213_v26, %v6212_v17  ;;  %v10005_v15 = vld [vmem:[%s12900_s3 + $0x100] ss:$8 sps:$4 sm:$0xff]   ;;  %v10022_v21 = vld [vmem:[%s12900_s3 + $0x154] ss:$8 sps:$4 sm:$0xff]  }
 0x656   : > { %6230 = vst.msk [vmem:[#allocation5 + $0x120] sm:$0xf8] %vm5829_vm10, %v6228_v39  ;;  %6246 = vrot.lane.b32.xlu0 %v6245_v27, %s10147_s22  ;;  %vm12950_vm10 = vcmask 325634   ;;  %v6261_v39 = vld [vmem:[#allocation4 + $0xde] sm:$0x3]  ;;  %v6116_v27 = vrot.slane %v6114_v1, 4 }
 0x657   : > { %v6262_v6 = vpack.c.bf16 %v6261_v39, %v6260_v3  ;;  %v6216_v7 = vrot.slane %v6214_v4, 2  ;;  %v10011_v28 = vld [vmem:[%s12900_s3 + $0x120] ss:$8 sps:$4 sm:$0xff]   ;;  %v10020_v55 = vld [vmem:[%s12900_s3 + $0x150] ss:$8 sps:$4 sm:$0xff]  }
 0x658   : > { %6255 = vrot.lane.b32.xlu1 %v6254_v5, %s10148_s24  ;;  %v6164_v5 = vrot.slane %v6162_v38, 7  ;;  %v10017_v48 = vld [vmem:[%s12900_s3 + $0x140] ss:$8 sps:$4 sm:$0xff]   ;;  %v10025_v32 = vld [vmem:[%s12900_s3 + $0x164] ss:$8 sps:$4 sm:$0xff]  }
 0x659   : > { %v6264_v42 = vrot.slane %v6262_v6, 5  ;;  %v10023_v52 = vld [vmem:[%s12900_s3 + $0x160] ss:$8 sps:$4 sm:$0xff]   ;;  %v10028_v33 = vld [vmem:[%s12900_s3 + $0x174] ss:$8 sps:$4 sm:$0xff]  }
 0x65a   : > { %v5398_v61 = vpop.permute.xlu0 %5397  ;;  %5428 = vrot.lane.b32.xlu0 %v5426_v60, %s10149_s21  ;;  %v10010_v60 = vld [vmem:[%s12900_s3 + $0x114] ss:$8 sps:$4 sm:$0xff]   ;;  %v10026_v54 = vld [vmem:[%s12900_s3 + $0x170] ss:$8 sps:$4 sm:$0xff]   ;;  %v10031_v56 = vld [vmem:[%s12900_s3 + $0x184] ss:$8 sps:$4 sm:$0xff]  }
 0x65b   : > { %5401 = vst.msk [vmem:[#allocation5] sm:$0x1f] %vm5400_vm4, %v5398_v61  ;;  %v10034_v35 = vld [vmem:[%s12900_s3 + $0x194] ss:$8 sps:$4 sm:$0xff]  }
 0x65c   : > { %5403 = vst.msk [vmem:[#allocation5 + $0x8] sm:$0x1f] %vm5402_vm14, %v5398_v61  ;;  %5494 = vrot.lane.b32.xlu1 %v5493_v43, %s10149_s21  ;;  %v10008_v61 = vld [vmem:[%s12900_s3 + $0x110] ss:$8 sps:$4 sm:$0xff]   ;;  %v10013_v43 = vld [vmem:[%s12900_s3 + $0x124] ss:$8 sps:$4 sm:$0xff]  }
 0x65e   : > { %v5409_v29 = vpop.permute.xlu0 %5408  ;;  %5552 = vrot.lane.b32.xlu0 %v5551_v11, %s10149_s21  ;;  %v10016_v11 = vld [vmem:[%s12900_s3 + $0x134] ss:$8 sps:$4 sm:$0xff]  }
 0x65f   : > { %5412 = vst.msk [vmem:[#allocation5 + $0x8] sm:$0x1f] %vm5411_vm8, %v5409_v29  ;;  %v10014_v29 = vld [vmem:[%s12900_s3 + $0x130] ss:$8 sps:$4 sm:$0xff]  }
 0x660   : > { %5618 = vrot.lane.b32.xlu1 %v5617_v46, %s10149_s21  ;;  %v10019_v46 = vld [vmem:[%s12900_s3 + $0x144] ss:$8 sps:$4 sm:$0xff]  }
 0x662   : > { %v5418_v49 = vpop.permute.xlu0 %5417  ;;  %5688 = vrot.lane.b32.xlu0 %v5687_v30, %s10149_s21 }
 0x663   : > { %5421 = vst.msk [vmem:[#allocation5 + $0x8] sm:$0x1f] %vm5420_vm3, %v5418_v49 }
 0x664   : > { %5423 = vst.msk [vmem:[#allocation5 + $0x10] sm:$0x1f] %vm5422_vm11, %v5418_v49  ;;  %v5451_v51 = vpop.permute.xlu1 %5450  ;;  %5746 = vrot.lane.b32.xlu1 %v5745_v31, %s10149_s21 }
 0x665   : > { %5454 = vst.msk [vmem:[#allocation5] sm:$0xe0] %vm5453_vm7, %v5451_v51 }
 0x666   : > { %5458 = vst.msk [vmem:[#allocation5 + $0x20] sm:$0x3] %vm12965_vm9, %v5451_v51  ;;  %5812 = vrot.lane.b32.xlu0 %v5811_v22, %s10149_s21  ;;  %vm12972_vm9 = vcmask 319488  }
 0x667   : > { %5456 = vst.msk [vmem:[#allocation5 + $0x8] sm:$0xe0] %vm12953_vm15, %v5451_v51  ;;  %vm12960_vm15 = vcmask 1044128  }
 0x668   : > { %5460 = vst.msk [vmem:[#allocation5 + $0x28] sm:$0x3] %vm12948_vm6, %v5451_v51  ;;  %v5467_v57 = vpop.permute.xlu1 %5466  ;;  %5870 = vrot.lane.b32.xlu1 %v5869_v53, %s10149_s21  ;;  %vm12955_vm6 = vcmask 648192  }
 0x669   : > { %5470 = vst.msk [vmem:[#allocation5 + $0x8] sm:$0xe0] %vm12952_vm0, %v5467_v57  ;;  %vm12961_vm0 = vcmask 1048231  }
 0x66a   : > { %5472 = vst.msk [vmem:[#allocation5 + $0x28] sm:$0x3] %vm12949_vm2, %v5467_v57  ;;  %v5519_v62 = vpop.permute.xlu0 %5518  ;;  %5911 = vrot.lane.b32.xlu0 %v5909_v24, %s10149_s21  ;;  %vm12956_vm2 = vcmask 1014082   ;;  %v10029_v57 = vld [vmem:[%s12900_s3 + $0x180] ss:$8 sps:$4 sm:$0xff]  }
 0x66b   : > { %5522 = vst.msk [vmem:[#allocation5 + $0x20] sm:$0x7c] %vm12951_vm12, %v5519_v62  ;;  %vm12962_vm12 = vcmask 653314  }
 0x66c   : > { %5524 = vst.msk [vmem:[#allocation5 + $0x28] sm:$0x7c] %vm12950_vm10, %v5519_v62  ;;  %v5479_v0 = vpop.permute.xlu1 %5478  ;;  %5963 = vrot.lane.b32.xlu1 %v5962_v36, %s10149_s21  ;;  %vm12963_vm10 = vcmask 1047522   ;;  %v6270_v8 = vld [vmem:[#allocation5] sm:$0xff]  ;;  %v10032_v36 = vld [vmem:[%s12900_s3 + $0x190] ss:$8 sps:$4 sm:$0xff]  }
 0x66d   : > { %5482 = vst.msk [vmem:[#allocation5 + $0x8] sm:$0xe0] %vm12964_vm13, %v5479_v0  ;;  %vm12973_vm13 = vcmask 326660   ;;  %v6362_v62 = vld [vmem:[%s12900_s3 + $0x1a0] sm:$0x33] }
 0x66e   : > { %5484 = vst.msk [vmem:[#allocation5 + $0x10] sm:$0xe0] %vm12957_vm1, %v5479_v0  ;;  %v5531_v14 = vpop.permute.xlu0 %5530  ;;  %6011 = vrot.lane.b32.xlu0 %v6010_v37, %s10149_s21  ;;  %vm12967_vm1 = vcmask 1011008   ;;  %v8923_v63 = vcombine.high %v6362_v62, %v6362_v62  ;;  %v8922_v13 = vcombine.low %v6362_v62, %v6362_v62 }
 0x66f   : > { %5486 = vst.msk [vmem:[#allocation5 + $0x28] sm:$0x3] %vm12954_vm5, %v5479_v0  ;;  %vm12959_vm5 = vcmask 326663  }
 0x670   : > { %5488 = vst.msk [vmem:[#allocation5 + $0x30] sm:$0x3] %vm12955_vm6, %v5479_v0  ;;  %6063 = vrot.lane.b32.xlu1 %v6062_v2, %s10149_s21  ;;  %vm12958_vm6 = vcmask 322560  }
 0x671   : > { %5534 = vst.msk [vmem:[#allocation5 + $0x28] sm:$0x7c] %vm12956_vm2, %v5531_v14  ;;  %vm12969_vm2 = vcmask 1015111  }
 0x672   : > { %v5541_v40 = vpop.permute.xlu0 %5540  ;;  %v5575_v16 = vpop.permute.xlu1 %5574  ;;  %6117 = vrot.lane.b32.xlu0 %v6116_v27, %s10149_s21 }
 0x673   : > { %5544 = vst.msk [vmem:[#allocation5 + $0x28] sm:$0x7c] %vm12963_vm10, %v5541_v40  ;;  %vm12971_vm10 = vcmask 1041056  }
 0x674   : > { %5546 = vst.msk [vmem:[#allocation5 + $0x30] sm:$0x7c] %vm12962_vm12, %v5541_v40  ;;  %6165 = vrot.lane.b32.xlu1 %v6164_v5, %s10149_s21  ;;  %v6271_v41 = vld [vmem:[#allocation5 + $0x8] sm:$0xff]  ;;  %vm12970_vm12 = vcmask 1048228  }
 0x675   : > { %5578 = vst.msk [vmem:[#allocation5 + $0x20] sm:$0x80] %vm12961_vm0, %v5575_v16  ;;  %6710 = vmatprep.mubr.bf16.mxu1 %v6271_v41  ;;  %vm12988_vm0 = vcmask 650240  }
 0x676   : > { %5582 = vst.msk [vmem:[#allocation5 + $0x40] sm:$0xf] %vm12960_vm15, %v5575_v16  ;;  %6711 = vmatmul.mubr.bf16.vlgmr.msra.gmra.mrb[112].mxu1 %v6270_v8  ;;  %v5591_v18 = vpop.permute.xlu1 %5590  ;;  %6217 = vrot.lane.b32.xlu0 %v6216_v7, %s10149_s21  ;;  %vm5609_vm15 = vcmask 1044448  }
 0x677   : > { %5580 = vst.msk [vmem:[#allocation5 + $0x28] sm:$0x80] %vm12959_vm5, %v5575_v16  ;;  %vm12968_vm5 = vcmask 654343   ;;  %6812 = vmatpush1.bf16.msra.mxu1 %v10005_v15 }
 0x678   : > { %5584 = vst.msk [vmem:[#allocation5 + $0x48] sm:$0xf] %vm12958_vm6, %v5575_v16  ;;  %vm12966_vm6 = vcmask 1048551   ;;  %6265 = vrot.lane.b32.xlu1 %v6264_v42, %s10149_s21  ;;  %6813 = vmatprep.subr.bf16.mxu1 %v10010_v60 }
 0x679   : > { %5594 = vst.msk [vmem:[#allocation5 + $0x28] sm:$0x80] %vm12969_vm2, %v5591_v18  ;;  %vm12975_vm2 = vcmask 647168  }
 0x67a   : > { %5596 = vst.msk [vmem:[#allocation5 + $0x48] sm:$0xf] %vm12967_vm1, %v5591_v18  ;;  %v5603_v10 = vpop.permute.xlu1 %5602  ;;  %v5645_v44 = vpop.permute.xlu0 %5644  ;;  %vm12976_vm1 = vcmask 1007936  }
 0x67b   : > { %5606 = vst.msk [vmem:[#allocation5 + $0x28] sm:$0x80] %vm12966_vm6, %v5603_v10  ;;  %6814 = vmatpush1.bf16.msra.mxu1 %v10008_v61  ;;  %vm12977_vm6 = vcmask 1015108  }
 0x67c   : > { %5608 = vst.msk [vmem:[#allocation5 + $0x30] sm:$0x80] %vm12968_vm5, %v5603_v10  ;;  %vm12974_vm5 = vcmask 654340   ;;  %6815 = vmatprep.subr.bf16.mxu1 %v10013_v43  ;;  %v6274_v20 = vld [vmem:[#allocation5 + $0x20] sm:$0xff] }
 0x67d   : > { %5610 = vst.msk [vmem:[#allocation5 + $0x48] sm:$0xf] %vm5609_vm15, %v5603_v10 }
 0x67e   : > { %5612 = vst.msk [vmem:[#allocation5 + $0x50] sm:$0xf] %vm12988_vm0, %v5603_v10  ;;  %v5661_v45 = vpop.permute.xlu1 %5660  ;;  %v5673_v19 = vpop.permute.xlu0 %5672  ;;  %vm5841_vm0 = vcmask 326659  }
 0x67f   : > { %5648 = vst.msk [vmem:[#allocation5 + $0x40] sm:$0xf0] %vm12970_vm12, %v5645_v44  ;;  %vm12982_vm12 = vcmask 1048548   ;;  %6816 = vmatpush1.bf16.msra.mxu1 %v10011_v28 }
 0x680   : > { %5652 = vst.msk [vmem:[#allocation5 + $0x60] sm:$0x1] %vm12971_vm10, %v5645_v44  ;;  %vm12978_vm10 = vcmask 1041376   ;;  %6817 = vmatprep.subr.bf16.mxu1 %v10016_v11 }
 0x681   : > { %5650 = vst.msk [vmem:[#allocation5 + $0x48] sm:$0xf0] %vm12973_vm13, %v5645_v44  ;;  %vm12979_vm13 = vcmask 324609  }
 0x682   : > { %5654 = vst.msk [vmem:[#allocation5 + $0x68] sm:$0x1] %vm12972_vm9, %v5645_v44  ;;  %vm12980_vm9 = vcmask 1046177   ;;  %v5713_v9 = vpop.permute.xlu1 %5712  ;;  %v6275_v47 = vld [vmem:[#allocation5 + $0x28] sm:$0xff] }
 0x683   : > { %5664 = vst.msk [vmem:[#allocation5 + $0x48] sm:$0xf0] %vm12977_vm6, %v5661_v45  ;;  %vm12984_vm6 = vcmask 321536   ;;  %6720 = vmatprep.mubr.bf16.mxu1 %v6275_v47  ;;  %6818 = vmatpush1.bf16.msra.mxu1 %v10014_v29 }
 0x684   : > { %5666 = vst.msk [vmem:[#allocation5 + $0x68] sm:$0x1] %vm12976_vm1, %v5661_v45  ;;  %vm12985_vm1 = vcmask 326662   ;;  %6721 = vmatmul.mubr.bf16.gmra.mrb[116].mxu1 %v6274_v20  ;;  %v5769_v30 = vpop.permute.xlu0 %5768  ;;  %6819 = vmatprep.subr.bf16.mxu1 %v10019_v46 }
 0x685   : > { %5678 = vst.msk [vmem:[#allocation5 + $0x50] sm:$0xf0] %vm12974_vm5, %v5673_v19  ;;  %vm12981_vm5 = vcmask 1048230  }
 0x686   : > { %5682 = vst.msk [vmem:[#allocation5 + $0x70] sm:$0x1] %vm12975_vm2, %v5673_v19  ;;  %vm12986_vm2 = vcmask 1043104   ;;  %v5725_v49 = vpop.permute.xlu1 %5724  ;;  %v6278_v22 = vld [vmem:[#allocation5 + $0x40] sm:$0xff] }
 0x687   : > { %5676 = vst.msk [vmem:[#allocation5 + $0x48] sm:$0xf0] %vm12982_vm12, %v5673_v19  ;;  %6820 = vmatpush1.bf16.msra.mxu1 %v10017_v48  ;;  %vm12989_vm12 = vcmask 652289  }
 0x688   : > { %5680 = vst.msk [vmem:[#allocation5 + $0x68] sm:$0x1] %vm12978_vm10, %v5673_v19  ;;  %vm12983_vm10 = vcmask 1013057   ;;  %v5785_v50 = vpop.permute.xlu0 %5784  ;;  %6821 = vmatprep.subr.bf16.mxu1 %v10022_v21 }
 0x689   : > { %5716 = vst.msk [vmem:[#allocation5 + $0x60] sm:$0x3e] %vm12980_vm9, %v5713_v9  ;;  %vm5789_vm9 = vcmask 1009984  }
 0x68a   : > { %5718 = vst.msk [vmem:[#allocation5 + $0x68] sm:$0x3e] %vm12979_vm13, %v5713_v9  ;;  %vm12987_vm13 = vcmask 1015110   ;;  %v5735_v51 = vpop.permute.xlu1 %5734 }
 0x68b   : > { %5772 = vst.msk [vmem:[#allocation5 + $0x60] sm:$0xc0] %vm12981_vm5, %v5769_v30  ;;  %vm12990_vm5 = vcmask 1046497   ;;  %6822 = vmatpush1.bf16.msra.mxu1 %v10020_v55 }
 0x68c   : > { %5776 = vst.msk [vmem:[#allocation5 + $0x80] sm:$0x7] %vm12986_vm2, %v5769_v30  ;;  %vm5805_vm2 = vcmask 649216   ;;  %v5797_v23 = vpop.permute.xlu0 %5796  ;;  %6823 = vmatprep.subr.bf16.mxu1 %v10025_v32 }
 0x68d   : > { %5774 = vst.msk [vmem:[#allocation5 + $0x68] sm:$0xc0] %vm12985_vm1, %v5769_v30  ;;  %vm5803_vm1 = vcmask 1043424  }
 0x68e   : > { %5778 = vst.msk [vmem:[#allocation5 + $0x88] sm:$0x7] %vm12984_vm6, %v5769_v30  ;;  %v6279_v31 = vld [vmem:[#allocation5 + $0x48] sm:$0xff]  ;;  %vm5801_vm6 = vcmask 654342   ;;  %v5837_v53 = vpop.permute.xlu1 %5836 }
 0x68f   : > { %5728 = vst.msk [vmem:[#allocation5 + $0x68] sm:$0x3e] %vm12983_vm10, %v5725_v49  ;;  %6730 = vmatprep.mubr.bf16.mxu1 %v6279_v31  ;;  %vm12991_vm10 = vcmask 1048550   ;;  %6824 = vmatpush1.bf16.msra.mxu1 %v10023_v52 }
 0x690   : > { %5788 = vst.msk [vmem:[#allocation5 + $0x68] sm:$0xc0] %vm12987_vm13, %v5785_v50  ;;  %6731 = vmatmul.mubr.bf16.gmra.mrb[120].mxu1 %v6278_v22  ;;  %vm5839_vm13 = vcmask 1048227   ;;  %v5849_v58 = vpop.permute.xlu0 %5848  ;;  %6825 = vmatprep.subr.bf16.mxu1 %v10028_v33 }
 0x691   : > { %5790 = vst.msk [vmem:[#allocation5 + $0x88] sm:$0x7] %vm5789_vm9, %v5785_v50 }
 0x692   : > { %5738 = vst.msk [vmem:[#allocation5 + $0x68] sm:$0x3e] %vm12990_vm5, %v5735_v51  ;;  %vm12993_vm5 = vcmask 1048547   ;;  %v5859_v34 = vpop.permute.xlu1 %5858  ;;  %v6282_v12 = vld [vmem:[#allocation5 + $0x60] sm:$0xff] }
 0x693   : > { %5740 = vst.msk [vmem:[#allocation5 + $0x70] sm:$0x3e] %vm12989_vm12, %v5735_v51  ;;  %vm12994_vm12 = vcmask 1015107   ;;  %6826 = vmatpush1.bf16.msra.mxu1 %v10026_v54 }
 0x694   : > { %5800 = vst.msk [vmem:[#allocation5 + $0x68] sm:$0xc0] %vm12991_vm10, %v5797_v23  ;;  %vm12992_vm10 = vcmask 654339   ;;  %v5886_v24 = vpop.permute.xlu0 %5885  ;;  %6827 = vmatprep.subr.bf16.mxu1 %v10031_v56 }
 0x695   : > { %5802 = vst.msk [vmem:[#allocation5 + $0x70] sm:$0xc0] %vm5801_vm6, %v5797_v23 }
 0x696   : > { %5804 = vst.msk [vmem:[#allocation5 + $0x88] sm:$0x7] %vm5803_vm1, %v5797_v23 }
 0x697   : > { %5806 = vst.msk [vmem:[#allocation5 + $0x90] sm:$0x7] %vm5805_vm2, %v5797_v23  ;;  %6828 = vmatpush1.bf16.msra.mxu1 %v10029_v57 }
 0x698   : > { %5840 = vst.msk [vmem:[#allocation5 + $0x80] sm:$0xf8] %vm5839_vm13, %v5837_v53  ;;  %v5895_v25 = vpop.permute.xlu0 %5894  ;;  %6829 = vmatprep.subr.bf16.mxu1 %v10034_v35 }
 0x699   : > { %5842 = vst.msk [vmem:[#allocation5 + $0x88] sm:$0xf8] %vm5841_vm0, %v5837_v53 }
 0x69a   : > { %5852 = vst.msk [vmem:[#allocation5 + $0x88] sm:$0xf8] %vm12994_vm12, %v5849_v58  ;;  %vm13129_vm12 = vcmask 1015109  }
 0x69b   : > { %5862 = vst.msk [vmem:[#allocation5 + $0x88] sm:$0xf8] %vm12993_vm5, %v5859_v34  ;;  %v6283_v59 = vld [vmem:[#allocation5 + $0x68] sm:$0xff]  ;;  %6830 = vmatpush1.bf16.msra.mxu1 %v10032_v36  ;;  %vm13127_vm5 = vcmask 326661  }
 0x69c   : > { %5864 = vst.msk [vmem:[#allocation5 + $0x90] sm:$0xf8] %vm12992_vm10, %v5859_v34  ;;  %6740 = vmatprep.mubr.bf16.mxu1 %v6283_v59  ;;  %v5903_v37 = vpop.permute.xlu0 %5902  ;;  %vm13126_vm10 = vcmask 1042080  }
 0x69d   : > { %5888 = vst.msk [vmem:[#allocation5 + $0xa0] sm:$0x1f] %vm5400_vm4, %v5886_v24  ;;  %6741 = vmatmul.mubr.bf16.gmra.mrb[124].mxu1 %v6282_v12  ;;  %v5930_v1 = vpop.permute.xlu1 %5929  ;;  %vm13124_vm4 = vcmask 1041408  }
 0x69e   : > { %5889 = vst.msk [vmem:[#allocation5 + $0xa8] sm:$0x1f] %vm5402_vm14, %v5886_v24  ;;  %8924 = vmatprep.subr.msk.bf16.mxu1 %vm13124_vm4, %v8923_v63  ;;  %vm13125_vm14 = vmmov %vm13124_vm4  ;;  %vm13130_vm4 = vcmask 1008960  }
 0x69f   : > { %5897 = vst.msk [vmem:[#allocation5 + $0xa8] sm:$0x1f] %vm5411_vm8, %v5895_v25  ;;  %v6673_v26 = vsel %vm13125_vm14, %v8922_v13, 0  ;;  %vm13128_vm8 = vcmask 320512   ;;  %v6286_v14 = vld [vmem:[#allocation5 + $0x80] sm:$0xff]  ;;  %vm13136_vm14 = vcmask 648192  }
 0x6a0   : > { %5905 = vst.msk [vmem:[#allocation5 + $0xa8] sm:$0x1f] %vm5420_vm3, %v5903_v37  ;;  %6832 = vmatpush1.bf16.msra.mxu1 %v6673_v26  ;;  %vm13131_vm3 = vcmask 1047202  }
 0x6a1   : > { %5906 = vst.msk [vmem:[#allocation5 + $0xb0] sm:$0x1f] %vm5422_vm11, %v5903_v37  ;;  %v5942_v2 = vpop.permute.xlu1 %5941  ;;  %vm13132_vm11 = vcmask 325634  }
 0x6a2   : > { %v6287_v0 = vld [vmem:[#allocation5 + $0x88] sm:$0xff]  ;;  %5932 = vst.msk [vmem:[#allocation5 + $0xa0] sm:$0xe0] %vm5453_vm7, %v5930_v1  ;;  %v5983_v38 = vpop.permute.xlu0 %5982  ;;  %vm13133_vm7 = vcmask 1048549  }
 0x6a3   : > { %6750 = vmatprep.mubr.bf16.mxu1 %v6287_v0  ;;  %5934 = vst.msk [vmem:[#allocation5 + $0xc0] sm:$0x3] %vm13126_vm10, %v5930_v1  ;;  %vm13134_vm10 = vcmask 654341  }
 0x6a4   : > { %5933 = vst.msk [vmem:[#allocation5 + $0xa8] sm:$0xe0] %vm13127_vm5, %v5930_v1  ;;  %vm13135_vm5 = vcmask 1042400  }
 0x6a5   : > { %5935 = vst.msk [vmem:[#allocation5 + $0xc8] sm:$0x3] %vm13128_vm8, %v5930_v1  ;;  %6751 = vmatmul.mubr.bf16.gmra.mrb[128].mxu1 %v6286_v14  ;;  %v5952_v17 = vpop.permute.xlu1 %5951  ;;  %vm13137_vm8 = vcmask 1014082  }
 0x6a6   : > { %5944 = vst.msk [vmem:[#allocation5 + $0xa8] sm:$0xe0] %vm13129_vm12, %v5942_v2  ;;  %v5993_v3 = vpop.permute.xlu0 %5992  ;;  %vm13138_vm12 = vcmask 1047522  }
 0x6a7   : > { %5945 = vst.msk [vmem:[#allocation5 + $0xc8] sm:$0x3] %vm13130_vm4, %v5942_v2  ;;  %vm13139_vm4 = vcmask 653314  }
 0x6a8   : > { %5985 = vst.msk [vmem:[#allocation5 + $0xc0] sm:$0x7c] %vm13131_vm3, %v5983_v38  ;;  %vm13140_vm3 = vcmask 1048231  }
 0x6a9   : > { %5986 = vst.msk [vmem:[#allocation5 + $0xc8] sm:$0x7c] %vm13132_vm11, %v5983_v38  ;;  %vm13141_vm11 = vcmask 1044128   ;;  %v6290_v40 = vld [vmem:[#allocation5 + $0xa0] sm:$0xff] }
 0x6aa   : > { %5954 = vst.msk [vmem:[#allocation5 + $0xa8] sm:$0xe0] %vm13133_vm7, %v5952_v17  ;;  %v6002_v39 = vpop.permute.xlu0 %6001  ;;  %v6030_v27 = vpop.permute.xlu1 %6029  ;;  %vm13142_vm7 = vcmask 326663  }
 0x6ab   : > { %5955 = vst.msk [vmem:[#allocation5 + $0xb0] sm:$0xe0] %vm13134_vm10, %v5952_v17  ;;  %vm13143_vm10 = vcmask 322560  }
 0x6ac   : > { %5956 = vst.msk [vmem:[#allocation5 + $0xc8] sm:$0x3] %vm13135_vm5, %v5952_v17  ;;  %vm13144_vm5 = vcmask 1015111  }
 0x6ad   : > { %5957 = vst.msk [vmem:[#allocation5 + $0xd0] sm:$0x3] %vm13136_vm14, %v5952_v17  ;;  %vm13145_vm14 = vcmask 1011008   ;;  %v10038_v17 = vld [vmem:[%s12904_s7 + $0x4] ss:$8 sps:$4 sm:$0xff]  }
 0x6ae   : > { %5995 = vst.msk [vmem:[#allocation5 + $0xc8] sm:$0x7c] %vm13137_vm8, %v5993_v3  ;;  %v6042_v16 = vpop.permute.xlu1 %6041  ;;  %vm13146_vm8 = vcmask 1048551   ;;  %v6363_v3 = vld [vmem:[%s12901_s4] sm:$0x3] }
 0x6af   : > { %6004 = vst.msk [vmem:[#allocation5 + $0xc8] sm:$0x7c] %vm13138_vm12, %v6002_v39  ;;  %vm13147_vm12 = vcmask 654343  }
 0x6b0   : > { %6005 = vst.msk [vmem:[#allocation5 + $0xd0] sm:$0x7c] %vm13139_vm4, %v6002_v39  ;;  %vm13148_vm4 = vcmask 650240   ;;  %v13187_v39 = vld [vmem:[#allocation7_spill] sm:$0xff] }
 0x6b1   : > { %6032 = vst.msk [vmem:[#allocation5 + $0xc0] sm:$0x80] %vm13140_vm3, %v6030_v27  ;;  %v6291_v4 = vld [vmem:[#allocation5 + $0xa8] sm:$0xff]  ;;  %vm13149_vm3 = vcmask 1048228  }
 0x6b2   : > { %6034 = vst.msk [vmem:[#allocation5 + $0xe0] sm:$0xf] %vm13141_vm11, %v6030_v27  ;;  %6760 = vmatprep.mubr.bf16.mxu1 %v6291_v4  ;;  %v6052_v5 = vpop.permute.xlu1 %6051  ;;  %v6084_v6 = vpop.permute.xlu0 %6083  ;;  %vm13150_vm11 = vcmask 1041056  }
 0x6b3   : > { %6033 = vst.msk [vmem:[#allocation5 + $0xc8] sm:$0x80] %vm13142_vm7, %v6030_v27  ;;  %6761 = vmatmul.mubr.bf16.gmra.mrb[132].mxu1 %v6290_v40  ;;  %vm13151_vm7 = vcmask 326660   ;;  %v13189_v40 = vsub.s32 1, %v13187_v39 }
 0x6b4   : > { %6035 = vst.msk [vmem:[#allocation5 + $0xe8] sm:$0xf] %vm13143_vm10, %v6030_v27  ;;  %vm13152_vm10 = vcmask 319488   ;;  %v13188_v27 = vsub.s32 0, %v13187_v39 }
 0x6b5   : > { %6044 = vst.msk [vmem:[#allocation5 + $0xc8] sm:$0x80] %vm13144_vm5, %v6042_v16  ;;  %vm13153_vm5 = vcmask 1015108  }
 0x6b6   : > { %6045 = vst.msk [vmem:[#allocation5 + $0xe8] sm:$0xf] %vm13145_vm14, %v6042_v16  ;;  %v6096_v15 = vpop.permute.xlu1 %6095  ;;  %v6106_v41 = vpop.permute.xlu0 %6105  ;;  %vm13154_vm14 = vcmask 1007936   ;;  %v12512_v4 = vrot.slane %v6363_v3, %v13188_v27  ;;  %v12516_v16 = vrot.slane %v6363_v3, %v13189_v40 }
 0x6b7   : > { %6054 = vst.msk [vmem:[#allocation5 + $0xc8] sm:$0x80] %vm13146_vm8, %v6052_v5  ;;  %vm13155_vm8 = vcmask 654340  }
 0x6b8   : > { %6055 = vst.msk [vmem:[#allocation5 + $0xd0] sm:$0x80] %vm13147_vm12, %v6052_v5  ;;  %vm13156_vm12 = vcmask 647168   ;;  %v6294_v8 = vld [vmem:[#allocation5 + $0xc0] sm:$0xff] }
 0x6b9   : > { %6056 = vst.msk [vmem:[#allocation5 + $0xe8] sm:$0xf] %vm5609_vm15, %v6052_v5  ;;  %vm13157_vm15 = vcmask 1048548  }
 0x6ba   : > { %6057 = vst.msk [vmem:[#allocation5 + $0xf0] sm:$0xf] %vm13148_vm4, %v6052_v5  ;;  %vm13158_vm4 = vcmask 1041376   ;;  %v6137_v7 = vpop.permute.xlu1 %6136 }
 0x6bb   : > { %6086 = vst.msk [vmem:[#allocation5 + $0xe0] sm:$0xf0] %vm13149_vm3, %v6084_v6  ;;  %vm13159_vm3 = vcmask 1046177  }
 0x6bc   : > { %6088 = vst.msk [vmem:[#allocation5 + $0x100] sm:$0x1] %vm13150_vm11, %v6084_v6  ;;  %vm13160_vm11 = vcmask 324609   ;;  %v6184_v18 = vpop.permute.xlu0 %6183 }
 0x6bd   : > { %6087 = vst.msk [vmem:[#allocation5 + $0xe8] sm:$0xf0] %vm13151_vm7, %v6084_v6  ;;  %vm13161_vm7 = vcmask 1048230  }
 0x6be   : > { %6089 = vst.msk [vmem:[#allocation5 + $0x108] sm:$0x1] %vm13152_vm10, %v6084_v6  ;;  %v6295_v60 = vld [vmem:[#allocation5 + $0xc8] sm:$0xff]  ;;  %vm13162_vm10 = vcmask 1043104   ;;  %v6147_v42 = vpop.permute.xlu1 %6146 }
 0x6bf   : > { %6098 = vst.msk [vmem:[#allocation5 + $0xe8] sm:$0xf0] %vm13153_vm5, %v6096_v15  ;;  %6770 = vmatprep.mubr.bf16.mxu1 %v6295_v60  ;;  %vm13163_vm5 = vcmask 326662  }
 0x6c0   : > { %6099 = vst.msk [vmem:[#allocation5 + $0x108] sm:$0x1] %vm13154_vm14, %v6096_v15  ;;  %6771 = vmatmul.mubr.bf16.gmra.mrb[136].mxu1 %v6294_v8  ;;  %vm13164_vm14 = vcmask 321536   ;;  %v6196_v43 = vpop.permute.xlu0 %6195 }
 0x6c1   : > { %6109 = vst.msk [vmem:[#allocation5 + $0xf0] sm:$0xf0] %vm13155_vm8, %v6106_v41  ;;  %vm13165_vm8 = vcmask 1013057  }
 0x6c2   : > { %6111 = vst.msk [vmem:[#allocation5 + $0x110] sm:$0x1] %vm13156_vm12, %v6106_v41  ;;  %vm13166_vm12 = vcmask 1015110   ;;  %v6156_v10 = vpop.permute.xlu1 %6155  ;;  %v6298_v44 = vld [vmem:[#allocation5 + $0xe0] sm:$0xff] }
 0x6c3   : > { %6108 = vst.msk [vmem:[#allocation5 + $0xe8] sm:$0xf0] %vm13157_vm15, %v6106_v41  ;;  %vm13167_vm15 = vcmask 1046497  }
 0x6c4   : > { %6110 = vst.msk [vmem:[#allocation5 + $0x108] sm:$0x1] %vm13158_vm4, %v6106_v41  ;;  %vm13168_vm4 = vcmask 652289   ;;  %v6206_v28 = vpop.permute.xlu0 %6205 }
 0x6c5   : > { %6139 = vst.msk [vmem:[#allocation5 + $0x100] sm:$0x3e] %vm13159_vm3, %v6137_v7  ;;  %vm13169_vm3 = vcmask 1048550  }
 0x6c6   : > { %6140 = vst.msk [vmem:[#allocation5 + $0x108] sm:$0x3e] %vm13160_vm11, %v6137_v7  ;;  %v6237_v11 = vpop.permute.xlu1 %6236  ;;  %vm5431_vm11 = vcmask 1045120  }
 0x6c7   : > { %6186 = vst.msk [vmem:[#allocation5 + $0x100] sm:$0xc0] %vm13161_vm7, %v6184_v18  ;;  %vm5433_vm7 = vcmask 290816  }
 0x6c8   : > { %6188 = vst.msk [vmem:[#allocation5 + $0x120] sm:$0x7] %vm13162_vm10, %v6184_v18  ;;  %v6247_v45 = vpop.permute.xlu0 %6246  ;;  %vm13171_vm10 = vcmask 1048547  }
 0x6c9   : > { %6187 = vst.msk [vmem:[#allocation5 + $0x108] sm:$0xc0] %vm13163_vm5, %v6184_v18  ;;  %vm13172_vm5 = vcmask 654339  }
 0x6ca   : > { %6189 = vst.msk [vmem:[#allocation5 + $0x128] sm:$0x7] %vm13164_vm14, %v6184_v18  ;;  %v6299_v61 = vld [vmem:[#allocation5 + $0xe8] sm:$0xff]  ;;  %v6256_v19 = vpop.permute.xlu1 %6255  ;;  %vm12995_vm14 = vcmask 287744  }
 0x6cb   : > { %6149 = vst.msk [vmem:[#allocation5 + $0x108] sm:$0x3e] %vm13165_vm8, %v6147_v42  ;;  %6780 = vmatprep.mubr.bf16.mxu1 %v6299_v61  ;;  %vm13001_vm8 = vcmask 1048199  }
 0x6cc   : > { %6198 = vst.msk [vmem:[#allocation5 + $0x108] sm:$0xc0] %vm13166_vm12, %v6196_v43  ;;  %6781 = vmatmul.mubr.bf16.gmra.mrb[140].mxu1 %v6298_v44  ;;  %v5429_v29 = vpop.permute.xlu0 %5428  ;;  %vm12999_vm12 = vcmask 293895  }
 0x6cd   : > { %6199 = vst.msk [vmem:[#allocation5 + $0x128] sm:$0x7] %vm5789_vm9, %v6196_v43  ;;  %vm13170_vm9 = vcmask 1015107  }
 0x6ce   : > { %6158 = vst.msk [vmem:[#allocation5 + $0x108] sm:$0x3e] %vm13167_vm15, %v6156_v10  ;;  %v6302_v9 = vld [vmem:[#allocation5 + $0x100] sm:$0xff]  ;;  %v5495_v47 = vpop.permute.xlu1 %5494  ;;  %vm12998_vm15 = vcmask 1044096  }
 0x6cf   : > { %6159 = vst.msk [vmem:[#allocation5 + $0x110] sm:$0x3e] %vm13168_vm4, %v6156_v10  ;;  %vm13000_vm4 = vcmask 289792  }
 0x6d0   : > { %6208 = vst.msk [vmem:[#allocation5 + $0x108] sm:$0xc0] %vm13169_vm3, %v6206_v28  ;;  %v5553_v20 = vpop.permute.xlu0 %5552  ;;  %vm13003_vm3 = vcmask 1048196  }
 0x6d1   : > { %6210 = vst.msk [vmem:[#allocation5 + $0x128] sm:$0x7] %vm5803_vm1, %v6206_v28  ;;  %vm5497_vm1 = vcmask 1048197  }
 0x6d2   : > { %6209 = vst.msk [vmem:[#allocation5 + $0x110] sm:$0xc0] %vm5801_vm6, %v6206_v28  ;;  %vm5499_vm6 = vcmask 293893   ;;  %v5619_v48 = vpop.permute.xlu1 %5618 }
 0x6d3   : > { %6211 = vst.msk [vmem:[#allocation5 + $0x130] sm:$0x7] %vm5805_vm2, %v6206_v28  ;;  %vm12997_vm2 = vcmask 1042048  }
 0x6d4   : > { %6239 = vst.msk [vmem:[#allocation5 + $0x120] sm:$0xf8] %vm5839_vm13, %v6237_v11  ;;  %vm12996_vm13 = vcmask 1047170   ;;  %v5689_v21 = vpop.permute.xlu0 %5688 }
 0x6d5   : > { %6240 = vst.msk [vmem:[#allocation5 + $0x128] sm:$0xf8] %vm5841_vm0, %v6237_v11  ;;  %vm5557_vm0 = vcmask 292866  }
 0x6d6   : > { %6249 = vst.msk [vmem:[#allocation5 + $0x128] sm:$0xf8] %vm13170_vm9, %v6247_v45  ;;  %vm13002_vm9 = vcmask 293892   ;;  %v5747_v31 = vpop.permute.xlu1 %5746 }
 0x6d7   : > { %6258 = vst.msk [vmem:[#allocation5 + $0x128] sm:$0xf8] %vm13171_vm10, %v6256_v19  ;;  %v6303_v46 = vld [vmem:[#allocation5 + $0x108] sm:$0xff]  ;;  %vm5695_vm10 = vcmask 1041024  }
 0x6d8   : > { %6259 = vst.msk [vmem:[#allocation5 + $0x130] sm:$0xf8] %vm13172_vm5, %v6256_v19  ;;  %6790 = vmatprep.mubr.bf16.mxu1 %v6303_v46  ;;  %vm5697_vm5 = vcmask 286720   ;;  %v5813_v50 = vpop.permute.xlu0 %5812 }
 0x6d9   : > { %5432 = vst.msk [vmem:[#allocation5 + $0x10] sm:$0x1f] %vm5431_vm11, %v5429_v29  ;;  %6791 = vmatmul.mubr.bf16.gmra.mrb[144].mxu1 %v6302_v9 }
 0x6da   : > { %5434 = vst.msk [vmem:[#allocation5 + $0x18] sm:$0x1f] %vm5433_vm7, %v5429_v29  ;;  %v5871_v32 = vpop.permute.xlu1 %5870 }
 0x6db   : > { %5498 = vst.msk [vmem:[#allocation5 + $0x10] sm:$0xe0] %vm5497_vm1, %v5495_v47  ;;  %v6306_v49 = vld [vmem:[#allocation5 + $0x120] sm:$0xff] }
 0x6dc   : > { %5500 = vst.msk [vmem:[#allocation5 + $0x18] sm:$0xe0] %vm5499_vm6, %v5495_v47  ;;  %v5912_v51 = vpop.permute.xlu0 %5911 }
 0x6dd   : > { %5502 = vst.msk [vmem:[#allocation5 + $0x30] sm:$0x3] %vm12997_vm2, %v5495_v47  ;;  %vm6640_vm2 = vcmask 293888  }
 0x6de   : > { %5504 = vst.msk [vmem:[#allocation5 + $0x38] sm:$0x3] %vm12995_vm14, %v5495_v47  ;;  %v6307_v30 = vld [vmem:[#allocation5 + $0x128] sm:$0xff]  ;;  %vm5749_vm14 = vcmask 1046145   ;;  %v5964_v52 = vpop.permute.xlu1 %5963 }
 0x6df   : > { %5556 = vst.msk [vmem:[#allocation5 + $0x30] sm:$0x7c] %vm12996_vm13, %v5553_v20  ;;  %6800 = vmatprep.mubr.bf16.mxu1 %v6307_v30  ;;  %vm5751_vm13 = vcmask 291841  }
 0x6e0   : > { %5558 = vst.msk [vmem:[#allocation5 + $0x38] sm:$0x7c] %vm5557_vm0, %v5553_v20  ;;  %v6012_v33 = vpop.permute.xlu0 %6011 }
 0x6e1   : > { %5622 = vst.msk [vmem:[#allocation5 + $0x30] sm:$0x80] %vm13001_vm8, %v5619_v48  ;;  %6801 = vmatmul.mubr.bf16.gmra.mrb[148].mxu1 %v6306_v49  ;;  %vm13005_vm8 = vcmask 288768  }
 0x6e2   : > { %5624 = vst.msk [vmem:[#allocation5 + $0x38] sm:$0x80] %vm12999_vm12, %v5619_v48  ;;  %vm13004_vm12 = vcmask 1043072   ;;  %v6272_v22 = vld [vmem:[#allocation5 + $0x10] sm:$0xff]  ;;  %v6064_v53 = vpop.permute.xlu1 %6063 }
 0x6e3   : > { %5626 = vst.msk [vmem:[#allocation5 + $0x50] sm:$0xf] %vm12998_vm15, %v5619_v48  ;;  %v6273_v55 = vld [vmem:[#allocation5 + $0x18] sm:$0xff]  ;;  %vm5815_vm15 = vcmask 1048198  }
 0x6e4   : > { %5628 = vst.msk [vmem:[#allocation5 + $0x58] sm:$0xf] %vm13000_vm4, %v5619_v48  ;;  %vm5817_vm4 = vcmask 293894   ;;  %8925 = vmatprep.mubr.msk.bf16.mxu1 %vm6640_vm2, %v6273_v55  ;;  %v6118_v54 = vpop.permute.xlu0 %6117 }
 0x6e5   : > { %5692 = vst.msk [vmem:[#allocation5 + $0x50] sm:$0xf0] %vm13003_vm3, %v5689_v21  ;;  %vm13006_vm3 = vcmask 293891  }
 0x6e6   : > { %5694 = vst.msk [vmem:[#allocation5 + $0x58] sm:$0xf0] %vm13002_vm9, %v5689_v21  ;;  %vm13007_vm9 = vcmask 1048195   ;;  %v6166_v56 = vpop.permute.xlu1 %6165 }
 0x6e7   : > { %5696 = vst.msk [vmem:[#allocation5 + $0x70] sm:$0x1] %vm5695_vm10, %v5689_v21  ;;  %6122 = vst.msk [vmem:[#allocation5 + $0x110] sm:$0x1] %vm5695_vm10, %v6118_v54 }
 0x6e8   : > { %5698 = vst.msk [vmem:[#allocation5 + $0x78] sm:$0x1] %vm5697_vm5, %v5689_v21  ;;  %6123 = vst.msk [vmem:[#allocation5 + $0x118] sm:$0x1] %vm5697_vm5, %v6118_v54  ;;  %v6276_v58 = vld [vmem:[#allocation5 + $0x30] sm:$0xff]  ;;  %v6218_v57 = vpop.permute.xlu0 %6217 }
 0x6e9   : > { %5750 = vst.msk [vmem:[#allocation5 + $0x70] sm:$0x3e] %vm5749_vm14, %v5747_v31  ;;  %6844 = vmatmul.mubr.bf16.vlgmr.msra.gmra.mrb[112].mxu1 %v6272_v22  ;;  %v6277_v23 = vld [vmem:[#allocation5 + $0x38] sm:$0xff]  ;;  %6168 = vst.msk [vmem:[#allocation5 + $0x110] sm:$0x3e] %vm5749_vm14, %v6166_v56  ;;  %vm13186_vm14 = vcmask 261120  }
 0x6ea   : > { %5752 = vst.msk [vmem:[#allocation5 + $0x78] sm:$0x3e] %vm5751_vm13, %v5747_v31  ;;  %8926 = vmatprep.mubr.msk.bf16.mxu1 %vm6640_vm2, %v6277_v23  ;;  %6169 = vst.msk [vmem:[#allocation5 + $0x118] sm:$0x3e] %vm5751_vm13, %v6166_v56  ;;  %v6266_v24 = vpop.permute.xlu1 %6265  ;;  %8955 = vmatprep.mubr.msk.bf16.mxu0 %vm13186_vm14, %v10038_v17 }
 0x6eb   : > { %5816 = vst.msk [vmem:[#allocation5 + $0x70] sm:$0xc0] %vm5815_vm15, %v5813_v50  ;;  %6220 = vst.msk [vmem:[#allocation5 + $0x110] sm:$0xc0] %vm5815_vm15, %v6218_v57 }
 0x6ec   : > { %5820 = vst.msk [vmem:[#allocation5 + $0x90] sm:$0x7] %vm13004_vm12, %v5813_v50  ;;  %vm13173_vm12 = vcmask 1042048   ;;  %v6280_v59 = vld [vmem:[#allocation5 + $0x50] sm:$0xff] }
 0x6ed   : > { %5818 = vst.msk [vmem:[#allocation5 + $0x78] sm:$0xc0] %vm5817_vm4, %v5813_v50  ;;  %v6281_v34 = vld [vmem:[#allocation5 + $0x58] sm:$0xff]  ;;  %6221 = vst.msk [vmem:[#allocation5 + $0x118] sm:$0xc0] %vm5817_vm4, %v6218_v57 }
 0x6ee   : > { %5822 = vst.msk [vmem:[#allocation5 + $0x98] sm:$0x7] %vm13005_vm8, %v5813_v50  ;;  %vm13174_vm8 = vcmask 287744  }
 0x6ef   : > { %5874 = vst.msk [vmem:[#allocation5 + $0x90] sm:$0xf8] %vm13007_vm9, %v5871_v32  ;;  %vm13178_vm9 = vcmask 1044096  }
 0x6f0   : > { %5876 = vst.msk [vmem:[#allocation5 + $0x98] sm:$0xf8] %vm13006_vm3, %v5871_v32  ;;  %vm13175_vm3 = vcmask 1047170  }
 0x6f1   : > { %5914 = vst.msk [vmem:[#allocation5 + $0xb0] sm:$0x1f] %vm5431_vm11, %v5912_v51  ;;  %vm13176_vm11 = vcmask 1048199   ;;  %6854 = vmatmul.mubr.bf16.gmra.mrb[116].mxu1 %v6276_v58 }
 0x6f2   : > { %5915 = vst.msk [vmem:[#allocation5 + $0xb8] sm:$0x1f] %vm5433_vm7, %v5912_v51  ;;  %vm13177_vm7 = vcmask 293895   ;;  %8927 = vmatprep.mubr.msk.bf16.mxu1 %vm6640_vm2, %v6281_v34  ;;  %v6284_v12 = vld [vmem:[#allocation5 + $0x70] sm:$0xff] }
 0x6f3   : > { %5966 = vst.msk [vmem:[#allocation5 + $0xb0] sm:$0xe0] %vm5497_vm1, %v5964_v52  ;;  %vm13179_vm1 = vcmask 289792   ;;  %v6304_v14 = vld [vmem:[#allocation5 + $0x110] sm:$0xff] }
 0x6f4   : > { %5967 = vst.msk [vmem:[#allocation5 + $0xb8] sm:$0xe0] %vm5499_vm6, %v5964_v52  ;;  %vm13180_vm6 = vcmask 1048196   ;;  %v6285_v35 = vld [vmem:[#allocation5 + $0x78] sm:$0xff] }
 0x6f5   : > { %5968 = vst.msk [vmem:[#allocation5 + $0xd0] sm:$0x3] %vm13173_vm12, %v5964_v52  ;;  %vm13183_vm12 = vcmask 288768   ;;  %v6305_v26 = vld [vmem:[#allocation5 + $0x118] sm:$0xff] }
 0x6f6   : > { %5969 = vst.msk [vmem:[#allocation5 + $0xd8] sm:$0x3] %vm13174_vm8, %v5964_v52  ;;  %vm13181_vm8 = vcmask 293892   ;;  %v6288_v36 = vld [vmem:[#allocation5 + $0x90] sm:$0xff] }
 0x6f7   : > { %6014 = vst.msk [vmem:[#allocation5 + $0xd0] sm:$0x7c] %vm13175_vm3, %v6012_v33  ;;  %vm13184_vm3 = vcmask 1048195   ;;  %v6289_v62 = vld [vmem:[#allocation5 + $0x98] sm:$0xff] }
 0x6f8   : > { %6015 = vst.msk [vmem:[#allocation5 + $0xd8] sm:$0x7c] %vm5557_vm0, %v6012_v33  ;;  %vm13182_vm0 = vcmask 1043072  }
 0x6f9   : > { %6066 = vst.msk [vmem:[#allocation5 + $0xd0] sm:$0x80] %vm13176_vm11, %v6064_v53  ;;  %6864 = vmatmul.mubr.bf16.gmra.mrb[120].mxu1 %v6280_v59 }
 0x6fa   : > { %6067 = vst.msk [vmem:[#allocation5 + $0xd8] sm:$0x80] %vm13177_vm7, %v6064_v53  ;;  %8928 = vmatprep.mubr.msk.bf16.mxu1 %vm6640_vm2, %v6285_v35  ;;  %v6292_v63 = vld [vmem:[#allocation5 + $0xb0] sm:$0xff] }
 0x6fb   : > { %6068 = vst.msk [vmem:[#allocation5 + $0xf0] sm:$0xf] %vm13178_vm9, %v6064_v53  ;;  %vm13185_vm9 = vcmask 293891   ;;  %v6293_v25 = vld [vmem:[#allocation5 + $0xb8] sm:$0xff] }
 0x6fc   : > { %6069 = vst.msk [vmem:[#allocation5 + $0xf8] sm:$0xf] %vm13179_vm1, %v6064_v53 }
 0x6fd   : > { %6120 = vst.msk [vmem:[#allocation5 + $0xf0] sm:$0xf0] %vm13180_vm6, %v6118_v54 }
 0x6fe   : > { %6121 = vst.msk [vmem:[#allocation5 + $0xf8] sm:$0xf0] %vm13181_vm8, %v6118_v54 }
 0x6ff   : > { %6222 = vst.msk [vmem:[#allocation5 + $0x130] sm:$0x7] %vm13182_vm0, %v6218_v57 }
 0x700   : > { %6223 = vst.msk [vmem:[#allocation5 + $0x138] sm:$0x7] %vm13183_vm12, %v6218_v57  ;;  %v6296_v0 = vld [vmem:[#allocation5 + $0xd0] sm:$0xff] }
 0x701   : > { %6268 = vst.msk [vmem:[#allocation5 + $0x130] sm:$0xf8] %vm13184_vm3, %v6266_v24  ;;  %6874 = vmatmul.mubr.bf16.gmra.mrb[124].mxu1 %v6284_v12  ;;  %v6297_v13 = vld [vmem:[#allocation5 + $0xd8] sm:$0xff] }
 0x702   : > { %6269 = vst.msk [vmem:[#allocation5 + $0x138] sm:$0xf8] %vm13185_vm9, %v6266_v24  ;;  %8929 = vmatprep.mubr.msk.bf16.mxu1 %vm6640_vm2, %v6289_v62 }
 0x704   : > { %v6300_v1 = vld [vmem:[#allocation5 + $0xf0] sm:$0xff] }
 0x705   : > { %v6301_v37 = vld [vmem:[#allocation5 + $0xf8] sm:$0xff] }
 0x708   : > { %v6308_v38 = vld [vmem:[#allocation5 + $0x130] sm:$0xff] }
 0x709   : > { %6884 = vmatmul.mubr.bf16.gmra.mrb[128].mxu1 %v6288_v36  ;;  %v6309_v2 = vld [vmem:[#allocation5 + $0x138] sm:$0xff] }
 0x70a   : > { %8930 = vmatprep.mubr.msk.bf16.mxu1 %vm6640_vm2, %v6293_v25 }
 0x711   : > { %6894 = vmatmul.mubr.bf16.gmra.mrb[132].mxu1 %v6292_v63 }
 0x712   : > { %8931 = vmatprep.mubr.msk.bf16.mxu1 %vm6640_vm2, %v6297_v13 }
 0x719   : > { %6904 = vmatmul.mubr.bf16.gmra.mrb[136].mxu1 %v6296_v0 }
 0x71a   : > { %8932 = vmatprep.mubr.msk.bf16.mxu1 %vm6640_vm2, %v6301_v37 }
 0x721   : > { %6914 = vmatmul.mubr.bf16.gmra.mrb[140].mxu1 %v6300_v1 }
 0x722   : > { %8933 = vmatprep.mubr.msk.bf16.mxu1 %vm6640_vm2, %v6305_v26 }
 0x729   : > { %6924 = vmatmul.mubr.bf16.gmra.mrb[144].mxu1 %v6304_v14 }
 0x72a   : > { %8934 = vmatprep.mubr.msk.bf16.mxu1 %vm6640_vm2, %v6309_v2  ;;  %vm13190_vm2 = vmmov %vm13186_vm14 }
 0x72b   : > { %vm13191_vm13 = vmmov %vm13190_vm2 }
 0x72c   : > { %vm13192_vm15 = vmmov %vm13190_vm2 }
 0x72d   : > { %vm13193_vm4 = vmmov %vm13190_vm2 }
 0x72e   : > { %vm13194_vm10 = vmmov %vm13190_vm2 }
 0x72f   : > { %vm13195_vm5 = vmmov %vm13190_vm2 }
 0x730   : > { %vm13196_vm11 = vmmov %vm13190_vm2 }
 0x731   : > { %6934 = vmatmul.mubr.bf16.gmra.mrb[148].mxu1 %v6308_v38  ;;  %vm13197_vm7 = vmmov %vm13190_vm2 }
 0x732   : > { %vm13198_vm1 = vmmov %vm13190_vm2 }
 0x733   : > { %vm13199_vm6 = vmmov %vm13198_vm1 }
 0x734   : > { %vm13200_vm8 = vmmov %vm13198_vm1 }
 0x735   : > { %vm13201_vm0 = vmmov %vm13198_vm1 }
 0x736   : > { %vm13202_vm12 = vmmov %vm13201_vm0 }
 0x737   : > { %vm13203_vm3 = vmmov %vm13201_vm0 }
 0x738   : > { %vm13204_vm9 = vmmov %vm13201_vm0 }
 0x739   : > { %vm13205_vm14 = vmmov %vm13201_vm0 }
 0x7bc   : > { %v6845_v5 = vpop.f32.mrb[112].mxu1 }
 0x7bd   : > { %v9346_v6 = vadd.f32 %v6845_v5, %v12512_v4  ;;  %v6847_v15 = vpop.f32.mrb[113].mxu1 }
 0x7be   : > { %v9347_v41 = vadd.f32 %v6847_v15, %v12516_v16  ;;  %v6849_v7 = vpop.f32.mrb[114].mxu1 }
 0x7bf   : > { %v9348_v60 = vadd.f32 %v6849_v7, %v12512_v4  ;;  %v6851_v8 = vpop.f32.mrb[115].mxu1  ;;  %v6944_v42 = vmax.f32 %v9346_v6, 0.0 }
 0x7c0   : > { %v9349_v18 = vadd.f32 %v6851_v8, %v12516_v16  ;;  %v6945_v43 = vmax.f32 %v9347_v41, 0.0 }
 0x7c1   : > { %v6946_v61 = vmax.f32 %v9348_v60, 0.0 }
 0x7c2   : > { %v6947_v10 = vmax.f32 %v9349_v18, 0.0 }
 0x7c3   : > { %v6984_v44 = vpack.c.bf16 %v6946_v61, %v6944_v42  ;;  %v10066_v61 = vld [vmem:[%s12905_s8] ss:$8 sps:$4 sm:$0xff]  }
 0x7c4   : > { %v6985_v28 = vpack.c.bf16 %v6947_v10, %v6945_v43  ;;  %v6855_v11 = vpop.f32.mrb[116].mxu1  ;;  %v10068_v43 = vld [vmem:[%s12905_s8 + $0x4] ss:$8 sps:$4 sm:$0xff]  }
 0x7c5   : > { %v9350_v45 = vadd.f32 %v6855_v11, %v12512_v4  ;;  %v6857_v19 = vpop.f32.mrb[117].mxu1  ;;  %7482 = vmatprep.subr.bf16.mxu1 %v10068_v43 }
 0x7c6   : > { %7005 = vst.msk [vmem:[#allocation6 + $0x8] sm:$0xff] %vm13190_vm2, %v6985_v28  ;;  %v9351_v29 = vadd.f32 %v6857_v19, %v12516_v16  ;;  %v6859_v46 = vpop.f32.mrb[118].mxu1  ;;  %7483 = vmatpush1.bf16.msra.mxu1 %v10066_v61  ;;  %vm13206_vm2 = vmmov %vm13201_vm0 }
 0x7c7   : > { %v9352_v9 = vadd.f32 %v6859_v46, %v12512_v4  ;;  %v6861_v47 = vpop.f32.mrb[119].mxu1  ;;  %v6948_v48 = vmax.f32 %v9350_v45, 0.0  ;;  %v10069_v46 = vld [vmem:[%s12905_s8 + $0x10] ss:$8 sps:$4 sm:$0xff]  }
 0x7c8   : > { %v9353_v20 = vadd.f32 %v6861_v47, %v12516_v16  ;;  %v6949_v21 = vmax.f32 %v9351_v29, 0.0 }
 0x7c9   : > { %v6950_v30 = vmax.f32 %v9352_v9, 0.0 }
 0x7ca   : > { %v6951_v49 = vmax.f32 %v9353_v20, 0.0  ;;  %v10074_v20 = vld [vmem:[%s12905_s8 + $0x24] ss:$8 sps:$4 sm:$0xff]  }
 0x7cb   : > { %v6986_v31 = vpack.c.bf16 %v6950_v30, %v6948_v48 }
 0x7cc   : > { %v6987_v55 = vpack.c.bf16 %v6951_v49, %v6949_v21  ;;  %v6865_v50 = vpop.f32.mrb[120].mxu1 }
 0x7cd   : > { %v9354_v32 = vadd.f32 %v6865_v50, %v12512_v4  ;;  %v6867_v51 = vpop.f32.mrb[121].mxu1  ;;  %v7045_v22 = vld [vmem:[#allocation6 + $0x8] sm:$0xff] }
 0x7ce   : > { %7007 = vst.msk [vmem:[#allocation6 + $0x18] sm:$0xff] %vm13191_vm13, %v6987_v55  ;;  %v9355_v52 = vadd.f32 %v6867_v51, %v12516_v16  ;;  %v6869_v23 = vpop.f32.mrb[122].mxu1  ;;  %7184 = vmatprep.subr.bf16.mxu0 %v7045_v22  ;;  %v10072_v55 = vld [vmem:[%s12905_s8 + $0x20] ss:$8 sps:$4 sm:$0xff]   ;;  %vm13207_vm13 = vmmov %vm13201_vm0 }
 0x7cf   : > { %v9356_v33 = vadd.f32 %v6869_v23, %v12512_v4  ;;  %v6871_v53 = vpop.f32.mrb[123].mxu1  ;;  %7185 = vmatpush1.bf16.msra.mxu0 %v6984_v44  ;;  %v6952_v58 = vmax.f32 %v9354_v32, 0.0  ;;  %v10071_v44 = vld [vmem:[%s12905_s8 + $0x14] ss:$8 sps:$4 sm:$0xff]  }
 0x7d0   : > { %v9357_v54 = vadd.f32 %v6871_v53, %v12516_v16  ;;  %v6953_v34 = vmax.f32 %v9355_v52, 0.0  ;;  %7484 = vmatprep.subr.bf16.mxu1 %v10071_v44 }
 0x7d1   : > { %v6954_v56 = vmax.f32 %v9356_v33, 0.0  ;;  %7485 = vmatpush1.bf16.msra.mxu1 %v10069_v46 }
 0x7d2   : > { %v6955_v57 = vmax.f32 %v9357_v54, 0.0  ;;  %7486 = vmatprep.subr.bf16.mxu1 %v10074_v20 }
 0x7d3   : > { %v6988_v24 = vpack.c.bf16 %v6954_v56, %v6952_v58 }
 0x7d4   : > { %v6989_v59 = vpack.c.bf16 %v6955_v57, %v6953_v34  ;;  %v6875_v35 = vpop.f32.mrb[124].mxu1 }
 0x7d5   : > { %v9358_v12 = vadd.f32 %v6875_v35, %v12512_v4  ;;  %v6877_v62 = vpop.f32.mrb[125].mxu1  ;;  %v7047_v36 = vld [vmem:[#allocation6 + $0x18] sm:$0xff]  ;;  %7487 = vmatpush1.bf16.msra.mxu1 %v10072_v55 }
 0x7d6   : > { %7009 = vst.msk [vmem:[#allocation6 + $0x28] sm:$0xff] %vm13192_vm15, %v6989_v59  ;;  %v9359_v25 = vadd.f32 %v6877_v62, %v12516_v16  ;;  %v6879_v63 = vpop.f32.mrb[126].mxu1  ;;  %7186 = vmatprep.subr.bf16.mxu0 %v7047_v36  ;;  %vm13208_vm15 = vmmov %vm13201_vm0 }
 0x7d7   : > { %v9360_v13 = vadd.f32 %v6879_v63, %v12512_v4  ;;  %v6881_v0 = vpop.f32.mrb[127].mxu1  ;;  %7187 = vmatpush1.bf16.msra.mxu0 %v6986_v31  ;;  %v6956_v1 = vmax.f32 %v9358_v12, 0.0 }
 0x7d8   : > { %v9361_v37 = vadd.f32 %v6881_v0, %v12516_v16  ;;  %v6957_v14 = vmax.f32 %v9359_v25, 0.0 }
 0x7d9   : > { %v6958_v26 = vmax.f32 %v9360_v13, 0.0 }
 0x7da   : > { %v6959_v2 = vmax.f32 %v9361_v37, 0.0 }
 0x7db   : > { %v6990_v38 = vpack.c.bf16 %v6958_v26, %v6956_v1 }
 0x7dc   : > { %v6991_v17 = vpack.c.bf16 %v6959_v2, %v6957_v14  ;;  %v6885_v3 = vpop.f32.mrb[128].mxu1 }
 0x7dd   : > { %v9362_v39 = vadd.f32 %v6885_v3, %v12512_v4  ;;  %v6887_v27 = vpop.f32.mrb[129].mxu1  ;;  %v7049_v40 = vld [vmem:[#allocation6 + $0x28] sm:$0xff] }
 0x7de   : > { %7011 = vst.msk [vmem:[#allocation6 + $0x38] sm:$0xff] %vm13193_vm4, %v6991_v17  ;;  %v9363_v5 = vadd.f32 %v6887_v27, %v12516_v16  ;;  %v6889_v6 = vpop.f32.mrb[130].mxu1  ;;  %7188 = vmatprep.subr.bf16.mxu0 %v7049_v40  ;;  %vm13209_vm4 = vmmov %vm13201_vm0 }
 0x7df   : > { %v9364_v15 = vadd.f32 %v6889_v6, %v12512_v4  ;;  %v6891_v41 = vpop.f32.mrb[131].mxu1  ;;  %7189 = vmatpush1.bf16.msra.mxu0 %v6988_v24  ;;  %v6960_v60 = vmax.f32 %v9362_v39, 0.0 }
 0x7e0   : > { %v9365_v7 = vadd.f32 %v6891_v41, %v12516_v16  ;;  %v6961_v18 = vmax.f32 %v9363_v5, 0.0 }
 0x7e1   : > { %v6962_v8 = vmax.f32 %v9364_v15, 0.0 }
 0x7e2   : > { %v6963_v42 = vmax.f32 %v9365_v7, 0.0 }
 0x7e3   : > { %v6992_v10 = vpack.c.bf16 %v6962_v8, %v6960_v60 }
 0x7e4   : > { %v6993_v28 = vpack.c.bf16 %v6963_v42, %v6961_v18  ;;  %v6895_v11 = vpop.f32.mrb[132].mxu1 }
 0x7e5   : > { %v9366_v45 = vadd.f32 %v6895_v11, %v12512_v4  ;;  %v6897_v19 = vpop.f32.mrb[133].mxu1  ;;  %v7051_v29 = vld [vmem:[#allocation6 + $0x38] sm:$0xff] }
 0x7e6   : > { %7013 = vst.msk [vmem:[#allocation6 + $0x48] sm:$0xff] %vm13194_vm10, %v6993_v28  ;;  %v9367_v9 = vadd.f32 %v6897_v19, %v12516_v16  ;;  %v6899_v47 = vpop.f32.mrb[134].mxu1  ;;  %7190 = vmatprep.subr.bf16.mxu0 %v7051_v29  ;;  %vm13210_vm10 = vmmov %vm13201_vm0 }
 0x7e7   : > { %v9368_v48 = vadd.f32 %v6899_v47, %v12512_v4  ;;  %v6901_v30 = vpop.f32.mrb[135].mxu1  ;;  %7191 = vmatpush1.bf16.msra.mxu0 %v6990_v38  ;;  %v6964_v49 = vmax.f32 %v9366_v45, 0.0 }
 0x7e8   : > { %v9369_v21 = vadd.f32 %v6901_v30, %v12516_v16  ;;  %v6965_v50 = vmax.f32 %v9367_v9, 0.0 }
 0x7e9   : > { %v6966_v31 = vmax.f32 %v9368_v48, 0.0 }
 0x7ea   : > { %v6967_v32 = vmax.f32 %v9369_v21, 0.0 }
 0x7eb   : > { %v6994_v51 = vpack.c.bf16 %v6966_v31, %v6964_v49 }
 0x7ec   : > { %v6995_v22 = vpack.c.bf16 %v6967_v32, %v6965_v50  ;;  %v6905_v52 = vpop.f32.mrb[136].mxu1 }
 0x7ed   : > { %v9370_v23 = vadd.f32 %v6905_v52, %v12512_v4  ;;  %v6907_v33 = vpop.f32.mrb[137].mxu1  ;;  %v7053_v53 = vld [vmem:[#allocation6 + $0x48] sm:$0xff]  ;;  %v10041_v52 = vld [vmem:[%s12904_s7 + $0x10] ss:$8 sps:$4 sm:$0xff]  }
 0x7ee   : > { %7015 = vst.msk [vmem:[#allocation6 + $0x58] sm:$0xff] %vm13195_vm5, %v6995_v22  ;;  %v9371_v54 = vadd.f32 %v6907_v33, %v12516_v16  ;;  %v6909_v58 = vpop.f32.mrb[138].mxu1  ;;  %7192 = vmatprep.subr.bf16.mxu0 %v7053_v53  ;;  %v10044_v33 = vld [vmem:[%s12904_s7 + $0x20] ss:$8 sps:$4 sm:$0xff]   ;;  %v10045_v53 = vld [vmem:[%s12904_s7 + $0x34] ss:$8 sps:$4 sm:$0xff]   ;;  %vm13211_vm5 = vmmov %vm13201_vm0 }
 0x7ef   : > { %v9372_v56 = vadd.f32 %v6909_v58, %v12512_v4  ;;  %v6911_v34 = vpop.f32.mrb[139].mxu1  ;;  %7193 = vmatpush1.bf16.msra.mxu0 %v6992_v10  ;;  %v6968_v24 = vmax.f32 %v9370_v23, 0.0  ;;  %v10042_v23 = vld [vmem:[%s12904_s7 + $0x24] ss:$8 sps:$4 sm:$0xff]  }
 0x7f0   : > { %v9373_v57 = vadd.f32 %v6911_v34, %v12516_v16  ;;  %v6969_v35 = vmax.f32 %v9371_v54, 0.0  ;;  %v10047_v54 = vld [vmem:[%s12904_s7 + $0x30] ss:$8 sps:$4 sm:$0xff]   ;;  %v10048_v58 = vld [vmem:[%s12904_s7 + $0x44] ss:$8 sps:$4 sm:$0xff]  }
 0x7f1   : > { %v6970_v59 = vmax.f32 %v9372_v56, 0.0  ;;  %v10050_v56 = vld [vmem:[%s12904_s7 + $0x40] ss:$8 sps:$4 sm:$0xff]   ;;  %v10051_v34 = vld [vmem:[%s12904_s7 + $0x54] ss:$8 sps:$4 sm:$0xff]  }
 0x7f2   : > { %v6971_v12 = vmax.f32 %v9373_v57, 0.0  ;;  %v10053_v57 = vld [vmem:[%s12904_s7 + $0x50] ss:$8 sps:$4 sm:$0xff]  }
 0x7f3   : > { %v6996_v62 = vpack.c.bf16 %v6970_v59, %v6968_v24  ;;  %v10054_v24 = vld [vmem:[%s12904_s7 + $0x64] ss:$8 sps:$4 sm:$0xff]   ;;  %v10056_v59 = vld [vmem:[%s12904_s7 + $0x60] ss:$8 sps:$4 sm:$0xff]  }
 0x7f4   : > { %v6997_v36 = vpack.c.bf16 %v6971_v12, %v6969_v35  ;;  %v6915_v25 = vpop.f32.mrb[140].mxu1  ;;  %v10057_v35 = vld [vmem:[%s12904_s7 + $0x74] ss:$8 sps:$4 sm:$0xff]   ;;  %v10059_v12 = vld [vmem:[%s12904_s7 + $0x70] ss:$8 sps:$4 sm:$0xff]  }
 0x7f5   : > { %v9374_v63 = vadd.f32 %v6915_v25, %v12512_v4  ;;  %v6917_v13 = vpop.f32.mrb[141].mxu1  ;;  %v7055_v0 = vld [vmem:[#allocation6 + $0x58] sm:$0xff] }
 0x7f6   : > { %7017 = vst.msk [vmem:[#allocation6 + $0x68] sm:$0xff] %vm13196_vm11, %v6997_v36  ;;  %v9375_v37 = vadd.f32 %v6917_v13, %v12516_v16  ;;  %v6919_v1 = vpop.f32.mrb[142].mxu1  ;;  %7194 = vmatprep.subr.bf16.mxu0 %v7055_v0  ;;  %v10062_v36 = vld [vmem:[%s12904_s7 + $0x80] ss:$8 sps:$4 sm:$0xff]   ;;  %v10063_v25 = vld [vmem:[%s12904_s7 + $0x94] ss:$8 sps:$4 sm:$0xff]   ;;  %vm13212_vm11 = vmmov %vm13201_vm0 }
 0x7f7   : > { %v9376_v26 = vadd.f32 %v6919_v1, %v12512_v4  ;;  %v6921_v14 = vpop.f32.mrb[143].mxu1  ;;  %7195 = vmatpush1.bf16.msra.mxu0 %v6994_v51  ;;  %v6972_v38 = vmax.f32 %v9374_v63, 0.0  ;;  %v10065_v63 = vld [vmem:[%s12904_s7 + $0x90] ss:$8 sps:$4 sm:$0xff]   ;;  %v10077_v0 = vld [vmem:[%s12905_s8 + $0x34] ss:$8 sps:$4 sm:$0xff]  }
 0x7f8   : > { %v9377_v2 = vadd.f32 %v6921_v14, %v12516_v16  ;;  %v6973_v3 = vmax.f32 %v9375_v37, 0.0  ;;  %v10075_v13 = vld [vmem:[%s12905_s8 + $0x30] ss:$8 sps:$4 sm:$0xff]   ;;  %7488 = vmatprep.subr.bf16.mxu1 %v10077_v0  ;;  %v10078_v37 = vld [vmem:[%s12905_s8 + $0x40] ss:$8 sps:$4 sm:$0xff]  }
 0x7f9   : > { %v6974_v17 = vmax.f32 %v9376_v26, 0.0  ;;  %7489 = vmatpush1.bf16.msra.mxu1 %v10075_v13  ;;  %v10080_v1 = vld [vmem:[%s12905_s8 + $0x44] ss:$8 sps:$4 sm:$0xff]   ;;  %v10081_v26 = vld [vmem:[%s12905_s8 + $0x50] ss:$8 sps:$4 sm:$0xff]  }
 0x7fa   : > { %v6975_v39 = vmax.f32 %v9377_v2, 0.0  ;;  %7490 = vmatprep.subr.bf16.mxu1 %v10080_v1  ;;  %v10083_v14 = vld [vmem:[%s12905_s8 + $0x54] ss:$8 sps:$4 sm:$0xff]   ;;  %v10084_v2 = vld [vmem:[%s12905_s8 + $0x60] ss:$8 sps:$4 sm:$0xff]  }
 0x7fb   : > { %v6998_v27 = vpack.c.bf16 %v6974_v17, %v6972_v38  ;;  %v10086_v38 = vld [vmem:[%s12905_s8 + $0x64] ss:$8 sps:$4 sm:$0xff]   ;;  %v10087_v17 = vld [vmem:[%s12905_s8 + $0x70] ss:$8 sps:$4 sm:$0xff]  }
 0x7fc   : > { %v6999_v40 = vpack.c.bf16 %v6975_v39, %v6973_v3  ;;  %v6925_v5 = vpop.f32.mrb[144].mxu1  ;;  %v10089_v3 = vld [vmem:[%s12905_s8 + $0x74] ss:$8 sps:$4 sm:$0xff]   ;;  %v10090_v39 = vld [vmem:[%s12905_s8 + $0x80] ss:$8 sps:$4 sm:$0xff]  }
 0x7fd   : > { %v9378_v6 = vadd.f32 %v6925_v5, %v12512_v4  ;;  %v6927_v15 = vpop.f32.mrb[145].mxu1  ;;  %v7057_v41 = vld [vmem:[#allocation6 + $0x68] sm:$0xff]  ;;  %7491 = vmatpush1.bf16.msra.mxu1 %v10078_v37  ;;  %v10095_v5 = vld [vmem:[%s12905_s8 + $0x94] ss:$8 sps:$4 sm:$0xff]  }
 0x7fe   : > { %7019 = vst.msk [vmem:[#allocation6 + $0x78] sm:$0xff] %vm13197_vm7, %v6999_v40  ;;  %v9379_v7 = vadd.f32 %v6927_v15, %v12516_v16  ;;  %v6929_v60 = vpop.f32.mrb[146].mxu1  ;;  %7196 = vmatprep.subr.bf16.mxu0 %v7057_v41  ;;  %7492 = vmatprep.subr.bf16.mxu1 %v10083_v14  ;;  %v10093_v40 = vld [vmem:[%s12905_s8 + $0x90] ss:$8 sps:$4 sm:$0xff]   ;;  %v10150_v15 = vmov 0.0   ;;  %vm13213_vm7 = vmmov %vm13201_vm0 }
 0x7ff   : > { %v9380_v8 = vadd.f32 %v6929_v60, %v12512_v4  ;;  %v6931_v18 = vpop.f32.mrb[147].mxu1  ;;  %7197 = vmatpush1.bf16.msra.mxu0 %v6996_v62  ;;  %v6976_v61 = vmax.f32 %v9378_v6, 0.0  ;;  %v10060_v62 = vld [vmem:[%s12904_s7 + $0x84] ss:$8 sps:$4 sm:$0xff]   ;;  %v10097_v41 = vld [vmem:[%s12906_s9 + $0x30] sm:$0xff]  }
 0x800   : > { %v9381_v42 = vadd.f32 %v6931_v18, %v12516_v16  ;;  %v6977_v10 = vmax.f32 %v9379_v7, 0.0  ;;  %v10096_v6 = vld [vmem:[%s12906_s9 + $0x28] sm:$0xff]  }
 0x801   : > { %v6978_v43 = vmax.f32 %v9380_v8, 0.0  ;;  %7493 = vmatpush1.bf16.msra.mxu1 %v10081_v26 }
 0x802   : > { %v6979_v44 = vmax.f32 %v9381_v42, 0.0  ;;  %7494 = vmatprep.subr.bf16.mxu1 %v10086_v38 }
 0x803   : > { %v7000_v28 = vpack.c.bf16 %v6978_v43, %v6976_v61 }
 0x804   : > { %v7001_v11 = vpack.c.bf16 %v6979_v44, %v6977_v10  ;;  %v6935_v45 = vpop.f32.mrb[148].mxu1 }
 0x805   : > { %v9382_v19 = vadd.f32 %v6935_v45, %v12512_v4  ;;  %v6937_v29 = vpop.f32.mrb[149].mxu1  ;;  %v7059_v46 = vld [vmem:[#allocation6 + $0x78] sm:$0xff]  ;;  %7495 = vmatpush1.bf16.msra.mxu1 %v10084_v2 }
 0x806   : > { %7021 = vst.msk [vmem:[#allocation6 + $0x88] sm:$0xff] %vm13198_vm1, %v7001_v11  ;;  %v9383_v9 = vadd.f32 %v6937_v29, %v12516_v16  ;;  %v6939_v47 = vpop.f32.mrb[150].mxu1  ;;  %7198 = vmatprep.subr.bf16.mxu0 %v7059_v46  ;;  %7496 = vmatprep.subr.bf16.mxu1 %v10089_v3  ;;  %vm10151_vm1 = vmmov 0  }
 0x807   : > { %v9384_v20 = vadd.f32 %v6939_v47, %v12512_v4  ;;  %v6941_v48 = vpop.f32.mrb[151].mxu1  ;;  %7199 = vmatpush1.bf16.msra.mxu0 %v6998_v27  ;;  %v6980_v21 = vmax.f32 %v9382_v19, 0.0  ;;  %v10036_v4 = vld [vmem:[%s12904_s7] ss:$8 sps:$4 sm:$0xff]   ;;  %v10092_v27 = vld [vmem:[%s12905_s8 + $0x84] ss:$8 sps:$4 sm:$0xff]  }
 0x808   : > { %v9385_v30 = vadd.f32 %v6941_v48, %v12516_v16  ;;  %v6981_v31 = vmax.f32 %v9383_v9, 0.0  ;;  %v10039_v16 = vld [vmem:[%s12904_s7 + $0x14] ss:$8 sps:$4 sm:$0xff]  }
 0x809   : > { %v6982_v49 = vmax.f32 %v9384_v20, 0.0  ;;  %7497 = vmatpush1.bf16.msra.mxu1 %v10087_v17 }
 0x80a   : > { %v6983_v55 = vmax.f32 %v9385_v30, 0.0  ;;  %7498 = vmatprep.subr.bf16.mxu1 %v10092_v27 }
 0x80b   : > { %v7002_v50 = vpack.c.bf16 %v6982_v49, %v6980_v21 }
 0x80c   : > { %v7003_v32 = vpack.c.bf16 %v6983_v55, %v6981_v31 }
 0x80d   : > { %v7061_v51 = vld [vmem:[#allocation6 + $0x88] sm:$0xff]  ;;  %7499 = vmatpush1.bf16.msra.mxu1 %v10090_v39 }
 0x80e   : > { %7023 = vst.msk [vmem:[#allocation6 + $0x98] sm:$0xff] %vm13199_vm6, %v7003_v32  ;;  %7200 = vmatprep.subr.bf16.mxu0 %v7061_v51  ;;  %7500 = vmatprep.subr.bf16.mxu1 %v10095_v5  ;;  %vm7628_vm6 = vcmask 654336  }
 0x80f   : > { %7201 = vmatpush1.bf16.msra.mxu0 %v7000_v28 }
 0x811   : > { %7501 = vmatpush1.bf16.msra.mxu1 %v10093_v40 }
 0x812   : > { %9142 = vmatprep.subr.bf16.mxu1 %v10150_v15 }
 0x815   : > { %v7063_v22 = vld [vmem:[#allocation6 + $0x98] sm:$0xff] }
 0x816   : > { %7202 = vmatprep.subr.bf16.mxu0 %v7063_v22 }
 0x817   : > { %7203 = vmatpush1.bf16.msra.mxu0 %v7002_v50 }
 0x818   : > { %9128 = vmatprep.subr.bf16.mxu0 %v10150_v15 }
 0x81a   : > { %7217 = vmatmul.mubr.bf16.vlgmr.msra.gmra.mrb[168].mxu0 %v10036_v4 }
 0x81b   : > { %8956 = vmatprep.mubr.msk.bf16.mxu0 %vm13200_vm8, %v10039_v16  ;;  %9129 = vmatpush3.bf16.msra.mxu0 %v10096_v6  ;;  %vm13214_vm8 = vcmask 1043456  }
 0x81c   : > { %9130 = vmatprep.subr.bf16.mxu0 %v10150_v15 }
 0x81f   : > { %9131 = vmatpush3.bf16.msra.mxu0 %v10097_v41 }
 0x820   : > { %9132 = vmatprep.subr.bf16.mxu0 %v10150_v15 }
 0x822   : > { %7227 = vmatmul.mubr.bf16.gmra.mrb[172].mxu0 %v10041_v52 }
 0x823   : > { %8957 = vmatprep.mubr.msk.bf16.mxu0 %vm13201_vm0, %v10042_v23  ;;  %vm8088_vm0 = vcmask 982016  }
 0x82a   : > { %7237 = vmatmul.mubr.bf16.gmra.mrb[176].mxu0 %v10044_v33 }
 0x82b   : > { %8958 = vmatprep.mubr.msk.bf16.mxu0 %vm13202_vm12, %v10045_v53  ;;  %vm13215_vm12 = vcmask 1041408  }
 0x832   : > { %7247 = vmatmul.mubr.bf16.gmra.mrb[180].mxu0 %v10047_v54 }
 0x833   : > { %8959 = vmatprep.mubr.msk.bf16.mxu0 %vm13203_vm3, %v10048_v58  ;;  %vm13216_vm3 = vcmask 687104  }
 0x83a   : > { %7257 = vmatmul.mubr.bf16.gmra.mrb[184].mxu0 %v10050_v56 }
 0x83b   : > { %8960 = vmatprep.mubr.msk.bf16.mxu0 %vm13204_vm9, %v10051_v34 }
 0x842   : > { %7267 = vmatmul.mubr.bf16.gmra.mrb[188].mxu0 %v10053_v57 }
 0x843   : > { %8961 = vmatprep.mubr.msk.bf16.mxu0 %vm13205_vm14, %v10054_v24 }
 0x84a   : > { %7277 = vmatmul.mubr.bf16.gmra.mrb[192].mxu0 %v10056_v59 }
 0x84b   : > { %8962 = vmatprep.mubr.msk.bf16.mxu0 %vm13206_vm2, %v10057_v35 }
 0x852   : > { %7287 = vmatmul.mubr.bf16.gmra.mrb[196].mxu0 %v10059_v12 }
 0x853   : > { %8963 = vmatprep.mubr.msk.bf16.mxu0 %vm13207_vm13, %v10060_v62 }
 0x85a   : > { %7297 = vmatmul.mubr.bf16.gmra.mrb[200].mxu0 %v10062_v36 }
 0x85b   : > { %8964 = vmatprep.mubr.msk.bf16.mxu0 %vm13208_vm15, %v10063_v25 }
 0x862   : > { %7307 = vmatmul.mubr.bf16.gmra.mrb[204].mxu0 %v10065_v63 }
 0x863   : > { %9138 = vmatprep.mubr.msk.bf16.mxu0 %vm10151_vm1, %v10150_v15 }
 0x8ed   : > { %v7218_v7 = vpop.f32.mrb[168].mxu0 }
 0x8ee   : > { %v7220_v60 = vpop.f32.mrb[169].mxu0 }
 0x8ef   : > { %v7222_v8 = vpop.f32.mrb[170].mxu0 }
 0x8f0   : > { %v7224_v18 = vpop.f32.mrb[171].mxu0 }
 0x8f5   : > { %v7228_v42 = vpop.f32.mrb[172].mxu0 }
 0x8f6   : > { %v7230_v61 = vpop.f32.mrb[173].mxu0 }
 0x8f7   : > { %v7232_v43 = vpop.f32.mrb[174].mxu0 }
 0x8f8   : > { %v7234_v10 = vpop.f32.mrb[175].mxu0 }
 0x8fd   : > { %v7238_v44 = vpop.f32.mrb[176].mxu0 }
 0x8fe   : > { %v7240_v28 = vpop.f32.mrb[177].mxu0 }
 0x8ff   : > { %v7242_v11 = vpop.f32.mrb[178].mxu0 }
 0x900   : > { %v7244_v45 = vpop.f32.mrb[179].mxu0 }
 0x905   : > { %v7248_v19 = vpop.f32.mrb[180].mxu0 }
 0x906   : > { %v7250_v29 = vpop.f32.mrb[181].mxu0 }
 0x907   : > { %v7252_v46 = vpop.f32.mrb[182].mxu0 }
 0x908   : > { %v7254_v9 = vpop.f32.mrb[183].mxu0 }
 0x90d   : > { %v7258_v47 = vpop.f32.mrb[184].mxu0 }
 0x90e   : > { %v7260_v20 = vpop.f32.mrb[185].mxu0 }
 0x90f   : > { %v7262_v48 = vpop.f32.mrb[186].mxu0 }
 0x910   : > { %v7264_v30 = vpop.f32.mrb[187].mxu0 }
 0x915   : > { %v7268_v21 = vpop.f32.mrb[188].mxu0 }
 0x916   : > { %v7317_v49 = vmax.f32 %v7218_v7, %v7268_v21  ;;  %v7270_v31 = vpop.f32.mrb[189].mxu0 }
 0x917   : > { %v7318_v55 = vmax.f32 %v7220_v60, %v7270_v31  ;;  %v7272_v50 = vpop.f32.mrb[190].mxu0 }
 0x918   : > { %v7319_v32 = vmax.f32 %v7222_v8, %v7272_v50  ;;  %v7274_v51 = vpop.f32.mrb[191].mxu0 }
 0x919   : > { %v7320_v22 = vmax.f32 %v7224_v18, %v7274_v51 }
 0x91a   : > { %v7337_v4 = vpack.c.bf16 %v7319_v32, %v7317_v49 }
 0x91b   : > { %v7338_v16 = vpack.c.bf16 %v7320_v22, %v7318_v55 }
 0x91d   : > { %v7278_v52 = vpop.f32.mrb[192].mxu0  ;;  %8985 = vmatprep.mubr.msk.bf16.mxu1 %vm13209_vm4, %v7338_v16 }
 0x91e   : > { %v7321_v23 = vmax.f32 %v7228_v42, %v7278_v52  ;;  %v7280_v33 = vpop.f32.mrb[193].mxu0  ;;  %7515 = vmatmul.mubr.bf16.vlgmr.msra.gmra.mrb[152].mxu1 %v7337_v4  ;;  %v10104_v4 = vld [vmem:[%s12906_s9 + $0xa0] sm:$0xff]  }
 0x91f   : > { %v7322_v53 = vmax.f32 %v7230_v61, %v7280_v33  ;;  %v7282_v54 = vpop.f32.mrb[194].mxu0  ;;  %v10106_v33 = vld [vmem:[%s12906_s9 + $0xa8] sm:$0xff]  }
 0x920   : > { %v7323_v58 = vmax.f32 %v7232_v43, %v7282_v54  ;;  %v7284_v56 = vpop.f32.mrb[195].mxu0 }
 0x921   : > { %v7324_v34 = vmax.f32 %v7234_v10, %v7284_v56  ;;  %v10098_v10 = vld [vmem:[%s12906_s9 + $0x38] sm:$0xff]  }
 0x922   : > { %v7339_v57 = vpack.c.bf16 %v7323_v58, %v7321_v23  ;;  %9133 = vmatpush3.bf16.msra.mxu0 %v10098_v10  ;;  %v10126_v10 = vld [vmem:[%s12908_s11 + $0x28] sm:$0xff]  }
 0x923   : > { %v7340_v24 = vpack.c.bf16 %v7324_v34, %v7322_v53  ;;  %9134 = vmatprep.subr.bf16.mxu0 %v10150_v15  ;;  %v10108_v34 = vld [vmem:[%s12906_s9 + $0xb0] sm:$0xff]  }
 0x925   : > { %v7288_v59 = vpop.f32.mrb[196].mxu0  ;;  %8986 = vmatprep.mubr.msk.bf16.mxu1 %vm13210_vm10, %v7340_v24 }
 0x926   : > { %v7325_v35 = vmax.f32 %v7238_v44, %v7288_v59  ;;  %v7290_v12 = vpop.f32.mrb[197].mxu0  ;;  %7525 = vmatmul.mubr.bf16.gmra.mrb[156].mxu1 %v7339_v57  ;;  %v10099_v44 = vld [vmem:[%s12906_s9 + $0x40] sm:$0xff]  }
 0x927   : > { %v7326_v62 = vmax.f32 %v7240_v28, %v7290_v12  ;;  %v7292_v36 = vpop.f32.mrb[198].mxu0  ;;  %9135 = vmatpush3.bf16.msra.mxu0 %v10099_v44  ;;  %v10100_v28 = vld [vmem:[%s12906_s9 + $0x78] sm:$0xff]   ;;  %v10127_v44 = vld [vmem:[%s12908_s11 + $0x30] sm:$0xff]  }
 0x928   : > { %v7327_v25 = vmax.f32 %v7242_v11, %v7292_v36  ;;  %v7294_v63 = vpop.f32.mrb[199].mxu0  ;;  %9136 = vmatprep.subr.bf16.mxu0 %v10150_v15  ;;  %v10101_v11 = vld [vmem:[%s12906_s9 + $0x48] sm:$0xff]   ;;  %9143 = vmatpush3.bf16.msra.mxu1 %v10100_v28  ;;  %v10128_v28 = vld [vmem:[%s12908_s11 + $0x38] ss:$0 sps:$4 sm:$0xff]  }
 0x929   : > { %v7328_v13 = vmax.f32 %v7244_v45, %v7294_v63  ;;  %9144 = vmatprep.subr.bf16.mxu1 %v10150_v15  ;;  %v10102_v45 = vld [vmem:[%s12906_s9 + $0x80] sm:$0xff]  }
 0x92a   : > { %v7341_v0 = vpack.c.bf16 %v7327_v25, %v7325_v35  ;;  %v10109_v35 = vld [vmem:[%s12906_s9 + $0xb8] sm:$0xff]   ;;  %v10110_v63 = vld [vmem:[%s12906_s9] sm:$0xff]  }
 0x92b   : > { %v7342_v37 = vpack.c.bf16 %v7328_v13, %v7326_v62  ;;  %9137 = vmatpush3.bf16.msra.mxu0 %v10101_v11  ;;  %v10111_v13 = vld [vmem:[%s12906_s9 + $0xc0] sm:$0xff]   ;;  %v8093_v11 = vsel %vm13214_vm8, %v10128_v28, 0 }
 0x92c   : > { %9156 = vmatprep.subr.bf16.mxu0 %v10150_v15  ;;  %9145 = vmatpush3.bf16.msra.mxu1 %v10102_v45  ;;  %v10129_v45 = vld [vmem:[%s12910_s13] sm:$0xff]  }
 0x92d   : > { %v7298_v1 = vpop.f32.mrb[200].mxu0  ;;  %8987 = vmatprep.mubr.msk.bf16.mxu1 %vm13211_vm5, %v7342_v37  ;;  %9146 = vmatprep.subr.bf16.mxu1 %v10150_v15 }
 0x92e   : > { %v7329_v26 = vmax.f32 %v7248_v19, %v7298_v1  ;;  %v7300_v14 = vpop.f32.mrb[201].mxu0  ;;  %7535 = vmatmul.mubr.bf16.gmra.mrb[160].mxu1 %v7341_v0  ;;  %v10103_v19 = vld [vmem:[%s12906_s9 + $0x88] sm:$0xff]  }
 0x92f   : > { %v7330_v2 = vmax.f32 %v7250_v29, %v7300_v14  ;;  %v7302_v38 = vpop.f32.mrb[202].mxu0  ;;  %v10105_v29 = vld [vmem:[%s12906_s9 + $0x90] sm:$0xff]  }
 0x930   : > { %v7331_v17 = vmax.f32 %v7252_v46, %v7302_v38  ;;  %v7304_v3 = vpop.f32.mrb[203].mxu0  ;;  %9147 = vmatpush3.bf16.msra.mxu1 %v10103_v19  ;;  %v10107_v46 = vld [vmem:[%s12906_s9 + $0x98] sm:$0xff]   ;;  %v10130_v19 = vld [vmem:[%s12910_s13 + $0x8] sm:$0xff]  }
 0x931   : > { %v7332_v39 = vmax.f32 %v7254_v9, %v7304_v3  ;;  %9148 = vmatprep.subr.bf16.mxu1 %v10150_v15  ;;  %v10113_v3 = vld [vmem:[%s12906_s9 + $0x10] sm:$0xff]  }
 0x932   : > { %v7343_v27 = vpack.c.bf16 %v7331_v17, %v7329_v26  ;;  %v10112_v26 = vld [vmem:[%s12906_s9 + $0x8] sm:$0xff]  }
 0x933   : > { %v7344_v40 = vpack.c.bf16 %v7332_v39, %v7330_v2  ;;  %v10114_v39 = vld [vmem:[%s12906_s9 + $0x50] sm:$0xff]  }
 0x934   : > { %9149 = vmatpush3.bf16.msra.mxu1 %v10105_v29  ;;  %v10131_v29 = vld [vmem:[%s12910_s13 + $0x10] sm:$0xff]  }
 0x935   : > { %v7308_v5 = vpop.f32.mrb[204].mxu0  ;;  %8988 = vmatprep.mubr.msk.bf16.mxu1 %vm13212_vm11, %v7344_v40  ;;  %9150 = vmatprep.subr.bf16.mxu1 %v10150_v15  ;;  %v10115_v40 = vld [vmem:[%s12906_s9 + $0x18] sm:$0xff]  }
 0x936   : > { %v7333_v6 = vmax.f32 %v7258_v47, %v7308_v5  ;;  %v7310_v41 = vpop.f32.mrb[205].mxu0  ;;  %7545 = vmatmul.mubr.bf16.gmra.mrb[164].mxu1 %v7343_v27  ;;  %v10116_v5 = vld [vmem:[%s12906_s9 + $0x58] sm:$0xff]  }
 0x937   : > { %v7334_v7 = vmax.f32 %v7260_v20, %v7310_v41  ;;  %v7312_v60 = vpop.f32.mrb[206].mxu0  ;;  %v10118_v41 = vld [vmem:[%s12906_s9 + $0x60] sm:$0xff]  }
 0x938   : > { %v7335_v8 = vmax.f32 %v7262_v48, %v7312_v60  ;;  %v7314_v18 = vpop.f32.mrb[207].mxu0  ;;  %9151 = vmatpush3.bf16.msra.mxu1 %v10107_v46  ;;  %v10120_v60 = vld [vmem:[%s12906_s9 + $0x70] sm:$0xff]   ;;  %v10132_v46 = vld [vmem:[%s12910_s13 + $0x18] sm:$0xff]  }
 0x939   : > { %v7336_v42 = vmax.f32 %v7264_v30, %v7314_v18  ;;  %9170 = vmatprep.subr.bf16.mxu1 %v10150_v15  ;;  %v10122_v18 = vld [vmem:[%s12908_s11 + $0x8] sm:$0xff]  }
 0x93a   : > { %v7345_v61 = vpack.c.bf16 %v7335_v8, %v7333_v6  ;;  %v10117_v6 = vld [vmem:[%s12906_s9 + $0x20] sm:$0xff]  }
 0x93b   : > { %v7346_v43 = vpack.c.bf16 %v7336_v42, %v7334_v7  ;;  %v10119_v7 = vld [vmem:[%s12906_s9 + $0x68] sm:$0xff]   ;;  %v10121_v8 = vld [vmem:[%s12908_s11] sm:$0xff]   ;;  %v10123_v42 = vld [vmem:[%s12908_s11 + $0x10] sm:$0xff]  }
 0x93d   : > { %8989 = vmatprep.mubr.msk.bf16.mxu1 %vm13213_vm7, %v7346_v43  ;;  %v10125_v43 = vld [vmem:[%s12908_s11 + $0x20] sm:$0xff]  }
 0x93e   : > { %7555 = vmatmul.mubr.bf16.gmra.mrb[168].mxu1 %v7345_v61  ;;  %v10124_v61 = vld [vmem:[%s12908_s11 + $0x18] sm:$0xff]  }
 0x93f   : > { %9152 = vmatprep.mubr.msk.bf16.mxu1 %vm10151_vm1, %v10150_v15 }
 0x9f1   : > { %v7516_v9 = vpop.f32.mrb[152].mxu1 }
 0x9f2   : > { %v7518_v47 = vpop.f32.mrb[153].mxu1 }
 0x9f3   : > { %v7565_v20 = vmax.f32 %v7516_v9, %v7518_v47  ;;  %v7520_v48 = vpop.f32.mrb[154].mxu1 }
 0x9f4   : > { %v7522_v30 = vpop.f32.mrb[155].mxu1 }
 0x9f5   : > { %v7566_v21 = vmax.f32 %v7520_v48, %v7522_v30 }
 0x9f7   : > { %v12745_v49 = vpack.c.bf16 %v7566_v21, %v7565_v20 }
 0x9f9   : > { %v7526_v31 = vpop.f32.mrb[156].mxu1 }
 0x9fa   : > { %v7528_v55 = vpop.f32.mrb[157].mxu1 }
 0x9fb   : > { %v7567_v50 = vmax.f32 %v7526_v31, %v7528_v55  ;;  %v7530_v32 = vpop.f32.mrb[158].mxu1 }
 0x9fc   : > { %v7532_v51 = vpop.f32.mrb[159].mxu1 }
 0x9fd   : > { %v7568_v22 = vmax.f32 %v7530_v32, %v7532_v51 }
 0x9ff   : > { %v7586_v16 = vpack.c.bf16 %v7568_v22, %v7567_v50 }
 0xa01   : > { %v7536_v52 = vpop.f32.mrb[160].mxu1  ;;  %9139 = vmatmul.mubr.msk.bf16.vlgmr.msra.gmra.mrb[208].mxu0 %vm7628_vm6, %v7586_v16 }
 0xa02   : > { %v7538_v23 = vpop.f32.mrb[161].mxu1  ;;  %9157 = vmatpush3.bf16.msra.mxu0 %v10104_v4  ;;  %9166 = vmatprep.mubr.msk.bf16.mxu0 %vm10151_vm1, %v10150_v15 }
 0xa03   : > { %v7569_v53 = vmax.f32 %v7536_v52, %v7538_v23  ;;  %v7540_v54 = vpop.f32.mrb[162].mxu1  ;;  %9158 = vmatprep.subr.bf16.mxu0 %v10150_v15 }
 0xa04   : > { %v7542_v58 = vpop.f32.mrb[163].mxu1 }
 0xa05   : > { %v7570_v56 = vmax.f32 %v7540_v54, %v7542_v58 }
 0xa06   : > { %9159 = vmatpush3.bf16.msra.mxu0 %v10106_v33 }
 0xa07   : > { %v7673_v57 = vpack.c.bf16 %v7570_v56, %v7569_v53  ;;  %9160 = vmatprep.subr.bf16.mxu0 %v10150_v15 }
 0xa09   : > { %v7546_v24 = vpop.f32.mrb[164].mxu1 }
 0xa0a   : > { %v7548_v59 = vpop.f32.mrb[165].mxu1  ;;  %9161 = vmatpush3.bf16.msra.mxu0 %v10108_v34 }
 0xa0b   : > { %v7571_v12 = vmax.f32 %v7546_v24, %v7548_v59  ;;  %v7550_v62 = vpop.f32.mrb[166].mxu1  ;;  %9162 = vmatprep.subr.bf16.mxu0 %v10150_v15  ;;  %v9060_v59 = vld [vmem:[%s12907_s10] ss:$0 sm:$0xff] }
 0xa0c   : > { %v7552_v36 = vpop.f32.mrb[167].mxu1 }
 0xa0d   : > { %v7572_v25 = vmax.f32 %v7550_v62, %v7552_v36 }
 0xa0e   : > { %9163 = vmatpush3.bf16.msra.mxu0 %v10109_v35 }
 0xa0f   : > { %v7685_v0 = vpack.c.bf16 %v7572_v25, %v7571_v12  ;;  %9164 = vmatprep.subr.bf16.mxu0 %v10150_v15 }
 0xa11   : > { %v7556_v37 = vpop.f32.mrb[168].mxu1  ;;  %9153 = vmatmul.mubr.msk.bf16.vlgmr.msra.gmra.mrb[172].mxu1 %vm7628_vm6, %v7685_v0 }
 0xa12   : > { %9171 = vmatpush3.bf16.msra.mxu1 %v10110_v63  ;;  %v7558_v1 = vpop.f32.mrb[169].mxu1  ;;  %9165 = vmatpush3.bf16.msra.mxu0 %v10111_v13 }
 0xa13   : > { %v7573_v14 = vmax.f32 %v7556_v37, %v7558_v1  ;;  %v7560_v2 = vpop.f32.mrb[170].mxu1  ;;  %9172 = vmatprep.subr.bf16.mxu1 %v10150_v15  ;;  %9184 = vmatprep.subr.bf16.mxu0 %v10150_v15  ;;  %v10133_v37 = vld [vmem:[%s12910_s13 + $0x20] sm:$0xff]   ;;  %v10134_v1 = vld [vmem:[%s12910_s13 + $0x28] ss:$0 sps:$4 sm:$0x33]  }
 0xa14   : > { %v7562_v38 = vpop.f32.mrb[171].mxu1  ;;  %9180 = vmatprep.mubr.msk.bf16.mxu1 %vm10151_vm1, %v10150_v15 }
 0xa15   : > { %v7574_v17 = vmax.f32 %v7560_v2, %v7562_v38 }
 0xa16   : > { %9173 = vmatpush3.bf16.msra.mxu1 %v10112_v26  ;;  %v8194_v26 = vsel %vm13215_vm12, %v10134_v1, 0 }
 0xa17   : > { %v7771_v27 = vpack.c.bf16 %v7574_v17, %v7573_v14  ;;  %9174 = vmatprep.subr.bf16.mxu1 %v10150_v15  ;;  %v9061_v14 = vld [vmem:[%s12909_s12] ss:$0 sm:$0xff] }
 0xa19   : > { %9167 = vmatmul.mubr.msk.bf16.vlgmr.msra.gmra.mrb[212].mxu0 %vm7628_vm6, %v7771_v27 }
 0xa1a   : > { %9175 = vmatpush3.bf16.msra.mxu1 %v10113_v3  ;;  %9185 = vmatpush3.bf16.msra.mxu0 %v10114_v39 }
 0xa1b   : > { %9176 = vmatprep.subr.bf16.mxu1 %v10150_v15  ;;  %9186 = vmatprep.subr.bf16.mxu0 %v10150_v15 }
 0xa1c   : > { %9194 = vmatprep.mubr.msk.bf16.mxu0 %vm10151_vm1, %v10150_v15 }
 0xa1e   : > { %9177 = vmatpush3.bf16.msra.mxu1 %v10115_v40  ;;  %9187 = vmatpush3.bf16.msra.mxu0 %v10116_v5 }
 0xa1f   : > { %9178 = vmatprep.subr.bf16.mxu1 %v10150_v15  ;;  %9188 = vmatprep.subr.bf16.mxu0 %v10150_v15 }
 0xa22   : > { %9179 = vmatpush3.bf16.msra.mxu1 %v10117_v6  ;;  %9189 = vmatpush3.bf16.msra.mxu0 %v10118_v41  ;;  %v9071_v6 = vld [vmem:[%s12911_s14] ss:$0 sm:$0xff] }
 0xa23   : > { %9190 = vmatprep.subr.bf16.mxu0 %v10150_v15  ;;  %9198 = vmatprep.subr.bf16.mxu1 %v10150_v15 }
 0xa25   : > { %9181 = vmatmul.mubr.msk.bf16.vlgmr.msra.gmra.mrb[176].mxu1 %vm7628_vm6, %v12745_v49 }
 0xa26   : > { %9191 = vmatpush3.bf16.msra.mxu0 %v10119_v7  ;;  %9214 = vmatprep.mubr.msk.bf16.mxu1 %vm10151_vm1, %v10150_v15 }
 0xa27   : > { %9192 = vmatprep.subr.bf16.mxu0 %v10150_v15  ;;  %9199 = vmatpush3.bf16.msra.mxu1 %v10121_v8 }
 0xa28   : > { %9200 = vmatprep.subr.bf16.mxu1 %v10150_v15 }
 0xa2a   : > { %9193 = vmatpush3.bf16.msra.mxu0 %v10120_v60 }
 0xa2b   : > { %9218 = vmatprep.subr.bf16.mxu0 %v10150_v15  ;;  %9201 = vmatpush3.bf16.msra.mxu1 %v10122_v18 }
 0xa2c   : > { %9202 = vmatprep.subr.bf16.mxu1 %v10150_v15 }
 0xa2d   : > { %9195 = vmatmul.mubr.msk.bf16.vlgmr.msra.gmra.mrb[216].mxu0 %vm7628_vm6, %v7673_v57 }
 0xa2e   : > { %9230 = vmatprep.mubr.msk.bf16.mxu0 %vm10151_vm1, %v10150_v15  ;;  %9219 = vmatpush3.bf16.msra.mxu0 %v10129_v45 }
 0xa2f   : > { %9203 = vmatpush3.bf16.msra.mxu1 %v10123_v42  ;;  %9220 = vmatprep.subr.bf16.mxu0 %v10150_v15 }
 0xa30   : > { %9204 = vmatprep.subr.bf16.mxu1 %v10150_v15 }
 0xa32   : > { %9221 = vmatpush3.bf16.msra.mxu0 %v10130_v19 }
 0xa33   : > { %9205 = vmatpush3.bf16.msra.mxu1 %v10124_v61  ;;  %9222 = vmatprep.subr.bf16.mxu0 %v10150_v15 }
 0xa34   : > { %9206 = vmatprep.subr.bf16.mxu1 %v10150_v15 }
 0xa36   : > { %9223 = vmatpush3.bf16.msra.mxu0 %v10131_v29 }
 0xa37   : > { %9207 = vmatpush3.bf16.msra.mxu1 %v10125_v43  ;;  %9224 = vmatprep.subr.bf16.mxu0 %v10150_v15 }
 0xa38   : > { %9208 = vmatprep.subr.bf16.mxu1 %v10150_v15 }
 0xa3a   : > { %9225 = vmatpush3.bf16.msra.mxu0 %v10132_v46 }
 0xa3b   : > { %9209 = vmatpush3.bf16.msra.mxu1 %v10126_v10  ;;  %9226 = vmatprep.subr.bf16.mxu0 %v10150_v15 }
 0xa3c   : > { %9210 = vmatprep.subr.bf16.mxu1 %v10150_v15 }
 0xa3e   : > { %9227 = vmatpush3.bf16.msra.mxu0 %v10133_v37 }
 0xa3f   : > { %9211 = vmatpush3.bf16.msra.mxu1 %v10127_v44  ;;  %9228 = vmatprep.subr.bf16.mxu0 %v10150_v15 }
 0xa40   : > { %9212 = vmatprep.subr.bf16.mxu1 %v10150_v15 }
 0xa42   : > { %9229 = vmatpush3.bf16.msra.mxu0 %v8194_v26 }
 0xa43   : > { %9213 = vmatpush3.bf16.msra.mxu1 %v8093_v11 }
 0xad4   : > { %v7666_v9 = vpop.f32.mrb[208].mxu0 }
 0xad5   : > { %v9140_v47 = vpop.f32.mrb[209].mxu0 }
 0xad6   : > { %v7669_v20 = vpop.f32.mrb[210].mxu0 }
 0xad7   : > { %v9141_v48 = vpop.f32.mrb[211].mxu0 }
 0xae4   : > { %v7764_v30 = vpop.f32.mrb[172].mxu1 }
 0xae5   : > { %v9154_v21 = vpop.f32.mrb[173].mxu1 }
 0xae6   : > { %v7767_v49 = vpop.f32.mrb[174].mxu1 }
 0xae7   : > { %v9155_v31 = vpop.f32.mrb[175].mxu1 }
 0xaec   : > { %v7850_v55 = vpop.f32.mrb[212].mxu0 }
 0xaed   : > { %v9168_v50 = vpop.f32.mrb[213].mxu0 }
 0xaee   : > { %v7853_v32 = vpop.f32.mrb[214].mxu0 }
 0xaef   : > { %v9169_v51 = vpop.f32.mrb[215].mxu0 }
 0xaf8   : > { %v7924_v22 = vpop.f32.mrb[176].mxu1 }
 0xaf9   : > { %v7925_v4 = vadd.f32 %v7924_v22, %v7666_v9  ;;  %v9182_v16 = vpop.f32.mrb[177].mxu1 }
 0xafa   : > { %v7927_v52 = vpop.f32.mrb[178].mxu1 }
 0xafb   : > { %v7928_v23 = vadd.f32 %v7927_v52, %v7669_v20  ;;  %v9183_v33 = vpop.f32.mrb[179].mxu1 }
 0xb00   : > { %v7998_v53 = vpop.f32.mrb[216].mxu0 }
 0xb01   : > { %v7999_v54 = vadd.f32 %v7998_v53, %v7764_v30  ;;  %v9196_v58 = vpop.f32.mrb[217].mxu0 }
 0xb02   : > { %v8001_v56 = vpop.f32.mrb[218].mxu0 }
 0xb03   : > { %v8005_v34 = vadd.f32 %v7999_v54, %v7925_v4  ;;  %v8002_v57 = vadd.f32 %v8001_v56, %v7767_v49  ;;  %v9197_v24 = vpop.f32.mrb[219].mxu0 }
 0xb05   : > { %v8007_v35 = vadd.f32 %v8005_v34, %v7850_v55  ;;  %v8006_v12 = vadd.f32 %v8002_v57, %v7928_v23 }
 0xb07   : > { %v8016_v62 = vadd.f32 %v9060_v59, %v8007_v35  ;;  %v8008_v36 = vadd.f32 %v8006_v12, %v7853_v32 }
 0xb09   : > { %v8017_v25 = vadd.f32 %v9060_v59, %v8008_v36  ;;  %v8018_v63 = vmax.f32 %v8016_v62, 0.0 }
 0xb0b   : > { %v8019_v13 = vmax.f32 %v8017_v25, 0.0 }
 0xb0d   : > { %v8020_v0 = vpack.c.bf16 %v8019_v13, %v8018_v63 }
 0xb0f   : > { %9215 = vmatmul.mubr.msk.bf16.vlgmr.msra.gmra.mrb[180].mxu1 %vm8088_vm0, %v8020_v0 }
 0xbe2   : > { %v8129_v2 = vpop.f32.mrb[180].mxu1 }
 0xbe3   : > { %v8130_v38 = vadd.f32 %v9061_v14, %v8129_v2  ;;  %v9216_v17 = vpop.f32.mrb[181].mxu1 }
 0xbe4   : > { %v8132_v3 = vpop.f32.mrb[182].mxu1 }
 0xbe5   : > { %v8133_v39 = vadd.f32 %v9061_v14, %v8132_v3  ;;  %v9217_v27 = vpop.f32.mrb[183].mxu1  ;;  %v8136_v40 = vmax.f32 %v8130_v38, 0.0 }
 0xbe7   : > { %v8137_v5 = vmax.f32 %v8133_v39, 0.0 }
 0xbe9   : > { %v8138_v15 = vpack.c.bf16 %v8137_v5, %v8136_v40 }
 0xbeb   : > { %9231 = vmatmul.mubr.msk.bf16.vlgmr.msra.gmra.mrb[220].mxu0 %vm13216_vm3, %v8138_v15 }
 0xcbe   : > { %v8230_v41 = vpop.f32.mrb[220].mxu0 }
 0xcbf   : > { %v8231_v7 = vadd.f32 %v9071_v6, %v8230_v41  ;;  %v9232_v60 = vpop.f32.mrb[221].mxu0 }
 0xcc0   : > { %v8233_v8 = vpop.f32.mrb[222].mxu0 }
 0xcc1   : > { %8237 = vst [vmem:[%s499_s30] sm:$0xff] %v8231_v7  ;;  %v8234_v18 = vadd.f32 %v9071_v6, %v8233_v8  ;;  %v9233_v42 = vpop.f32.mrb[223].mxu0 }
 0xcc3   : > { %8238 = vst [vmem:[%s499_s30 + $0x8] sm:$0xff] %v8234_v18 }
 0xcc4 PF: > { %s25_s18 = sadd.s32 1, %s10141_s18  }
 0xcc5   : > { %p22_p5 = scmp.ge.s32.totalorder %s25_s18, 4  }
 0xcc7   :  { %24 = sbr.rel (!%p22_p5) target bundleno = 1 (0x1), region = 129 }

</bundles_post_ra>
